<compile_context>
chip_gen: v6e
topology: v6e:2x2x1
jax: 0.10.0
libtpu: 0.0.40
codegen_flags: <defaults>
</compile_context>

<pallas_src>
import math
from functools import partial

import jax
import jax.numpy as jnp
from jax import lax
from jax.experimental import pallas as pl
from jax.experimental.pallas import tpu as pltpu

F32 = jnp.float32
BF16 = jnp.bfloat16
BN_EPS = 1e-5
# TODO(synk): BN folding assumes default-init BatchNorm (mean=0, var=1); recompute
# per-channel scale/bias for real checkpoints.
BN_SCALE = 1.0 / math.sqrt(1.0 + BN_EPS)

MAX_TM = 1024  # lane tile for the GEMM (multiple of 128)


def _round_up(x, m):
    return (x + m - 1) // m * m


def _choose_tm(m, max_tm=MAX_TM):
    """Pick a lane tile TM and padded M.  Avoids padding whenever possible."""
    if m <= max_tm:
        return m, m
    for t in range(max_tm, 127, -128):
        if m % t == 0:
            return t, m
    return max_tm, _round_up(m, max_tm)


def _pick_lane_tile(n, max_tile=2048):
    if n <= max_tile:
        return n
    for t in range(max_tile, 127, -128):
        if n % t == 0:
            return t
    return n


# ----------------------------------------------------------------------------
# Pallas kernel 1: transposed fused GEMM:  out = relu?(W @ A * scale + bias)
#   W: (Cout, K) bf16, A: (K, TM) bf16, scale/bias: (Cout, 1) f32
#   output block (Cout, TM) -> lane-dense stores.
# ----------------------------------------------------------------------------
def _mm_bias_act_kernel(w_ref, a_ref, s_ref, b_ref, o_ref, *, relu):
    acc = jnp.dot(w_ref[...], a_ref[...], preferred_element_type=jnp.float32)
    out = acc * s_ref[...] + b_ref[...]
    if relu:
        out = jnp.maximum(out, 0.0)
    o_ref[...] = out


def matmul_bias_act_t(w, a, scale, bias, relu):
    w = w.astype(BF16)
    a = a.astype(BF16)
    cout, k = w.shape
    m = a.shape[1]
    tm, mp = _choose_tm(m)
    if mp != m:
        a = jnp.pad(a, ((0, 0), (0, mp - m)))
    out = pl.pallas_call(
        partial(_mm_bias_act_kernel, relu=relu),
        out_shape=jax.ShapeDtypeStruct((cout, mp), F32),
        grid=(mp // tm,),
        in_specs=[
            pl.BlockSpec((cout, k), lambda i: (0, 0)),
            pl.BlockSpec((k, tm), lambda i: (0, i)),
            pl.BlockSpec((cout, 1), lambda i: (0, 0)),
            pl.BlockSpec((cout, 1), lambda i: (0, 0)),
        ],
        out_specs=pl.BlockSpec((cout, tm), lambda i: (0, i)),
        compiler_params=pltpu.CompilerParams(dimension_semantics=("parallel",)),
    )(w, a, scale, bias)
    if mp != m:
        out = out[:, :m]
    return out


# ----------------------------------------------------------------------------
# Pallas kernel 2: cost-volume variance with in-kernel broadcast of the
# reference feature over depth:  var = (ref^2 + sum_src^2)/V - ((ref+sum_src)/V)^2
# ----------------------------------------------------------------------------
def _variance_kernel(ref_ref, *rest, num_views):
    out_ref = rest[-1]
    src_refs = rest[:-1]
    r = ref_ref[...]                                       # (1, 1, T)
    vsum = jnp.broadcast_to(r, out_ref.shape)              # (1, D, T)
    vsq = jnp.broadcast_to(r * r, out_ref.shape)
    for s_ref in src_refs:
        v = s_ref[...]
        vsum = vsum + v
        vsq = vsq + v * v
    inv = 1.0 / num_views
    out_ref[...] = vsq * inv - (vsum * inv) ** 2


def cost_volume_variance(ref_cb, src_vols, num_views):
    # ref_cb: (CB, 1, HW) f32 ; src_vols: list of (CB, D, HW) f32
    cb, _, hw = ref_cb.shape
    d = src_vols[0].shape[1]
    thw = _pick_lane_tile(hw)
    in_specs = [pl.BlockSpec((1, 1, thw), lambda c, i: (c, 0, i))]
    for _ in src_vols:
        in_specs.append(pl.BlockSpec((1, d, thw), lambda c, i: (c, 0, i)))
    return pl.pallas_call(
        partial(_variance_kernel, num_views=num_views),
        out_shape=jax.ShapeDtypeStruct((cb, d, hw), F32),
        grid=(cb, hw // thw),
        in_specs=in_specs,
        out_specs=pl.BlockSpec((1, d, thw), lambda c, i: (c, 0, i)),
        compiler_params=pltpu.CompilerParams(
            dimension_semantics=("parallel", "parallel")),
    )(ref_cb, *src_vols)


# ----------------------------------------------------------------------------
# Pallas kernel 3: softmax over depth + depth regression + photometric
# confidence.  sum4 gather == band-mask reduction around the expected index.
# ----------------------------------------------------------------------------
def _softmax_depth_conf_kernel(pre_ref, dv_ref, depth_ref, conf_ref, *, num_depth):
    pre = pre_ref[0]                                       # (D, T)
    dv = dv_ref[0]
    m = jnp.max(pre, axis=0, keepdims=True)
    e = jnp.exp(pre - m)
    p = e / jnp.sum(e, axis=0, keepdims=True)              # softmax over depth
    depth_ref[0] = jnp.sum(p * dv, axis=0, keepdims=True)

    # expected depth index (truncate like .long()), clamp
    didx_i = lax.broadcasted_iota(jnp.int32, p.shape, 0)
    widx = jnp.sum(p * didx_i.astype(F32), axis=0, keepdims=True)
    di = jnp.clip(widx.astype(jnp.int32), 0, num_depth - 1)      # (1, T)
    # gather(sum4, di) == sum of p over the window [di-1, di+2]
    band = ((didx_i >= di - 1) & (didx_i <= di + 2)).astype(F32)
    conf_ref[0] = jnp.sum(p * band, axis=0, keepdims=True)


def softmax_depth_conf(pre, dv, num_depth, H, W):
    # pre, dv: (B, D, H*W) f32 -- natural layout of the prob volume, no transposes
    b, d, hw = pre.shape
    thw = _pick_lane_tile(hw)
    depth, conf = pl.pallas_call(
        partial(_softmax_depth_conf_kernel, num_depth=num_depth),
        out_shape=(jax.ShapeDtypeStruct((b, 1, hw), F32),
                   jax.ShapeDtypeStruct((b, 1, hw), F32)),
        grid=(b, hw // thw),
        in_specs=[pl.BlockSpec((1, d, thw), lambda i, j: (i, 0, j)),
                  pl.BlockSpec((1, d, thw), lambda i, j: (i, 0, j))],
        out_specs=(pl.BlockSpec((1, 1, thw), lambda i, j: (i, 0, j)),
                   pl.BlockSpec((1, 1, thw), lambda i, j: (i, 0, j))),
        compiler_params=pltpu.CompilerParams(
            dimension_semantics=("parallel", "parallel")),
    )(pre, dv)
    return depth.reshape(b, H, W), conf.reshape(b, H, W)


# ----------------------------------------------------------------------------
# Conv3d / ConvTranspose3d wrappers (im2col in (K, M) layout, GEMM in Pallas)
# ----------------------------------------------------------------------------
def conv3d(x, p, *, stride=1, relu=True):
    # x: (C, B, D, H, W)
    C, B, D, H, W = x.shape
    k, pad = p['k'], p['pad']
    Cout = p['scale'].shape[0]
    xb = jnp.pad(x.astype(BF16),
                 ((0, 0), (0, 0), (pad, pad), (pad, pad), (pad, pad)))
    Do = (D + 2 * pad - k) // stride + 1
    Ho = (H + 2 * pad - k) // stride + 1
    Wo = (W + 2 * pad - k) // stride + 1
    # TODO(synk): im2col is still materialized in HBM (now bf16, (K, M) layout);
    # folding the tap reduction into the Pallas grid with manual DMAs would cut
    # activation traffic another ~k^3-fold.
    taps = []
    for dz in range(k):
        for dy in range(k):
            for dx in range(k):
                taps.append(xb[:, :,
                               dz:dz + (Do - 1) * stride + 1:stride,
                               dy:dy + (Ho - 1) * stride + 1:stride,
                               dx:dx + (Wo - 1) * stride + 1:stride])
    a = jnp.stack(taps, axis=0).reshape(k * k * k * C, B * Do * Ho * Wo)
    out = matmul_bias_act_t(p['w'], a, p['scale'], p['bias'], relu=relu)
    return out.reshape(Cout, B, Do, Ho, Wo)


def deconv3d(x, p):
    # ConvTranspose3d(k=3, s=2, p=1, output_padding=1, bias=False) + BN + ReLU,
    # decomposed into 8 output-parity sub-convolutions (1/2/4/8 taps each).
    Cin, B, D, H, W = x.shape
    Cout = p['scale'].shape[0]
    xb = jnp.pad(x.astype(BF16), ((0, 0), (0, 0), (0, 1), (0, 1), (0, 1)))
    M = B * D * H * W
    parts = []
    for pz in (0, 1):
        for py in (0, 1):
            for px in (0, 1):
                sub = p['parity'][(pz, py, px)]
                taps = [xb[:, :, oz:oz + D, oy:oy + H, ox:ox + W]
                        for (oz, oy, ox) in sub['offs']]
                a = jnp.stack(taps, axis=0).reshape(len(sub['offs']) * Cin, M)
                o = matmul_bias_act_t(sub['w'], a, p['scale'], p['bias'], relu=True)
                parts.append(o.reshape(Cout, B, D, H, W))
    stacked = jnp.stack(parts, axis=0).reshape(2, 2, 2, Cout, B, D, H, W)
    # interleave parities: out[c,b,2d+pz,2h+py,2w+px]
    return jnp.transpose(stacked, (3, 4, 5, 0, 6, 1, 7, 2)).reshape(
        Cout, B, 2 * D, 2 * H, 2 * W)


# ----------------------------------------------------------------------------
# Parameter init (deterministic synthetic weights, PyTorch layouts transposed
# once at init into the (Cout, K) GEMM layout, bf16).
# ----------------------------------------------------------------------------
class _KeyGen:
    def __init__(self, seed):
        self._key = jax.random.PRNGKey(seed)

    def __call__(self):
        self._key, k = jax.random.split(self._key)
        return k


def init_conv3d(kg, cin, cout, k=3, bn=True, bias=False):
    w_pt = 0.05 * jax.random.normal(kg(), (cout, cin, k, k, k), F32)          # OIDHW
    w = jnp.transpose(w_pt, (0, 2, 3, 4, 1)).reshape(cout, k * k * k * cin)    # tap-major, cin-minor
    scale = jnp.full((cout, 1), BN_SCALE if bn else 1.0, F32)
    b = (0.05 * jax.random.normal(kg(), (cout, 1), F32) if bias
         else jnp.zeros((cout, 1), F32))
    return {'w': w.astype(BF16), 'scale': scale, 'bias': b, 'k': k, 'pad': 1}


def _parity_taps(parity):
    # (input_offset, kernel_index) pairs along one axis for ConvTranspose k=3,s=2,p=1,op=1
    return [(0, 1)] if parity == 0 else [(0, 2), (1, 0)]


def init_deconv3d(kg, cin, cout, k=3):
    w_pt = 0.05 * jax.random.normal(kg(), (cin, cout, k, k, k), F32)  # ConvTranspose3d layout
    parity = {}
    for pz in (0, 1):
        for py in (0, 1):
            for px in (0, 1):
                offs, wcols = [], []
                for (oz, kz) in _parity_taps(pz):
                    for (oy, ky) in _parity_taps(py):
                        for (ox, kx) in _parity_taps(px):
                            offs.append((oz, oy, ox))
                            wcols.append(jnp.transpose(w_pt[:, :, kz, ky, kx]))  # (Cout, Cin)
                wmat = jnp.concatenate(wcols, axis=1).astype(BF16)               # (Cout, ntaps*Cin)
                parity[(pz, py, px)] = {'w': wmat, 'offs': tuple(offs)}
    return {'parity': parity,
            'scale': jnp.full((cout, 1), BN_SCALE, F32),
            'bias': jnp.zeros((cout, 1), F32)}


def init_costregnet(kg, cin):
    return {
        'conv0': init_conv3d(kg, cin, 8),
        'conv1': init_conv3d(kg, 8, 16),
        'conv2': init_conv3d(kg, 16, 16),
        'conv3': init_conv3d(kg, 16, 32),
        'conv4': init_conv3d(kg, 32, 32),
        'conv5': init_conv3d(kg, 32, 64),
        'conv6': init_conv3d(kg, 64, 64),
        'conv7': init_deconv3d(kg, 64, 32),
        'conv9': init_deconv3d(kg, 32, 16),
        'conv11': init_deconv3d(kg, 16, 8),
        'prob': init_conv3d(kg, 8, 1, bn=False, bias=True),
    }


def cost_reg_net(p, x):
    c0 = conv3d(x, p['conv0'], stride=1)
    c1 = conv3d(c0, p['conv1'], stride=2)
    c2 = conv3d(c1, p['conv2'], stride=1)
    c3 = conv3d(c2, p['conv3'], stride=2)
    c4 = conv3d(c3, p['conv4'], stride=1)
    c5 = conv3d(c4, p['conv5'], stride=2)
    x = conv3d(c5, p['conv6'], stride=1)
    x = c4 + deconv3d(x, p['conv7'])
    x = c2 + deconv3d(x, p['conv9'])
    x = c0 + deconv3d(x, p['conv11'])
    x = conv3d(x, p['prob'], stride=1, relu=False)
    return x                                               # (1, B, D, H, W)


# ----------------------------------------------------------------------------
# Homography warping (grid_sample bilinear, zeros padding, align_corners=True)
# ----------------------------------------------------------------------------
def homo_warping(src_fea_hwc, src_proj, ref_proj, depth_values, H, W):
    # TODO(synk): data-dependent bilinear gather kept in plain JAX (single linear-index
    # gather per tap on an (H*W, C) view); a manual-DMA Pallas gather is future work.
    B, HW, C = src_fea_hwc.shape
    D = depth_values.shape[1]
    proj = jnp.einsum('bij,bjk->bik', src_proj, jnp.linalg.inv(ref_proj))
    rot, trans = proj[:, :3, :3], proj[:, :3, 3:4]
    yy, xx = jnp.meshgrid(jnp.arange(H, dtype=F32), jnp.arange(W, dtype=F32),
                          indexing='ij')
    xyz = jnp.stack([xx.ravel(), yy.ravel(), jnp.ones(HW, F32)], axis=0)      # (3, HW)
    rot_xyz = jnp.einsum('bij,jn->bin', rot, xyz)                              # (B, 3, HW)
    proj_xyz = (rot_xyz[:, :, None, :] * depth_values.reshape(B, 1, D, HW)
                + trans[:, :, :, None])                                        # (B, 3, D, HW)
    px = proj_xyz[:, 0] / proj_xyz[:, 2]
    py = proj_xyz[:, 1] / proj_xyz[:, 2]

    x0 = jnp.floor(px)
    y0 = jnp.floor(py)
    wx1 = px - x0
    wx0 = 1.0 - wx1
    wy1 = py - y0
    wy0 = 1.0 - wy1

    def gather(fea, lin):                                  # fea: (HW, C), lin: (N,)
        return fea[lin]

    def tap(xi, yi, wgt):
        valid = ((xi >= 0) & (xi <= W - 1) & (yi >= 0) & (yi <= H - 1)).astype(F32)
        xc = jnp.clip(xi, 0, W - 1).astype(jnp.int32)
        yc = jnp.clip(yi, 0, H - 1).astype(jnp.int32)
        lin = (yc * W + xc).reshape(B, D * HW)
        vals = jax.vmap(gather)(src_fea_hwc, lin)          # (B, D*HW, C)
        return vals * (wgt * valid).reshape(B, D * HW, 1)

    warped = (tap(x0, y0, wx0 * wy0) + tap(x0 + 1, y0, wx1 * wy0)
              + tap(x0, y0 + 1, wx0 * wy1) + tap(x0 + 1, y0 + 1, wx1 * wy1))
    return jnp.transpose(warped, (2, 0, 1)).reshape(C, B, D, HW)


# ----------------------------------------------------------------------------
# DepthNet forward (mirrors the PyTorch module, inference path)
# ----------------------------------------------------------------------------
def depth_net(params, features, proj_matrices, depth_values, prob_volume_init=None):
    V = len(features)
    B, C, H, W = features[0].shape
    D = depth_values.shape[1]
    ref_proj = proj_matrices[:, 0]

    ref_cb = jnp.transpose(features[0], (1, 0, 2, 3)).reshape(C * B, 1, H * W)
    src_vols = []
    for v in range(1, V):
        fea_hwc = jnp.transpose(features[v], (0, 2, 3, 1)).reshape(B, H * W, C)
        warped = homo_warping(fea_hwc, proj_matrices[:, v], ref_proj,
                              depth_values, H, W)          # (C, B, D, HW)
        src_vols.append(warped.reshape(C * B, D, H * W))

    var_cb = cost_volume_variance(ref_cb, src_vols, V)     # Pallas kernel 2
    volume = var_cb.reshape(C, B, D, H, W)

    cost_reg = cost_reg_net(params['cost_reg'], volume)    # Pallas kernel 1 (x many)
    pre = cost_reg.reshape(B, D, H * W)                    # squeeze channel, no transpose
    if prob_volume_init is not None:
        pre = pre + prob_volume_init.reshape(B, D, H * W)
    dv = depth_values.reshape(B, D, H * W).astype(F32)

    depth, conf = softmax_depth_conf(pre, dv, D, H, W)     # Pallas kernel 3
    return {'depth': depth, 'photometric_confidence': conf}


class DepthNetPallas:
    """DepthNet with a built-in CostRegNet as the `cost_regularization` module."""

    def __init__(self, feature_channels=16, seed=0):
        kg = _KeyGen(seed)
        self.params = {'cost_reg': init_costregnet(kg, feature_channels)}
        # params are bound as trace-time constants (keeps static ints/tuples out of
        # the traced pytree); the whole forward is a single jitted graph.
        self._fwd = jax.jit(partial(depth_net, self.params))

    def __call__(self, features, proj_matrices, depth_values, num_depth=None,
                 prob_volume_init=None):
        assert len(features) == proj_matrices.shape[1], \
            'Different number of images and projection matrices'
        if num_depth is not None:
            assert depth_values.shape[1] == num_depth
        return self._fwd(tuple(features), proj_matrices, depth_values,
                         prob_volume_init)


def make_proj_matrices(B, V, H, W):
    f = float(W)
    cx, cy = W / 2.0, H / 2.0
    K = jnp.array([[f, 0.0, cx], [0.0, f, cy], [0.0, 0.0, 1.0]], F32)
    mats = []
    for v in range(V):
        E = jnp.eye(4, dtype=F32).at[0, 3].set(0.05 * v)   # small baseline per view
        P = jnp.eye(4, dtype=F32).at[:3, :4].set(K @ E[:3, :4])
        mats.append(P)
    return jnp.broadcast_to(jnp.stack(mats)[None], (B, V, 4, 4))


if __name__ == "__main__":
    B, V, C, H, W, D = 1, 3, 16, 16, 16, 16
    dmin, dmax = 2.0, 6.0

    key = jax.random.PRNGKey(0)
    kfeat, _ = jax.random.split(key)
    feat_keys = jax.random.split(kfeat, V)
    features = [0.5 * jax.random.normal(feat_keys[v], (B, C, H, W), F32)
                for v in range(V)]
    depth_values = jnp.broadcast_to(
        jnp.linspace(dmin, dmax, D, dtype=F32).reshape(1, D, 1, 1), (B, D, H, W))
    proj_matrices = make_proj_matrices(B, V, H, W)

    model = DepthNetPallas(feature_channels=C, seed=0)
    out = model(features, proj_matrices, depth_values, num_depth=D)
    depth = jax.block_until_ready(out['depth'])
    conf = jax.block_until_ready(out['photometric_confidence'])

    assert depth.shape == (B, H, W), depth.shape
    assert conf.shape == (B, H, W), conf.shape
    assert bool(jnp.all(jnp.isfinite(depth)))
    assert bool(jnp.all(jnp.isfinite(conf)))
    # depth is a softmax-weighted mean of the hypotheses -> must lie in [dmin, dmax]
    assert float(jnp.min(depth)) >= dmin - 1e-3
    assert float(jnp.max(depth)) <= dmax + 1e-3
    # confidence is a partial sum of a probability distribution -> in [0, 1]
    assert float(jnp.min(conf)) >= -1e-4
    assert float(jnp.max(conf)) <= 1.0 + 1e-3
    print("KERNEL_OK")
</pallas_src>

<mosaic_0001>
module attributes {stable_mosaic.version = 11 : i64} {
  func.func @_variance_kernel(%arg0: i32, %arg1: i32, %arg2: memref<1x1x256xf32, #tpu.memory_space<vmem>>, %arg3: memref<1x16x256xf32, #tpu.memory_space<vmem>>, %arg4: memref<1x16x256xf32, #tpu.memory_space<vmem>>, %arg5: memref<1x16x256xf32, #tpu.memory_space<vmem>>) attributes {dimension_semantics = [#tpu.dimension_semantics<parallel>, #tpu.dimension_semantics<parallel>], iteration_bounds = array<i64: 16, 1>, scalar_prefetch = 0 : i64, scratch_operands = 0 : i64, tpu.core_type = #tpu.core_type<tc>, window_params = [{transform_indices = @transform_0, window_bounds = array<i64: 1, 1, 256>}, {transform_indices = @transform_1, window_bounds = array<i64: 1, 16, 256>}, {transform_indices = @transform_2, window_bounds = array<i64: 1, 16, 256>}, {transform_indices = @transform_3, window_bounds = array<i64: 1, 16, 256>}]} {
    %c0 = arith.constant 0 : index
    %c0_0 = arith.constant 0 : index
    %c0_1 = arith.constant 0 : index
    %0 = vector.load %arg2[%c0, %c0_0, %c0_1] : memref<1x1x256xf32, #tpu.memory_space<vmem>>, vector<1x1x256xf32>
    %1 = vector.shape_cast %0 : vector<1x1x256xf32> to vector<1x1x256xf32>
    %2 = vector.broadcast %1 : vector<1x1x256xf32> to vector<1x16x256xf32>
    %3 = arith.mulf %0, %0 : vector<1x1x256xf32>
    %4 = vector.shape_cast %3 : vector<1x1x256xf32> to vector<1x1x256xf32>
    %5 = vector.broadcast %4 : vector<1x1x256xf32> to vector<1x16x256xf32>
    %c0_2 = arith.constant 0 : index
    %c0_3 = arith.constant 0 : index
    %c0_4 = arith.constant 0 : index
    %6 = vector.load %arg3[%c0_2, %c0_3, %c0_4] : memref<1x16x256xf32, #tpu.memory_space<vmem>>, vector<1x16x256xf32>
    %7 = arith.addf %2, %6 : vector<1x16x256xf32>
    %8 = arith.mulf %6, %6 : vector<1x16x256xf32>
    %9 = arith.addf %5, %8 : vector<1x16x256xf32>
    %c0_5 = arith.constant 0 : index
    %c0_6 = arith.constant 0 : index
    %c0_7 = arith.constant 0 : index
    %10 = vector.load %arg4[%c0_5, %c0_6, %c0_7] : memref<1x16x256xf32, #tpu.memory_space<vmem>>, vector<1x16x256xf32>
    %11 = arith.addf %7, %10 : vector<1x16x256xf32>
    %12 = arith.mulf %10, %10 : vector<1x16x256xf32>
    %13 = arith.addf %9, %12 : vector<1x16x256xf32>
    %cst = arith.constant 0.333333343 : f32
    %14 = vector.broadcast %cst : f32 to vector<1x16x256xf32>
    %15 = arith.mulf %13, %14 : vector<1x16x256xf32>
    %cst_8 = arith.constant 0.333333343 : f32
    %16 = vector.broadcast %cst_8 : f32 to vector<1x16x256xf32>
    %17 = arith.mulf %11, %16 : vector<1x16x256xf32>
    %18 = arith.mulf %17, %17 : vector<1x16x256xf32>
    %19 = arith.subf %15, %18 : vector<1x16x256xf32>
    %c0_9 = arith.constant 0 : index
    %c0_10 = arith.constant 0 : index
    %c0_11 = arith.constant 0 : index
    %20 = vector.load %arg5[%c0_9, %c0_10, %c0_11] : memref<1x16x256xf32, #tpu.memory_space<vmem>>, vector<1x16x256xf32>
    tpu.vector_store %arg5[%c0_9, %c0_10, %c0_11], %19 {strides = array<i32>} : memref<1x16x256xf32, #tpu.memory_space<vmem>>, vector<1x16x256xf32>,
    return
  }
  func.func @transform_0(%arg0: i32, %arg1: i32) -> (i32, i32, i32) {
    %c0_i32 = arith.constant 0 : i32
    %c0_i32_0 = arith.constant 0 : i32
    return %arg0, %c0_i32, %arg1 : i32, i32, i32
  }
  func.func @transform_1(%arg0: i32, %arg1: i32) -> (i32, i32, i32) {
    %c0_i32 = arith.constant 0 : i32
    %c0_i32_0 = arith.constant 0 : i32
    return %arg0, %c0_i32, %arg1 : i32, i32, i32
  }
  func.func @transform_2(%arg0: i32, %arg1: i32) -> (i32, i32, i32) {
    %c0_i32 = arith.constant 0 : i32
    %c0_i32_0 = arith.constant 0 : i32
    return %arg0, %c0_i32, %arg1 : i32, i32, i32
  }
  func.func @transform_3(%arg0: i32, %arg1: i32) -> (i32, i32, i32) {
    %c0_i32 = arith.constant 0 : i32
    %c0_i32_0 = arith.constant 0 : i32
    return %arg0, %c0_i32, %arg1 : i32, i32, i32
  }
}

module attributes {stable_mosaic.version = 11 : i64} {
  func.func @_mm_bias_act_kernel(%arg0: i32, %arg1: memref<8x432xbf16, #tpu.memory_space<vmem>>, %arg2: memref<432x1024xbf16, #tpu.memory_space<vmem>>, %arg3: memref<8x1xf32, #tpu.memory_space<vmem>>, %arg4: memref<8x1xf32, #tpu.memory_space<vmem>>, %arg5: memref<8x1024xf32, #tpu.memory_space<vmem>>) attributes {dimension_semantics = [#tpu.dimension_semantics<parallel>], iteration_bounds = array<i64: 4>, scalar_prefetch = 0 : i64, scratch_operands = 0 : i64, tpu.core_type = #tpu.core_type<tc>, window_params = [{pipeline_mode = #tpu.pipeline_mode<synchronous>, transform_indices = @transform_0, window_bounds = array<i64: 8, 432>}, {transform_indices = @transform_1, window_bounds = array<i64: 432, 1024>}, {pipeline_mode = #tpu.pipeline_mode<synchronous>, transform_indices = @transform_2, window_bounds = array<i64: 8, 1>}, {pipeline_mode = #tpu.pipeline_mode<synchronous>, transform_indices = @transform_3, window_bounds = array<i64: 8, 1>}, {transform_indices = @transform_4, window_bounds = array<i64: 8, 1024>}]} {
    %c0 = arith.constant 0 : index
    %c0_0 = arith.constant 0 : index
    %0 = vector.load %arg1[%c0, %c0_0] : memref<8x432xbf16, #tpu.memory_space<vmem>>, vector<8x432xbf16>
    %c0_1 = arith.constant 0 : index
    %c0_2 = arith.constant 0 : index
    %1 = vector.load %arg2[%c0_1, %c0_2] : memref<432x1024xbf16, #tpu.memory_space<vmem>>, vector<432x1024xbf16>
    %cst = arith.constant dense<0.000000e+00> : vector<8x1024xf32>
    %2 = tpu.matmul %0, %1, %cst {dimension_numbers = #tpu.dot_dimension_numbers<[1], [0], [0], [1], [0, 0, 1, 1], [], []>} : vector<8x432xbf16>, vector<432x1024xbf16>, vector<8x1024xf32> -> vector<8x1024xf32>
    %c0_3 = arith.constant 0 : index
    %c0_4 = arith.constant 0 : index
    %3 = vector.load %arg3[%c0_3, %c0_4] : memref<8x1xf32, #tpu.memory_space<vmem>>, vector<8x1xf32>
    %4 = vector.broadcast %3 : vector<8x1xf32> to vector<8x1024xf32>
    %5 = arith.mulf %2, %4 : vector<8x1024xf32>
    %c0_5 = arith.constant 0 : index
    %c0_6 = arith.constant 0 : index
    %6 = vector.load %arg4[%c0_5, %c0_6] : memref<8x1xf32, #tpu.memory_space<vmem>>, vector<8x1xf32>
    %7 = vector.broadcast %6 : vector<8x1xf32> to vector<8x1024xf32>
    %8 = arith.addf %5, %7 : vector<8x1024xf32>
    %cst_7 = arith.constant 0.000000e+00 : f32
    %9 = vector.broadcast %cst_7 : f32 to vector<8x1024xf32>
    %10 = arith.maximumf %8, %9 : vector<8x1024xf32>
    %c0_8 = arith.constant 0 : index
    %c0_9 = arith.constant 0 : index
    %11 = vector.load %arg5[%c0_8, %c0_9] : memref<8x1024xf32, #tpu.memory_space<vmem>>, vector<8x1024xf32>
    tpu.vector_store %arg5[%c0_8, %c0_9], %10 {strides = array<i32>} : memref<8x1024xf32, #tpu.memory_space<vmem>>, vector<8x1024xf32>,
    return
  }
  func.func @transform_0(%arg0: i32) -> (i32, i32) {
    %c0_i32 = arith.constant 0 : i32
    %c0_i32_0 = arith.constant 0 : i32
    %c0_i32_1 = arith.constant 0 : i32
    return %c0_i32, %c0_i32_0 : i32, i32
  }
  func.func @transform_1(%arg0: i32) -> (i32, i32) {
    %c0_i32 = arith.constant 0 : i32
    %c0_i32_0 = arith.constant 0 : i32
    return %c0_i32, %arg0 : i32, i32
  }
  func.func @transform_2(%arg0: i32) -> (i32, i32) {
    %c0_i32 = arith.constant 0 : i32
    %c0_i32_0 = arith.constant 0 : i32
    %c0_i32_1 = arith.constant 0 : i32
    return %c0_i32, %c0_i32_0 : i32, i32
  }
  func.func @transform_3(%arg0: i32) -> (i32, i32) {
    %c0_i32 = arith.constant 0 : i32
    %c0_i32_0 = arith.constant 0 : i32
    %c0_i32_1 = arith.constant 0 : i32
    return %c0_i32, %c0_i32_0 : i32, i32
  }
  func.func @transform_4(%arg0: i32) -> (i32, i32) {
    %c0_i32 = arith.constant 0 : i32
    %c0_i32_0 = arith.constant 0 : i32
    return %c0_i32, %arg0 : i32, i32
  }
}

module attributes {stable_mosaic.version = 11 : i64} {
  func.func @_mm_bias_act_kernel(%arg0: i32, %arg1: memref<16x216xbf16, #tpu.memory_space<vmem>>, %arg2: memref<216x512xbf16, #tpu.memory_space<vmem>>, %arg3: memref<16x1xf32, #tpu.memory_space<vmem>>, %arg4: memref<16x1xf32, #tpu.memory_space<vmem>>, %arg5: memref<16x512xf32, #tpu.memory_space<vmem>>) attributes {dimension_semantics = [#tpu.dimension_semantics<parallel>], iteration_bounds = array<i64: 1>, scalar_prefetch = 0 : i64, scratch_operands = 0 : i64, tpu.core_type = #tpu.core_type<tc>, window_params = [{pipeline_mode = #tpu.pipeline_mode<synchronous>, transform_indices = @transform_0, window_bounds = array<i64: 16, 216>}, {transform_indices = @transform_1, window_bounds = array<i64: 216, 512>}, {pipeline_mode = #tpu.pipeline_mode<synchronous>, transform_indices = @transform_2, window_bounds = array<i64: 16, 1>}, {pipeline_mode = #tpu.pipeline_mode<synchronous>, transform_indices = @transform_3, window_bounds = array<i64: 16, 1>}, {transform_indices = @transform_4, window_bounds = array<i64: 16, 512>}]} {
    %c0 = arith.constant 0 : index
    %c0_0 = arith.constant 0 : index
    %0 = vector.load %arg1[%c0, %c0_0] : memref<16x216xbf16, #tpu.memory_space<vmem>>, vector<16x216xbf16>
    %c0_1 = arith.constant 0 : index
    %c0_2 = arith.constant 0 : index
    %1 = vector.load %arg2[%c0_1, %c0_2] : memref<216x512xbf16, #tpu.memory_space<vmem>>, vector<216x512xbf16>
    %cst = arith.constant dense<0.000000e+00> : vector<16x512xf32>
    %2 = tpu.matmul %0, %1, %cst {dimension_numbers = #tpu.dot_dimension_numbers<[1], [0], [0], [1], [0, 0, 1, 1], [], []>} : vector<16x216xbf16>, vector<216x512xbf16>, vector<16x512xf32> -> vector<16x512xf32>
    %c0_3 = arith.constant 0 : index
    %c0_4 = arith.constant 0 : index
    %3 = vector.load %arg3[%c0_3, %c0_4] : memref<16x1xf32, #tpu.memory_space<vmem>>, vector<16x1xf32>
    %4 = vector.broadcast %3 : vector<16x1xf32> to vector<16x512xf32>
    %5 = arith.mulf %2, %4 : vector<16x512xf32>
    %c0_5 = arith.constant 0 : index
    %c0_6 = arith.constant 0 : index
    %6 = vector.load %arg4[%c0_5, %c0_6] : memref<16x1xf32, #tpu.memory_space<vmem>>, vector<16x1xf32>
    %7 = vector.broadcast %6 : vector<16x1xf32> to vector<16x512xf32>
    %8 = arith.addf %5, %7 : vector<16x512xf32>
    %cst_7 = arith.constant 0.000000e+00 : f32
    %9 = vector.broadcast %cst_7 : f32 to vector<16x512xf32>
    %10 = arith.maximumf %8, %9 : vector<16x512xf32>
    %c0_8 = arith.constant 0 : index
    %c0_9 = arith.constant 0 : index
    %11 = vector.load %arg5[%c0_8, %c0_9] : memref<16x512xf32, #tpu.memory_space<vmem>>, vector<16x512xf32>
    tpu.vector_store %arg5[%c0_8, %c0_9], %10 {strides = array<i32>} : memref<16x512xf32, #tpu.memory_space<vmem>>, vector<16x512xf32>,
    return
  }
  func.func @transform_0(%arg0: i32) -> (i32, i32) {
    %c0_i32 = arith.constant 0 : i32
    %c0_i32_0 = arith.constant 0 : i32
    %c0_i32_1 = arith.constant 0 : i32
    return %c0_i32, %c0_i32_0 : i32, i32
  }
  func.func @transform_1(%arg0: i32) -> (i32, i32) {
    %c0_i32 = arith.constant 0 : i32
    %c0_i32_0 = arith.constant 0 : i32
    return %c0_i32, %arg0 : i32, i32
  }
  func.func @transform_2(%arg0: i32) -> (i32, i32) {
    %c0_i32 = arith.constant 0 : i32
    %c0_i32_0 = arith.constant 0 : i32
    %c0_i32_1 = arith.constant 0 : i32
    return %c0_i32, %c0_i32_0 : i32, i32
  }
  func.func @transform_3(%arg0: i32) -> (i32, i32) {
    %c0_i32 = arith.constant 0 : i32
    %c0_i32_0 = arith.constant 0 : i32
    %c0_i32_1 = arith.constant 0 : i32
    return %c0_i32, %c0_i32_0 : i32, i32
  }
  func.func @transform_4(%arg0: i32) -> (i32, i32) {
    %c0_i32 = arith.constant 0 : i32
    %c0_i32_0 = arith.constant 0 : i32
    return %c0_i32, %arg0 : i32, i32
  }
}

module attributes {stable_mosaic.version = 11 : i64} {
  func.func @_mm_bias_act_kernel(%arg0: i32, %arg1: memref<16x432xbf16, #tpu.memory_space<vmem>>, %arg2: memref<432x512xbf16, #tpu.memory_space<vmem>>, %arg3: memref<16x1xf32, #tpu.memory_space<vmem>>, %arg4: memref<16x1xf32, #tpu.memory_space<vmem>>, %arg5: memref<16x512xf32, #tpu.memory_space<vmem>>) attributes {dimension_semantics = [#tpu.dimension_semantics<parallel>], iteration_bounds = array<i64: 1>, scalar_prefetch = 0 : i64, scratch_operands = 0 : i64, tpu.core_type = #tpu.core_type<tc>, window_params = [{pipeline_mode = #tpu.pipeline_mode<synchronous>, transform_indices = @transform_0, window_bounds = array<i64: 16, 432>}, {transform_indices = @transform_1, window_bounds = array<i64: 432, 512>}, {pipeline_mode = #tpu.pipeline_mode<synchronous>, transform_indices = @transform_2, window_bounds = array<i64: 16, 1>}, {pipeline_mode = #tpu.pipeline_mode<synchronous>, transform_indices = @transform_3, window_bounds = array<i64: 16, 1>}, {transform_indices = @transform_4, window_bounds = array<i64: 16, 512>}]} {
    %c0 = arith.constant 0 : index
    %c0_0 = arith.constant 0 : index
    %0 = vector.load %arg1[%c0, %c0_0] : memref<16x432xbf16, #tpu.memory_space<vmem>>, vector<16x432xbf16>
    %c0_1 = arith.constant 0 : index
    %c0_2 = arith.constant 0 : index
    %1 = vector.load %arg2[%c0_1, %c0_2] : memref<432x512xbf16, #tpu.memory_space<vmem>>, vector<432x512xbf16>
    %cst = arith.constant dense<0.000000e+00> : vector<16x512xf32>
    %2 = tpu.matmul %0, %1, %cst {dimension_numbers = #tpu.dot_dimension_numbers<[1], [0], [0], [1], [0, 0, 1, 1], [], []>} : vector<16x432xbf16>, vector<432x512xbf16>, vector<16x512xf32> -> vector<16x512xf32>
    %c0_3 = arith.constant 0 : index
    %c0_4 = arith.constant 0 : index
    %3 = vector.load %arg3[%c0_3, %c0_4] : memref<16x1xf32, #tpu.memory_space<vmem>>, vector<16x1xf32>
    %4 = vector.broadcast %3 : vector<16x1xf32> to vector<16x512xf32>
    %5 = arith.mulf %2, %4 : vector<16x512xf32>
    %c0_5 = arith.constant 0 : index
    %c0_6 = arith.constant 0 : index
    %6 = vector.load %arg4[%c0_5, %c0_6] : memref<16x1xf32, #tpu.memory_space<vmem>>, vector<16x1xf32>
    %7 = vector.broadcast %6 : vector<16x1xf32> to vector<16x512xf32>
    %8 = arith.addf %5, %7 : vector<16x512xf32>
    %cst_7 = arith.constant 0.000000e+00 : f32
    %9 = vector.broadcast %cst_7 : f32 to vector<16x512xf32>
    %10 = arith.maximumf %8, %9 : vector<16x512xf32>
    %c0_8 = arith.constant 0 : index
    %c0_9 = arith.constant 0 : index
    %11 = vector.load %arg5[%c0_8, %c0_9] : memref<16x512xf32, #tpu.memory_space<vmem>>, vector<16x512xf32>
    tpu.vector_store %arg5[%c0_8, %c0_9], %10 {strides = array<i32>} : memref<16x512xf32, #tpu.memory_space<vmem>>, vector<16x512xf32>,
    return
  }
  func.func @transform_0(%arg0: i32) -> (i32, i32) {
    %c0_i32 = arith.constant 0 : i32
    %c0_i32_0 = arith.constant 0 : i32
    %c0_i32_1 = arith.constant 0 : i32
    return %c0_i32, %c0_i32_0 : i32, i32
  }
  func.func @transform_1(%arg0: i32) -> (i32, i32) {
    %c0_i32 = arith.constant 0 : i32
    %c0_i32_0 = arith.constant 0 : i32
    return %c0_i32, %arg0 : i32, i32
  }
  func.func @transform_2(%arg0: i32) -> (i32, i32) {
    %c0_i32 = arith.constant 0 : i32
    %c0_i32_0 = arith.constant 0 : i32
    %c0_i32_1 = arith.constant 0 : i32
    return %c0_i32, %c0_i32_0 : i32, i32
  }
  func.func @transform_3(%arg0: i32) -> (i32, i32) {
    %c0_i32 = arith.constant 0 : i32
    %c0_i32_0 = arith.constant 0 : i32
    %c0_i32_1 = arith.constant 0 : i32
    return %c0_i32, %c0_i32_0 : i32, i32
  }
  func.func @transform_4(%arg0: i32) -> (i32, i32) {
    %c0_i32 = arith.constant 0 : i32
    %c0_i32_0 = arith.constant 0 : i32
    return %c0_i32, %arg0 : i32, i32
  }
}

module attributes {stable_mosaic.version = 11 : i64} {
  func.func @_mm_bias_act_kernel(%arg0: i32, %arg1: memref<32x432xbf16, #tpu.memory_space<vmem>>, %arg2: memref<432x64xbf16, #tpu.memory_space<vmem>>, %arg3: memref<32x1xf32, #tpu.memory_space<vmem>>, %arg4: memref<32x1xf32, #tpu.memory_space<vmem>>, %arg5: memref<32x64xf32, #tpu.memory_space<vmem>>) attributes {dimension_semantics = [#tpu.dimension_semantics<parallel>], iteration_bounds = array<i64: 1>, scalar_prefetch = 0 : i64, scratch_operands = 0 : i64, tpu.core_type = #tpu.core_type<tc>, window_params = [{pipeline_mode = #tpu.pipeline_mode<synchronous>, transform_indices = @transform_0, window_bounds = array<i64: 32, 432>}, {transform_indices = @transform_1, window_bounds = array<i64: 432, 64>}, {pipeline_mode = #tpu.pipeline_mode<synchronous>, transform_indices = @transform_2, window_bounds = array<i64: 32, 1>}, {pipeline_mode = #tpu.pipeline_mode<synchronous>, transform_indices = @transform_3, window_bounds = array<i64: 32, 1>}, {transform_indices = @transform_4, window_bounds = array<i64: 32, 64>}]} {
    %c0 = arith.constant 0 : index
    %c0_0 = arith.constant 0 : index
    %0 = vector.load %arg1[%c0, %c0_0] : memref<32x432xbf16, #tpu.memory_space<vmem>>, vector<32x432xbf16>
    %c0_1 = arith.constant 0 : index
    %c0_2 = arith.constant 0 : index
    %1 = vector.load %arg2[%c0_1, %c0_2] : memref<432x64xbf16, #tpu.memory_space<vmem>>, vector<432x64xbf16>
    %cst = arith.constant dense<0.000000e+00> : vector<32x64xf32>
    %2 = tpu.matmul %0, %1, %cst {dimension_numbers = #tpu.dot_dimension_numbers<[1], [0], [0], [1], [0, 0, 1, 1], [], []>} : vector<32x432xbf16>, vector<432x64xbf16>, vector<32x64xf32> -> vector<32x64xf32>
    %c0_3 = arith.constant 0 : index
    %c0_4 = arith.constant 0 : index
    %3 = vector.load %arg3[%c0_3, %c0_4] : memref<32x1xf32, #tpu.memory_space<vmem>>, vector<32x1xf32>
    %4 = vector.broadcast %3 : vector<32x1xf32> to vector<32x64xf32>
    %5 = arith.mulf %2, %4 : vector<32x64xf32>
    %c0_5 = arith.constant 0 : index
    %c0_6 = arith.constant 0 : index
    %6 = vector.load %arg4[%c0_5, %c0_6] : memref<32x1xf32, #tpu.memory_space<vmem>>, vector<32x1xf32>
    %7 = vector.broadcast %6 : vector<32x1xf32> to vector<32x64xf32>
    %8 = arith.addf %5, %7 : vector<32x64xf32>
    %cst_7 = arith.constant 0.000000e+00 : f32
    %9 = vector.broadcast %cst_7 : f32 to vector<32x64xf32>
    %10 = arith.maximumf %8, %9 : vector<32x64xf32>
    %c0_8 = arith.constant 0 : index
    %c0_9 = arith.constant 0 : index
    %11 = vector.load %arg5[%c0_8, %c0_9] : memref<32x64xf32, #tpu.memory_space<vmem>>, vector<32x64xf32>
    tpu.vector_store %arg5[%c0_8, %c0_9], %10 {strides = array<i32>} : memref<32x64xf32, #tpu.memory_space<vmem>>, vector<32x64xf32>,
    return
  }
  func.func @transform_0(%arg0: i32) -> (i32, i32) {
    %c0_i32 = arith.constant 0 : i32
    %c0_i32_0 = arith.constant 0 : i32
    %c0_i32_1 = arith.constant 0 : i32
    return %c0_i32, %c0_i32_0 : i32, i32
  }
  func.func @transform_1(%arg0: i32) -> (i32, i32) {
    %c0_i32 = arith.constant 0 : i32
    %c0_i32_0 = arith.constant 0 : i32
    return %c0_i32, %arg0 : i32, i32
  }
  func.func @transform_2(%arg0: i32) -> (i32, i32) {
    %c0_i32 = arith.constant 0 : i32
    %c0_i32_0 = arith.constant 0 : i32
    %c0_i32_1 = arith.constant 0 : i32
    return %c0_i32, %c0_i32_0 : i32, i32
  }
  func.func @transform_3(%arg0: i32) -> (i32, i32) {
    %c0_i32 = arith.constant 0 : i32
    %c0_i32_0 = arith.constant 0 : i32
    %c0_i32_1 = arith.constant 0 : i32
    return %c0_i32, %c0_i32_0 : i32, i32
  }
  func.func @transform_4(%arg0: i32) -> (i32, i32) {
    %c0_i32 = arith.constant 0 : i32
    %c0_i32_0 = arith.constant 0 : i32
    return %c0_i32, %arg0 : i32, i32
  }
}

module attributes {stable_mosaic.version = 11 : i64} {
  func.func @_mm_bias_act_kernel(%arg0: i32, %arg1: memref<32x864xbf16, #tpu.memory_space<vmem>>, %arg2: memref<864x64xbf16, #tpu.memory_space<vmem>>, %arg3: memref<32x1xf32, #tpu.memory_space<vmem>>, %arg4: memref<32x1xf32, #tpu.memory_space<vmem>>, %arg5: memref<32x64xf32, #tpu.memory_space<vmem>>) attributes {dimension_semantics = [#tpu.dimension_semantics<parallel>], iteration_bounds = array<i64: 1>, scalar_prefetch = 0 : i64, scratch_operands = 0 : i64, tpu.core_type = #tpu.core_type<tc>, window_params = [{pipeline_mode = #tpu.pipeline_mode<synchronous>, transform_indices = @transform_0, window_bounds = array<i64: 32, 864>}, {transform_indices = @transform_1, window_bounds = array<i64: 864, 64>}, {pipeline_mode = #tpu.pipeline_mode<synchronous>, transform_indices = @transform_2, window_bounds = array<i64: 32, 1>}, {pipeline_mode = #tpu.pipeline_mode<synchronous>, transform_indices = @transform_3, window_bounds = array<i64: 32, 1>}, {transform_indices = @transform_4, window_bounds = array<i64: 32, 64>}]} {
    %c0 = arith.constant 0 : index
    %c0_0 = arith.constant 0 : index
    %0 = vector.load %arg1[%c0, %c0_0] : memref<32x864xbf16, #tpu.memory_space<vmem>>, vector<32x864xbf16>
    %c0_1 = arith.constant 0 : index
    %c0_2 = arith.constant 0 : index
    %1 = vector.load %arg2[%c0_1, %c0_2] : memref<864x64xbf16, #tpu.memory_space<vmem>>, vector<864x64xbf16>
    %cst = arith.constant dense<0.000000e+00> : vector<32x64xf32>
    %2 = tpu.matmul %0, %1, %cst {dimension_numbers = #tpu.dot_dimension_numbers<[1], [0], [0], [1], [0, 0, 1, 1], [], []>} : vector<32x864xbf16>, vector<864x64xbf16>, vector<32x64xf32> -> vector<32x64xf32>
    %c0_3 = arith.constant 0 : index
    %c0_4 = arith.constant 0 : index
    %3 = vector.load %arg3[%c0_3, %c0_4] : memref<32x1xf32, #tpu.memory_space<vmem>>, vector<32x1xf32>
    %4 = vector.broadcast %3 : vector<32x1xf32> to vector<32x64xf32>
    %5 = arith.mulf %2, %4 : vector<32x64xf32>
    %c0_5 = arith.constant 0 : index
    %c0_6 = arith.constant 0 : index
    %6 = vector.load %arg4[%c0_5, %c0_6] : memref<32x1xf32, #tpu.memory_space<vmem>>, vector<32x1xf32>
    %7 = vector.broadcast %6 : vector<32x1xf32> to vector<32x64xf32>
    %8 = arith.addf %5, %7 : vector<32x64xf32>
    %cst_7 = arith.constant 0.000000e+00 : f32
    %9 = vector.broadcast %cst_7 : f32 to vector<32x64xf32>
    %10 = arith.maximumf %8, %9 : vector<32x64xf32>
    %c0_8 = arith.constant 0 : index
    %c0_9 = arith.constant 0 : index
    %11 = vector.load %arg5[%c0_8, %c0_9] : memref<32x64xf32, #tpu.memory_space<vmem>>, vector<32x64xf32>
    tpu.vector_store %arg5[%c0_8, %c0_9], %10 {strides = array<i32>} : memref<32x64xf32, #tpu.memory_space<vmem>>, vector<32x64xf32>,
    return
  }
  func.func @transform_0(%arg0: i32) -> (i32, i32) {
    %c0_i32 = arith.constant 0 : i32
    %c0_i32_0 = arith.constant 0 : i32
    %c0_i32_1 = arith.constant 0 : i32
    return %c0_i32, %c0_i32_0 : i32, i32
  }
  func.func @transform_1(%arg0: i32) -> (i32, i32) {
    %c0_i32 = arith.constant 0 : i32
    %c0_i32_0 = arith.constant 0 : i32
    return %c0_i32, %arg0 : i32, i32
  }
  func.func @transform_2(%arg0: i32) -> (i32, i32) {
    %c0_i32 = arith.constant 0 : i32
    %c0_i32_0 = arith.constant 0 : i32
    %c0_i32_1 = arith.constant 0 : i32
    return %c0_i32, %c0_i32_0 : i32, i32
  }
  func.func @transform_3(%arg0: i32) -> (i32, i32) {
    %c0_i32 = arith.constant 0 : i32
    %c0_i32_0 = arith.constant 0 : i32
    %c0_i32_1 = arith.constant 0 : i32
    return %c0_i32, %c0_i32_0 : i32, i32
  }
  func.func @transform_4(%arg0: i32) -> (i32, i32) {
    %c0_i32 = arith.constant 0 : i32
    %c0_i32_0 = arith.constant 0 : i32
    return %c0_i32, %arg0 : i32, i32
  }
}

module attributes {stable_mosaic.version = 11 : i64} {
  func.func @_mm_bias_act_kernel(%arg0: i32, %arg1: memref<64x864xbf16, #tpu.memory_space<vmem>>, %arg2: memref<864x8xbf16, #tpu.memory_space<vmem>>, %arg3: memref<64x1xf32, #tpu.memory_space<vmem>>, %arg4: memref<64x1xf32, #tpu.memory_space<vmem>>, %arg5: memref<64x8xf32, #tpu.memory_space<vmem>>) attributes {dimension_semantics = [#tpu.dimension_semantics<parallel>], iteration_bounds = array<i64: 1>, scalar_prefetch = 0 : i64, scratch_operands = 0 : i64, tpu.core_type = #tpu.core_type<tc>, window_params = [{pipeline_mode = #tpu.pipeline_mode<synchronous>, transform_indices = @transform_0, window_bounds = array<i64: 64, 864>}, {transform_indices = @transform_1, window_bounds = array<i64: 864, 8>}, {pipeline_mode = #tpu.pipeline_mode<synchronous>, transform_indices = @transform_2, window_bounds = array<i64: 64, 1>}, {pipeline_mode = #tpu.pipeline_mode<synchronous>, transform_indices = @transform_3, window_bounds = array<i64: 64, 1>}, {transform_indices = @transform_4, window_bounds = array<i64: 64, 8>}]} {
    %c0 = arith.constant 0 : index
    %c0_0 = arith.constant 0 : index
    %0 = vector.load %arg1[%c0, %c0_0] : memref<64x864xbf16, #tpu.memory_space<vmem>>, vector<64x864xbf16>
    %c0_1 = arith.constant 0 : index
    %c0_2 = arith.constant 0 : index
    %1 = vector.load %arg2[%c0_1, %c0_2] : memref<864x8xbf16, #tpu.memory_space<vmem>>, vector<864x8xbf16>
    %cst = arith.constant dense<0.000000e+00> : vector<64x8xf32>
    %2 = tpu.matmul %0, %1, %cst {dimension_numbers = #tpu.dot_dimension_numbers<[1], [0], [0], [1], [0, 0, 1, 1], [], []>} : vector<64x864xbf16>, vector<864x8xbf16>, vector<64x8xf32> -> vector<64x8xf32>
    %c0_3 = arith.constant 0 : index
    %c0_4 = arith.constant 0 : index
    %3 = vector.load %arg3[%c0_3, %c0_4] : memref<64x1xf32, #tpu.memory_space<vmem>>, vector<64x1xf32>
    %4 = vector.broadcast %3 : vector<64x1xf32> to vector<64x8xf32>
    %5 = arith.mulf %2, %4 : vector<64x8xf32>
    %c0_5 = arith.constant 0 : index
    %c0_6 = arith.constant 0 : index
    %6 = vector.load %arg4[%c0_5, %c0_6] : memref<64x1xf32, #tpu.memory_space<vmem>>, vector<64x1xf32>
    %7 = vector.broadcast %6 : vector<64x1xf32> to vector<64x8xf32>
    %8 = arith.addf %5, %7 : vector<64x8xf32>
    %cst_7 = arith.constant 0.000000e+00 : f32
    %9 = vector.broadcast %cst_7 : f32 to vector<64x8xf32>
    %10 = arith.maximumf %8, %9 : vector<64x8xf32>
    %c0_8 = arith.constant 0 : index
    %c0_9 = arith.constant 0 : index
    %11 = vector.load %arg5[%c0_8, %c0_9] : memref<64x8xf32, #tpu.memory_space<vmem>>, vector<64x8xf32>
    tpu.vector_store %arg5[%c0_8, %c0_9], %10 {strides = array<i32>} : memref<64x8xf32, #tpu.memory_space<vmem>>, vector<64x8xf32>,
    return
  }
  func.func @transform_0(%arg0: i32) -> (i32, i32) {
    %c0_i32 = arith.constant 0 : i32
    %c0_i32_0 = arith.constant 0 : i32
    %c0_i32_1 = arith.constant 0 : i32
    return %c0_i32, %c0_i32_0 : i32, i32
  }
  func.func @transform_1(%arg0: i32) -> (i32, i32) {
    %c0_i32 = arith.constant 0 : i32
    %c0_i32_0 = arith.constant 0 : i32
    return %c0_i32, %arg0 : i32, i32
  }
  func.func @transform_2(%arg0: i32) -> (i32, i32) {
    %c0_i32 = arith.constant 0 : i32
    %c0_i32_0 = arith.constant 0 : i32
    %c0_i32_1 = arith.constant 0 : i32
    return %c0_i32, %c0_i32_0 : i32, i32
  }
  func.func @transform_3(%arg0: i32) -> (i32, i32) {
    %c0_i32 = arith.constant 0 : i32
    %c0_i32_0 = arith.constant 0 : i32
    %c0_i32_1 = arith.constant 0 : i32
    return %c0_i32, %c0_i32_0 : i32, i32
  }
  func.func @transform_4(%arg0: i32) -> (i32, i32) {
    %c0_i32 = arith.constant 0 : i32
    %c0_i32_0 = arith.constant 0 : i32
    return %c0_i32, %arg0 : i32, i32
  }
}

module attributes {stable_mosaic.version = 11 : i64} {
  func.func @_mm_bias_act_kernel(%arg0: i32, %arg1: memref<64x1728xbf16, #tpu.memory_space<vmem>>, %arg2: memref<1728x8xbf16, #tpu.memory_space<vmem>>, %arg3: memref<64x1xf32, #tpu.memory_space<vmem>>, %arg4: memref<64x1xf32, #tpu.memory_space<vmem>>, %arg5: memref<64x8xf32, #tpu.memory_space<vmem>>) attributes {dimension_semantics = [#tpu.dimension_semantics<parallel>], iteration_bounds = array<i64: 1>, scalar_prefetch = 0 : i64, scratch_operands = 0 : i64, tpu.core_type = #tpu.core_type<tc>, window_params = [{pipeline_mode = #tpu.pipeline_mode<synchronous>, transform_indices = @transform_0, window_bounds = array<i64: 64, 1728>}, {transform_indices = @transform_1, window_bounds = array<i64: 1728, 8>}, {pipeline_mode = #tpu.pipeline_mode<synchronous>, transform_indices = @transform_2, window_bounds = array<i64: 64, 1>}, {pipeline_mode = #tpu.pipeline_mode<synchronous>, transform_indices = @transform_3, window_bounds = array<i64: 64, 1>}, {transform_indices = @transform_4, window_bounds = array<i64: 64, 8>}]} {
    %c0 = arith.constant 0 : index
    %c0_0 = arith.constant 0 : index
    %0 = vector.load %arg1[%c0, %c0_0] : memref<64x1728xbf16, #tpu.memory_space<vmem>>, vector<64x1728xbf16>
    %c0_1 = arith.constant 0 : index
    %c0_2 = arith.constant 0 : index
    %1 = vector.load %arg2[%c0_1, %c0_2] : memref<1728x8xbf16, #tpu.memory_space<vmem>>, vector<1728x8xbf16>
    %cst = arith.constant dense<0.000000e+00> : vector<64x8xf32>
    %2 = tpu.matmul %0, %1, %cst {dimension_numbers = #tpu.dot_dimension_numbers<[1], [0], [0], [1], [0, 0, 1, 1], [], []>} : vector<64x1728xbf16>, vector<1728x8xbf16>, vector<64x8xf32> -> vector<64x8xf32>
    %c0_3 = arith.constant 0 : index
    %c0_4 = arith.constant 0 : index
    %3 = vector.load %arg3[%c0_3, %c0_4] : memref<64x1xf32, #tpu.memory_space<vmem>>, vector<64x1xf32>
    %4 = vector.broadcast %3 : vector<64x1xf32> to vector<64x8xf32>
    %5 = arith.mulf %2, %4 : vector<64x8xf32>
    %c0_5 = arith.constant 0 : index
    %c0_6 = arith.constant 0 : index
    %6 = vector.load %arg4[%c0_5, %c0_6] : memref<64x1xf32, #tpu.memory_space<vmem>>, vector<64x1xf32>
    %7 = vector.broadcast %6 : vector<64x1xf32> to vector<64x8xf32>
    %8 = arith.addf %5, %7 : vector<64x8xf32>
    %cst_7 = arith.constant 0.000000e+00 : f32
    %9 = vector.broadcast %cst_7 : f32 to vector<64x8xf32>
    %10 = arith.maximumf %8, %9 : vector<64x8xf32>
    %c0_8 = arith.constant 0 : index
    %c0_9 = arith.constant 0 : index
    %11 = vector.load %arg5[%c0_8, %c0_9] : memref<64x8xf32, #tpu.memory_space<vmem>>, vector<64x8xf32>
    tpu.vector_store %arg5[%c0_8, %c0_9], %10 {strides = array<i32>} : memref<64x8xf32, #tpu.memory_space<vmem>>, vector<64x8xf32>,
    return
  }
  func.func @transform_0(%arg0: i32) -> (i32, i32) {
    %c0_i32 = arith.constant 0 : i32
    %c0_i32_0 = arith.constant 0 : i32
    %c0_i32_1 = arith.constant 0 : i32
    return %c0_i32, %c0_i32_0 : i32, i32
  }
  func.func @transform_1(%arg0: i32) -> (i32, i32) {
    %c0_i32 = arith.constant 0 : i32
    %c0_i32_0 = arith.constant 0 : i32
    return %c0_i32, %arg0 : i32, i32
  }
  func.func @transform_2(%arg0: i32) -> (i32, i32) {
    %c0_i32 = arith.constant 0 : i32
    %c0_i32_0 = arith.constant 0 : i32
    %c0_i32_1 = arith.constant 0 : i32
    return %c0_i32, %c0_i32_0 : i32, i32
  }
  func.func @transform_3(%arg0: i32) -> (i32, i32) {
    %c0_i32 = arith.constant 0 : i32
    %c0_i32_0 = arith.constant 0 : i32
    %c0_i32_1 = arith.constant 0 : i32
    return %c0_i32, %c0_i32_0 : i32, i32
  }
  func.func @transform_4(%arg0: i32) -> (i32, i32) {
    %c0_i32 = arith.constant 0 : i32
    %c0_i32_0 = arith.constant 0 : i32
    return %c0_i32, %arg0 : i32, i32
  }
}

module attributes {stable_mosaic.version = 11 : i64} {
  func.func @_mm_bias_act_kernel(%arg0: i32, %arg1: memref<32x512xbf16, #tpu.memory_space<vmem>>, %arg2: memref<512x8xbf16, #tpu.memory_space<vmem>>, %arg3: memref<32x1xf32, #tpu.memory_space<vmem>>, %arg4: memref<32x1xf32, #tpu.memory_space<vmem>>, %arg5: memref<32x8xf32, #tpu.memory_space<vmem>>) attributes {dimension_semantics = [#tpu.dimension_semantics<parallel>], iteration_bounds = array<i64: 1>, scalar_prefetch = 0 : i64, scratch_operands = 0 : i64, tpu.core_type = #tpu.core_type<tc>, window_params = [{pipeline_mode = #tpu.pipeline_mode<synchronous>, transform_indices = @transform_0, window_bounds = array<i64: 32, 512>}, {transform_indices = @transform_1, window_bounds = array<i64: 512, 8>}, {pipeline_mode = #tpu.pipeline_mode<synchronous>, transform_indices = @transform_2, window_bounds = array<i64: 32, 1>}, {pipeline_mode = #tpu.pipeline_mode<synchronous>, transform_indices = @transform_3, window_bounds = array<i64: 32, 1>}, {transform_indices = @transform_4, window_bounds = array<i64: 32, 8>}]} {
    %c0 = arith.constant 0 : index
    %c0_0 = arith.constant 0 : index
    %0 = vector.load %arg1[%c0, %c0_0] : memref<32x512xbf16, #tpu.memory_space<vmem>>, vector<32x512xbf16>
    %c0_1 = arith.constant 0 : index
    %c0_2 = arith.constant 0 : index
    %1 = vector.load %arg2[%c0_1, %c0_2] : memref<512x8xbf16, #tpu.memory_space<vmem>>, vector<512x8xbf16>
    %cst = arith.constant dense<0.000000e+00> : vector<32x8xf32>
    %2 = tpu.matmul %0, %1, %cst {dimension_numbers = #tpu.dot_dimension_numbers<[1], [0], [0], [1], [0, 0, 1, 1], [], []>} : vector<32x512xbf16>, vector<512x8xbf16>, vector<32x8xf32> -> vector<32x8xf32>
    %c0_3 = arith.constant 0 : index
    %c0_4 = arith.constant 0 : index
    %3 = vector.load %arg3[%c0_3, %c0_4] : memref<32x1xf32, #tpu.memory_space<vmem>>, vector<32x1xf32>
    %4 = vector.broadcast %3 : vector<32x1xf32> to vector<32x8xf32>
    %5 = arith.mulf %2, %4 : vector<32x8xf32>
    %c0_5 = arith.constant 0 : index
    %c0_6 = arith.constant 0 : index
    %6 = vector.load %arg4[%c0_5, %c0_6] : memref<32x1xf32, #tpu.memory_space<vmem>>, vector<32x1xf32>
    %7 = vector.broadcast %6 : vector<32x1xf32> to vector<32x8xf32>
    %8 = arith.addf %5, %7 : vector<32x8xf32>
    %cst_7 = arith.constant 0.000000e+00 : f32
    %9 = vector.broadcast %cst_7 : f32 to vector<32x8xf32>
    %10 = arith.maximumf %8, %9 : vector<32x8xf32>
    %c0_8 = arith.constant 0 : index
    %c0_9 = arith.constant 0 : index
    %11 = vector.load %arg5[%c0_8, %c0_9] : memref<32x8xf32, #tpu.memory_space<vmem>>, vector<32x8xf32>
    tpu.vector_store %arg5[%c0_8, %c0_9], %10 {strides = array<i32>} : memref<32x8xf32, #tpu.memory_space<vmem>>, vector<32x8xf32>,
    return
  }
  func.func @transform_0(%arg0: i32) -> (i32, i32) {
    %c0_i32 = arith.constant 0 : i32
    %c0_i32_0 = arith.constant 0 : i32
    %c0_i32_1 = arith.constant 0 : i32
    return %c0_i32, %c0_i32_0 : i32, i32
  }
  func.func @transform_1(%arg0: i32) -> (i32, i32) {
    %c0_i32 = arith.constant 0 : i32
    %c0_i32_0 = arith.constant 0 : i32
    return %c0_i32, %arg0 : i32, i32
  }
  func.func @transform_2(%arg0: i32) -> (i32, i32) {
    %c0_i32 = arith.constant 0 : i32
    %c0_i32_0 = arith.constant 0 : i32
    %c0_i32_1 = arith.constant 0 : i32
    return %c0_i32, %c0_i32_0 : i32, i32
  }
  func.func @transform_3(%arg0: i32) -> (i32, i32) {
    %c0_i32 = arith.constant 0 : i32
    %c0_i32_0 = arith.constant 0 : i32
    %c0_i32_1 = arith.constant 0 : i32
    return %c0_i32, %c0_i32_0 : i32, i32
  }
  func.func @transform_4(%arg0: i32) -> (i32, i32) {
    %c0_i32 = arith.constant 0 : i32
    %c0_i32_0 = arith.constant 0 : i32
    return %c0_i32, %arg0 : i32, i32
  }
}

module attributes {stable_mosaic.version = 11 : i64} {
  func.func @_mm_bias_act_kernel(%arg0: i32, %arg1: memref<32x256xbf16, #tpu.memory_space<vmem>>, %arg2: memref<256x8xbf16, #tpu.memory_space<vmem>>, %arg3: memref<32x1xf32, #tpu.memory_space<vmem>>, %arg4: memref<32x1xf32, #tpu.memory_space<vmem>>, %arg5: memref<32x8xf32, #tpu.memory_space<vmem>>) attributes {dimension_semantics = [#tpu.dimension_semantics<parallel>], iteration_bounds = array<i64: 1>, scalar_prefetch = 0 : i64, scratch_operands = 0 : i64, tpu.core_type = #tpu.core_type<tc>, window_params = [{pipeline_mode = #tpu.pipeline_mode<synchronous>, transform_indices = @transform_0, window_bounds = array<i64: 32, 256>}, {transform_indices = @transform_1, window_bounds = array<i64: 256, 8>}, {pipeline_mode = #tpu.pipeline_mode<synchronous>, transform_indices = @transform_2, window_bounds = array<i64: 32, 1>}, {pipeline_mode = #tpu.pipeline_mode<synchronous>, transform_indices = @transform_3, window_bounds = array<i64: 32, 1>}, {transform_indices = @transform_4, window_bounds = array<i64: 32, 8>}]} {
    %c0 = arith.constant 0 : index
    %c0_0 = arith.constant 0 : index
    %0 = vector.load %arg1[%c0, %c0_0] : memref<32x256xbf16, #tpu.memory_space<vmem>>, vector<32x256xbf16>
    %c0_1 = arith.constant 0 : index
    %c0_2 = arith.constant 0 : index
    %1 = vector.load %arg2[%c0_1, %c0_2] : memref<256x8xbf16, #tpu.memory_space<vmem>>, vector<256x8xbf16>
    %cst = arith.constant dense<0.000000e+00> : vector<32x8xf32>
    %2 = tpu.matmul %0, %1, %cst {dimension_numbers = #tpu.dot_dimension_numbers<[1], [0], [0], [1], [0, 0, 1, 1], [], []>} : vector<32x256xbf16>, vector<256x8xbf16>, vector<32x8xf32> -> vector<32x8xf32>
    %c0_3 = arith.constant 0 : index
    %c0_4 = arith.constant 0 : index
    %3 = vector.load %arg3[%c0_3, %c0_4] : memref<32x1xf32, #tpu.memory_space<vmem>>, vector<32x1xf32>
    %4 = vector.broadcast %3 : vector<32x1xf32> to vector<32x8xf32>
    %5 = arith.mulf %2, %4 : vector<32x8xf32>
    %c0_5 = arith.constant 0 : index
    %c0_6 = arith.constant 0 : index
    %6 = vector.load %arg4[%c0_5, %c0_6] : memref<32x1xf32, #tpu.memory_space<vmem>>, vector<32x1xf32>
    %7 = vector.broadcast %6 : vector<32x1xf32> to vector<32x8xf32>
    %8 = arith.addf %5, %7 : vector<32x8xf32>
    %cst_7 = arith.constant 0.000000e+00 : f32
    %9 = vector.broadcast %cst_7 : f32 to vector<32x8xf32>
    %10 = arith.maximumf %8, %9 : vector<32x8xf32>
    %c0_8 = arith.constant 0 : index
    %c0_9 = arith.constant 0 : index
    %11 = vector.load %arg5[%c0_8, %c0_9] : memref<32x8xf32, #tpu.memory_space<vmem>>, vector<32x8xf32>
    tpu.vector_store %arg5[%c0_8, %c0_9], %10 {strides = array<i32>} : memref<32x8xf32, #tpu.memory_space<vmem>>, vector<32x8xf32>,
    return
  }
  func.func @transform_0(%arg0: i32) -> (i32, i32) {
    %c0_i32 = arith.constant 0 : i32
    %c0_i32_0 = arith.constant 0 : i32
    %c0_i32_1 = arith.constant 0 : i32
    return %c0_i32, %c0_i32_0 : i32, i32
  }
  func.func @transform_1(%arg0: i32) -> (i32, i32) {
    %c0_i32 = arith.constant 0 : i32
    %c0_i32_0 = arith.constant 0 : i32
    return %c0_i32, %arg0 : i32, i32
  }
  func.func @transform_2(%arg0: i32) -> (i32, i32) {
    %c0_i32 = arith.constant 0 : i32
    %c0_i32_0 = arith.constant 0 : i32
    %c0_i32_1 = arith.constant 0 : i32
    return %c0_i32, %c0_i32_0 : i32, i32
  }
  func.func @transform_3(%arg0: i32) -> (i32, i32) {
    %c0_i32 = arith.constant 0 : i32
    %c0_i32_0 = arith.constant 0 : i32
    %c0_i32_1 = arith.constant 0 : i32
    return %c0_i32, %c0_i32_0 : i32, i32
  }
  func.func @transform_4(%arg0: i32) -> (i32, i32) {
    %c0_i32 = arith.constant 0 : i32
    %c0_i32_0 = arith.constant 0 : i32
    return %c0_i32, %arg0 : i32, i32
  }
}

module attributes {stable_mosaic.version = 11 : i64} {
  func.func @_mm_bias_act_kernel(%arg0: i32, %arg1: memref<32x128xbf16, #tpu.memory_space<vmem>>, %arg2: memref<128x8xbf16, #tpu.memory_space<vmem>>, %arg3: memref<32x1xf32, #tpu.memory_space<vmem>>, %arg4: memref<32x1xf32, #tpu.memory_space<vmem>>, %arg5: memref<32x8xf32, #tpu.memory_space<vmem>>) attributes {dimension_semantics = [#tpu.dimension_semantics<parallel>], iteration_bounds = array<i64: 1>, scalar_prefetch = 0 : i64, scratch_operands = 0 : i64, tpu.core_type = #tpu.core_type<tc>, window_params = [{pipeline_mode = #tpu.pipeline_mode<synchronous>, transform_indices = @transform_0, window_bounds = array<i64: 32, 128>}, {transform_indices = @transform_1, window_bounds = array<i64: 128, 8>}, {pipeline_mode = #tpu.pipeline_mode<synchronous>, transform_indices = @transform_2, window_bounds = array<i64: 32, 1>}, {pipeline_mode = #tpu.pipeline_mode<synchronous>, transform_indices = @transform_3, window_bounds = array<i64: 32, 1>}, {transform_indices = @transform_4, window_bounds = array<i64: 32, 8>}]} {
    %c0 = arith.constant 0 : index
    %c0_0 = arith.constant 0 : index
    %0 = vector.load %arg1[%c0, %c0_0] : memref<32x128xbf16, #tpu.memory_space<vmem>>, vector<32x128xbf16>
    %c0_1 = arith.constant 0 : index
    %c0_2 = arith.constant 0 : index
    %1 = vector.load %arg2[%c0_1, %c0_2] : memref<128x8xbf16, #tpu.memory_space<vmem>>, vector<128x8xbf16>
    %cst = arith.constant dense<0.000000e+00> : vector<32x8xf32>
    %2 = tpu.matmul %0, %1, %cst {dimension_numbers = #tpu.dot_dimension_numbers<[1], [0], [0], [1], [0, 0, 1, 1], [], []>} : vector<32x128xbf16>, vector<128x8xbf16>, vector<32x8xf32> -> vector<32x8xf32>
    %c0_3 = arith.constant 0 : index
    %c0_4 = arith.constant 0 : index
    %3 = vector.load %arg3[%c0_3, %c0_4] : memref<32x1xf32, #tpu.memory_space<vmem>>, vector<32x1xf32>
    %4 = vector.broadcast %3 : vector<32x1xf32> to vector<32x8xf32>
    %5 = arith.mulf %2, %4 : vector<32x8xf32>
    %c0_5 = arith.constant 0 : index
    %c0_6 = arith.constant 0 : index
    %6 = vector.load %arg4[%c0_5, %c0_6] : memref<32x1xf32, #tpu.memory_space<vmem>>, vector<32x1xf32>
    %7 = vector.broadcast %6 : vector<32x1xf32> to vector<32x8xf32>
    %8 = arith.addf %5, %7 : vector<32x8xf32>
    %cst_7 = arith.constant 0.000000e+00 : f32
    %9 = vector.broadcast %cst_7 : f32 to vector<32x8xf32>
    %10 = arith.maximumf %8, %9 : vector<32x8xf32>
    %c0_8 = arith.constant 0 : index
    %c0_9 = arith.constant 0 : index
    %11 = vector.load %arg5[%c0_8, %c0_9] : memref<32x8xf32, #tpu.memory_space<vmem>>, vector<32x8xf32>
    tpu.vector_store %arg5[%c0_8, %c0_9], %10 {strides = array<i32>} : memref<32x8xf32, #tpu.memory_space<vmem>>, vector<32x8xf32>,
    return
  }
  func.func @transform_0(%arg0: i32) -> (i32, i32) {
    %c0_i32 = arith.constant 0 : i32
    %c0_i32_0 = arith.constant 0 : i32
    %c0_i32_1 = arith.constant 0 : i32
    return %c0_i32, %c0_i32_0 : i32, i32
  }
  func.func @transform_1(%arg0: i32) -> (i32, i32) {
    %c0_i32 = arith.constant 0 : i32
    %c0_i32_0 = arith.constant 0 : i32
    return %c0_i32, %arg0 : i32, i32
  }
  func.func @transform_2(%arg0: i32) -> (i32, i32) {
    %c0_i32 = arith.constant 0 : i32
    %c0_i32_0 = arith.constant 0 : i32
    %c0_i32_1 = arith.constant 0 : i32
    return %c0_i32, %c0_i32_0 : i32, i32
  }
  func.func @transform_3(%arg0: i32) -> (i32, i32) {
    %c0_i32 = arith.constant 0 : i32
    %c0_i32_0 = arith.constant 0 : i32
    %c0_i32_1 = arith.constant 0 : i32
    return %c0_i32, %c0_i32_0 : i32, i32
  }
  func.func @transform_4(%arg0: i32) -> (i32, i32) {
    %c0_i32 = arith.constant 0 : i32
    %c0_i32_0 = arith.constant 0 : i32
    return %c0_i32, %arg0 : i32, i32
  }
}

module attributes {stable_mosaic.version = 11 : i64} {
  func.func @_mm_bias_act_kernel(%arg0: i32, %arg1: memref<32x64xbf16, #tpu.memory_space<vmem>>, %arg2: memref<64x8xbf16, #tpu.memory_space<vmem>>, %arg3: memref<32x1xf32, #tpu.memory_space<vmem>>, %arg4: memref<32x1xf32, #tpu.memory_space<vmem>>, %arg5: memref<32x8xf32, #tpu.memory_space<vmem>>) attributes {dimension_semantics = [#tpu.dimension_semantics<parallel>], iteration_bounds = array<i64: 1>, scalar_prefetch = 0 : i64, scratch_operands = 0 : i64, tpu.core_type = #tpu.core_type<tc>, window_params = [{pipeline_mode = #tpu.pipeline_mode<synchronous>, transform_indices = @transform_0, window_bounds = array<i64: 32, 64>}, {transform_indices = @transform_1, window_bounds = array<i64: 64, 8>}, {pipeline_mode = #tpu.pipeline_mode<synchronous>, transform_indices = @transform_2, window_bounds = array<i64: 32, 1>}, {pipeline_mode = #tpu.pipeline_mode<synchronous>, transform_indices = @transform_3, window_bounds = array<i64: 32, 1>}, {transform_indices = @transform_4, window_bounds = array<i64: 32, 8>}]} {
    %c0 = arith.constant 0 : index
    %c0_0 = arith.constant 0 : index
    %0 = vector.load %arg1[%c0, %c0_0] : memref<32x64xbf16, #tpu.memory_space<vmem>>, vector<32x64xbf16>
    %c0_1 = arith.constant 0 : index
    %c0_2 = arith.constant 0 : index
    %1 = vector.load %arg2[%c0_1, %c0_2] : memref<64x8xbf16, #tpu.memory_space<vmem>>, vector<64x8xbf16>
    %cst = arith.constant dense<0.000000e+00> : vector<32x8xf32>
    %2 = tpu.matmul %0, %1, %cst {dimension_numbers = #tpu.dot_dimension_numbers<[1], [0], [0], [1], [0, 0, 1, 1], [], []>} : vector<32x64xbf16>, vector<64x8xbf16>, vector<32x8xf32> -> vector<32x8xf32>
    %c0_3 = arith.constant 0 : index
    %c0_4 = arith.constant 0 : index
    %3 = vector.load %arg3[%c0_3, %c0_4] : memref<32x1xf32, #tpu.memory_space<vmem>>, vector<32x1xf32>
    %4 = vector.broadcast %3 : vector<32x1xf32> to vector<32x8xf32>
    %5 = arith.mulf %2, %4 : vector<32x8xf32>
    %c0_5 = arith.constant 0 : index
    %c0_6 = arith.constant 0 : index
    %6 = vector.load %arg4[%c0_5, %c0_6] : memref<32x1xf32, #tpu.memory_space<vmem>>, vector<32x1xf32>
    %7 = vector.broadcast %6 : vector<32x1xf32> to vector<32x8xf32>
    %8 = arith.addf %5, %7 : vector<32x8xf32>
    %cst_7 = arith.constant 0.000000e+00 : f32
    %9 = vector.broadcast %cst_7 : f32 to vector<32x8xf32>
    %10 = arith.maximumf %8, %9 : vector<32x8xf32>
    %c0_8 = arith.constant 0 : index
    %c0_9 = arith.constant 0 : index
    %11 = vector.load %arg5[%c0_8, %c0_9] : memref<32x8xf32, #tpu.memory_space<vmem>>, vector<32x8xf32>
    tpu.vector_store %arg5[%c0_8, %c0_9], %10 {strides = array<i32>} : memref<32x8xf32, #tpu.memory_space<vmem>>, vector<32x8xf32>,
    return
  }
  func.func @transform_0(%arg0: i32) -> (i32, i32) {
    %c0_i32 = arith.constant 0 : i32
    %c0_i32_0 = arith.constant 0 : i32
    %c0_i32_1 = arith.constant 0 : i32
    return %c0_i32, %c0_i32_0 : i32, i32
  }
  func.func @transform_1(%arg0: i32) -> (i32, i32) {
    %c0_i32 = arith.constant 0 : i32
    %c0_i32_0 = arith.constant 0 : i32
    return %c0_i32, %arg0 : i32, i32
  }
  func.func @transform_2(%arg0: i32) -> (i32, i32) {
    %c0_i32 = arith.constant 0 : i32
    %c0_i32_0 = arith.constant 0 : i32
    %c0_i32_1 = arith.constant 0 : i32
    return %c0_i32, %c0_i32_0 : i32, i32
  }
  func.func @transform_3(%arg0: i32) -> (i32, i32) {
    %c0_i32 = arith.constant 0 : i32
    %c0_i32_0 = arith.constant 0 : i32
    %c0_i32_1 = arith.constant 0 : i32
    return %c0_i32, %c0_i32_0 : i32, i32
  }
  func.func @transform_4(%arg0: i32) -> (i32, i32) {
    %c0_i32 = arith.constant 0 : i32
    %c0_i32_0 = arith.constant 0 : i32
    return %c0_i32, %arg0 : i32, i32
  }
}

module attributes {stable_mosaic.version = 11 : i64} {
  func.func @_mm_bias_act_kernel(%arg0: i32, %arg1: memref<16x256xbf16, #tpu.memory_space<vmem>>, %arg2: memref<256x64xbf16, #tpu.memory_space<vmem>>, %arg3: memref<16x1xf32, #tpu.memory_space<vmem>>, %arg4: memref<16x1xf32, #tpu.memory_space<vmem>>, %arg5: memref<16x64xf32, #tpu.memory_space<vmem>>) attributes {dimension_semantics = [#tpu.dimension_semantics<parallel>], iteration_bounds = array<i64: 1>, scalar_prefetch = 0 : i64, scratch_operands = 0 : i64, tpu.core_type = #tpu.core_type<tc>, window_params = [{pipeline_mode = #tpu.pipeline_mode<synchronous>, transform_indices = @transform_0, window_bounds = array<i64: 16, 256>}, {transform_indices = @transform_1, window_bounds = array<i64: 256, 64>}, {pipeline_mode = #tpu.pipeline_mode<synchronous>, transform_indices = @transform_2, window_bounds = array<i64: 16, 1>}, {pipeline_mode = #tpu.pipeline_mode<synchronous>, transform_indices = @transform_3, window_bounds = array<i64: 16, 1>}, {transform_indices = @transform_4, window_bounds = array<i64: 16, 64>}]} {
    %c0 = arith.constant 0 : index
    %c0_0 = arith.constant 0 : index
    %0 = vector.load %arg1[%c0, %c0_0] : memref<16x256xbf16, #tpu.memory_space<vmem>>, vector<16x256xbf16>
    %c0_1 = arith.constant 0 : index
    %c0_2 = arith.constant 0 : index
    %1 = vector.load %arg2[%c0_1, %c0_2] : memref<256x64xbf16, #tpu.memory_space<vmem>>, vector<256x64xbf16>
    %cst = arith.constant dense<0.000000e+00> : vector<16x64xf32>
    %2 = tpu.matmul %0, %1, %cst {dimension_numbers = #tpu.dot_dimension_numbers<[1], [0], [0], [1], [0, 0, 1, 1], [], []>} : vector<16x256xbf16>, vector<256x64xbf16>, vector<16x64xf32> -> vector<16x64xf32>
    %c0_3 = arith.constant 0 : index
    %c0_4 = arith.constant 0 : index
    %3 = vector.load %arg3[%c0_3, %c0_4] : memref<16x1xf32, #tpu.memory_space<vmem>>, vector<16x1xf32>
    %4 = vector.broadcast %3 : vector<16x1xf32> to vector<16x64xf32>
    %5 = arith.mulf %2, %4 : vector<16x64xf32>
    %c0_5 = arith.constant 0 : index
    %c0_6 = arith.constant 0 : index
    %6 = vector.load %arg4[%c0_5, %c0_6] : memref<16x1xf32, #tpu.memory_space<vmem>>, vector<16x1xf32>
    %7 = vector.broadcast %6 : vector<16x1xf32> to vector<16x64xf32>
    %8 = arith.addf %5, %7 : vector<16x64xf32>
    %cst_7 = arith.constant 0.000000e+00 : f32
    %9 = vector.broadcast %cst_7 : f32 to vector<16x64xf32>
    %10 = arith.maximumf %8, %9 : vector<16x64xf32>
    %c0_8 = arith.constant 0 : index
    %c0_9 = arith.constant 0 : index
    %11 = vector.load %arg5[%c0_8, %c0_9] : memref<16x64xf32, #tpu.memory_space<vmem>>, vector<16x64xf32>
    tpu.vector_store %arg5[%c0_8, %c0_9], %10 {strides = array<i32>} : memref<16x64xf32, #tpu.memory_space<vmem>>, vector<16x64xf32>,
    return
  }
  func.func @transform_0(%arg0: i32) -> (i32, i32) {
    %c0_i32 = arith.constant 0 : i32
    %c0_i32_0 = arith.constant 0 : i32
    %c0_i32_1 = arith.constant 0 : i32
    return %c0_i32, %c0_i32_0 : i32, i32
  }
  func.func @transform_1(%arg0: i32) -> (i32, i32) {
    %c0_i32 = arith.constant 0 : i32
    %c0_i32_0 = arith.constant 0 : i32
    return %c0_i32, %arg0 : i32, i32
  }
  func.func @transform_2(%arg0: i32) -> (i32, i32) {
    %c0_i32 = arith.constant 0 : i32
    %c0_i32_0 = arith.constant 0 : i32
    %c0_i32_1 = arith.constant 0 : i32
    return %c0_i32, %c0_i32_0 : i32, i32
  }
  func.func @transform_3(%arg0: i32) -> (i32, i32) {
    %c0_i32 = arith.constant 0 : i32
    %c0_i32_0 = arith.constant 0 : i32
    %c0_i32_1 = arith.constant 0 : i32
    return %c0_i32, %c0_i32_0 : i32, i32
  }
  func.func @transform_4(%arg0: i32) -> (i32, i32) {
    %c0_i32 = arith.constant 0 : i32
    %c0_i32_0 = arith.constant 0 : i32
    return %c0_i32, %arg0 : i32, i32
  }
}

module attributes {stable_mosaic.version = 11 : i64} {
  func.func @_mm_bias_act_kernel(%arg0: i32, %arg1: memref<16x128xbf16, #tpu.memory_space<vmem>>, %arg2: memref<128x64xbf16, #tpu.memory_space<vmem>>, %arg3: memref<16x1xf32, #tpu.memory_space<vmem>>, %arg4: memref<16x1xf32, #tpu.memory_space<vmem>>, %arg5: memref<16x64xf32, #tpu.memory_space<vmem>>) attributes {dimension_semantics = [#tpu.dimension_semantics<parallel>], iteration_bounds = array<i64: 1>, scalar_prefetch = 0 : i64, scratch_operands = 0 : i64, tpu.core_type = #tpu.core_type<tc>, window_params = [{pipeline_mode = #tpu.pipeline_mode<synchronous>, transform_indices = @transform_0, window_bounds = array<i64: 16, 128>}, {transform_indices = @transform_1, window_bounds = array<i64: 128, 64>}, {pipeline_mode = #tpu.pipeline_mode<synchronous>, transform_indices = @transform_2, window_bounds = array<i64: 16, 1>}, {pipeline_mode = #tpu.pipeline_mode<synchronous>, transform_indices = @transform_3, window_bounds = array<i64: 16, 1>}, {transform_indices = @transform_4, window_bounds = array<i64: 16, 64>}]} {
    %c0 = arith.constant 0 : index
    %c0_0 = arith.constant 0 : index
    %0 = vector.load %arg1[%c0, %c0_0] : memref<16x128xbf16, #tpu.memory_space<vmem>>, vector<16x128xbf16>
    %c0_1 = arith.constant 0 : index
    %c0_2 = arith.constant 0 : index
    %1 = vector.load %arg2[%c0_1, %c0_2] : memref<128x64xbf16, #tpu.memory_space<vmem>>, vector<128x64xbf16>
    %cst = arith.constant dense<0.000000e+00> : vector<16x64xf32>
    %2 = tpu.matmul %0, %1, %cst {dimension_numbers = #tpu.dot_dimension_numbers<[1], [0], [0], [1], [0, 0, 1, 1], [], []>} : vector<16x128xbf16>, vector<128x64xbf16>, vector<16x64xf32> -> vector<16x64xf32>
    %c0_3 = arith.constant 0 : index
    %c0_4 = arith.constant 0 : index
    %3 = vector.load %arg3[%c0_3, %c0_4] : memref<16x1xf32, #tpu.memory_space<vmem>>, vector<16x1xf32>
    %4 = vector.broadcast %3 : vector<16x1xf32> to vector<16x64xf32>
    %5 = arith.mulf %2, %4 : vector<16x64xf32>
    %c0_5 = arith.constant 0 : index
    %c0_6 = arith.constant 0 : index
    %6 = vector.load %arg4[%c0_5, %c0_6] : memref<16x1xf32, #tpu.memory_space<vmem>>, vector<16x1xf32>
    %7 = vector.broadcast %6 : vector<16x1xf32> to vector<16x64xf32>
    %8 = arith.addf %5, %7 : vector<16x64xf32>
    %cst_7 = arith.constant 0.000000e+00 : f32
    %9 = vector.broadcast %cst_7 : f32 to vector<16x64xf32>
    %10 = arith.maximumf %8, %9 : vector<16x64xf32>
    %c0_8 = arith.constant 0 : index
    %c0_9 = arith.constant 0 : index
    %11 = vector.load %arg5[%c0_8, %c0_9] : memref<16x64xf32, #tpu.memory_space<vmem>>, vector<16x64xf32>
    tpu.vector_store %arg5[%c0_8, %c0_9], %10 {strides = array<i32>} : memref<16x64xf32, #tpu.memory_space<vmem>>, vector<16x64xf32>,
    return
  }
  func.func @transform_0(%arg0: i32) -> (i32, i32) {
    %c0_i32 = arith.constant 0 : i32
    %c0_i32_0 = arith.constant 0 : i32
    %c0_i32_1 = arith.constant 0 : i32
    return %c0_i32, %c0_i32_0 : i32, i32
  }
  func.func @transform_1(%arg0: i32) -> (i32, i32) {
    %c0_i32 = arith.constant 0 : i32
    %c0_i32_0 = arith.constant 0 : i32
    return %c0_i32, %arg0 : i32, i32
  }
  func.func @transform_2(%arg0: i32) -> (i32, i32) {
    %c0_i32 = arith.constant 0 : i32
    %c0_i32_0 = arith.constant 0 : i32
    %c0_i32_1 = arith.constant 0 : i32
    return %c0_i32, %c0_i32_0 : i32, i32
  }
  func.func @transform_3(%arg0: i32) -> (i32, i32) {
    %c0_i32 = arith.constant 0 : i32
    %c0_i32_0 = arith.constant 0 : i32
    %c0_i32_1 = arith.constant 0 : i32
    return %c0_i32, %c0_i32_0 : i32, i32
  }
  func.func @transform_4(%arg0: i32) -> (i32, i32) {
    %c0_i32 = arith.constant 0 : i32
    %c0_i32_0 = arith.constant 0 : i32
    return %c0_i32, %arg0 : i32, i32
  }
}

module attributes {stable_mosaic.version = 11 : i64} {
  func.func @_mm_bias_act_kernel(%arg0: i32, %arg1: memref<16x64xbf16, #tpu.memory_space<vmem>>, %arg2: memref<64x64xbf16, #tpu.memory_space<vmem>>, %arg3: memref<16x1xf32, #tpu.memory_space<vmem>>, %arg4: memref<16x1xf32, #tpu.memory_space<vmem>>, %arg5: memref<16x64xf32, #tpu.memory_space<vmem>>) attributes {dimension_semantics = [#tpu.dimension_semantics<parallel>], iteration_bounds = array<i64: 1>, scalar_prefetch = 0 : i64, scratch_operands = 0 : i64, tpu.core_type = #tpu.core_type<tc>, window_params = [{pipeline_mode = #tpu.pipeline_mode<synchronous>, transform_indices = @transform_0, window_bounds = array<i64: 16, 64>}, {transform_indices = @transform_1, window_bounds = array<i64: 64, 64>}, {pipeline_mode = #tpu.pipeline_mode<synchronous>, transform_indices = @transform_2, window_bounds = array<i64: 16, 1>}, {pipeline_mode = #tpu.pipeline_mode<synchronous>, transform_indices = @transform_3, window_bounds = array<i64: 16, 1>}, {transform_indices = @transform_4, window_bounds = array<i64: 16, 64>}]} {
    %c0 = arith.constant 0 : index
    %c0_0 = arith.constant 0 : index
    %0 = vector.load %arg1[%c0, %c0_0] : memref<16x64xbf16, #tpu.memory_space<vmem>>, vector<16x64xbf16>
    %c0_1 = arith.constant 0 : index
    %c0_2 = arith.constant 0 : index
    %1 = vector.load %arg2[%c0_1, %c0_2] : memref<64x64xbf16, #tpu.memory_space<vmem>>, vector<64x64xbf16>
    %cst = arith.constant dense<0.000000e+00> : vector<16x64xf32>
    %2 = tpu.matmul %0, %1, %cst {dimension_numbers = #tpu.dot_dimension_numbers<[1], [0], [0], [1], [0, 0, 1, 1], [], []>} : vector<16x64xbf16>, vector<64x64xbf16>, vector<16x64xf32> -> vector<16x64xf32>
    %c0_3 = arith.constant 0 : index
    %c0_4 = arith.constant 0 : index
    %3 = vector.load %arg3[%c0_3, %c0_4] : memref<16x1xf32, #tpu.memory_space<vmem>>, vector<16x1xf32>
    %4 = vector.broadcast %3 : vector<16x1xf32> to vector<16x64xf32>
    %5 = arith.mulf %2, %4 : vector<16x64xf32>
    %c0_5 = arith.constant 0 : index
    %c0_6 = arith.constant 0 : index
    %6 = vector.load %arg4[%c0_5, %c0_6] : memref<16x1xf32, #tpu.memory_space<vmem>>, vector<16x1xf32>
    %7 = vector.broadcast %6 : vector<16x1xf32> to vector<16x64xf32>
    %8 = arith.addf %5, %7 : vector<16x64xf32>
    %cst_7 = arith.constant 0.000000e+00 : f32
    %9 = vector.broadcast %cst_7 : f32 to vector<16x64xf32>
    %10 = arith.maximumf %8, %9 : vector<16x64xf32>
    %c0_8 = arith.constant 0 : index
    %c0_9 = arith.constant 0 : index
    %11 = vector.load %arg5[%c0_8, %c0_9] : memref<16x64xf32, #tpu.memory_space<vmem>>, vector<16x64xf32>
    tpu.vector_store %arg5[%c0_8, %c0_9], %10 {strides = array<i32>} : memref<16x64xf32, #tpu.memory_space<vmem>>, vector<16x64xf32>,
    return
  }
  func.func @transform_0(%arg0: i32) -> (i32, i32) {
    %c0_i32 = arith.constant 0 : i32
    %c0_i32_0 = arith.constant 0 : i32
    %c0_i32_1 = arith.constant 0 : i32
    return %c0_i32, %c0_i32_0 : i32, i32
  }
  func.func @transform_1(%arg0: i32) -> (i32, i32) {
    %c0_i32 = arith.constant 0 : i32
    %c0_i32_0 = arith.constant 0 : i32
    return %c0_i32, %arg0 : i32, i32
  }
  func.func @transform_2(%arg0: i32) -> (i32, i32) {
    %c0_i32 = arith.constant 0 : i32
    %c0_i32_0 = arith.constant 0 : i32
    %c0_i32_1 = arith.constant 0 : i32
    return %c0_i32, %c0_i32_0 : i32, i32
  }
  func.func @transform_3(%arg0: i32) -> (i32, i32) {
    %c0_i32 = arith.constant 0 : i32
    %c0_i32_0 = arith.constant 0 : i32
    %c0_i32_1 = arith.constant 0 : i32
    return %c0_i32, %c0_i32_0 : i32, i32
  }
  func.func @transform_4(%arg0: i32) -> (i32, i32) {
    %c0_i32 = arith.constant 0 : i32
    %c0_i32_0 = arith.constant 0 : i32
    return %c0_i32, %arg0 : i32, i32
  }
}

module attributes {stable_mosaic.version = 11 : i64} {
  func.func @_mm_bias_act_kernel(%arg0: i32, %arg1: memref<16x32xbf16, #tpu.memory_space<vmem>>, %arg2: memref<32x64xbf16, #tpu.memory_space<vmem>>, %arg3: memref<16x1xf32, #tpu.memory_space<vmem>>, %arg4: memref<16x1xf32, #tpu.memory_space<vmem>>, %arg5: memref<16x64xf32, #tpu.memory_space<vmem>>) attributes {dimension_semantics = [#tpu.dimension_semantics<parallel>], iteration_bounds = array<i64: 1>, scalar_prefetch = 0 : i64, scratch_operands = 0 : i64, tpu.core_type = #tpu.core_type<tc>, window_params = [{pipeline_mode = #tpu.pipeline_mode<synchronous>, transform_indices = @transform_0, window_bounds = array<i64: 16, 32>}, {transform_indices = @transform_1, window_bounds = array<i64: 32, 64>}, {pipeline_mode = #tpu.pipeline_mode<synchronous>, transform_indices = @transform_2, window_bounds = array<i64: 16, 1>}, {pipeline_mode = #tpu.pipeline_mode<synchronous>, transform_indices = @transform_3, window_bounds = array<i64: 16, 1>}, {transform_indices = @transform_4, window_bounds = array<i64: 16, 64>}]} {
    %c0 = arith.constant 0 : index
    %c0_0 = arith.constant 0 : index
    %0 = vector.load %arg1[%c0, %c0_0] : memref<16x32xbf16, #tpu.memory_space<vmem>>, vector<16x32xbf16>
    %c0_1 = arith.constant 0 : index
    %c0_2 = arith.constant 0 : index
    %1 = vector.load %arg2[%c0_1, %c0_2] : memref<32x64xbf16, #tpu.memory_space<vmem>>, vector<32x64xbf16>
    %cst = arith.constant dense<0.000000e+00> : vector<16x64xf32>
    %2 = tpu.matmul %0, %1, %cst {dimension_numbers = #tpu.dot_dimension_numbers<[1], [0], [0], [1], [0, 0, 1, 1], [], []>} : vector<16x32xbf16>, vector<32x64xbf16>, vector<16x64xf32> -> vector<16x64xf32>
    %c0_3 = arith.constant 0 : index
    %c0_4 = arith.constant 0 : index
    %3 = vector.load %arg3[%c0_3, %c0_4] : memref<16x1xf32, #tpu.memory_space<vmem>>, vector<16x1xf32>
    %4 = vector.broadcast %3 : vector<16x1xf32> to vector<16x64xf32>
    %5 = arith.mulf %2, %4 : vector<16x64xf32>
    %c0_5 = arith.constant 0 : index
    %c0_6 = arith.constant 0 : index
    %6 = vector.load %arg4[%c0_5, %c0_6] : memref<16x1xf32, #tpu.memory_space<vmem>>, vector<16x1xf32>
    %7 = vector.broadcast %6 : vector<16x1xf32> to vector<16x64xf32>
    %8 = arith.addf %5, %7 : vector<16x64xf32>
    %cst_7 = arith.constant 0.000000e+00 : f32
    %9 = vector.broadcast %cst_7 : f32 to vector<16x64xf32>
    %10 = arith.maximumf %8, %9 : vector<16x64xf32>
    %c0_8 = arith.constant 0 : index
    %c0_9 = arith.constant 0 : index
    %11 = vector.load %arg5[%c0_8, %c0_9] : memref<16x64xf32, #tpu.memory_space<vmem>>, vector<16x64xf32>
    tpu.vector_store %arg5[%c0_8, %c0_9], %10 {strides = array<i32>} : memref<16x64xf32, #tpu.memory_space<vmem>>, vector<16x64xf32>,
    return
  }
  func.func @transform_0(%arg0: i32) -> (i32, i32) {
    %c0_i32 = arith.constant 0 : i32
    %c0_i32_0 = arith.constant 0 : i32
    %c0_i32_1 = arith.constant 0 : i32
    return %c0_i32, %c0_i32_0 : i32, i32
  }
  func.func @transform_1(%arg0: i32) -> (i32, i32) {
    %c0_i32 = arith.constant 0 : i32
    %c0_i32_0 = arith.constant 0 : i32
    return %c0_i32, %arg0 : i32, i32
  }
  func.func @transform_2(%arg0: i32) -> (i32, i32) {
    %c0_i32 = arith.constant 0 : i32
    %c0_i32_0 = arith.constant 0 : i32
    %c0_i32_1 = arith.constant 0 : i32
    return %c0_i32, %c0_i32_0 : i32, i32
  }
  func.func @transform_3(%arg0: i32) -> (i32, i32) {
    %c0_i32 = arith.constant 0 : i32
    %c0_i32_0 = arith.constant 0 : i32
    %c0_i32_1 = arith.constant 0 : i32
    return %c0_i32, %c0_i32_0 : i32, i32
  }
  func.func @transform_4(%arg0: i32) -> (i32, i32) {
    %c0_i32 = arith.constant 0 : i32
    %c0_i32_0 = arith.constant 0 : i32
    return %c0_i32, %arg0 : i32, i32
  }
}

module attributes {stable_mosaic.version = 11 : i64} {
  func.func @_mm_bias_act_kernel(%arg0: i32, %arg1: memref<8x128xbf16, #tpu.memory_space<vmem>>, %arg2: memref<128x512xbf16, #tpu.memory_space<vmem>>, %arg3: memref<8x1xf32, #tpu.memory_space<vmem>>, %arg4: memref<8x1xf32, #tpu.memory_space<vmem>>, %arg5: memref<8x512xf32, #tpu.memory_space<vmem>>) attributes {dimension_semantics = [#tpu.dimension_semantics<parallel>], iteration_bounds = array<i64: 1>, scalar_prefetch = 0 : i64, scratch_operands = 0 : i64, tpu.core_type = #tpu.core_type<tc>, window_params = [{pipeline_mode = #tpu.pipeline_mode<synchronous>, transform_indices = @transform_0, window_bounds = array<i64: 8, 128>}, {transform_indices = @transform_1, window_bounds = array<i64: 128, 512>}, {pipeline_mode = #tpu.pipeline_mode<synchronous>, transform_indices = @transform_2, window_bounds = array<i64: 8, 1>}, {pipeline_mode = #tpu.pipeline_mode<synchronous>, transform_indices = @transform_3, window_bounds = array<i64: 8, 1>}, {transform_indices = @transform_4, window_bounds = array<i64: 8, 512>}]} {
    %c0 = arith.constant 0 : index
    %c0_0 = arith.constant 0 : index
    %0 = vector.load %arg1[%c0, %c0_0] : memref<8x128xbf16, #tpu.memory_space<vmem>>, vector<8x128xbf16>
    %c0_1 = arith.constant 0 : index
    %c0_2 = arith.constant 0 : index
    %1 = vector.load %arg2[%c0_1, %c0_2] : memref<128x512xbf16, #tpu.memory_space<vmem>>, vector<128x512xbf16>
    %cst = arith.constant dense<0.000000e+00> : vector<8x512xf32>
    %2 = tpu.matmul %0, %1, %cst {dimension_numbers = #tpu.dot_dimension_numbers<[1], [0], [0], [1], [0, 0, 1, 1], [], []>} : vector<8x128xbf16>, vector<128x512xbf16>, vector<8x512xf32> -> vector<8x512xf32>
    %c0_3 = arith.constant 0 : index
    %c0_4 = arith.constant 0 : index
    %3 = vector.load %arg3[%c0_3, %c0_4] : memref<8x1xf32, #tpu.memory_space<vmem>>, vector<8x1xf32>
    %4 = vector.broadcast %3 : vector<8x1xf32> to vector<8x512xf32>
    %5 = arith.mulf %2, %4 : vector<8x512xf32>
    %c0_5 = arith.constant 0 : index
    %c0_6 = arith.constant 0 : index
    %6 = vector.load %arg4[%c0_5, %c0_6] : memref<8x1xf32, #tpu.memory_space<vmem>>, vector<8x1xf32>
    %7 = vector.broadcast %6 : vector<8x1xf32> to vector<8x512xf32>
    %8 = arith.addf %5, %7 : vector<8x512xf32>
    %cst_7 = arith.constant 0.000000e+00 : f32
    %9 = vector.broadcast %cst_7 : f32 to vector<8x512xf32>
    %10 = arith.maximumf %8, %9 : vector<8x512xf32>
    %c0_8 = arith.constant 0 : index
    %c0_9 = arith.constant 0 : index
    %11 = vector.load %arg5[%c0_8, %c0_9] : memref<8x512xf32, #tpu.memory_space<vmem>>, vector<8x512xf32>
    tpu.vector_store %arg5[%c0_8, %c0_9], %10 {strides = array<i32>} : memref<8x512xf32, #tpu.memory_space<vmem>>, vector<8x512xf32>,
    return
  }
  func.func @transform_0(%arg0: i32) -> (i32, i32) {
    %c0_i32 = arith.constant 0 : i32
    %c0_i32_0 = arith.constant 0 : i32
    %c0_i32_1 = arith.constant 0 : i32
    return %c0_i32, %c0_i32_0 : i32, i32
  }
  func.func @transform_1(%arg0: i32) -> (i32, i32) {
    %c0_i32 = arith.constant 0 : i32
    %c0_i32_0 = arith.constant 0 : i32
    return %c0_i32, %arg0 : i32, i32
  }
  func.func @transform_2(%arg0: i32) -> (i32, i32) {
    %c0_i32 = arith.constant 0 : i32
    %c0_i32_0 = arith.constant 0 : i32
    %c0_i32_1 = arith.constant 0 : i32
    return %c0_i32, %c0_i32_0 : i32, i32
  }
  func.func @transform_3(%arg0: i32) -> (i32, i32) {
    %c0_i32 = arith.constant 0 : i32
    %c0_i32_0 = arith.constant 0 : i32
    %c0_i32_1 = arith.constant 0 : i32
    return %c0_i32, %c0_i32_0 : i32, i32
  }
  func.func @transform_4(%arg0: i32) -> (i32, i32) {
    %c0_i32 = arith.constant 0 : i32
    %c0_i32_0 = arith.constant 0 : i32
    return %c0_i32, %arg0 : i32, i32
  }
}

module attributes {stable_mosaic.version = 11 : i64} {
  func.func @_mm_bias_act_kernel(%arg0: i32, %arg1: memref<8x64xbf16, #tpu.memory_space<vmem>>, %arg2: memref<64x512xbf16, #tpu.memory_space<vmem>>, %arg3: memref<8x1xf32, #tpu.memory_space<vmem>>, %arg4: memref<8x1xf32, #tpu.memory_space<vmem>>, %arg5: memref<8x512xf32, #tpu.memory_space<vmem>>) attributes {dimension_semantics = [#tpu.dimension_semantics<parallel>], iteration_bounds = array<i64: 1>, scalar_prefetch = 0 : i64, scratch_operands = 0 : i64, tpu.core_type = #tpu.core_type<tc>, window_params = [{pipeline_mode = #tpu.pipeline_mode<synchronous>, transform_indices = @transform_0, window_bounds = array<i64: 8, 64>}, {transform_indices = @transform_1, window_bounds = array<i64: 64, 512>}, {pipeline_mode = #tpu.pipeline_mode<synchronous>, transform_indices = @transform_2, window_bounds = array<i64: 8, 1>}, {pipeline_mode = #tpu.pipeline_mode<synchronous>, transform_indices = @transform_3, window_bounds = array<i64: 8, 1>}, {transform_indices = @transform_4, window_bounds = array<i64: 8, 512>}]} {
    %c0 = arith.constant 0 : index
    %c0_0 = arith.constant 0 : index
    %0 = vector.load %arg1[%c0, %c0_0] : memref<8x64xbf16, #tpu.memory_space<vmem>>, vector<8x64xbf16>
    %c0_1 = arith.constant 0 : index
    %c0_2 = arith.constant 0 : index
    %1 = vector.load %arg2[%c0_1, %c0_2] : memref<64x512xbf16, #tpu.memory_space<vmem>>, vector<64x512xbf16>
    %cst = arith.constant dense<0.000000e+00> : vector<8x512xf32>
    %2 = tpu.matmul %0, %1, %cst {dimension_numbers = #tpu.dot_dimension_numbers<[1], [0], [0], [1], [0, 0, 1, 1], [], []>} : vector<8x64xbf16>, vector<64x512xbf16>, vector<8x512xf32> -> vector<8x512xf32>
    %c0_3 = arith.constant 0 : index
    %c0_4 = arith.constant 0 : index
    %3 = vector.load %arg3[%c0_3, %c0_4] : memref<8x1xf32, #tpu.memory_space<vmem>>, vector<8x1xf32>
    %4 = vector.broadcast %3 : vector<8x1xf32> to vector<8x512xf32>
    %5 = arith.mulf %2, %4 : vector<8x512xf32>
    %c0_5 = arith.constant 0 : index
    %c0_6 = arith.constant 0 : index
    %6 = vector.load %arg4[%c0_5, %c0_6] : memref<8x1xf32, #tpu.memory_space<vmem>>, vector<8x1xf32>
    %7 = vector.broadcast %6 : vector<8x1xf32> to vector<8x512xf32>
    %8 = arith.addf %5, %7 : vector<8x512xf32>
    %cst_7 = arith.constant 0.000000e+00 : f32
    %9 = vector.broadcast %cst_7 : f32 to vector<8x512xf32>
    %10 = arith.maximumf %8, %9 : vector<8x512xf32>
    %c0_8 = arith.constant 0 : index
    %c0_9 = arith.constant 0 : index
    %11 = vector.load %arg5[%c0_8, %c0_9] : memref<8x512xf32, #tpu.memory_space<vmem>>, vector<8x512xf32>
    tpu.vector_store %arg5[%c0_8, %c0_9], %10 {strides = array<i32>} : memref<8x512xf32, #tpu.memory_space<vmem>>, vector<8x512xf32>,
    return
  }
  func.func @transform_0(%arg0: i32) -> (i32, i32) {
    %c0_i32 = arith.constant 0 : i32
    %c0_i32_0 = arith.constant 0 : i32
    %c0_i32_1 = arith.constant 0 : i32
    return %c0_i32, %c0_i32_0 : i32, i32
  }
  func.func @transform_1(%arg0: i32) -> (i32, i32) {
    %c0_i32 = arith.constant 0 : i32
    %c0_i32_0 = arith.constant 0 : i32
    return %c0_i32, %arg0 : i32, i32
  }
  func.func @transform_2(%arg0: i32) -> (i32, i32) {
    %c0_i32 = arith.constant 0 : i32
    %c0_i32_0 = arith.constant 0 : i32
    %c0_i32_1 = arith.constant 0 : i32
    return %c0_i32, %c0_i32_0 : i32, i32
  }
  func.func @transform_3(%arg0: i32) -> (i32, i32) {
    %c0_i32 = arith.constant 0 : i32
    %c0_i32_0 = arith.constant 0 : i32
    %c0_i32_1 = arith.constant 0 : i32
    return %c0_i32, %c0_i32_0 : i32, i32
  }
  func.func @transform_4(%arg0: i32) -> (i32, i32) {
    %c0_i32 = arith.constant 0 : i32
    %c0_i32_0 = arith.constant 0 : i32
    return %c0_i32, %arg0 : i32, i32
  }
}

module attributes {stable_mosaic.version = 11 : i64} {
  func.func @_mm_bias_act_kernel(%arg0: i32, %arg1: memref<8x32xbf16, #tpu.memory_space<vmem>>, %arg2: memref<32x512xbf16, #tpu.memory_space<vmem>>, %arg3: memref<8x1xf32, #tpu.memory_space<vmem>>, %arg4: memref<8x1xf32, #tpu.memory_space<vmem>>, %arg5: memref<8x512xf32, #tpu.memory_space<vmem>>) attributes {dimension_semantics = [#tpu.dimension_semantics<parallel>], iteration_bounds = array<i64: 1>, scalar_prefetch = 0 : i64, scratch_operands = 0 : i64, tpu.core_type = #tpu.core_type<tc>, window_params = [{pipeline_mode = #tpu.pipeline_mode<synchronous>, transform_indices = @transform_0, window_bounds = array<i64: 8, 32>}, {transform_indices = @transform_1, window_bounds = array<i64: 32, 512>}, {pipeline_mode = #tpu.pipeline_mode<synchronous>, transform_indices = @transform_2, window_bounds = array<i64: 8, 1>}, {pipeline_mode = #tpu.pipeline_mode<synchronous>, transform_indices = @transform_3, window_bounds = array<i64: 8, 1>}, {transform_indices = @transform_4, window_bounds = array<i64: 8, 512>}]} {
    %c0 = arith.constant 0 : index
    %c0_0 = arith.constant 0 : index
    %0 = vector.load %arg1[%c0, %c0_0] : memref<8x32xbf16, #tpu.memory_space<vmem>>, vector<8x32xbf16>
    %c0_1 = arith.constant 0 : index
    %c0_2 = arith.constant 0 : index
    %1 = vector.load %arg2[%c0_1, %c0_2] : memref<32x512xbf16, #tpu.memory_space<vmem>>, vector<32x512xbf16>
    %cst = arith.constant dense<0.000000e+00> : vector<8x512xf32>
    %2 = tpu.matmul %0, %1, %cst {dimension_numbers = #tpu.dot_dimension_numbers<[1], [0], [0], [1], [0, 0, 1, 1], [], []>} : vector<8x32xbf16>, vector<32x512xbf16>, vector<8x512xf32> -> vector<8x512xf32>
    %c0_3 = arith.constant 0 : index
    %c0_4 = arith.constant 0 : index
    %3 = vector.load %arg3[%c0_3, %c0_4] : memref<8x1xf32, #tpu.memory_space<vmem>>, vector<8x1xf32>
    %4 = vector.broadcast %3 : vector<8x1xf32> to vector<8x512xf32>
    %5 = arith.mulf %2, %4 : vector<8x512xf32>
    %c0_5 = arith.constant 0 : index
    %c0_6 = arith.constant 0 : index
    %6 = vector.load %arg4[%c0_5, %c0_6] : memref<8x1xf32, #tpu.memory_space<vmem>>, vector<8x1xf32>
    %7 = vector.broadcast %6 : vector<8x1xf32> to vector<8x512xf32>
    %8 = arith.addf %5, %7 : vector<8x512xf32>
    %cst_7 = arith.constant 0.000000e+00 : f32
    %9 = vector.broadcast %cst_7 : f32 to vector<8x512xf32>
    %10 = arith.maximumf %8, %9 : vector<8x512xf32>
    %c0_8 = arith.constant 0 : index
    %c0_9 = arith.constant 0 : index
    %11 = vector.load %arg5[%c0_8, %c0_9] : memref<8x512xf32, #tpu.memory_space<vmem>>, vector<8x512xf32>
    tpu.vector_store %arg5[%c0_8, %c0_9], %10 {strides = array<i32>} : memref<8x512xf32, #tpu.memory_space<vmem>>, vector<8x512xf32>,
    return
  }
  func.func @transform_0(%arg0: i32) -> (i32, i32) {
    %c0_i32 = arith.constant 0 : i32
    %c0_i32_0 = arith.constant 0 : i32
    %c0_i32_1 = arith.constant 0 : i32
    return %c0_i32, %c0_i32_0 : i32, i32
  }
  func.func @transform_1(%arg0: i32) -> (i32, i32) {
    %c0_i32 = arith.constant 0 : i32
    %c0_i32_0 = arith.constant 0 : i32
    return %c0_i32, %arg0 : i32, i32
  }
  func.func @transform_2(%arg0: i32) -> (i32, i32) {
    %c0_i32 = arith.constant 0 : i32
    %c0_i32_0 = arith.constant 0 : i32
    %c0_i32_1 = arith.constant 0 : i32
    return %c0_i32, %c0_i32_0 : i32, i32
  }
  func.func @transform_3(%arg0: i32) -> (i32, i32) {
    %c0_i32 = arith.constant 0 : i32
    %c0_i32_0 = arith.constant 0 : i32
    %c0_i32_1 = arith.constant 0 : i32
    return %c0_i32, %c0_i32_0 : i32, i32
  }
  func.func @transform_4(%arg0: i32) -> (i32, i32) {
    %c0_i32 = arith.constant 0 : i32
    %c0_i32_0 = arith.constant 0 : i32
    return %c0_i32, %arg0 : i32, i32
  }
}

module attributes {stable_mosaic.version = 11 : i64} {
  func.func @_mm_bias_act_kernel(%arg0: i32, %arg1: memref<8x16xbf16, #tpu.memory_space<vmem>>, %arg2: memref<16x512xbf16, #tpu.memory_space<vmem>>, %arg3: memref<8x1xf32, #tpu.memory_space<vmem>>, %arg4: memref<8x1xf32, #tpu.memory_space<vmem>>, %arg5: memref<8x512xf32, #tpu.memory_space<vmem>>) attributes {dimension_semantics = [#tpu.dimension_semantics<parallel>], iteration_bounds = array<i64: 1>, scalar_prefetch = 0 : i64, scratch_operands = 0 : i64, tpu.core_type = #tpu.core_type<tc>, window_params = [{pipeline_mode = #tpu.pipeline_mode<synchronous>, transform_indices = @transform_0, window_bounds = array<i64: 8, 16>}, {transform_indices = @transform_1, window_bounds = array<i64: 16, 512>}, {pipeline_mode = #tpu.pipeline_mode<synchronous>, transform_indices = @transform_2, window_bounds = array<i64: 8, 1>}, {pipeline_mode = #tpu.pipeline_mode<synchronous>, transform_indices = @transform_3, window_bounds = array<i64: 8, 1>}, {transform_indices = @transform_4, window_bounds = array<i64: 8, 512>}]} {
    %c0 = arith.constant 0 : index
    %c0_0 = arith.constant 0 : index
    %0 = vector.load %arg1[%c0, %c0_0] : memref<8x16xbf16, #tpu.memory_space<vmem>>, vector<8x16xbf16>
    %c0_1 = arith.constant 0 : index
    %c0_2 = arith.constant 0 : index
    %1 = vector.load %arg2[%c0_1, %c0_2] : memref<16x512xbf16, #tpu.memory_space<vmem>>, vector<16x512xbf16>
    %cst = arith.constant dense<0.000000e+00> : vector<8x512xf32>
    %2 = tpu.matmul %0, %1, %cst {dimension_numbers = #tpu.dot_dimension_numbers<[1], [0], [0], [1], [0, 0, 1, 1], [], []>} : vector<8x16xbf16>, vector<16x512xbf16>, vector<8x512xf32> -> vector<8x512xf32>
    %c0_3 = arith.constant 0 : index
    %c0_4 = arith.constant 0 : index
    %3 = vector.load %arg3[%c0_3, %c0_4] : memref<8x1xf32, #tpu.memory_space<vmem>>, vector<8x1xf32>
    %4 = vector.broadcast %3 : vector<8x1xf32> to vector<8x512xf32>
    %5 = arith.mulf %2, %4 : vector<8x512xf32>
    %c0_5 = arith.constant 0 : index
    %c0_6 = arith.constant 0 : index
    %6 = vector.load %arg4[%c0_5, %c0_6] : memref<8x1xf32, #tpu.memory_space<vmem>>, vector<8x1xf32>
    %7 = vector.broadcast %6 : vector<8x1xf32> to vector<8x512xf32>
    %8 = arith.addf %5, %7 : vector<8x512xf32>
    %cst_7 = arith.constant 0.000000e+00 : f32
    %9 = vector.broadcast %cst_7 : f32 to vector<8x512xf32>
    %10 = arith.maximumf %8, %9 : vector<8x512xf32>
    %c0_8 = arith.constant 0 : index
    %c0_9 = arith.constant 0 : index
    %11 = vector.load %arg5[%c0_8, %c0_9] : memref<8x512xf32, #tpu.memory_space<vmem>>, vector<8x512xf32>
    tpu.vector_store %arg5[%c0_8, %c0_9], %10 {strides = array<i32>} : memref<8x512xf32, #tpu.memory_space<vmem>>, vector<8x512xf32>,
    return
  }
  func.func @transform_0(%arg0: i32) -> (i32, i32) {
    %c0_i32 = arith.constant 0 : i32
    %c0_i32_0 = arith.constant 0 : i32
    %c0_i32_1 = arith.constant 0 : i32
    return %c0_i32, %c0_i32_0 : i32, i32
  }
  func.func @transform_1(%arg0: i32) -> (i32, i32) {
    %c0_i32 = arith.constant 0 : i32
    %c0_i32_0 = arith.constant 0 : i32
    return %c0_i32, %arg0 : i32, i32
  }
  func.func @transform_2(%arg0: i32) -> (i32, i32) {
    %c0_i32 = arith.constant 0 : i32
    %c0_i32_0 = arith.constant 0 : i32
    %c0_i32_1 = arith.constant 0 : i32
    return %c0_i32, %c0_i32_0 : i32, i32
  }
  func.func @transform_3(%arg0: i32) -> (i32, i32) {
    %c0_i32 = arith.constant 0 : i32
    %c0_i32_0 = arith.constant 0 : i32
    %c0_i32_1 = arith.constant 0 : i32
    return %c0_i32, %c0_i32_0 : i32, i32
  }
  func.func @transform_4(%arg0: i32) -> (i32, i32) {
    %c0_i32 = arith.constant 0 : i32
    %c0_i32_0 = arith.constant 0 : i32
    return %c0_i32, %arg0 : i32, i32
  }
}

module attributes {stable_mosaic.version = 11 : i64} {
  func.func @_mm_bias_act_kernel(%arg0: i32, %arg1: memref<1x216xbf16, #tpu.memory_space<vmem>>, %arg2: memref<216x1024xbf16, #tpu.memory_space<vmem>>, %arg3: memref<1x1xf32, #tpu.memory_space<vmem>>, %arg4: memref<1x1xf32, #tpu.memory_space<vmem>>, %arg5: memref<1x1024xf32, #tpu.memory_space<vmem>>) attributes {dimension_semantics = [#tpu.dimension_semantics<parallel>], iteration_bounds = array<i64: 4>, scalar_prefetch = 0 : i64, scratch_operands = 0 : i64, tpu.core_type = #tpu.core_type<tc>, window_params = [{pipeline_mode = #tpu.pipeline_mode<synchronous>, transform_indices = @transform_0, window_bounds = array<i64: 1, 216>}, {transform_indices = @transform_1, window_bounds = array<i64: 216, 1024>}, {pipeline_mode = #tpu.pipeline_mode<synchronous>, transform_indices = @transform_2, window_bounds = array<i64: 1, 1>}, {pipeline_mode = #tpu.pipeline_mode<synchronous>, transform_indices = @transform_3, window_bounds = array<i64: 1, 1>}, {transform_indices = @transform_4, window_bounds = array<i64: 1, 1024>}]} {
    %c0 = arith.constant 0 : index
    %c0_0 = arith.constant 0 : index
    %0 = vector.load %arg1[%c0, %c0_0] : memref<1x216xbf16, #tpu.memory_space<vmem>>, vector<1x216xbf16>
    %c0_1 = arith.constant 0 : index
    %c0_2 = arith.constant 0 : index
    %1 = vector.load %arg2[%c0_1, %c0_2] : memref<216x1024xbf16, #tpu.memory_space<vmem>>, vector<216x1024xbf16>
    %cst = arith.constant dense<0.000000e+00> : vector<1x1024xf32>
    %2 = tpu.matmul %0, %1, %cst {dimension_numbers = #tpu.dot_dimension_numbers<[1], [0], [0], [1], [0, 0, 1, 1], [], []>} : vector<1x216xbf16>, vector<216x1024xbf16>, vector<1x1024xf32> -> vector<1x1024xf32>
    %c0_3 = arith.constant 0 : index
    %c0_4 = arith.constant 0 : index
    %3 = vector.load %arg3[%c0_3, %c0_4] : memref<1x1xf32, #tpu.memory_space<vmem>>, vector<1x1xf32>
    %4 = vector.broadcast %3 : vector<1x1xf32> to vector<1x1024xf32>
    %5 = arith.mulf %2, %4 : vector<1x1024xf32>
    %c0_5 = arith.constant 0 : index
    %c0_6 = arith.constant 0 : index
    %6 = vector.load %arg4[%c0_5, %c0_6] : memref<1x1xf32, #tpu.memory_space<vmem>>, vector<1x1xf32>
    %7 = vector.broadcast %6 : vector<1x1xf32> to vector<1x1024xf32>
    %8 = arith.addf %5, %7 : vector<1x1024xf32>
    %c0_7 = arith.constant 0 : index
    %c0_8 = arith.constant 0 : index
    %9 = vector.load %arg5[%c0_7, %c0_8] : memref<1x1024xf32, #tpu.memory_space<vmem>>, vector<1x1024xf32>
    tpu.vector_store %arg5[%c0_7, %c0_8], %8 {strides = array<i32>} : memref<1x1024xf32, #tpu.memory_space<vmem>>, vector<1x1024xf32>,
    return
  }
  func.func @transform_0(%arg0: i32) -> (i32, i32) {
    %c0_i32 = arith.constant 0 : i32
    %c0_i32_0 = arith.constant 0 : i32
    %c0_i32_1 = arith.constant 0 : i32
    return %c0_i32, %c0_i32_0 : i32, i32
  }
  func.func @transform_1(%arg0: i32) -> (i32, i32) {
    %c0_i32 = arith.constant 0 : i32
    %c0_i32_0 = arith.constant 0 : i32
    return %c0_i32, %arg0 : i32, i32
  }
  func.func @transform_2(%arg0: i32) -> (i32, i32) {
    %c0_i32 = arith.constant 0 : i32
    %c0_i32_0 = arith.constant 0 : i32
    %c0_i32_1 = arith.constant 0 : i32
    return %c0_i32, %c0_i32_0 : i32, i32
  }
  func.func @transform_3(%arg0: i32) -> (i32, i32) {
    %c0_i32 = arith.constant 0 : i32
    %c0_i32_0 = arith.constant 0 : i32
    %c0_i32_1 = arith.constant 0 : i32
    return %c0_i32, %c0_i32_0 : i32, i32
  }
  func.func @transform_4(%arg0: i32) -> (i32, i32) {
    %c0_i32 = arith.constant 0 : i32
    %c0_i32_0 = arith.constant 0 : i32
    return %c0_i32, %arg0 : i32, i32
  }
}

module attributes {stable_mosaic.version = 11 : i64} {
  func.func @_softmax_depth_conf_kernel(%arg0: i32, %arg1: i32, %arg2: memref<1x16x256xf32, #tpu.memory_space<vmem>>, %arg3: memref<1x16x256xf32, #tpu.memory_space<vmem>>, %arg4: memref<1x1x256xf32, #tpu.memory_space<vmem>>, %arg5: memref<1x1x256xf32, #tpu.memory_space<vmem>>) attributes {dimension_semantics = [#tpu.dimension_semantics<parallel>, #tpu.dimension_semantics<parallel>], iteration_bounds = array<i64: 1, 1>, scalar_prefetch = 0 : i64, scratch_operands = 0 : i64, tpu.core_type = #tpu.core_type<tc>, window_params = [{transform_indices = @transform_0, window_bounds = array<i64: 1, 16, 256>}, {transform_indices = @transform_1, window_bounds = array<i64: 1, 16, 256>}, {transform_indices = @transform_2, window_bounds = array<i64: 1, 1, 256>}, {transform_indices = @transform_3, window_bounds = array<i64: 1, 1, 256>}]} {
    %c0 = arith.constant 0 : index
    %c0_0 = arith.constant 0 : index
    %c0_1 = arith.constant 0 : index
    %0 = vector.load %arg2[%c0, %c0_0, %c0_1] : memref<1x16x256xf32, #tpu.memory_space<vmem>>, vector<1x16x256xf32>
    %1 = vector.shape_cast %0 : vector<1x16x256xf32> to vector<16x256xf32>
    %c0_2 = arith.constant 0 : index
    %c0_3 = arith.constant 0 : index
    %c0_4 = arith.constant 0 : index
    %2 = vector.load %arg3[%c0_2, %c0_3, %c0_4] : memref<1x16x256xf32, #tpu.memory_space<vmem>>, vector<1x16x256xf32>
    %3 = vector.shape_cast %2 : vector<1x16x256xf32> to vector<16x256xf32>
    %cst = arith.constant dense<0xFF800000> : vector<256xf32>
    %4 = vector.multi_reduction <maximumf>, %1, %cst [0] : vector<16x256xf32> to vector<256xf32>
    %5 = vector.shape_cast %4 : vector<256xf32> to vector<1x256xf32>
    %6 = vector.broadcast %5 : vector<1x256xf32> to vector<16x256xf32>
    %7 = arith.subf %1, %6 : vector<16x256xf32>
    %8 = math.exp %7 : vector<16x256xf32>
    %cst_5 = arith.constant dense<0.000000e+00> : vector<256xf32>
    %9 = vector.multi_reduction <add>, %8, %cst_5 [0] : vector<16x256xf32> to vector<256xf32>
    %10 = vector.shape_cast %9 : vector<256xf32> to vector<1x256xf32>
    %11 = vector.broadcast %10 : vector<1x256xf32> to vector<16x256xf32>
    %12 = arith.divf %8, %11 : vector<16x256xf32>
    %13 = arith.mulf %12, %3 : vector<16x256xf32>
    %cst_6 = arith.constant dense<0.000000e+00> : vector<256xf32>
    %14 = vector.multi_reduction <add>, %13, %cst_6 [0] : vector<16x256xf32> to vector<256xf32>
    %15 = vector.shape_cast %14 : vector<256xf32> to vector<1x256xf32>
    %c0_7 = arith.constant 0 : index
    %c0_8 = arith.constant 0 : index
    %c0_9 = arith.constant 0 : index
    %16 = vector.load %arg4[%c0_7, %c0_8, %c0_9] : memref<1x1x256xf32, #tpu.memory_space<vmem>>, vector<1x1x256xf32>
    %17 = vector.shape_cast %16 : vector<1x1x256xf32> to vector<1x256xf32>
    %18 = vector.shape_cast %15 : vector<1x256xf32> to vector<1x1x256xf32>
    tpu.vector_store %arg4[%c0_7, %c0_8, %c0_9], %18 {strides = array<i32>} : memref<1x1x256xf32, #tpu.memory_space<vmem>>, vector<1x1x256xf32>,
    %19 = tpu.iota {dimensions = array<i32: 0>} : vector<16x256xi32>
    %20 = arith.sitofp %19 : vector<16x256xi32> to vector<16x256xf32>
    %21 = arith.mulf %12, %20 : vector<16x256xf32>
    %cst_10 = arith.constant dense<0.000000e+00> : vector<256xf32>
    %22 = vector.multi_reduction <add>, %21, %cst_10 [0] : vector<16x256xf32> to vector<256xf32>
    %23 = vector.shape_cast %22 : vector<256xf32> to vector<1x256xf32>
    %24 = arith.fptosi %23 : vector<1x256xf32> to vector<1x256xi32>
    %c0_i32 = arith.constant 0 : i32
    %c15_i32 = arith.constant 15 : i32
    %25 = vector.broadcast %c0_i32 : i32 to vector<1x256xi32>
    %26 = arith.maxsi %25, %24 : vector<1x256xi32>
    %27 = vector.broadcast %c15_i32 : i32 to vector<1x256xi32>
    %28 = arith.minsi %27, %26 : vector<1x256xi32>
    %c1_i32 = arith.constant 1 : i32
    %29 = vector.broadcast %c1_i32 : i32 to vector<1x256xi32>
    %30 = arith.subi %28, %29 : vector<1x256xi32>
    %31 = vector.broadcast %30 : vector<1x256xi32> to vector<16x256xi32>
    %32 = arith.cmpi sge, %19, %31 : vector<16x256xi32>
    %c2_i32 = arith.constant 2 : i32
    %33 = vector.broadcast %c2_i32 : i32 to vector<1x256xi32>
    %34 = arith.addi %28, %33 : vector<1x256xi32>
    %35 = vector.broadcast %34 : vector<1x256xi32> to vector<16x256xi32>
    %36 = arith.cmpi sle, %19, %35 : vector<16x256xi32>
    %37 = arith.andi %32, %36 : vector<16x256xi1>
    %38 = arith.extui %37 : vector<16x256xi1> to vector<16x256xi32>
    %39 = arith.sitofp %38 : vector<16x256xi32> to vector<16x256xf32>
    %40 = arith.mulf %12, %39 : vector<16x256xf32>
    %cst_11 = arith.constant dense<0.000000e+00> : vector<256xf32>
    %41 = vector.multi_reduction <add>, %40, %cst_11 [0] : vector<16x256xf32> to vector<256xf32>
    %42 = vector.shape_cast %41 : vector<256xf32> to vector<1x256xf32>
    %c0_12 = arith.constant 0 : index
    %c0_13 = arith.constant 0 : index
    %c0_14 = arith.constant 0 : index
    %43 = vector.load %arg5[%c0_12, %c0_13, %c0_14] : memref<1x1x256xf32, #tpu.memory_space<vmem>>, vector<1x1x256xf32>
    %44 = vector.shape_cast %43 : vector<1x1x256xf32> to vector<1x256xf32>
    %45 = vector.shape_cast %42 : vector<1x256xf32> to vector<1x1x256xf32>
    tpu.vector_store %arg5[%c0_12, %c0_13, %c0_14], %45 {strides = array<i32>} : memref<1x1x256xf32, #tpu.memory_space<vmem>>, vector<1x1x256xf32>,
    return
  }
  func.func @transform_0(%arg0: i32, %arg1: i32) -> (i32, i32, i32) {
    %c0_i32 = arith.constant 0 : i32
    %c0_i32_0 = arith.constant 0 : i32
    return %arg0, %c0_i32, %arg1 : i32, i32, i32
  }
  func.func @transform_1(%arg0: i32, %arg1: i32) -> (i32, i32, i32) {
    %c0_i32 = arith.constant 0 : i32
    %c0_i32_0 = arith.constant 0 : i32
    return %arg0, %c0_i32, %arg1 : i32, i32, i32
  }
  func.func @transform_2(%arg0: i32, %arg1: i32) -> (i32, i32, i32) {
    %c0_i32 = arith.constant 0 : i32
    %c0_i32_0 = arith.constant 0 : i32
    return %arg0, %c0_i32, %arg1 : i32, i32, i32
  }
  func.func @transform_3(%arg0: i32, %arg1: i32) -> (i32, i32, i32) {
    %c0_i32 = arith.constant 0 : i32
    %c0_i32_0 = arith.constant 0 : i32
    return %arg0, %c0_i32, %arg1 : i32, i32, i32
  }
}

</mosaic_0001>

<bundles_post_ra>
// kernel: custom-call.27
= control target key start
LH: loop header
LB: loop body
LE: loop exit
PB: predicated region body
PF: predicated region fallthrough
CT: control target
= control target key end

     0   :  { %5 = vsyncpa [#allocation6], 0  ;;  %v77_v1 = vlaneseq  ;;  %v534_v2 = vmov 0   ;;  %s563_s14 = smov 0   ;;  %s604_s0 = inlined_call_operand.vmem [shape: f32[4,4], index: 0, kind: input, shape index: {}]   ;;  %s605_s1 = inlined_call_operand.vmem [shape: f32[4,4], index: 1, kind: output, shape index: {0}]   ;;  %s606_s2 = inlined_call_operand.hbm [shape: s32[4], index: 2, kind: output, shape index: {1}]   ;;  %s607_s3 = inlined_call_operand.vmem [shape: s32[4], index: 3, kind: output, shape index: {2}]  }
   0x1   :  { %v67_v0 = vld [vmem:[%s604_s0] sm:$0xf]  ;;  %76 = vst [vmem:[#allocation4] sm:$0x1] %v534_v2 }
   0x2   :  { %68 = vst [vmem:[#allocation1] sm:$0xf] %v67_v0  ;;  %v560_v3 = vshrl.u32 %v77_v1, 7 }
   0x4   :  { %81 = vst [vmem:[#allocation9] sm:$0xff] %v560_v3 }
   0x9   :  { %v72_v4 = vld [vmem:[#allocation1] sm:$0xf] }
   0xa   :  { %73 = vst [vmem:[#allocation0] sm:$0xf] %v72_v4 }
  0x11   :  { %v74_v5 = vld [vmem:[#allocation0] sm:$0xff] }
  0x12   :  { %75 = vst [vmem:[#allocation2] sm:$0xff] %v74_v5 }
  0x13 LB: > { %vm97_vm0 = vcmp.lt.s32.totalorder %v560_v3, 4  ;;  %v570_v8 = vstv %s532_s14  ;;  %s138_s0 = ssub.s32 128, %s532_s14  ;;  %v144_v38 = vand.u32 127, %v77_v1  ;;  %v147_v40 = vld [vmem:[#allocation4] ss:$0 sm:$0xff]  ;;  %s150_s15 = scalar_lea.vmem [#allocation2], %s532_s14  ;;  %s532_s14 = sphi %s563_s14, %s87_s14  }
  0x14   : > { %vm96_vm1 = vcmp.ge.s32.totalorder %v560_v3, %v570_v8  ;;  %s156_s17 = scalar_lea.vmem [#allocation9], %s532_s14  ;;  %vm176_vm15 = vcmp.gt.s32.totalorder %v560_v3, %v570_v8  ;;  %s87_s14 = sadd.s32 1, %s532_s14  }
  0x15   : > { %vm98_vm3 = vmand %vm96_vm1, %vm97_vm0  ;;  %vm168_vm12 = vcmp.gt.s32.totalorder %v144_v38, %v570_v8  ;;  %vm145_vm13 = vcmp.eq.s32.totalorder %v144_v38, %v570_v8  ;;  %v158_v42 = vld [vmem:[%s156_s17] ss:$0 sm:$0xff]  ;;  %p84_p0 = scmp.ge.s32.totalorder %s87_s14, 4  }
  0x16   : > { %vm180_vm1 = vmand %vm176_vm15, %vm145_vm13  ;;  %s535_s20 = smov (%p84_p0), [#allocation5]  }
  0x17   :  { %s328_s21 = sshll.u32 (%p84_p0), %s535_s20, 4  ;;  %s329_s21 = int_to_ptr.vmem [resolvable:$true] %s328_s21 }
  0x18   :  { %s504_s24 = scalar_lea.vmem (%p84_p0), %s329_s21, 16  ;;  %s508_s25 = scalar_lea.vmem (%p84_p0), %s329_s21, 32 }
  0x19   : > { %v92_v6 = vld [vmem:[#allocation2] sm:$0xff]  ;;  %v152_v41 = vld [vmem:[%s150_s15] ss:$0 sm:$0xff]  ;;  %p505_p1 = scmp.ne.s32.totalorder (%p84_p0), %s329_s21, %s504_s24  ;;  %p509_p2 = scmp.lt.s32.totalorder (%p84_p0), %s329_s21, %s329_s21 }
  0x1a   : > { %v93_v7 = vand.u32 2147483647, %v92_v6  ;;  %p510_p3 = scmp.lt.s32.totalorder (%p84_p0), %s508_s25, %s504_s24 }
  0x1c   : > { %vm483_vm2 = vcmp.gt.f32.partialorder %v93_v7, -inf  ;;  %p511_p4 = por (%p84_p0), %p510_p3, %p509_p2 }
  0x1d   : > { %vm100_vm4 = vmand %vm98_vm3, %vm483_vm2 }
  0x1e   : > { %v101_v9 = vsel %vm100_vm4, %v560_v3, %v570_v8  ;;  %v102_v10 = vsel %vm100_vm4, %v93_v7, -inf  ;;  %p512_p5 = pnand (%p84_p0), %p511_p4, %p505_p1 }
  0x1f   : > { %v103_v11 = vrot.slane %v102_v10, 1  ;;  %v104_v12 = vrot.slane %v101_v9, 1 }
  0x21   : > { %vm105_vm5 = vcmp.ge.f32.partialorder %v103_v11, %v102_v10  ;;  %v108_v13 = vrot.slane %v103_v11, 1  ;;  %v109_v14 = vrot.slane %v104_v12, 1 }
  0x22   : > { %v106_v15 = vsel %vm105_vm5, %v103_v11, %v102_v10  ;;  %v107_v16 = vsel %vm105_vm5, %v104_v12, %v101_v9 }
  0x23   : > { %vm110_vm6 = vcmp.ge.f32.partialorder %v108_v13, %v106_v15  ;;  %v113_v17 = vrot.slane %v108_v13, 1  ;;  %v114_v18 = vrot.slane %v109_v14, 1 }
  0x24   : > { %v111_v19 = vsel %vm110_vm6, %v108_v13, %v106_v15  ;;  %v112_v20 = vsel %vm110_vm6, %v109_v14, %v107_v16 }
  0x25   : > { %vm115_vm7 = vcmp.ge.f32.partialorder %v113_v17, %v111_v19  ;;  %v118_v21 = vrot.slane %v113_v17, 1  ;;  %v119_v22 = vrot.slane %v114_v18, 1 }
  0x26   : > { %v116_v23 = vsel %vm115_vm7, %v113_v17, %v111_v19  ;;  %v117_v24 = vsel %vm115_vm7, %v114_v18, %v112_v20 }
  0x27   : > { %vm120_vm8 = vcmp.ge.f32.partialorder %v118_v21, %v116_v23  ;;  %v123_v25 = vrot.slane %v118_v21, 1  ;;  %v124_v26 = vrot.slane %v119_v22, 1 }
  0x28   : > { %v121_v27 = vsel %vm120_vm8, %v118_v21, %v116_v23  ;;  %v122_v28 = vsel %vm120_vm8, %v119_v22, %v117_v24 }
  0x29   : > { %vm125_vm9 = vcmp.ge.f32.partialorder %v123_v25, %v121_v27  ;;  %v128_v29 = vrot.slane %v123_v25, 1  ;;  %v129_v30 = vrot.slane %v124_v26, 1 }
  0x2a   : > { %v126_v31 = vsel %vm125_vm9, %v123_v25, %v121_v27  ;;  %v127_v32 = vsel %vm125_vm9, %v124_v26, %v122_v28 }
  0x2b   : > { %vm130_vm10 = vcmp.ge.f32.partialorder %v128_v29, %v126_v31  ;;  %v133_v33 = vrot.slane %v128_v29, 1  ;;  %v134_v34 = vrot.slane %v129_v30, 1 }
  0x2c   : > { %v131_v35 = vsel %vm130_vm10, %v128_v29, %v126_v31  ;;  %v132_v36 = vsel %vm130_vm10, %v129_v30, %v127_v32 }
  0x2d   : > { %vm135_vm11 = vcmp.ge.f32.partialorder %v133_v33, %v131_v35 }
  0x2e   : > { %v137_v37 = vsel %vm135_vm11, %v134_v34, %v132_v36 }
  0x2f   : > { %139 = vrot.lane.b32.xlu0 %v137_v37, %s138_s0 }
  0xa1   : > { %v140_v39 = vpop.permute.xlu0 %139 }
  0xa2   : > { %490 = vpush %v140_v39 }
  0xd3   : > { %s491_s16 = spop %490 }
  0xd4   : > { %v146_v43 = vstv %s491_s16  ;;  %s151_s18 = scalar_lea.vmem [#allocation2], %s491_s16  ;;  %s157_s19 = scalar_lea.vmem [#allocation9], %s491_s16 }
  0xd5   : > { %v153_v44 = vld [vmem:[%s151_s18] ss:$0 sm:$0xff]  ;;  %v148_v46 = vsel %vm145_vm13, %v146_v43, %v147_v40 }
  0xd6   : > { %v159_v45 = vld [vmem:[%s157_s19] ss:$0 sm:$0xff]  ;;  %154 = vst [vmem:[%s151_s18] sm:$0x1] %v152_v41  ;;  %vm162_vm14 = vcmp.ne.f32.partialorder %v153_v44, 0.0  ;;  %149 = vst [vmem:[#allocation4] sm:$0x1] %v148_v46 }
  0xd7   : > { %160 = vst [vmem:[%s157_s19] sm:$0x1] %v158_v42  ;;  %155 = vst [vmem:[%s150_s15] sm:$0x1] %v153_v44  ;;  %v169_v53 = vsel %vm168_vm12, %v153_v44, 0.0 }
  0xd8   : > { %161 = vst [vmem:[%s156_s17] sm:$0x1] %v159_v45  ;;  %vm163_vm0 = vmand %vm145_vm13, %vm162_vm14 }
  0xd9   : > { %v164_v47 = vsel %vm163_vm0, %v153_v44, 1.0 }
  0xda   : > { %v177_v48 = vsel %vm176_vm15, %v164_v47, 1.0 }
  0xdb   : > { %502 = vrcp.f32 %v177_v48 }
  0xdd   :  { %v248_v59 = vld [vmem:[#allocation4] sm:$0x1] (%p84_p0) }
  0xde   : > { %v173_v50 = vld [vmem:[#allocation2] sm:$0xff]  ;;  %251 = vst [vmem:[#allocation5] sm:$0x1] (%p84_p0), %v248_v59 }
  0xdf   :  { %v187_v57 = vld [vmem:[#allocation9] sm:$0xff] (%p84_p0) }
  0xe8   : > { %v503_v49 = vpop.eup %502 }
  0xe9   : > { %v179_v51 = vmul.f32 %v503_v49, %v173_v50 }
  0xeb   : > { %v181_v52 = vsel %vm180_vm1, %v179_v51, 0.0 }
  0xec   : > { %182 = vadd.xlane.f32.xlu0 %v181_v52 }
 0x119   :  { %203 = vxpose.xlu0.b32.start.end [1/1] (short) (narrow) (%p84_p0), %v187_v57, 8 }
 0x175   : > { %v183_v54 = vpop.xlane.xlu0 %182 }
 0x176   : > { %v184_v55 = vmul.f32 %v183_v54, %v169_v53  ;;  %86 = sbr.rel (!%p84_p0) target bundleno = 19 (0x13), region = 163 }
 0x178   : > { %v185_v56 = vsub.f32 %v179_v51, %v184_v55 }
 0x17a   : > { %186 = vst [vmem:[#allocation2] sm:$0xff] %v185_v56 }
 0x181   :  { %v240_v58 = vld [vmem:[#allocation2] sm:$0xf] }
 0x182   :  { %243 = vst [vmem:[#allocation3] sm:$0xf] %v240_v58 }
 0x189   :  { %v321_v60 = vld [vmem:[#allocation3] sm:$0xf] }
 0x18a   :  { %322 = vst [vmem:[%s605_s1] sm:$0xf] %v321_v60 }
 0x18b   :  { %515 = shalt.err (!%p512_p5)
}
 0x18c   :  { %331 = dma.vmem_to_hbm [thread:$0]  %s329_s21, 16, %s606_s2, [#allocation6]  }
 0x195   :  { %v219_v61 = vpop.trf.xlu0 }
 0x196   :  { %235 = vst [vmem:[#allocation7] sm:$0x1] %v219_v61 }
 0x19d   :  { %v256_v62 = vld [vmem:[#allocation7] sm:$0x1] }
 0x19e   :  { %259 = vst [vmem:[#allocation8] sm:$0x1] %v256_v62 }
 0x1a5   :  { %v395_v63 = vld [vmem:[#allocation8] sm:$0x1] }
 0x1a6   :  { %396 = vst [vmem:[%s607_s3] sm:$0x1] %v395_v63 }
 0x1a7   :  { %528 = dma.done.wait [#allocation6], 16  }
 0x1a8   :  { %529 = vsyncadd [#allocation6], 4294967280 }
 0x1a9   :  { %402 = vsyncpa [#allocation6], 1 }

// kernel: custom-call.29
= control target key start
LH: loop header
LB: loop body
LE: loop exit
PB: predicated region body
PF: predicated region fallthrough
CT: control target
= control target key end

     0   :  { %v40_v1 = vlaneseq  ;;  %v155_v11 = vmov -1.0   ;;  %s172_s0 = inlined_call_operand.vmem [shape: f32[1,4,4], index: 0, kind: input, shape index: {}]   ;;  %s173_s1 = inlined_call_operand.vmem [shape: f32[1,4,4], index: 1, kind: output, shape index: {}]  }
   0x1   :  { %v18_v0 = vld [vmem:[%s172_s0] sm:$0xf] }
   0x2   :  { %19 = vst [vmem:[#allocation1] sm:$0xf] %v18_v0  ;;  %v41_v3 = vand.u32 127, %v40_v1  ;;  %v44_v4 = vshrl.u32 %v40_v1, 7 }
   0x4   :  { %vm42_vm0 = vcmp.lt.s32.totalorder %v41_v3, 4  ;;  %vm51_vm1 = vcmp.ge.s32.totalorder %v44_v4, %v41_v3  ;;  %vm46_vm2 = vcmp.eq.s32.totalorder %v44_v4, %v41_v3  ;;  %vm65_vm4 = vcmp.eq.s32.totalorder %v41_v3, 0 }
   0x5   :  { %vm52_vm3 = vmand %vm51_vm1, %vm42_vm0  ;;  %vm62_vm5 = vcmp.eq.s32.totalorder %v41_v3, %v44_v4  ;;  %v66_v12 = vsel %vm65_vm4, 1.0, %v155_v11  ;;  %vm73_vm6 = vcmp.eq.s32.totalorder %v41_v3, 1  ;;  %vm83_vm7 = vcmp.eq.s32.totalorder %v41_v3, 2 }
   0x6   :  { %v67_v13 = vsel %vm62_vm5, %v66_v12, 0.0  ;;  %vm93_vm8 = vcmp.eq.s32.totalorder %v41_v3, 3 }
   0x9   :  { %v38_v2 = vld [vmem:[#allocation1] sm:$0xf] }
   0xa   :  { %39 = vst [vmem:[#allocation0] sm:$0xf] %v38_v2 }
  0x11   :  { %v47_v5 = vld [vmem:[#allocation0] sm:$0xff] }
  0x12   :  { %v48_v6 = vsel %vm46_vm2, %v47_v5, 0.0  ;;  %v53_v7 = vsel %vm52_vm3, %v47_v5, 0.0 }
  0x13   :  { %49 = vadd.xlane.f32.xlu0 %v48_v6 }
  0x9c   :  { %v50_v8 = vpop.xlane.xlu0 %49 }
  0x9d   :  { %153 = vrcp.f32 %v50_v8  ;;  %vm100_vm9 = vweird.f32 %v50_v8 }
  0xaa   :  { %v154_v9 = vpop.eup %153 }
  0xab   :  { %v55_v10 = vmul.f32 %v154_v9, %v53_v7 }
  0xad   :  { %56 = vst [vmem:[#allocation4] sm:$0xff] %v55_v10 }
  0xb4   :  { %v69_v14 = vld [vmem:[#allocation4 + $0x1] ss:$0 sm:$0xff]  ;;  %v79_v17 = vld [vmem:[#allocation4 + $0x2] ss:$0 sm:$0xff]  ;;  %v89_v22 = vld [vmem:[#allocation4 + $0x3] ss:$0 sm:$0xff] }
  0xb5   :  { %v70_v15 = vxor.u32 2147483648, %v69_v14  ;;  %v80_v19 = vxor.u32 2147483648, %v79_v17  ;;  %v90_v24 = vxor.u32 2147483648, %v89_v22 }
  0xb7   :  { %v74_v16 = vmul.f32 %v70_v15, %v67_v13 }
  0xb9   :  { %75 = vadd.xlane.f32.xlu0 %v74_v16 }
 0x142   :  { %v76_v18 = vpop.xlane.xlu0 %75 }
 0x143   :  { %v77_v20 = vsel %vm73_vm6, %v76_v18, %v67_v13 }
 0x144   :  { %v84_v21 = vmul.f32 %v80_v19, %v77_v20 }
 0x146   :  { %85 = vadd.xlane.f32.xlu1 %v84_v21 }
 0x1cf   :  { %v86_v23 = vpop.xlane.xlu1 %85 }
 0x1d0   :  { %v87_v25 = vsel %vm83_vm7, %v86_v23, %v77_v20 }
 0x1d1   :  { %v94_v26 = vmul.f32 %v90_v24, %v87_v25 }
 0x1d3   :  { %95 = vadd.xlane.f32.xlu1 %v94_v26 }
 0x25c   :  { %v96_v27 = vpop.xlane.xlu1 %95 }
 0x25d   :  { %v97_v28 = vsel %vm93_vm8, %v96_v27, %v87_v25 }
 0x25e   :  { %v99_v29 = vmul.f32 %v154_v9, %v97_v28 }
 0x260   :  { %v101_v30 = vsel %vm100_vm9, %v97_v28, %v99_v29 }
 0x261   :  { %102 = vst [vmem:[#allocation2] sm:$0xff] %v101_v30 }
 0x268   :  { %v107_v31 = vld [vmem:[#allocation2] sm:$0xf] }
 0x269   :  { %110 = vst [vmem:[#allocation3] sm:$0xf] %v107_v31 }
 0x270   :  { %v127_v32 = vld [vmem:[#allocation3] sm:$0xf] }
 0x271   :  { %128 = vst [vmem:[%s173_s1] sm:$0xf] %v127_v32 }

// kernel: custom-call.28
= control target key start
LH: loop header
LB: loop body
LE: loop exit
PB: predicated region body
PF: predicated region fallthrough
CT: control target
= control target key end

     0   :  { %v40_v1 = vlaneseq  ;;  %v154_v11 = vmov -1.0   ;;  %s171_s0 = inlined_call_operand.vmem [shape: f32[1,4,4], index: 0, kind: input, shape index: {}]   ;;  %s172_s1 = inlined_call_operand.vmem [shape: f32[1,4,4], index: 1, kind: output, shape index: {}]  }
   0x1   :  { %v18_v0 = vld [vmem:[%s171_s0] sm:$0xf] }
   0x2   :  { %19 = vst [vmem:[#allocation1] sm:$0xf] %v18_v0  ;;  %v41_v3 = vand.u32 127, %v40_v1  ;;  %v44_v4 = vshrl.u32 %v40_v1, 7 }
   0x4   :  { %vm42_vm0 = vcmp.lt.s32.totalorder %v41_v3, 4  ;;  %vm51_vm1 = vcmp.le.s32.totalorder %v44_v4, %v41_v3  ;;  %vm46_vm2 = vcmp.eq.s32.totalorder %v44_v4, %v41_v3  ;;  %vm65_vm4 = vcmp.eq.s32.totalorder %v41_v3, 3 }
   0x5   :  { %vm52_vm3 = vmand %vm51_vm1, %vm42_vm0  ;;  %vm62_vm5 = vcmp.eq.s32.totalorder %v41_v3, %v44_v4  ;;  %v66_v12 = vsel %vm65_vm4, 1.0, %v154_v11  ;;  %vm73_vm6 = vcmp.eq.s32.totalorder %v41_v3, 2  ;;  %vm83_vm7 = vcmp.eq.s32.totalorder %v41_v3, 1 }
   0x6   :  { %v67_v13 = vsel %vm62_vm5, %v66_v12, 0.0  ;;  %vm92_vm8 = vcmp.eq.s32.totalorder %v41_v3, 0 }
   0x9   :  { %v38_v2 = vld [vmem:[#allocation1] sm:$0xf] }
   0xa   :  { %39 = vst [vmem:[#allocation0] sm:$0xf] %v38_v2 }
  0x11   :  { %v47_v5 = vld [vmem:[#allocation0] sm:$0xff] }
  0x12   :  { %v48_v6 = vsel %vm46_vm2, %v47_v5, 0.0  ;;  %v53_v7 = vsel %vm52_vm3, %v47_v5, 0.0 }
  0x13   :  { %49 = vadd.xlane.f32.xlu0 %v48_v6 }
  0x9c   :  { %v50_v8 = vpop.xlane.xlu0 %49 }
  0x9d   :  { %152 = vrcp.f32 %v50_v8  ;;  %vm99_vm9 = vweird.f32 %v50_v8 }
  0xaa   :  { %v153_v9 = vpop.eup %152 }
  0xab   :  { %v55_v10 = vmul.f32 %v153_v9, %v53_v7 }
  0xad   :  { %56 = vst [vmem:[#allocation4] sm:$0xff] %v55_v10 }
  0xb4   :  { %v69_v14 = vld [vmem:[#allocation4 + $0x2] ss:$0 sm:$0xff]  ;;  %v79_v17 = vld [vmem:[#allocation4 + $0x1] ss:$0 sm:$0xff]  ;;  %v88_v22 = vld [vmem:[#allocation4] ss:$0 sm:$0xff] }
  0xb5   :  { %v70_v15 = vxor.u32 2147483648, %v69_v14  ;;  %v80_v19 = vxor.u32 2147483648, %v79_v17  ;;  %v89_v24 = vxor.u32 2147483648, %v88_v22 }
  0xb7   :  { %v74_v16 = vmul.f32 %v70_v15, %v67_v13 }
  0xb9   :  { %75 = vadd.xlane.f32.xlu0 %v74_v16 }
 0x142   :  { %v76_v18 = vpop.xlane.xlu0 %75 }
 0x143   :  { %v77_v20 = vsel %vm73_vm6, %v76_v18, %v67_v13 }
 0x144   :  { %v84_v21 = vmul.f32 %v80_v19, %v77_v20 }
 0x146   :  { %85 = vadd.xlane.f32.xlu1 %v84_v21 }
 0x1cf   :  { %v86_v23 = vpop.xlane.xlu1 %85 }
 0x1d0   :  { %v87_v25 = vsel %vm83_vm7, %v86_v23, %v77_v20 }
 0x1d1   :  { %v93_v26 = vmul.f32 %v89_v24, %v87_v25 }
 0x1d3   :  { %94 = vadd.xlane.f32.xlu1 %v93_v26 }
 0x25c   :  { %v95_v27 = vpop.xlane.xlu1 %94 }
 0x25d   :  { %v96_v28 = vsel %vm92_vm8, %v95_v27, %v87_v25 }
 0x25e   :  { %v98_v29 = vmul.f32 %v153_v9, %v96_v28 }
 0x260   :  { %v100_v30 = vsel %vm99_vm9, %v96_v28, %v98_v29 }
 0x261   :  { %101 = vst [vmem:[#allocation2] sm:$0xff] %v100_v30 }
 0x268   :  { %v106_v31 = vld [vmem:[#allocation2] sm:$0xf] }
 0x269   :  { %109 = vst [vmem:[#allocation3] sm:$0xf] %v106_v31 }
 0x270   :  { %v126_v32 = vld [vmem:[#allocation3] sm:$0xf] }
 0x271   :  { %127 = vst [vmem:[%s172_s1] sm:$0xf] %v126_v32 }

// kernel: depth_net.34
= control target key start
LH: loop header
LB: loop body
LE: loop exit
PB: predicated region body
PF: predicated region fallthrough
CT: control target
= control target key end

     0   :  { %s560_s12 = smov 0   ;;  %s562_s13 = smov 0   ;;  %s604_s0 = inlined_call_operand.vmem [shape: f32[16,1,256], index: 0, kind: input, shape index: {}]   ;;  %s605_s1 = inlined_call_operand.vmem [shape: f32[16,16,256], index: 1, kind: input, shape index: {}]   ;;  %s606_s2 = inlined_call_operand.vmem [shape: f32[16,16,256], index: 2, kind: input, shape index: {}]   ;;  %s607_s3 = inlined_call_operand.vmem [shape: f32[16,16,256], index: 3, kind: output, shape index: {}]  }
   0x1   :  { %s564_s14 = smov 0  }
   0x2 LB: > { %s25_s15 = sadd.s32 1, %s534_s13  ;;  %p479_p0 = scmp.ge.s32.totalorder %s538_s14, 1  ;;  %s538_s14 = sphi %s564_s14, %s13_s14   ;;  %s534_s13 = sphi %s562_s13, %s609_s13   ;;  %s530_s12 = sphi %s560_s12, %s608_s12  }
   0x3   : > { %p27_p1 = scmp.ge.s32.totalorder %s25_s15, 16  ;;  %p191_p2 = scmp.lt.s32.totalorder %s538_s14, 17 }
   0x5   : > { %s611_s15 = smov (%p27_p1, %s25_s15), 0  ;;  %p192_p3 = pnand %p479_p0, %p191_p2 }
   0x6   : > { %p241_p4 = scmp.lt.s32.totalorder (!%p192_p3), %s530_s12, 15 }
   0x7   : > { %195 = sbr.rel (%p192_p3) target bundleno = 32 (0x20), region = 32 }
   0xc   : > { %v281_v0 = vlaneseq  ;;  %s613_s12 = smov (!%p241_p4, %s530_s12), 15 }
   0xd   : > { %s480_s16 = sshll.u32 %s613_s12, 1  ;;  %s578_s17 = sshll.u32 %s613_s12, 5 }
   0xe   : > { %v282_v1 = vshrl.u32 %v281_v0, 7  ;;  %s247_s20 = scalar_lea.vmem %s604_s0, %s480_s16  ;;  %s257_s23 = scalar_lea.vmem %s605_s1, %s578_s17 }
   0xf   : > { %s267_s26 = scalar_lea.vmem %s606_s2, %s578_s17  ;;  %v279_v4 = vld [vmem:[%s247_s20] sm:$0x3]  ;;  %v304_v6 = vld [vmem:[%s257_s23 + $0x8] sm:$0xff]  ;;  %v305_v13 = vld [vmem:[%s257_s23 + $0x10] sm:$0xff]  ;;  %s277_s29 = scalar_lea.vmem %s607_s3, %s578_s17 }
  0x10   : > { %v283_v2 = vsub.s32 0, %v282_v1  ;;  %v287_v3 = vsub.s32 1, %v282_v1  ;;  %v303_v5 = vld [vmem:[%s257_s23] sm:$0xff]  ;;  %v291_v8 = vmul.f32 %v279_v4, %v279_v4  ;;  %v320_v12 = vld [vmem:[%s267_s26 + $0x8] sm:$0xff]  ;;  %v312_v15 = vmul.f32 %v304_v6, %v304_v6  ;;  %v321_v18 = vld [vmem:[%s267_s26 + $0x10] sm:$0xff] }
  0x11   : > { %v311_v9 = vmul.f32 %v303_v5, %v303_v5  ;;  %v319_v10 = vld [vmem:[%s267_s26] sm:$0xff]  ;;  %v328_v16 = vmul.f32 %v320_v12, %v320_v12  ;;  %v313_v17 = vmul.f32 %v305_v13, %v305_v13  ;;  %v306_v19 = vld [vmem:[%s257_s23 + $0x18] sm:$0xff]  ;;  %v329_v26 = vmul.f32 %v321_v18, %v321_v18 }
  0x12   : > { %v284_v7 = vrot.slane %v279_v4, %v283_v2  ;;  %v288_v11 = vrot.slane %v279_v4, %v287_v3  ;;  %v327_v14 = vmul.f32 %v319_v10, %v319_v10  ;;  %v296_v20 = vrot.slane %v291_v8, %v283_v2  ;;  %v322_v24 = vld [vmem:[%s267_s26 + $0x18] sm:$0xff] }
  0x13   : > { %v300_v22 = vrot.slane %v291_v8, %v287_v3  ;;  %v314_v28 = vmul.f32 %v306_v19, %v306_v19  ;;  %v330_v43 = vmul.f32 %v322_v24, %v322_v24 }
  0x14   : > { %v307_v21 = vadd.f32 %v303_v5, %v284_v7  ;;  %v308_v23 = vadd.f32 %v304_v6, %v288_v11  ;;  %v309_v25 = vadd.f32 %v305_v13, %v284_v7  ;;  %v310_v27 = vadd.f32 %v306_v19, %v288_v11 }
  0x15   : > { %v315_v29 = vadd.f32 %v311_v9, %v296_v20  ;;  %v316_v31 = vadd.f32 %v312_v15, %v300_v22  ;;  %v317_v33 = vadd.f32 %v313_v17, %v296_v20  ;;  %v318_v35 = vadd.f32 %v314_v28, %v300_v22 }
  0x16   : > { %v323_v30 = vadd.f32 %v319_v10, %v307_v21  ;;  %v324_v32 = vadd.f32 %v320_v12, %v308_v23  ;;  %v325_v34 = vadd.f32 %v321_v18, %v309_v25  ;;  %v326_v36 = vadd.f32 %v322_v24, %v310_v27 }
  0x17   : > { %v331_v37 = vadd.f32 %v327_v14, %v315_v29  ;;  %v332_v39 = vadd.f32 %v328_v16, %v316_v31  ;;  %v333_v41 = vadd.f32 %v329_v26, %v317_v33  ;;  %v334_v51 = vadd.f32 %v330_v43, %v318_v35 }
  0x18   : > { %v339_v38 = vmul.f32 0.33333334, %v323_v30  ;;  %v340_v40 = vmul.f32 0.33333334, %v324_v32  ;;  %v341_v42 = vmul.f32 0.33333334, %v325_v34 }
  0x19   : > { %v342_v44 = vmul.f32 0.33333334, %v326_v36  ;;  %v335_v45 = vmul.f32 0.33333334, %v331_v37  ;;  %v336_v47 = vmul.f32 0.33333334, %v332_v39 }
  0x1a   : > { %v343_v46 = vmul.f32 %v339_v38, %v339_v38  ;;  %v344_v48 = vmul.f32 %v340_v40, %v340_v40  ;;  %v337_v49 = vmul.f32 0.33333334, %v333_v41  ;;  %v345_v50 = vmul.f32 %v341_v42, %v341_v42 }
  0x1b   : > { %v346_v52 = vmul.f32 %v342_v44, %v342_v44  ;;  %v338_v56 = vmul.f32 0.33333334, %v334_v51 }
  0x1c   : > { %v347_v53 = vsub.f32 %v335_v45, %v343_v46  ;;  %v348_v54 = vsub.f32 %v336_v47, %v344_v48  ;;  %v349_v55 = vsub.f32 %v337_v49, %v345_v50 }
  0x1d   : > { %v350_v57 = vsub.f32 %v338_v56, %v346_v52 }
  0x1e   : > { %351 = vst [vmem:[%s277_s29] sm:$0xff] %v347_v53  ;;  %352 = vst [vmem:[%s277_s29 + $0x8] sm:$0xff] %v348_v54 }
  0x1f   : > { %353 = vst [vmem:[%s277_s29 + $0x10] sm:$0xff] %v349_v55  ;;  %354 = vst [vmem:[%s277_s29 + $0x18] sm:$0xff] %v350_v57 }
  0x20 PF: > { %s13_s14 = sadd.s32 1, %s538_s14   ;;  %s608_s12 = smov %s534_s13 }
  0x21   : > { %p10_p5 = scmp.ge.s32.totalorder %s13_s14, 18   ;;  %s609_s13 = smov %s611_s15 }
  0x23   :  { %12 = sbr.rel (!%p10_p5) target bundleno = 2 (0x2), region = 68 }

// kernel: depth_net.35
= control target key start
LH: loop header
LB: loop body
LE: loop exit
PB: predicated region body
PF: predicated region fallthrough
CT: control target
= control target key end

     0   :  { %s2718_s15 = smov 0   ;;  %s2720_s16 = smov 0   ;;  %s3506_s0 = inlined_call_operand.vmem [shape: bf16[8,432], index: 0, kind: input, shape index: {}]   ;;  %s3507_s1 = inlined_call_operand.vmem [shape: bf16[432,4096], index: 1, kind: input, shape index: {}]   ;;  %s3508_s2 = inlined_call_operand.vmem [shape: f32[8,1], index: 2, kind: input, shape index: {}]   ;;  %s3509_s3 = inlined_call_operand.vmem [shape: f32[8,1], index: 3, kind: input, shape index: {}]   ;;  %s3510_s4 = inlined_call_operand.vmem [shape: f32[8,4096], index: 4, kind: output, shape index: {}]  }
   0x1   :  { %s2722_s17 = smov 0  }
   0x2 LB: > { %s2400_s18 = sadd.s32 4294967295, %s2690_s17   ;;  %s2735_s19 = sadd.s32 1, %s2690_s17   ;;  %s2690_s17 = sphi %s2722_s17, %s3513_s17   ;;  %s2686_s16 = sphi %s2720_s16, %s3512_s16   ;;  %s2682_s15 = sphi %s2718_s15, %s3511_s15  }
   0x3   : > { %s39_s20 = ssub.s32 %s2690_s17, %s2735_s19  ;;  %s42_s21 = sadd.s32 1, %s2686_s16 }
   0x4   : > { %p40_p0 = scmp.eq.s32.totalorder %s39_s20, 0  ;;  %p49_p1 = scmp.ne.s32.totalorder %s2686_s16, %s2682_s15 }
   0x5   : > { %p50_p2 = scmp.eq.s32.totalorder %s2690_s17, 0  ;;  %p2403_p4 = scmp.ge.s32.totalorder %s2690_s17, 4 }
   0x6   : > { %s2744_s22 = scalar_select %p40_p0, %s2686_s16, %s42_s21  }
   0x7   : > { %p51_p3 = por %p50_p2, %p49_p1  ;;  %152 = sbr.rel (%p2403_p4) target bundleno = 125 (0x7d), region = 28 }
   0xc   : > { %155 = sbr.rel (!%p51_p3) target bundleno = 125 (0x7d), region = 32  ;;  %s157_s23 = sand.u32 (%p51_p3), 1, %s2686_s16  }
   0xd   : > { %s2635_s24 = sshll.u32 (%p51_p3), %s2690_s17, 5  ;;  %s2636_s25 = smul.u32 (%p51_p3), 1728, %s157_s23 }
   0xe   : > { %s2752_s28 = scalar_lea.vmem (%p51_p3), %s3507_s1, %s2635_s24 }
   0xf   : > { %v175_v0 = vld [vmem:[%s2752_s28] sm:$0xff] (%p51_p3)  ;;  %v177_v1 = vld [vmem:[%s2752_s28 + $0x8] sm:$0xff] (%p51_p3)  ;;  %v179_v2 = vld [vmem:[%s2752_s28 + $0x10] sm:$0xff] (%p51_p3)  ;;  %s2760_s29 = scalar_lea.vmem (%p51_p3), [#allocation2], %s2636_s25 }
  0x10   : > { %v181_v3 = vld [vmem:[%s2752_s28 + $0x18] sm:$0xff] (%p51_p3)  ;;  %v183_v4 = vld [vmem:[%s2752_s28 + $0x80] sm:$0xff] (%p51_p3)  ;;  %v185_v5 = vld [vmem:[%s2752_s28 + $0x88] sm:$0xff] (%p51_p3)  ;;  %176 = vst [vmem:[%s2760_s29] sm:$0xff] (%p51_p3), %v175_v0 }
  0x11   : > { %178 = vst [vmem:[%s2760_s29 + $0x8] sm:$0xff] %v177_v1  ;;  %180 = vst [vmem:[%s2760_s29 + $0x10] sm:$0xff] %v179_v2  ;;  %v187_v6 = vld [vmem:[%s2752_s28 + $0x90] sm:$0xff]  ;;  %v189_v7 = vld [vmem:[%s2752_s28 + $0x98] sm:$0xff] }
  0x12   : > { %182 = vst [vmem:[%s2760_s29 + $0x18] sm:$0xff] %v181_v3  ;;  %184 = vst [vmem:[%s2760_s29 + $0x20] sm:$0xff] %v183_v4  ;;  %v191_v8 = vld [vmem:[%s2752_s28 + $0x100] sm:$0xff]  ;;  %v193_v9 = vld [vmem:[%s2752_s28 + $0x108] sm:$0xff] }
  0x13   : > { %186 = vst [vmem:[%s2760_s29 + $0x28] sm:$0xff] %v185_v5  ;;  %188 = vst [vmem:[%s2760_s29 + $0x30] sm:$0xff] %v187_v6  ;;  %v195_v10 = vld [vmem:[%s2752_s28 + $0x110] sm:$0xff]  ;;  %v197_v11 = vld [vmem:[%s2752_s28 + $0x118] sm:$0xff] }
  0x14   : > { %190 = vst [vmem:[%s2760_s29 + $0x38] sm:$0xff] %v189_v7  ;;  %192 = vst [vmem:[%s2760_s29 + $0x40] sm:$0xff] %v191_v8  ;;  %v199_v12 = vld [vmem:[%s2752_s28 + $0x180] sm:$0xff]  ;;  %v201_v13 = vld [vmem:[%s2752_s28 + $0x188] sm:$0xff] }
  0x15   : > { %194 = vst [vmem:[%s2760_s29 + $0x48] sm:$0xff] %v193_v9  ;;  %196 = vst [vmem:[%s2760_s29 + $0x50] sm:$0xff] %v195_v10  ;;  %v203_v14 = vld [vmem:[%s2752_s28 + $0x190] sm:$0xff]  ;;  %v205_v15 = vld [vmem:[%s2752_s28 + $0x198] sm:$0xff] }
  0x16   : > { %198 = vst [vmem:[%s2760_s29 + $0x58] sm:$0xff] %v197_v11  ;;  %200 = vst [vmem:[%s2760_s29 + $0x60] sm:$0xff] %v199_v12  ;;  %v207_v16 = vld [vmem:[%s2752_s28 + $0x200] sm:$0xff]  ;;  %v209_v17 = vld [vmem:[%s2752_s28 + $0x208] sm:$0xff] }
  0x17   : > { %202 = vst [vmem:[%s2760_s29 + $0x68] sm:$0xff] %v201_v13  ;;  %204 = vst [vmem:[%s2760_s29 + $0x70] sm:$0xff] %v203_v14  ;;  %v211_v18 = vld [vmem:[%s2752_s28 + $0x210] sm:$0xff]  ;;  %v213_v19 = vld [vmem:[%s2752_s28 + $0x218] sm:$0xff] }
  0x18   : > { %206 = vst [vmem:[%s2760_s29 + $0x78] sm:$0xff] %v205_v15  ;;  %208 = vst [vmem:[%s2760_s29 + $0x80] sm:$0xff] %v207_v16  ;;  %v215_v20 = vld [vmem:[%s2752_s28 + $0x280] sm:$0xff]  ;;  %v217_v21 = vld [vmem:[%s2752_s28 + $0x288] sm:$0xff] }
  0x19   : > { %210 = vst [vmem:[%s2760_s29 + $0x88] sm:$0xff] %v209_v17  ;;  %212 = vst [vmem:[%s2760_s29 + $0x90] sm:$0xff] %v211_v18  ;;  %v219_v22 = vld [vmem:[%s2752_s28 + $0x290] sm:$0xff]  ;;  %v221_v23 = vld [vmem:[%s2752_s28 + $0x298] sm:$0xff] }
  0x1a   : > { %214 = vst [vmem:[%s2760_s29 + $0x98] sm:$0xff] %v213_v19  ;;  %216 = vst [vmem:[%s2760_s29 + $0xa0] sm:$0xff] %v215_v20  ;;  %v223_v24 = vld [vmem:[%s2752_s28 + $0x300] sm:$0xff]  ;;  %v225_v25 = vld [vmem:[%s2752_s28 + $0x308] sm:$0xff] }
  0x1b   : > { %218 = vst [vmem:[%s2760_s29 + $0xa8] sm:$0xff] %v217_v21  ;;  %220 = vst [vmem:[%s2760_s29 + $0xb0] sm:$0xff] %v219_v22  ;;  %v227_v26 = vld [vmem:[%s2752_s28 + $0x310] sm:$0xff]  ;;  %v229_v27 = vld [vmem:[%s2752_s28 + $0x318] sm:$0xff] }
  0x1c   : > { %222 = vst [vmem:[%s2760_s29 + $0xb8] sm:$0xff] %v221_v23  ;;  %224 = vst [vmem:[%s2760_s29 + $0xc0] sm:$0xff] %v223_v24  ;;  %v231_v28 = vld [vmem:[%s2752_s28 + $0x380] sm:$0xff]  ;;  %v233_v29 = vld [vmem:[%s2752_s28 + $0x388] sm:$0xff] }
  0x1d   : > { %226 = vst [vmem:[%s2760_s29 + $0xc8] sm:$0xff] %v225_v25  ;;  %228 = vst [vmem:[%s2760_s29 + $0xd0] sm:$0xff] %v227_v26  ;;  %v235_v30 = vld [vmem:[%s2752_s28 + $0x390] sm:$0xff]  ;;  %v237_v31 = vld [vmem:[%s2752_s28 + $0x398] sm:$0xff] }
  0x1e   : > { %230 = vst [vmem:[%s2760_s29 + $0xd8] sm:$0xff] %v229_v27  ;;  %232 = vst [vmem:[%s2760_s29 + $0xe0] sm:$0xff] %v231_v28  ;;  %v239_v32 = vld [vmem:[%s2752_s28 + $0x400] sm:$0xff]  ;;  %v241_v33 = vld [vmem:[%s2752_s28 + $0x408] sm:$0xff] }
  0x1f   : > { %234 = vst [vmem:[%s2760_s29 + $0xe8] sm:$0xff] %v233_v29  ;;  %236 = vst [vmem:[%s2760_s29 + $0xf0] sm:$0xff] %v235_v30  ;;  %v243_v34 = vld [vmem:[%s2752_s28 + $0x410] sm:$0xff]  ;;  %v245_v35 = vld [vmem:[%s2752_s28 + $0x418] sm:$0xff] }
  0x20   : > { %238 = vst [vmem:[%s2760_s29 + $0xf8] sm:$0xff] %v237_v31  ;;  %240 = vst [vmem:[%s2760_s29 + $0x100] sm:$0xff] %v239_v32  ;;  %v247_v36 = vld [vmem:[%s2752_s28 + $0x480] sm:$0xff]  ;;  %v249_v37 = vld [vmem:[%s2752_s28 + $0x488] sm:$0xff] }
  0x21   : > { %242 = vst [vmem:[%s2760_s29 + $0x108] sm:$0xff] %v241_v33  ;;  %244 = vst [vmem:[%s2760_s29 + $0x110] sm:$0xff] %v243_v34  ;;  %v251_v38 = vld [vmem:[%s2752_s28 + $0x490] sm:$0xff]  ;;  %v253_v39 = vld [vmem:[%s2752_s28 + $0x498] sm:$0xff] }
  0x22   : > { %246 = vst [vmem:[%s2760_s29 + $0x118] sm:$0xff] %v245_v35  ;;  %248 = vst [vmem:[%s2760_s29 + $0x120] sm:$0xff] %v247_v36  ;;  %v255_v40 = vld [vmem:[%s2752_s28 + $0x500] sm:$0xff]  ;;  %v257_v41 = vld [vmem:[%s2752_s28 + $0x508] sm:$0xff] }
  0x23   : > { %250 = vst [vmem:[%s2760_s29 + $0x128] sm:$0xff] %v249_v37  ;;  %252 = vst [vmem:[%s2760_s29 + $0x130] sm:$0xff] %v251_v38  ;;  %v259_v42 = vld [vmem:[%s2752_s28 + $0x510] sm:$0xff]  ;;  %v261_v43 = vld [vmem:[%s2752_s28 + $0x518] sm:$0xff] }
  0x24   : > { %254 = vst [vmem:[%s2760_s29 + $0x138] sm:$0xff] %v253_v39  ;;  %256 = vst [vmem:[%s2760_s29 + $0x140] sm:$0xff] %v255_v40  ;;  %v263_v44 = vld [vmem:[%s2752_s28 + $0x580] sm:$0xff]  ;;  %v265_v45 = vld [vmem:[%s2752_s28 + $0x588] sm:$0xff] }
  0x25   : > { %258 = vst [vmem:[%s2760_s29 + $0x148] sm:$0xff] %v257_v41  ;;  %260 = vst [vmem:[%s2760_s29 + $0x150] sm:$0xff] %v259_v42  ;;  %v267_v46 = vld [vmem:[%s2752_s28 + $0x590] sm:$0xff]  ;;  %v269_v47 = vld [vmem:[%s2752_s28 + $0x598] sm:$0xff] }
  0x26   : > { %262 = vst [vmem:[%s2760_s29 + $0x158] sm:$0xff] %v261_v43  ;;  %264 = vst [vmem:[%s2760_s29 + $0x160] sm:$0xff] %v263_v44  ;;  %v271_v48 = vld [vmem:[%s2752_s28 + $0x600] sm:$0xff]  ;;  %v273_v49 = vld [vmem:[%s2752_s28 + $0x608] sm:$0xff] }
  0x27   : > { %266 = vst [vmem:[%s2760_s29 + $0x168] sm:$0xff] %v265_v45  ;;  %268 = vst [vmem:[%s2760_s29 + $0x170] sm:$0xff] %v267_v46  ;;  %v275_v50 = vld [vmem:[%s2752_s28 + $0x610] sm:$0xff]  ;;  %v277_v51 = vld [vmem:[%s2752_s28 + $0x618] sm:$0xff] }
  0x28   : > { %270 = vst [vmem:[%s2760_s29 + $0x178] sm:$0xff] %v269_v47  ;;  %272 = vst [vmem:[%s2760_s29 + $0x180] sm:$0xff] %v271_v48  ;;  %v279_v52 = vld [vmem:[%s2752_s28 + $0x680] sm:$0xff]  ;;  %v281_v53 = vld [vmem:[%s2752_s28 + $0x688] sm:$0xff] }
  0x29   : > { %274 = vst [vmem:[%s2760_s29 + $0x188] sm:$0xff] %v273_v49  ;;  %276 = vst [vmem:[%s2760_s29 + $0x190] sm:$0xff] %v275_v50  ;;  %v283_v54 = vld [vmem:[%s2752_s28 + $0x690] sm:$0xff]  ;;  %v285_v55 = vld [vmem:[%s2752_s28 + $0x698] sm:$0xff] }
  0x2a   : > { %278 = vst [vmem:[%s2760_s29 + $0x198] sm:$0xff] %v277_v51  ;;  %280 = vst [vmem:[%s2760_s29 + $0x1a0] sm:$0xff] %v279_v52  ;;  %v287_v56 = vld [vmem:[%s2752_s28 + $0x700] sm:$0xff]  ;;  %v289_v57 = vld [vmem:[%s2752_s28 + $0x708] sm:$0xff] }
  0x2b   : > { %282 = vst [vmem:[%s2760_s29 + $0x1a8] sm:$0xff] %v281_v53  ;;  %284 = vst [vmem:[%s2760_s29 + $0x1b0] sm:$0xff] %v283_v54  ;;  %v291_v58 = vld [vmem:[%s2752_s28 + $0x710] sm:$0xff]  ;;  %v293_v59 = vld [vmem:[%s2752_s28 + $0x718] sm:$0xff] }
  0x2c   : > { %286 = vst [vmem:[%s2760_s29 + $0x1b8] sm:$0xff] %v285_v55  ;;  %288 = vst [vmem:[%s2760_s29 + $0x1c0] sm:$0xff] %v287_v56  ;;  %v295_v60 = vld [vmem:[%s2752_s28 + $0x780] sm:$0xff]  ;;  %v297_v61 = vld [vmem:[%s2752_s28 + $0x788] sm:$0xff] }
  0x2d   : > { %290 = vst [vmem:[%s2760_s29 + $0x1c8] sm:$0xff] %v289_v57  ;;  %292 = vst [vmem:[%s2760_s29 + $0x1d0] sm:$0xff] %v291_v58  ;;  %v299_v62 = vld [vmem:[%s2752_s28 + $0x790] sm:$0xff]  ;;  %v301_v63 = vld [vmem:[%s2752_s28 + $0x798] sm:$0xff] }
  0x2e   : > { %294 = vst [vmem:[%s2760_s29 + $0x1d8] sm:$0xff] %v293_v59  ;;  %296 = vst [vmem:[%s2760_s29 + $0x1e0] sm:$0xff] %v295_v60  ;;  %v303_v0 = vld [vmem:[%s2752_s28 + $0x800] sm:$0xff]  ;;  %v305_v1 = vld [vmem:[%s2752_s28 + $0x808] sm:$0xff] }
  0x2f   : > { %298 = vst [vmem:[%s2760_s29 + $0x1e8] sm:$0xff] %v297_v61  ;;  %300 = vst [vmem:[%s2760_s29 + $0x1f0] sm:$0xff] %v299_v62  ;;  %v307_v2 = vld [vmem:[%s2752_s28 + $0x810] sm:$0xff]  ;;  %v309_v3 = vld [vmem:[%s2752_s28 + $0x818] sm:$0xff] }
  0x30   : > { %302 = vst [vmem:[%s2760_s29 + $0x1f8] sm:$0xff] %v301_v63  ;;  %304 = vst [vmem:[%s2760_s29 + $0x200] sm:$0xff] %v303_v0  ;;  %v311_v4 = vld [vmem:[%s2752_s28 + $0x880] sm:$0xff]  ;;  %v313_v5 = vld [vmem:[%s2752_s28 + $0x888] sm:$0xff] }
  0x31   : > { %306 = vst [vmem:[%s2760_s29 + $0x208] sm:$0xff] %v305_v1  ;;  %308 = vst [vmem:[%s2760_s29 + $0x210] sm:$0xff] %v307_v2  ;;  %v315_v6 = vld [vmem:[%s2752_s28 + $0x890] sm:$0xff]  ;;  %v317_v7 = vld [vmem:[%s2752_s28 + $0x898] sm:$0xff] }
  0x32   : > { %310 = vst [vmem:[%s2760_s29 + $0x218] sm:$0xff] %v309_v3  ;;  %312 = vst [vmem:[%s2760_s29 + $0x220] sm:$0xff] %v311_v4  ;;  %v319_v8 = vld [vmem:[%s2752_s28 + $0x900] sm:$0xff]  ;;  %v321_v9 = vld [vmem:[%s2752_s28 + $0x908] sm:$0xff] }
  0x33   : > { %314 = vst [vmem:[%s2760_s29 + $0x228] sm:$0xff] %v313_v5  ;;  %316 = vst [vmem:[%s2760_s29 + $0x230] sm:$0xff] %v315_v6  ;;  %v323_v10 = vld [vmem:[%s2752_s28 + $0x910] sm:$0xff]  ;;  %v325_v11 = vld [vmem:[%s2752_s28 + $0x918] sm:$0xff] }
  0x34   : > { %318 = vst [vmem:[%s2760_s29 + $0x238] sm:$0xff] %v317_v7  ;;  %320 = vst [vmem:[%s2760_s29 + $0x240] sm:$0xff] %v319_v8  ;;  %v327_v12 = vld [vmem:[%s2752_s28 + $0x980] sm:$0xff]  ;;  %v329_v13 = vld [vmem:[%s2752_s28 + $0x988] sm:$0xff] }
  0x35   : > { %322 = vst [vmem:[%s2760_s29 + $0x248] sm:$0xff] %v321_v9  ;;  %324 = vst [vmem:[%s2760_s29 + $0x250] sm:$0xff] %v323_v10  ;;  %v331_v14 = vld [vmem:[%s2752_s28 + $0x990] sm:$0xff]  ;;  %v333_v15 = vld [vmem:[%s2752_s28 + $0x998] sm:$0xff] }
  0x36   : > { %326 = vst [vmem:[%s2760_s29 + $0x258] sm:$0xff] %v325_v11  ;;  %328 = vst [vmem:[%s2760_s29 + $0x260] sm:$0xff] %v327_v12  ;;  %v335_v16 = vld [vmem:[%s2752_s28 + $0xa00] sm:$0xff]  ;;  %v337_v17 = vld [vmem:[%s2752_s28 + $0xa08] sm:$0xff] }
  0x37   : > { %330 = vst [vmem:[%s2760_s29 + $0x268] sm:$0xff] %v329_v13  ;;  %332 = vst [vmem:[%s2760_s29 + $0x270] sm:$0xff] %v331_v14  ;;  %v339_v18 = vld [vmem:[%s2752_s28 + $0xa10] sm:$0xff]  ;;  %v341_v19 = vld [vmem:[%s2752_s28 + $0xa18] sm:$0xff] }
  0x38   : > { %334 = vst [vmem:[%s2760_s29 + $0x278] sm:$0xff] %v333_v15  ;;  %336 = vst [vmem:[%s2760_s29 + $0x280] sm:$0xff] %v335_v16  ;;  %v343_v20 = vld [vmem:[%s2752_s28 + $0xa80] sm:$0xff]  ;;  %v345_v21 = vld [vmem:[%s2752_s28 + $0xa88] sm:$0xff] }
  0x39   : > { %338 = vst [vmem:[%s2760_s29 + $0x288] sm:$0xff] %v337_v17  ;;  %340 = vst [vmem:[%s2760_s29 + $0x290] sm:$0xff] %v339_v18  ;;  %v347_v22 = vld [vmem:[%s2752_s28 + $0xa90] sm:$0xff]  ;;  %v349_v23 = vld [vmem:[%s2752_s28 + $0xa98] sm:$0xff] }
  0x3a   : > { %342 = vst [vmem:[%s2760_s29 + $0x298] sm:$0xff] %v341_v19  ;;  %344 = vst [vmem:[%s2760_s29 + $0x2a0] sm:$0xff] %v343_v20  ;;  %v351_v24 = vld [vmem:[%s2752_s28 + $0xb00] sm:$0xff]  ;;  %v353_v25 = vld [vmem:[%s2752_s28 + $0xb08] sm:$0xff] }
  0x3b   : > { %346 = vst [vmem:[%s2760_s29 + $0x2a8] sm:$0xff] %v345_v21  ;;  %348 = vst [vmem:[%s2760_s29 + $0x2b0] sm:$0xff] %v347_v22  ;;  %v355_v26 = vld [vmem:[%s2752_s28 + $0xb10] sm:$0xff]  ;;  %v357_v27 = vld [vmem:[%s2752_s28 + $0xb18] sm:$0xff] }
  0x3c   : > { %350 = vst [vmem:[%s2760_s29 + $0x2b8] sm:$0xff] %v349_v23  ;;  %352 = vst [vmem:[%s2760_s29 + $0x2c0] sm:$0xff] %v351_v24  ;;  %v359_v28 = vld [vmem:[%s2752_s28 + $0xb80] sm:$0xff]  ;;  %v361_v29 = vld [vmem:[%s2752_s28 + $0xb88] sm:$0xff] }
  0x3d   : > { %354 = vst [vmem:[%s2760_s29 + $0x2c8] sm:$0xff] %v353_v25  ;;  %356 = vst [vmem:[%s2760_s29 + $0x2d0] sm:$0xff] %v355_v26  ;;  %v363_v30 = vld [vmem:[%s2752_s28 + $0xb90] sm:$0xff]  ;;  %v365_v31 = vld [vmem:[%s2752_s28 + $0xb98] sm:$0xff] }
  0x3e   : > { %358 = vst [vmem:[%s2760_s29 + $0x2d8] sm:$0xff] %v357_v27  ;;  %360 = vst [vmem:[%s2760_s29 + $0x2e0] sm:$0xff] %v359_v28  ;;  %v367_v32 = vld [vmem:[%s2752_s28 + $0xc00] sm:$0xff]  ;;  %v369_v33 = vld [vmem:[%s2752_s28 + $0xc08] sm:$0xff] }
  0x3f   : > { %362 = vst [vmem:[%s2760_s29 + $0x2e8] sm:$0xff] %v361_v29  ;;  %364 = vst [vmem:[%s2760_s29 + $0x2f0] sm:$0xff] %v363_v30  ;;  %v371_v34 = vld [vmem:[%s2752_s28 + $0xc10] sm:$0xff]  ;;  %v373_v35 = vld [vmem:[%s2752_s28 + $0xc18] sm:$0xff] }
  0x40   : > { %366 = vst [vmem:[%s2760_s29 + $0x2f8] sm:$0xff] %v365_v31  ;;  %368 = vst [vmem:[%s2760_s29 + $0x300] sm:$0xff] %v367_v32  ;;  %v375_v36 = vld [vmem:[%s2752_s28 + $0xc80] sm:$0xff]  ;;  %v377_v37 = vld [vmem:[%s2752_s28 + $0xc88] sm:$0xff] }
  0x41   : > { %370 = vst [vmem:[%s2760_s29 + $0x308] sm:$0xff] %v369_v33  ;;  %372 = vst [vmem:[%s2760_s29 + $0x310] sm:$0xff] %v371_v34  ;;  %v379_v38 = vld [vmem:[%s2752_s28 + $0xc90] sm:$0xff]  ;;  %v381_v39 = vld [vmem:[%s2752_s28 + $0xc98] sm:$0xff] }
  0x42   : > { %374 = vst [vmem:[%s2760_s29 + $0x318] sm:$0xff] %v373_v35  ;;  %376 = vst [vmem:[%s2760_s29 + $0x320] sm:$0xff] %v375_v36  ;;  %v383_v40 = vld [vmem:[%s2752_s28 + $0xd00] sm:$0xff]  ;;  %v385_v41 = vld [vmem:[%s2752_s28 + $0xd08] sm:$0xff] }
  0x43   : > { %378 = vst [vmem:[%s2760_s29 + $0x328] sm:$0xff] %v377_v37  ;;  %380 = vst [vmem:[%s2760_s29 + $0x330] sm:$0xff] %v379_v38  ;;  %v387_v42 = vld [vmem:[%s2752_s28 + $0xd10] sm:$0xff]  ;;  %v389_v43 = vld [vmem:[%s2752_s28 + $0xd18] sm:$0xff] }
  0x44   : > { %382 = vst [vmem:[%s2760_s29 + $0x338] sm:$0xff] %v381_v39  ;;  %384 = vst [vmem:[%s2760_s29 + $0x340] sm:$0xff] %v383_v40  ;;  %v391_v44 = vld [vmem:[%s2752_s28 + $0xd80] sm:$0xff]  ;;  %v393_v45 = vld [vmem:[%s2752_s28 + $0xd88] sm:$0xff] }
  0x45   : > { %386 = vst [vmem:[%s2760_s29 + $0x348] sm:$0xff] %v385_v41  ;;  %388 = vst [vmem:[%s2760_s29 + $0x350] sm:$0xff] %v387_v42  ;;  %v395_v46 = vld [vmem:[%s2752_s28 + $0xd90] sm:$0xff]  ;;  %v397_v47 = vld [vmem:[%s2752_s28 + $0xd98] sm:$0xff] }
  0x46   : > { %390 = vst [vmem:[%s2760_s29 + $0x358] sm:$0xff] %v389_v43  ;;  %392 = vst [vmem:[%s2760_s29 + $0x360] sm:$0xff] %v391_v44  ;;  %v399_v48 = vld [vmem:[%s2752_s28 + $0xe00] sm:$0xff]  ;;  %v401_v49 = vld [vmem:[%s2752_s28 + $0xe08] sm:$0xff] }
  0x47   : > { %394 = vst [vmem:[%s2760_s29 + $0x368] sm:$0xff] %v393_v45  ;;  %396 = vst [vmem:[%s2760_s29 + $0x370] sm:$0xff] %v395_v46  ;;  %v403_v50 = vld [vmem:[%s2752_s28 + $0xe10] sm:$0xff]  ;;  %v405_v51 = vld [vmem:[%s2752_s28 + $0xe18] sm:$0xff] }
  0x48   : > { %398 = vst [vmem:[%s2760_s29 + $0x378] sm:$0xff] %v397_v47  ;;  %400 = vst [vmem:[%s2760_s29 + $0x380] sm:$0xff] %v399_v48  ;;  %v407_v52 = vld [vmem:[%s2752_s28 + $0xe80] sm:$0xff]  ;;  %v409_v53 = vld [vmem:[%s2752_s28 + $0xe88] sm:$0xff] }
  0x49   : > { %402 = vst [vmem:[%s2760_s29 + $0x388] sm:$0xff] %v401_v49  ;;  %404 = vst [vmem:[%s2760_s29 + $0x390] sm:$0xff] %v403_v50  ;;  %v411_v54 = vld [vmem:[%s2752_s28 + $0xe90] sm:$0xff]  ;;  %v413_v55 = vld [vmem:[%s2752_s28 + $0xe98] sm:$0xff] }
  0x4a   : > { %406 = vst [vmem:[%s2760_s29 + $0x398] sm:$0xff] %v405_v51  ;;  %408 = vst [vmem:[%s2760_s29 + $0x3a0] sm:$0xff] %v407_v52  ;;  %v415_v56 = vld [vmem:[%s2752_s28 + $0xf00] sm:$0xff]  ;;  %v417_v57 = vld [vmem:[%s2752_s28 + $0xf08] sm:$0xff] }
  0x4b   : > { %410 = vst [vmem:[%s2760_s29 + $0x3a8] sm:$0xff] %v409_v53  ;;  %412 = vst [vmem:[%s2760_s29 + $0x3b0] sm:$0xff] %v411_v54  ;;  %v419_v58 = vld [vmem:[%s2752_s28 + $0xf10] sm:$0xff]  ;;  %v421_v59 = vld [vmem:[%s2752_s28 + $0xf18] sm:$0xff] }
  0x4c   : > { %414 = vst [vmem:[%s2760_s29 + $0x3b8] sm:$0xff] %v413_v55  ;;  %416 = vst [vmem:[%s2760_s29 + $0x3c0] sm:$0xff] %v415_v56  ;;  %v423_v60 = vld [vmem:[%s2752_s28 + $0xf80] sm:$0xff]  ;;  %v425_v61 = vld [vmem:[%s2752_s28 + $0xf88] sm:$0xff] }
  0x4d   : > { %418 = vst [vmem:[%s2760_s29 + $0x3c8] sm:$0xff] %v417_v57  ;;  %420 = vst [vmem:[%s2760_s29 + $0x3d0] sm:$0xff] %v419_v58  ;;  %v427_v62 = vld [vmem:[%s2752_s28 + $0xf90] sm:$0xff]  ;;  %v429_v63 = vld [vmem:[%s2752_s28 + $0xf98] sm:$0xff] }
  0x4e   : > { %422 = vst [vmem:[%s2760_s29 + $0x3d8] sm:$0xff] %v421_v59  ;;  %424 = vst [vmem:[%s2760_s29 + $0x3e0] sm:$0xff] %v423_v60  ;;  %v431_v0 = vld [vmem:[%s2752_s28 + $0x1000] sm:$0xff]  ;;  %v433_v1 = vld [vmem:[%s2752_s28 + $0x1008] sm:$0xff] }
  0x4f   : > { %426 = vst [vmem:[%s2760_s29 + $0x3e8] sm:$0xff] %v425_v61  ;;  %428 = vst [vmem:[%s2760_s29 + $0x3f0] sm:$0xff] %v427_v62  ;;  %v435_v2 = vld [vmem:[%s2752_s28 + $0x1010] sm:$0xff]  ;;  %v437_v3 = vld [vmem:[%s2752_s28 + $0x1018] sm:$0xff] }
  0x50   : > { %430 = vst [vmem:[%s2760_s29 + $0x3f8] sm:$0xff] %v429_v63  ;;  %432 = vst [vmem:[%s2760_s29 + $0x400] sm:$0xff] %v431_v0  ;;  %v439_v4 = vld [vmem:[%s2752_s28 + $0x1080] sm:$0xff]  ;;  %v441_v5 = vld [vmem:[%s2752_s28 + $0x1088] sm:$0xff] }
  0x51   : > { %434 = vst [vmem:[%s2760_s29 + $0x408] sm:$0xff] %v433_v1  ;;  %436 = vst [vmem:[%s2760_s29 + $0x410] sm:$0xff] %v435_v2  ;;  %v443_v6 = vld [vmem:[%s2752_s28 + $0x1090] sm:$0xff]  ;;  %v445_v7 = vld [vmem:[%s2752_s28 + $0x1098] sm:$0xff] }
  0x52   : > { %438 = vst [vmem:[%s2760_s29 + $0x418] sm:$0xff] %v437_v3  ;;  %440 = vst [vmem:[%s2760_s29 + $0x420] sm:$0xff] %v439_v4  ;;  %v447_v8 = vld [vmem:[%s2752_s28 + $0x1100] sm:$0xff]  ;;  %v449_v9 = vld [vmem:[%s2752_s28 + $0x1108] sm:$0xff] }
  0x53   : > { %442 = vst [vmem:[%s2760_s29 + $0x428] sm:$0xff] %v441_v5  ;;  %444 = vst [vmem:[%s2760_s29 + $0x430] sm:$0xff] %v443_v6  ;;  %v451_v10 = vld [vmem:[%s2752_s28 + $0x1110] sm:$0xff]  ;;  %v453_v11 = vld [vmem:[%s2752_s28 + $0x1118] sm:$0xff] }
  0x54   : > { %446 = vst [vmem:[%s2760_s29 + $0x438] sm:$0xff] %v445_v7  ;;  %448 = vst [vmem:[%s2760_s29 + $0x440] sm:$0xff] %v447_v8  ;;  %v455_v12 = vld [vmem:[%s2752_s28 + $0x1180] sm:$0xff]  ;;  %v457_v13 = vld [vmem:[%s2752_s28 + $0x1188] sm:$0xff] }
  0x55   : > { %450 = vst [vmem:[%s2760_s29 + $0x448] sm:$0xff] %v449_v9  ;;  %452 = vst [vmem:[%s2760_s29 + $0x450] sm:$0xff] %v451_v10  ;;  %v459_v14 = vld [vmem:[%s2752_s28 + $0x1190] sm:$0xff]  ;;  %v461_v15 = vld [vmem:[%s2752_s28 + $0x1198] sm:$0xff] }
  0x56   : > { %454 = vst [vmem:[%s2760_s29 + $0x458] sm:$0xff] %v453_v11  ;;  %456 = vst [vmem:[%s2760_s29 + $0x460] sm:$0xff] %v455_v12  ;;  %v463_v16 = vld [vmem:[%s2752_s28 + $0x1200] sm:$0xff]  ;;  %v465_v17 = vld [vmem:[%s2752_s28 + $0x1208] sm:$0xff] }
  0x57   : > { %458 = vst [vmem:[%s2760_s29 + $0x468] sm:$0xff] %v457_v13  ;;  %460 = vst [vmem:[%s2760_s29 + $0x470] sm:$0xff] %v459_v14  ;;  %v467_v18 = vld [vmem:[%s2752_s28 + $0x1210] sm:$0xff]  ;;  %v469_v19 = vld [vmem:[%s2752_s28 + $0x1218] sm:$0xff] }
  0x58   : > { %462 = vst [vmem:[%s2760_s29 + $0x478] sm:$0xff] %v461_v15  ;;  %464 = vst [vmem:[%s2760_s29 + $0x480] sm:$0xff] %v463_v16  ;;  %v471_v20 = vld [vmem:[%s2752_s28 + $0x1280] sm:$0xff]  ;;  %v473_v21 = vld [vmem:[%s2752_s28 + $0x1288] sm:$0xff] }
  0x59   : > { %466 = vst [vmem:[%s2760_s29 + $0x488] sm:$0xff] %v465_v17  ;;  %468 = vst [vmem:[%s2760_s29 + $0x490] sm:$0xff] %v467_v18  ;;  %v475_v22 = vld [vmem:[%s2752_s28 + $0x1290] sm:$0xff]  ;;  %v477_v23 = vld [vmem:[%s2752_s28 + $0x1298] sm:$0xff] }
  0x5a   : > { %470 = vst [vmem:[%s2760_s29 + $0x498] sm:$0xff] %v469_v19  ;;  %472 = vst [vmem:[%s2760_s29 + $0x4a0] sm:$0xff] %v471_v20  ;;  %v479_v24 = vld [vmem:[%s2752_s28 + $0x1300] sm:$0xff]  ;;  %v481_v25 = vld [vmem:[%s2752_s28 + $0x1308] sm:$0xff] }
  0x5b   : > { %474 = vst [vmem:[%s2760_s29 + $0x4a8] sm:$0xff] %v473_v21  ;;  %476 = vst [vmem:[%s2760_s29 + $0x4b0] sm:$0xff] %v475_v22  ;;  %v483_v26 = vld [vmem:[%s2752_s28 + $0x1310] sm:$0xff]  ;;  %v485_v27 = vld [vmem:[%s2752_s28 + $0x1318] sm:$0xff] }
  0x5c   : > { %478 = vst [vmem:[%s2760_s29 + $0x4b8] sm:$0xff] %v477_v23  ;;  %480 = vst [vmem:[%s2760_s29 + $0x4c0] sm:$0xff] %v479_v24  ;;  %v487_v28 = vld [vmem:[%s2752_s28 + $0x1380] sm:$0xff]  ;;  %v489_v29 = vld [vmem:[%s2752_s28 + $0x1388] sm:$0xff] }
  0x5d   : > { %482 = vst [vmem:[%s2760_s29 + $0x4c8] sm:$0xff] %v481_v25  ;;  %484 = vst [vmem:[%s2760_s29 + $0x4d0] sm:$0xff] %v483_v26  ;;  %v491_v30 = vld [vmem:[%s2752_s28 + $0x1390] sm:$0xff]  ;;  %v493_v31 = vld [vmem:[%s2752_s28 + $0x1398] sm:$0xff] }
  0x5e   : > { %486 = vst [vmem:[%s2760_s29 + $0x4d8] sm:$0xff] %v485_v27  ;;  %488 = vst [vmem:[%s2760_s29 + $0x4e0] sm:$0xff] %v487_v28  ;;  %v495_v32 = vld [vmem:[%s2752_s28 + $0x1400] sm:$0xff]  ;;  %v497_v33 = vld [vmem:[%s2752_s28 + $0x1408] sm:$0xff] }
  0x5f   : > { %490 = vst [vmem:[%s2760_s29 + $0x4e8] sm:$0xff] %v489_v29  ;;  %492 = vst [vmem:[%s2760_s29 + $0x4f0] sm:$0xff] %v491_v30  ;;  %v499_v34 = vld [vmem:[%s2752_s28 + $0x1410] sm:$0xff]  ;;  %v501_v35 = vld [vmem:[%s2752_s28 + $0x1418] sm:$0xff] }
  0x60   : > { %494 = vst [vmem:[%s2760_s29 + $0x4f8] sm:$0xff] %v493_v31  ;;  %496 = vst [vmem:[%s2760_s29 + $0x500] sm:$0xff] %v495_v32  ;;  %v503_v36 = vld [vmem:[%s2752_s28 + $0x1480] sm:$0xff]  ;;  %v505_v37 = vld [vmem:[%s2752_s28 + $0x1488] sm:$0xff] }
  0x61   : > { %498 = vst [vmem:[%s2760_s29 + $0x508] sm:$0xff] %v497_v33  ;;  %500 = vst [vmem:[%s2760_s29 + $0x510] sm:$0xff] %v499_v34  ;;  %v507_v38 = vld [vmem:[%s2752_s28 + $0x1490] sm:$0xff]  ;;  %v509_v39 = vld [vmem:[%s2752_s28 + $0x1498] sm:$0xff] }
  0x62   : > { %502 = vst [vmem:[%s2760_s29 + $0x518] sm:$0xff] %v501_v35  ;;  %504 = vst [vmem:[%s2760_s29 + $0x520] sm:$0xff] %v503_v36  ;;  %v511_v40 = vld [vmem:[%s2752_s28 + $0x1500] sm:$0xff]  ;;  %v513_v41 = vld [vmem:[%s2752_s28 + $0x1508] sm:$0xff] }
  0x63   : > { %506 = vst [vmem:[%s2760_s29 + $0x528] sm:$0xff] %v505_v37  ;;  %508 = vst [vmem:[%s2760_s29 + $0x530] sm:$0xff] %v507_v38  ;;  %v515_v42 = vld [vmem:[%s2752_s28 + $0x1510] sm:$0xff]  ;;  %v517_v43 = vld [vmem:[%s2752_s28 + $0x1518] sm:$0xff] }
  0x64   : > { %510 = vst [vmem:[%s2760_s29 + $0x538] sm:$0xff] %v509_v39  ;;  %512 = vst [vmem:[%s2760_s29 + $0x540] sm:$0xff] %v511_v40  ;;  %v519_v44 = vld [vmem:[%s2752_s28 + $0x1580] sm:$0xff]  ;;  %v521_v45 = vld [vmem:[%s2752_s28 + $0x1588] sm:$0xff] }
  0x65   : > { %514 = vst [vmem:[%s2760_s29 + $0x548] sm:$0xff] %v513_v41  ;;  %516 = vst [vmem:[%s2760_s29 + $0x550] sm:$0xff] %v515_v42  ;;  %v523_v46 = vld [vmem:[%s2752_s28 + $0x1590] sm:$0xff]  ;;  %v525_v47 = vld [vmem:[%s2752_s28 + $0x1598] sm:$0xff] }
  0x66   : > { %518 = vst [vmem:[%s2760_s29 + $0x558] sm:$0xff] %v517_v43  ;;  %520 = vst [vmem:[%s2760_s29 + $0x560] sm:$0xff] %v519_v44  ;;  %v527_v48 = vld [vmem:[%s2752_s28 + $0x1600] sm:$0xff]  ;;  %v529_v49 = vld [vmem:[%s2752_s28 + $0x1608] sm:$0xff] }
  0x67   : > { %522 = vst [vmem:[%s2760_s29 + $0x568] sm:$0xff] %v521_v45  ;;  %524 = vst [vmem:[%s2760_s29 + $0x570] sm:$0xff] %v523_v46  ;;  %v531_v50 = vld [vmem:[%s2752_s28 + $0x1610] sm:$0xff]  ;;  %v533_v51 = vld [vmem:[%s2752_s28 + $0x1618] sm:$0xff] }
  0x68   : > { %526 = vst [vmem:[%s2760_s29 + $0x578] sm:$0xff] %v525_v47  ;;  %528 = vst [vmem:[%s2760_s29 + $0x580] sm:$0xff] %v527_v48  ;;  %v535_v52 = vld [vmem:[%s2752_s28 + $0x1680] sm:$0xff]  ;;  %v537_v53 = vld [vmem:[%s2752_s28 + $0x1688] sm:$0xff] }
  0x69   : > { %530 = vst [vmem:[%s2760_s29 + $0x588] sm:$0xff] %v529_v49  ;;  %532 = vst [vmem:[%s2760_s29 + $0x590] sm:$0xff] %v531_v50  ;;  %v539_v54 = vld [vmem:[%s2752_s28 + $0x1690] sm:$0xff]  ;;  %v541_v55 = vld [vmem:[%s2752_s28 + $0x1698] sm:$0xff] }
  0x6a   : > { %534 = vst [vmem:[%s2760_s29 + $0x598] sm:$0xff] %v533_v51  ;;  %536 = vst [vmem:[%s2760_s29 + $0x5a0] sm:$0xff] %v535_v52  ;;  %v543_v56 = vld [vmem:[%s2752_s28 + $0x1700] sm:$0xff]  ;;  %v545_v57 = vld [vmem:[%s2752_s28 + $0x1708] sm:$0xff] }
  0x6b   : > { %538 = vst [vmem:[%s2760_s29 + $0x5a8] sm:$0xff] %v537_v53  ;;  %540 = vst [vmem:[%s2760_s29 + $0x5b0] sm:$0xff] %v539_v54  ;;  %v547_v58 = vld [vmem:[%s2752_s28 + $0x1710] sm:$0xff]  ;;  %v549_v59 = vld [vmem:[%s2752_s28 + $0x1718] sm:$0xff] }
  0x6c   : > { %542 = vst [vmem:[%s2760_s29 + $0x5b8] sm:$0xff] %v541_v55  ;;  %544 = vst [vmem:[%s2760_s29 + $0x5c0] sm:$0xff] %v543_v56  ;;  %v551_v60 = vld [vmem:[%s2752_s28 + $0x1780] sm:$0xff]  ;;  %v553_v61 = vld [vmem:[%s2752_s28 + $0x1788] sm:$0xff] }
  0x6d   : > { %546 = vst [vmem:[%s2760_s29 + $0x5c8] sm:$0xff] %v545_v57  ;;  %548 = vst [vmem:[%s2760_s29 + $0x5d0] sm:$0xff] %v547_v58  ;;  %v555_v62 = vld [vmem:[%s2752_s28 + $0x1790] sm:$0xff]  ;;  %v557_v63 = vld [vmem:[%s2752_s28 + $0x1798] sm:$0xff] }
  0x6e   : > { %550 = vst [vmem:[%s2760_s29 + $0x5d8] sm:$0xff] %v549_v59  ;;  %552 = vst [vmem:[%s2760_s29 + $0x5e0] sm:$0xff] %v551_v60  ;;  %v559_v0 = vld [vmem:[%s2752_s28 + $0x1800] sm:$0xff]  ;;  %v561_v1 = vld [vmem:[%s2752_s28 + $0x1808] sm:$0xff] }
  0x6f   : > { %554 = vst [vmem:[%s2760_s29 + $0x5e8] sm:$0xff] %v553_v61  ;;  %556 = vst [vmem:[%s2760_s29 + $0x5f0] sm:$0xff] %v555_v62  ;;  %v563_v2 = vld [vmem:[%s2752_s28 + $0x1810] sm:$0xff]  ;;  %v565_v3 = vld [vmem:[%s2752_s28 + $0x1818] sm:$0xff] }
  0x70   : > { %558 = vst [vmem:[%s2760_s29 + $0x5f8] sm:$0xff] %v557_v63  ;;  %560 = vst [vmem:[%s2760_s29 + $0x600] sm:$0xff] %v559_v0  ;;  %v567_v4 = vld [vmem:[%s2752_s28 + $0x1880] sm:$0xff]  ;;  %v569_v5 = vld [vmem:[%s2752_s28 + $0x1888] sm:$0xff] }
  0x71   : > { %562 = vst [vmem:[%s2760_s29 + $0x608] sm:$0xff] %v561_v1  ;;  %564 = vst [vmem:[%s2760_s29 + $0x610] sm:$0xff] %v563_v2  ;;  %v571_v6 = vld [vmem:[%s2752_s28 + $0x1890] sm:$0xff]  ;;  %v573_v7 = vld [vmem:[%s2752_s28 + $0x1898] sm:$0xff] }
  0x72   : > { %566 = vst [vmem:[%s2760_s29 + $0x618] sm:$0xff] %v565_v3  ;;  %568 = vst [vmem:[%s2760_s29 + $0x620] sm:$0xff] %v567_v4  ;;  %v575_v8 = vld [vmem:[%s2752_s28 + $0x1900] sm:$0xff]  ;;  %v577_v9 = vld [vmem:[%s2752_s28 + $0x1908] sm:$0xff] }
  0x73   : > { %570 = vst [vmem:[%s2760_s29 + $0x628] sm:$0xff] %v569_v5  ;;  %572 = vst [vmem:[%s2760_s29 + $0x630] sm:$0xff] %v571_v6  ;;  %v579_v10 = vld [vmem:[%s2752_s28 + $0x1910] sm:$0xff]  ;;  %v581_v11 = vld [vmem:[%s2752_s28 + $0x1918] sm:$0xff] }
  0x74   : > { %574 = vst [vmem:[%s2760_s29 + $0x638] sm:$0xff] %v573_v7  ;;  %576 = vst [vmem:[%s2760_s29 + $0x640] sm:$0xff] %v575_v8  ;;  %v583_v12 = vld [vmem:[%s2752_s28 + $0x1980] sm:$0xff]  ;;  %v585_v13 = vld [vmem:[%s2752_s28 + $0x1988] sm:$0xff] }
  0x75   : > { %578 = vst [vmem:[%s2760_s29 + $0x648] sm:$0xff] %v577_v9  ;;  %580 = vst [vmem:[%s2760_s29 + $0x650] sm:$0xff] %v579_v10  ;;  %v587_v14 = vld [vmem:[%s2752_s28 + $0x1990] sm:$0xff]  ;;  %v589_v15 = vld [vmem:[%s2752_s28 + $0x1998] sm:$0xff] }
  0x76   : > { %582 = vst [vmem:[%s2760_s29 + $0x658] sm:$0xff] %v581_v11  ;;  %584 = vst [vmem:[%s2760_s29 + $0x660] sm:$0xff] %v583_v12  ;;  %v591_v16 = vld [vmem:[%s2752_s28 + $0x1a00] sm:$0xff]  ;;  %v593_v17 = vld [vmem:[%s2752_s28 + $0x1a08] sm:$0xff] }
  0x77   : > { %586 = vst [vmem:[%s2760_s29 + $0x668] sm:$0xff] %v585_v13  ;;  %588 = vst [vmem:[%s2760_s29 + $0x670] sm:$0xff] %v587_v14  ;;  %v595_v18 = vld [vmem:[%s2752_s28 + $0x1a10] sm:$0xff]  ;;  %v597_v19 = vld [vmem:[%s2752_s28 + $0x1a18] sm:$0xff] }
  0x78   : > { %590 = vst [vmem:[%s2760_s29 + $0x678] sm:$0xff] %v589_v15  ;;  %592 = vst [vmem:[%s2760_s29 + $0x680] sm:$0xff] %v591_v16  ;;  %v599_v20 = vld [vmem:[%s2752_s28 + $0x1a80] sm:$0xff]  ;;  %v601_v21 = vld [vmem:[%s2752_s28 + $0x1a88] sm:$0xff] }
  0x79   : > { %594 = vst [vmem:[%s2760_s29 + $0x688] sm:$0xff] %v593_v17  ;;  %596 = vst [vmem:[%s2760_s29 + $0x690] sm:$0xff] %v595_v18  ;;  %v603_v22 = vld [vmem:[%s2752_s28 + $0x1a90] sm:$0xff]  ;;  %v605_v23 = vld [vmem:[%s2752_s28 + $0x1a98] sm:$0xff] }
  0x7a   : > { %598 = vst [vmem:[%s2760_s29 + $0x698] sm:$0xff] %v597_v19  ;;  %600 = vst [vmem:[%s2760_s29 + $0x6a0] sm:$0xff] %v599_v20 }
  0x7b   : > { %602 = vst [vmem:[%s2760_s29 + $0x6a8] sm:$0xff] %v601_v21  ;;  %604 = vst [vmem:[%s2760_s29 + $0x6b0] sm:$0xff] %v603_v22 }
  0x7c   : > { %606 = vst [vmem:[%s2760_s29 + $0x6b8] sm:$0xff] %v605_v23 }
  0x7d PF: > { %p2406_p5 = scmp.ge.s32.totalorder %s2690_s17, 1  ;;  %p611_p6 = scmp.lt.s32.totalorder %s2690_s17, 5 }
  0x7f   : > { %p612_p7 = pnand %p2406_p5, %p611_p6 }
  0x80   : > { %s618_s30 = sand.u32 (!%p612_p7), 1, %s2682_s15   ;;  %s2407_s15 = sshll.u32 (!%p612_p7), %s2400_s18, 3 }
  0x81   : > { %615 = sbr.rel (%p612_p7) target bundleno = 561 (0x231), region = 55  ;;  %p645_p8 = scmp.lt.s32.totalorder (!%p612_p7), %s2407_s15, 31 }
  0x82   : > { %s2637_s9 = smul.u32 (!%p612_p7), 1728, %s618_s30 }
  0x84   : > { %s3212_s10 = scalar_lea.vmem (!%p612_p7), [#allocation2], %s2637_s9 }
  0x86   : > { %v3194_v24 = vld [vmem:[%s3506_s0 + $0x8] sm:$0xff]  ;;  %vm1962_vm0 = vcmask 392192   ;;  %v3199_v25 = vld [vmem:[%s3506_s0] sm:$0xff]  ;;  %v2692_v54 = vmov 0   ;;  %s3515_s15 = smov (!%p645_p8, %s2407_s15), 31 }
  0x87   : > { %v3203_v26 = vcombine.high %v3194_v24, %v3194_v24  ;;  %v3207_v27 = vcombine.high %v3199_v25, %v3199_v25  ;;  %v709_v28 = vld [vmem:[%s3212_s10 + $0x1c0] sm:$0xff]  ;;  %2663 = vset.pattern.permute.xlu0 %v2692_v54  ;;  %s2408_s20 = sshll.u32 %s3515_s15, 3 }
  0x88   : > { %v713_v29 = vld [vmem:[%s3212_s10 + $0x1e0] sm:$0xff]  ;;  %s3473_s21 = scalar_lea.vmem %s3510_s4, %s2408_s20 }
  0x89   : > { %2629 = vmatprep.mubr.msk.bf16.mxu1 %vm1962_vm0, %v3203_v26  ;;  %1998 = vmatprep.mubr.bf16.mxu0 %v3207_v27  ;;  %v837_v30 = vld [vmem:[%s3212_s10 + $0x5c0] sm:$0xff]  ;;  %v2470_v31 = vcombine.high %v709_v28, %v713_v29  ;;  %v2469_v33 = vcombine.low %v709_v28, %v713_v29 }
  0x8a   : > { %v841_v32 = vld [vmem:[%s3212_s10 + $0x5e0] sm:$0xff] }
  0x8b   : > { %v701_v34 = vld [vmem:[%s3212_s10 + $0x180] sm:$0xff]  ;;  %v2598_v36 = vcombine.high %v837_v30, %v841_v32  ;;  %v2597_v37 = vcombine.low %v837_v30, %v841_v32  ;;  %1966 = vmatprep.subr.bf16.mxu0 %v2470_v31 }
  0x8c   : > { %v705_v35 = vld [vmem:[%s3212_s10 + $0x1a0] sm:$0xff]  ;;  %1967 = vmatpush1.bf16.msra.mxu0 %v2469_v33 }
  0x8d   : > { %v2462_v38 = vcombine.high %v701_v34, %v705_v35  ;;  %v829_v39 = vld [vmem:[%s3212_s10 + $0x580] sm:$0xff]  ;;  %2007 = vmatprep.subr.bf16.mxu1 %v2598_v36  ;;  %v2461_v46 = vcombine.low %v701_v34, %v705_v35 }
  0x8e   : > { %v833_v40 = vld [vmem:[%s3212_s10 + $0x5a0] sm:$0xff]  ;;  %2008 = vmatpush1.bf16.msra.mxu1 %v2597_v37 }
  0x8f   : > { %v693_v41 = vld [vmem:[%s3212_s10 + $0x140] sm:$0xff]  ;;  %v2590_v42 = vcombine.high %v829_v39, %v833_v40  ;;  %1968 = vmatprep.subr.bf16.mxu0 %v2462_v38  ;;  %v2589_v47 = vcombine.low %v829_v39, %v833_v40 }
  0x90   : > { %v697_v43 = vld [vmem:[%s3212_s10 + $0x160] sm:$0xff]  ;;  %1969 = vmatpush1.bf16.msra.mxu0 %v2461_v46 }
  0x91   : > { %v821_v44 = vld [vmem:[%s3212_s10 + $0x540] sm:$0xff]  ;;  %v2454_v48 = vcombine.high %v693_v41, %v697_v43  ;;  %2009 = vmatprep.subr.bf16.mxu1 %v2590_v42  ;;  %v2453_v55 = vcombine.low %v693_v41, %v697_v43 }
  0x92   : > { %v825_v45 = vld [vmem:[%s3212_s10 + $0x560] sm:$0xff]  ;;  %2010 = vmatpush1.bf16.msra.mxu1 %v2589_v47 }
  0x93   : > { %v2582_v49 = vcombine.high %v821_v44, %v825_v45  ;;  %v685_v50 = vld [vmem:[%s3212_s10 + $0x100] sm:$0xff]  ;;  %1970 = vmatprep.subr.bf16.mxu0 %v2454_v48  ;;  %v2581_v56 = vcombine.low %v821_v44, %v825_v45 }
  0x94   : > { %v689_v51 = vld [vmem:[%s3212_s10 + $0x120] sm:$0xff]  ;;  %1971 = vmatpush1.bf16.msra.mxu0 %v2453_v55 }
  0x95   : > { %v813_v52 = vld [vmem:[%s3212_s10 + $0x500] sm:$0xff]  ;;  %v2446_v57 = vcombine.high %v685_v50, %v689_v51  ;;  %2011 = vmatprep.subr.bf16.mxu1 %v2582_v49  ;;  %v2445_v63 = vcombine.low %v685_v50, %v689_v51 }
  0x96   : > { %v817_v53 = vld [vmem:[%s3212_s10 + $0x520] sm:$0xff]  ;;  %2012 = vmatpush1.bf16.msra.mxu1 %v2581_v56 }
  0x97   : > { %v2574_v58 = vcombine.high %v813_v52, %v817_v53  ;;  %v677_v59 = vld [vmem:[%s3212_s10 + $0xc0] sm:$0xff]  ;;  %1972 = vmatprep.subr.bf16.mxu0 %v2446_v57  ;;  %v2573_v0 = vcombine.low %v813_v52, %v817_v53  ;;  %v710_v57 = vld [vmem:[%s3212_s10 + $0x1c8] sm:$0xff] }
  0x98   : > { %v681_v60 = vld [vmem:[%s3212_s10 + $0xe0] sm:$0xff]  ;;  %1973 = vmatpush1.bf16.msra.mxu0 %v2445_v63 }
  0x99   : > { %v805_v61 = vld [vmem:[%s3212_s10 + $0x4c0] sm:$0xff]  ;;  %v2438_v1 = vcombine.high %v677_v59, %v681_v60  ;;  %2013 = vmatprep.subr.bf16.mxu1 %v2574_v58  ;;  %v2437_v7 = vcombine.low %v677_v59, %v681_v60  ;;  %v714_v58 = vld [vmem:[%s3212_s10 + $0x1e8] sm:$0xff] }
  0x9a   : > { %v809_v62 = vld [vmem:[%s3212_s10 + $0x4e0] sm:$0xff]  ;;  %2014 = vmatpush1.bf16.msra.mxu1 %v2573_v0 }
  0x9b   : > { %v2566_v2 = vcombine.high %v805_v61, %v809_v62  ;;  %v669_v3 = vld [vmem:[%s3212_s10 + $0x80] sm:$0xff]  ;;  %1974 = vmatprep.subr.bf16.mxu0 %v2438_v1  ;;  %v2565_v8 = vcombine.low %v805_v61, %v809_v62  ;;  %v2472_v62 = vcombine.high %v710_v57, %v714_v58  ;;  %v702_v1 = vld [vmem:[%s3212_s10 + $0x188] sm:$0xff] }
  0x9c   : > { %v673_v4 = vld [vmem:[%s3212_s10 + $0xa0] sm:$0xff]  ;;  %1975 = vmatpush1.bf16.msra.mxu0 %v2437_v7 }
  0x9d   : > { %v797_v5 = vld [vmem:[%s3212_s10 + $0x480] sm:$0xff]  ;;  %v2430_v9 = vcombine.high %v669_v3, %v673_v4  ;;  %2015 = vmatprep.subr.bf16.mxu1 %v2566_v2  ;;  %v2429_v15 = vcombine.low %v669_v3, %v673_v4  ;;  %v706_v2 = vld [vmem:[%s3212_s10 + $0x1a8] sm:$0xff]  ;;  %v3268_v3 = vcombine.low %v3194_v24, %v3194_v24 }
  0x9e   : > { %v801_v6 = vld [vmem:[%s3212_s10 + $0x4a0] sm:$0xff]  ;;  %2016 = vmatpush1.bf16.msra.mxu1 %v2565_v8  ;;  %v2464_v8 = vcombine.high %v702_v1, %v706_v2  ;;  %v698_v24 = vld [vmem:[%s3212_s10 + $0x168] sm:$0xff] }
  0x9f   : > { %v2558_v10 = vcombine.high %v797_v5, %v801_v6  ;;  %v661_v11 = vld [vmem:[%s3212_s10 + $0x40] sm:$0xff]  ;;  %1976 = vmatprep.subr.bf16.mxu0 %v2430_v9  ;;  %v2557_v16 = vcombine.low %v797_v5, %v801_v6  ;;  %v2471_v5 = vcombine.low %v710_v57, %v714_v58 }
  0xa0   : > { %v665_v12 = vld [vmem:[%s3212_s10 + $0x60] sm:$0xff]  ;;  %1977 = vmatpush1.bf16.msra.mxu0 %v2429_v15 }
  0xa1   : > { %v789_v13 = vld [vmem:[%s3212_s10 + $0x440] sm:$0xff]  ;;  %v2422_v17 = vcombine.high %v661_v11, %v665_v12  ;;  %2017 = vmatprep.subr.bf16.mxu1 %v2558_v10  ;;  %v2421_v23 = vcombine.low %v661_v11, %v665_v12  ;;  %v694_v11 = vld [vmem:[%s3212_s10 + $0x148] sm:$0xff] }
  0xa2   : > { %v793_v14 = vld [vmem:[%s3212_s10 + $0x460] sm:$0xff]  ;;  %2018 = vmatpush1.bf16.msra.mxu1 %v2557_v16  ;;  %v2456_v16 = vcombine.high %v694_v11, %v698_v24 }
  0xa3   : > { %v2550_v18 = vcombine.high %v789_v13, %v793_v14  ;;  %v653_v19 = vld [vmem:[%s3212_s10] sm:$0xff]  ;;  %1978 = vmatprep.subr.bf16.mxu0 %v2422_v17  ;;  %v2549_v28 = vcombine.low %v789_v13, %v793_v14  ;;  %v2463_v14 = vcombine.low %v702_v1, %v706_v2 }
  0xa4   : > { %v657_v20 = vld [vmem:[%s3212_s10 + $0x20] sm:$0xff]  ;;  %1979 = vmatpush1.bf16.msra.mxu0 %v2421_v23 }
  0xa5   : > { %v781_v21 = vld [vmem:[%s3212_s10 + $0x400] sm:$0xff]  ;;  %v2414_v29 = vcombine.high %v653_v19, %v657_v20  ;;  %2019 = vmatprep.subr.bf16.mxu1 %v2550_v18  ;;  %v2413_v35 = vcombine.low %v653_v19, %v657_v20  ;;  %v686_v19 = vld [vmem:[%s3212_s10 + $0x108] sm:$0xff] }
  0xa6   : > { %v785_v22 = vld [vmem:[%s3212_s10 + $0x420] sm:$0xff]  ;;  %2020 = vmatpush1.bf16.msra.mxu1 %v2549_v28  ;;  %v690_v20 = vld [vmem:[%s3212_s10 + $0x128] sm:$0xff] }
  0xa7   : > { %v2542_v30 = vcombine.high %v781_v21, %v785_v22  ;;  %v773_v31 = vld [vmem:[%s3212_s10 + $0x3c0] sm:$0xff]  ;;  %1980 = vmatprep.subr.bf16.mxu0 %v2414_v29  ;;  %v2541_v36 = vcombine.low %v781_v21, %v785_v22  ;;  %v2455_v22 = vcombine.low %v694_v11, %v698_v24  ;;  %v2448_v28 = vcombine.high %v686_v19, %v690_v20 }
  0xa8   : > { %v777_v32 = vld [vmem:[%s3212_s10 + $0x3e0] sm:$0xff]  ;;  %1981 = vmatpush1.bf16.msra.mxu0 %v2413_v35 }
  0xa9   : > { %v861_v33 = vld [vmem:[%s3212_s10 + $0x680] sm:$0xff]  ;;  %v2534_v37 = vcombine.high %v773_v31, %v777_v32  ;;  %2021 = vmatprep.subr.bf16.mxu1 %v2542_v30  ;;  %v2533_v43 = vcombine.low %v773_v31, %v777_v32  ;;  %v678_v31 = vld [vmem:[%s3212_s10 + $0xc8] sm:$0xff] }
  0xaa   : > { %v865_v34 = vld [vmem:[%s3212_s10 + $0x6a0] sm:$0xff]  ;;  %2022 = vmatpush1.bf16.msra.mxu1 %v2541_v36  ;;  %v682_v32 = vld [vmem:[%s3212_s10 + $0xe8] sm:$0xff] }
  0xab   : > { %v2622_v38 = vcombine.high %v861_v33, %v865_v34  ;;  %v765_v39 = vld [vmem:[%s3212_s10 + $0x380] sm:$0xff]  ;;  %1982 = vmatprep.subr.bf16.mxu0 %v2534_v37  ;;  %v2621_v44 = vcombine.low %v861_v33, %v865_v34  ;;  %v2447_v34 = vcombine.low %v686_v19, %v690_v20  ;;  %v2440_v36 = vcombine.high %v678_v31, %v682_v32  ;;  %v838_v37 = vld [vmem:[%s3212_s10 + $0x5c8] sm:$0xff] }
  0xac   : > { %v769_v40 = vld [vmem:[%s3212_s10 + $0x3a0] sm:$0xff]  ;;  %1983 = vmatpush2.bf16.msra.mxu0 %v2533_v43 }
  0xad   : > { %v853_v41 = vld [vmem:[%s3212_s10 + $0x640] sm:$0xff]  ;;  %v2526_v45 = vcombine.high %v765_v39, %v769_v40  ;;  %2033 = vmatprep.subr.bf16.mxu1 %v2622_v38  ;;  %v2525_v51 = vcombine.low %v765_v39, %v769_v40  ;;  %v842_v38 = vld [vmem:[%s3212_s10 + $0x5e8] sm:$0xff] }
  0xae   : > { %v857_v42 = vld [vmem:[%s3212_s10 + $0x660] sm:$0xff]  ;;  %2034 = vmatpush2.bf16.msra.mxu1 %v2621_v44  ;;  %v670_v39 = vld [vmem:[%s3212_s10 + $0x88] sm:$0xff]  ;;  %v2600_v43 = vcombine.high %v838_v37, %v842_v38 }
  0xaf   : > { %v2614_v46 = vcombine.high %v853_v41, %v857_v42  ;;  %v757_v47 = vld [vmem:[%s3212_s10 + $0x340] sm:$0xff]  ;;  %1984 = vmatprep.subr.bf16.mxu0 %v2526_v45  ;;  %v2613_v52 = vcombine.low %v853_v41, %v857_v42  ;;  %v674_v40 = vld [vmem:[%s3212_s10 + $0xa8] sm:$0xff]  ;;  %v2439_v42 = vcombine.low %v678_v31, %v682_v32 }
  0xb0   : > { %v761_v48 = vld [vmem:[%s3212_s10 + $0x360] sm:$0xff]  ;;  %1985 = vmatpush2.bf16.msra.mxu0 %v2525_v51  ;;  %v2432_v44 = vcombine.high %v670_v39, %v674_v40  ;;  %v830_v45 = vld [vmem:[%s3212_s10 + $0x588] sm:$0xff]  ;;  %v2431_v51 = vcombine.low %v670_v39, %v674_v40 }
  0xb1   : > { %v845_v49 = vld [vmem:[%s3212_s10 + $0x600] sm:$0xff]  ;;  %v2518_v53 = vcombine.high %v757_v47, %v761_v48  ;;  %2035 = vmatprep.subr.bf16.mxu1 %v2614_v46  ;;  %v2517_v59 = vcombine.low %v757_v47, %v761_v48  ;;  %v834_v46 = vld [vmem:[%s3212_s10 + $0x5a8] sm:$0xff]  ;;  %v3298_v47 = vcombine.low %v3199_v25, %v3199_v25 }
  0xb2   : > { %v849_v50 = vld [vmem:[%s3212_s10 + $0x620] sm:$0xff]  ;;  %2036 = vmatpush2.bf16.msra.mxu1 %v2613_v52  ;;  %v662_v48 = vld [vmem:[%s3212_s10 + $0x48] sm:$0xff]  ;;  %v2592_v52 = vcombine.high %v830_v45, %v834_v46  ;;  %v2591_v57 = vcombine.low %v830_v45, %v834_v46 }
  0xb3   : > { %v2606_v54 = vcombine.high %v845_v49, %v849_v50  ;;  %v749_v55 = vld [vmem:[%s3212_s10 + $0x300] sm:$0xff]  ;;  %1986 = vmatprep.subr.bf16.mxu0 %v2518_v53  ;;  %v2605_v60 = vcombine.low %v845_v49, %v849_v50  ;;  %v666_v49 = vld [vmem:[%s3212_s10 + $0x68] sm:$0xff]  ;;  %v2599_v50 = vcombine.low %v838_v37, %v842_v38 }
  0xb4   : > { %v753_v56 = vld [vmem:[%s3212_s10 + $0x320] sm:$0xff]  ;;  %1987 = vmatpush2.bf16.msra.mxu0 %v2517_v59  ;;  %v2424_v53 = vcombine.high %v662_v48, %v666_v49  ;;  %v654_v25 = vld [vmem:[%s3212_s10 + $0x8] sm:$0xff]  ;;  %v2423_v58 = vcombine.low %v662_v48, %v666_v49 }
  0xb5   : > { %v2510_v61 = vcombine.high %v749_v55, %v753_v56  ;;  %2037 = vmatprep.subr.bf16.mxu1 %v2606_v54  ;;  %v741_v63 = vld [vmem:[%s3212_s10 + $0x2c0] sm:$0xff]  ;;  %v2509_v4 = vcombine.low %v749_v55, %v753_v56  ;;  %v822_v54 = vld [vmem:[%s3212_s10 + $0x548] sm:$0xff] }
  0xb6   : > { %v745_v0 = vld [vmem:[%s3212_s10 + $0x2e0] sm:$0xff]  ;;  %2038 = vmatpush2.bf16.msra.mxu1 %v2605_v60  ;;  %v826_v55 = vld [vmem:[%s3212_s10 + $0x568] sm:$0xff] }
  0xb7   : > { %1988 = vmatprep.subr.bf16.mxu0 %v2510_v61  ;;  %v2502_v6 = vcombine.high %v741_v63, %v745_v0  ;;  %v2294_v7 = vld [vmem:[%s3508_s2] sm:$0xff]  ;;  %2048 = vmatprep.subr.bf16.mxu1 %v2472_v62  ;;  %v2501_v12 = vcombine.low %v741_v63, %v745_v0  ;;  %v658_v56 = vld [vmem:[%s3212_s10 + $0x28] sm:$0xff]  ;;  %v2584_v59 = vcombine.high %v822_v54, %v826_v55 }
  0xb8   : > { %v733_v9 = vld [vmem:[%s3212_s10 + $0x280] sm:$0xff]  ;;  %2297 = vperm.xlu0 %2663, %v2294_v7   ;;  %1989 = vmatpush2.bf16.msra.mxu0 %v2509_v4  ;;  %v2416_v60 = vcombine.high %v654_v25, %v658_v56  ;;  %v814_v61 = vld [vmem:[%s3212_s10 + $0x508] sm:$0xff]  ;;  %v2583_v1 = vcombine.low %v822_v54, %v826_v55  ;;  %v2415_v2 = vcombine.low %v654_v25, %v658_v56 }
  0xb9   : > { %v737_v10 = vld [vmem:[%s3212_s10 + $0x2a0] sm:$0xff]  ;;  %2040 = vmatmul.mubr.bf16.vlgmr.msra.gmra.mxu1 %v3268_v3  ;;  %1990 = vmatprep.subr.bf16.mxu0 %v2502_v6  ;;  %v818_v62 = vld [vmem:[%s3212_s10 + $0x528] sm:$0xff] }
  0xba   : > { %v2308_v13 = vld [vmem:[%s3509_s3] sm:$0xff]  ;;  %2049 = vmatpush1.bf16.msra.mxu1 %v2471_v5  ;;  %v2494_v15 = vcombine.high %v733_v9, %v737_v10  ;;  %2080 = vmatprep.mubr.bf16.mxu1 %v3207_v27  ;;  %v2493_v21 = vcombine.low %v733_v9, %v737_v10  ;;  %v774_v63 = vld [vmem:[%s3212_s10 + $0x3c8] sm:$0xff]  ;;  %v2576_v4 = vcombine.high %v814_v61, %v818_v62 }
  0xbb   : > { %2050 = vmatprep.subr.bf16.mxu1 %v2464_v8  ;;  %v725_v17 = vld [vmem:[%s3212_s10 + $0x240] sm:$0xff]  ;;  %v778_v0 = vld [vmem:[%s3212_s10 + $0x3e8] sm:$0xff]  ;;  %v2575_v10 = vcombine.low %v814_v61, %v818_v62 }
  0xbc   : > { %v729_v18 = vld [vmem:[%s3212_s10 + $0x260] sm:$0xff]  ;;  %2311 = vperm.xlu0 %2663, %v2308_v13   ;;  %1991 = vmatpush2.bf16.msra.mxu0 %v2501_v12  ;;  %v2536_v5 = vcombine.high %v774_v63, %v778_v0  ;;  %v806_v6 = vld [vmem:[%s3212_s10 + $0x4c8] sm:$0xff]  ;;  %v2535_v11 = vcombine.low %v774_v63, %v778_v0 }
  0xbd   : > { %1992 = vmatprep.subr.bf16.mxu0 %v2494_v15  ;;  %v2486_v23 = vcombine.high %v725_v17, %v729_v18  ;;  %v717_v29 = vld [vmem:[%s3212_s10 + $0x200] sm:$0xff]  ;;  %v2485_v33 = vcombine.low %v725_v17, %v729_v18  ;;  %v810_v7 = vld [vmem:[%s3212_s10 + $0x4e8] sm:$0xff] }
  0xbe   : > { %2051 = vmatpush1.bf16.msra.mxu1 %v2463_v14  ;;  %v721_v30 = vld [vmem:[%s3212_s10 + $0x220] sm:$0xff]  ;;  %v766_v8 = vld [vmem:[%s3212_s10 + $0x388] sm:$0xff]  ;;  %v2568_v24 = vcombine.high %v806_v6, %v810_v7  ;;  %v2567_v17 = vcombine.low %v806_v6, %v810_v7 }
  0xbf   : > { %2052 = vmatprep.subr.bf16.mxu1 %v2456_v16  ;;  %v2478_v35 = vcombine.high %v717_v29, %v721_v30  ;;  %v2477_v41 = vcombine.low %v717_v29, %v721_v30  ;;  %v770_v9 = vld [vmem:[%s3212_s10 + $0x3a8] sm:$0xff] }
  0xc0   : > { %1993 = vmatpush2.bf16.msra.mxu0 %v2493_v21  ;;  %v2528_v12 = vcombine.high %v766_v8, %v770_v9  ;;  %v798_v13 = vld [vmem:[%s3212_s10 + $0x488] sm:$0xff]  ;;  %v2527_v18 = vcombine.low %v766_v8, %v770_v9 }
  0xc1   : > { %1994 = vmatprep.subr.bf16.mxu0 %v2486_v23  ;;  %v802_v14 = vld [vmem:[%s3212_s10 + $0x4a8] sm:$0xff] }
  0xc2   : > { %2053 = vmatpush1.bf16.msra.mxu1 %v2455_v22  ;;  %v758_v15 = vld [vmem:[%s3212_s10 + $0x348] sm:$0xff]  ;;  %v2560_v19 = vcombine.high %v798_v13, %v802_v14  ;;  %v2559_v29 = vcombine.low %v798_v13, %v802_v14 }
  0xc3   : > { %2054 = vmatprep.subr.bf16.mxu1 %v2448_v28  ;;  %v762_v16 = vld [vmem:[%s3212_s10 + $0x368] sm:$0xff] }
  0xc4   : > { %1995 = vmatpush2.bf16.msra.mxu0 %v2485_v33  ;;  %v2520_v20 = vcombine.high %v758_v15, %v762_v16  ;;  %v790_v21 = vld [vmem:[%s3212_s10 + $0x448] sm:$0xff]  ;;  %v2519_v30 = vcombine.low %v758_v15, %v762_v16 }
  0xc5   : > { %1996 = vmatprep.subr.bf16.mxu0 %v2478_v35  ;;  %v794_v22 = vld [vmem:[%s3212_s10 + $0x468] sm:$0xff] }
  0xc6   : > { %2055 = vmatpush1.bf16.msra.mxu1 %v2447_v34  ;;  %v750_v23 = vld [vmem:[%s3212_s10 + $0x308] sm:$0xff]  ;;  %v2552_v31 = vcombine.high %v790_v21, %v794_v22  ;;  %v2551_v37 = vcombine.low %v790_v21, %v794_v22 }
  0xc7   : > { %2056 = vmatprep.subr.bf16.mxu1 %v2440_v36  ;;  %v754_v28 = vld [vmem:[%s3212_s10 + $0x328] sm:$0xff] }
  0xc8   : > { %1997 = vmatpush2.bf16.msra.mxu0 %v2477_v41  ;;  %v2512_v32 = vcombine.high %v750_v23, %v754_v28  ;;  %v782_v33 = vld [vmem:[%s3212_s10 + $0x408] sm:$0xff]  ;;  %v2511_v38 = vcombine.low %v750_v23, %v754_v28 }
  0xc9   : > { %2089 = vmatprep.subr.bf16.mxu0 %v2600_v43  ;;  %v786_v34 = vld [vmem:[%s3212_s10 + $0x428] sm:$0xff] }
  0xca   : > { %2057 = vmatpush1.bf16.msra.mxu1 %v2439_v42  ;;  %v742_v35 = vld [vmem:[%s3212_s10 + $0x2c8] sm:$0xff]  ;;  %v2544_v39 = vcombine.high %v782_v33, %v786_v34  ;;  %v2543_v45 = vcombine.low %v782_v33, %v786_v34 }
  0xcb   : > { %2058 = vmatprep.subr.bf16.mxu1 %v2432_v44  ;;  %1999 = vmatmul.mubr.bf16.vlgmr.msra.gmra.mxu0 %v3298_v47  ;;  %v746_v36 = vld [vmem:[%s3212_s10 + $0x2e8] sm:$0xff] }
  0xcc   : > { %2090 = vmatpush1.bf16.msra.mxu0 %v2599_v50  ;;  %2630 = vmatprep.mubr.msk.bf16.mxu0 %vm1962_vm0, %v3203_v26  ;;  %v2504_v40 = vcombine.high %v742_v35, %v746_v36  ;;  %v862_v41 = vld [vmem:[%s3212_s10 + $0x688] sm:$0xff]  ;;  %v2503_v46 = vcombine.low %v742_v35, %v746_v36 }
  0xcd   : > { %2091 = vmatprep.subr.bf16.mxu0 %v2592_v52  ;;  %v866_v42 = vld [vmem:[%s3212_s10 + $0x6a8] sm:$0xff] }
  0xce   : > { %2059 = vmatpush1.bf16.msra.mxu1 %v2431_v51  ;;  %v734_v43 = vld [vmem:[%s3212_s10 + $0x288] sm:$0xff]  ;;  %v2624_v48 = vcombine.high %v862_v41, %v866_v42  ;;  %v2623_v54 = vcombine.low %v862_v41, %v866_v42 }
  0xcf   : > { %2060 = vmatprep.subr.bf16.mxu1 %v2424_v53  ;;  %v738_v44 = vld [vmem:[%s3212_s10 + $0x2a8] sm:$0xff] }
  0xd0   : > { %2092 = vmatpush1.bf16.msra.mxu0 %v2591_v57  ;;  %v2496_v49 = vcombine.high %v734_v43, %v738_v44  ;;  %v854_v50 = vld [vmem:[%s3212_s10 + $0x648] sm:$0xff]  ;;  %v2495_v55 = vcombine.low %v734_v43, %v738_v44 }
  0xd1   : > { %2093 = vmatprep.subr.bf16.mxu0 %v2584_v59  ;;  %v858_v51 = vld [vmem:[%s3212_s10 + $0x668] sm:$0xff] }
  0xd2   : > { %2061 = vmatpush1.bf16.msra.mxu1 %v2423_v58  ;;  %v726_v52 = vld [vmem:[%s3212_s10 + $0x248] sm:$0xff]  ;;  %v2616_v25 = vcombine.high %v854_v50, %v858_v51  ;;  %v2615_v61 = vcombine.low %v854_v50, %v858_v51 }
  0xd3   : > { %2062 = vmatprep.subr.bf16.mxu1 %v2416_v60  ;;  %v730_v53 = vld [vmem:[%s3212_s10 + $0x268] sm:$0xff] }
  0xd4   : > { %2094 = vmatpush1.bf16.msra.mxu0 %v2583_v1  ;;  %v2488_v56 = vcombine.high %v726_v52, %v730_v53  ;;  %v846_v57 = vld [vmem:[%s3212_s10 + $0x608] sm:$0xff]  ;;  %v2487_v62 = vcombine.low %v726_v52, %v730_v53  ;;  %v711_v1 = vld [vmem:[%s3212_s10 + $0x1d0] sm:$0xff] }
  0xd5   : > { %2095 = vmatprep.subr.bf16.mxu0 %v2576_v4  ;;  %v850_v58 = vld [vmem:[%s3212_s10 + $0x628] sm:$0xff]  ;;  %v839_v4 = vld [vmem:[%s3212_s10 + $0x5d0] sm:$0xff] }
  0xd6   : > { %2063 = vmatpush1.bf16.msra.mxu1 %v2415_v2  ;;  %v718_v59 = vld [vmem:[%s3212_s10 + $0x208] sm:$0xff]  ;;  %v2608_v63 = vcombine.high %v846_v57, %v850_v58  ;;  %v715_v2 = vld [vmem:[%s3212_s10 + $0x1f0] sm:$0xff]  ;;  %v2607_v6 = vcombine.low %v846_v57, %v850_v58 }
  0xd7   : > { %2064 = vmatprep.subr.bf16.mxu1 %v2536_v5  ;;  %v722_v60 = vld [vmem:[%s3212_s10 + $0x228] sm:$0xff]  ;;  %v843_v5 = vld [vmem:[%s3212_s10 + $0x5f0] sm:$0xff]  ;;  %v2474_v8 = vcombine.high %v711_v1, %v715_v2  ;;  %v2473_v13 = vcombine.low %v711_v1, %v715_v2 }
  0xd8   : > { %2096 = vmatpush1.bf16.msra.mxu0 %v2575_v10  ;;  %v2480_v0 = vcombine.high %v718_v59, %v722_v60  ;;  %v2479_v7 = vcombine.low %v718_v59, %v722_v60  ;;  %v2602_v9 = vcombine.high %v839_v4, %v843_v5  ;;  %v703_v10 = vld [vmem:[%s3212_s10 + $0x190] sm:$0xff]  ;;  %v2601_v14 = vcombine.low %v839_v4, %v843_v5 }
  0xd9   : > { %2097 = vmatprep.subr.bf16.mxu0 %v2568_v24  ;;  %v831_v24 = vld [vmem:[%s3212_s10 + $0x590] sm:$0xff] }
  0xda   : > { %2065 = vmatpush2.bf16.msra.mxu1 %v2535_v11  ;;  %v707_v11 = vld [vmem:[%s3212_s10 + $0x1b0] sm:$0xff] }
  0xdb   : > { %2066 = vmatprep.subr.bf16.mxu1 %v2528_v12  ;;  %v835_v12 = vld [vmem:[%s3212_s10 + $0x5b0] sm:$0xff]  ;;  %v2466_v15 = vcombine.high %v703_v10, %v707_v11  ;;  %v2465_v21 = vcombine.low %v703_v10, %v707_v11 }
  0xdc   : > { %2098 = vmatpush1.bf16.msra.mxu0 %v2567_v17  ;;  %v2594_v16 = vcombine.high %v831_v24, %v835_v12  ;;  %v695_v17 = vld [vmem:[%s3212_s10 + $0x150] sm:$0xff]  ;;  %v2593_v22 = vcombine.low %v831_v24, %v835_v12 }
  0xdd   : > { %2099 = vmatprep.subr.bf16.mxu0 %v2560_v19  ;;  %v823_v19 = vld [vmem:[%s3212_s10 + $0x550] sm:$0xff] }
  0xde   : > { %2067 = vmatpush2.bf16.msra.mxu1 %v2527_v18  ;;  %v699_v18 = vld [vmem:[%s3212_s10 + $0x170] sm:$0xff] }
  0xdf   : > { %2068 = vmatprep.subr.bf16.mxu1 %v2520_v20  ;;  %v827_v20 = vld [vmem:[%s3212_s10 + $0x570] sm:$0xff]  ;;  %v2458_v23 = vcombine.high %v695_v17, %v699_v18  ;;  %v2457_v33 = vcombine.low %v695_v17, %v699_v18 }
  0xe0   : > { %2100 = vmatpush1.bf16.msra.mxu0 %v2559_v29  ;;  %v2586_v28 = vcombine.high %v823_v19, %v827_v20  ;;  %v687_v29 = vld [vmem:[%s3212_s10 + $0x110] sm:$0xff]  ;;  %v2585_v34 = vcombine.low %v823_v19, %v827_v20 }
  0xe1   : > { %2101 = vmatprep.subr.bf16.mxu0 %v2552_v31  ;;  %v815_v31 = vld [vmem:[%s3212_s10 + $0x510] sm:$0xff] }
  0xe2   : > { %2069 = vmatpush2.bf16.msra.mxu1 %v2519_v30  ;;  %v691_v30 = vld [vmem:[%s3212_s10 + $0x130] sm:$0xff] }
  0xe3   : > { %2070 = vmatprep.subr.bf16.mxu1 %v2512_v32  ;;  %v819_v32 = vld [vmem:[%s3212_s10 + $0x530] sm:$0xff]  ;;  %v2450_v35 = vcombine.high %v687_v29, %v691_v30  ;;  %v2449_v41 = vcombine.low %v687_v29, %v691_v30 }
  0xe4   : > { %2102 = vmatpush1.bf16.msra.mxu0 %v2551_v37  ;;  %v2578_v36 = vcombine.high %v815_v31, %v819_v32  ;;  %v679_v37 = vld [vmem:[%s3212_s10 + $0xd0] sm:$0xff]  ;;  %v2577_v42 = vcombine.low %v815_v31, %v819_v32 }
  0xe5   : > { %2103 = vmatprep.subr.bf16.mxu0 %v2544_v39  ;;  %v807_v39 = vld [vmem:[%s3212_s10 + $0x4d0] sm:$0xff] }
  0xe6   : > { %2071 = vmatpush2.bf16.msra.mxu1 %v2511_v38  ;;  %v683_v38 = vld [vmem:[%s3212_s10 + $0xf0] sm:$0xff] }
  0xe7   : > { %2072 = vmatprep.subr.bf16.mxu1 %v2504_v40  ;;  %v811_v40 = vld [vmem:[%s3212_s10 + $0x4f0] sm:$0xff]  ;;  %v2442_v43 = vcombine.high %v679_v37, %v683_v38  ;;  %v2441_v50 = vcombine.low %v679_v37, %v683_v38 }
  0xe8   : > { %2104 = vmatpush1.bf16.msra.mxu0 %v2543_v45  ;;  %v2570_v44 = vcombine.high %v807_v39, %v811_v40  ;;  %v671_v45 = vld [vmem:[%s3212_s10 + $0x90] sm:$0xff]  ;;  %v2569_v51 = vcombine.low %v807_v39, %v811_v40 }
  0xe9   : > { %2115 = vmatprep.subr.bf16.mxu0 %v2624_v48  ;;  %v799_v48 = vld [vmem:[%s3212_s10 + $0x490] sm:$0xff] }
  0xea   : > { %2073 = vmatpush2.bf16.msra.mxu1 %v2503_v46  ;;  %v675_v46 = vld [vmem:[%s3212_s10 + $0xb0] sm:$0xff] }
  0xeb   : > { %2074 = vmatprep.subr.bf16.mxu1 %v2496_v49  ;;  %v803_v49 = vld [vmem:[%s3212_s10 + $0x4b0] sm:$0xff]  ;;  %v2434_v52 = vcombine.high %v671_v45, %v675_v46  ;;  %v2433_v57 = vcombine.low %v671_v45, %v675_v46 }
  0xec   : > { %2116 = vmatpush2.bf16.msra.mxu0 %v2623_v54  ;;  %v2562_v53 = vcombine.high %v799_v48, %v803_v49  ;;  %v663_v54 = vld [vmem:[%s3212_s10 + $0x50] sm:$0xff]  ;;  %v2561_v58 = vcombine.low %v799_v48, %v803_v49 }
  0xed   : > { %2117 = vmatprep.subr.bf16.mxu0 %v2616_v25  ;;  %v791_v25 = vld [vmem:[%s3212_s10 + $0x450] sm:$0xff] }
  0xee   : > { %2075 = vmatpush2.bf16.msra.mxu1 %v2495_v55  ;;  %v667_v55 = vld [vmem:[%s3212_s10 + $0x70] sm:$0xff] }
  0xef   : > { %2076 = vmatprep.subr.bf16.mxu1 %v2488_v56  ;;  %v795_v56 = vld [vmem:[%s3212_s10 + $0x470] sm:$0xff]  ;;  %v2426_v59 = vcombine.high %v663_v54, %v667_v55  ;;  %v2425_v1 = vcombine.low %v663_v54, %v667_v55 }
  0xf0   : > { %2118 = vmatpush2.bf16.msra.mxu0 %v2615_v61  ;;  %v2554_v60 = vcombine.high %v791_v25, %v795_v56  ;;  %v655_v61 = vld [vmem:[%s3212_s10 + $0x10] sm:$0xff]  ;;  %v2553_v2 = vcombine.low %v791_v25, %v795_v56 }
  0xf1   : > { %2119 = vmatprep.subr.bf16.mxu0 %v2608_v63  ;;  %v783_v63 = vld [vmem:[%s3212_s10 + $0x410] sm:$0xff] }
  0xf2   : > { %2077 = vmatpush2.bf16.msra.mxu1 %v2487_v62  ;;  %v659_v62 = vld [vmem:[%s3212_s10 + $0x30] sm:$0xff] }
  0xf3   : > { %2078 = vmatprep.subr.bf16.mxu1 %v2480_v0  ;;  %v787_v0 = vld [vmem:[%s3212_s10 + $0x430] sm:$0xff]  ;;  %v2418_v4 = vcombine.high %v655_v61, %v659_v62  ;;  %v2417_v10 = vcombine.low %v655_v61, %v659_v62 }
  0xf4   : > { %2120 = vmatpush2.bf16.msra.mxu0 %v2607_v6  ;;  %v2546_v5 = vcombine.high %v783_v63, %v787_v0  ;;  %v775_v6 = vld [vmem:[%s3212_s10 + $0x3d0] sm:$0xff]  ;;  %v2545_v11 = vcombine.low %v783_v63, %v787_v0 }
  0xf5   : > { %2130 = vmatprep.subr.bf16.mxu0 %v2474_v8  ;;  %v863_v8 = vld [vmem:[%s3212_s10 + $0x690] sm:$0xff] }
  0xf6   : > { %2079 = vmatpush2.bf16.msra.mxu1 %v2479_v7  ;;  %v779_v7 = vld [vmem:[%s3212_s10 + $0x3f0] sm:$0xff] }
  0xf7   : > { %2171 = vmatprep.subr.bf16.mxu1 %v2602_v9  ;;  %2122 = vmatmul.mubr.bf16.vlgmr.msra.gmra.mxu0 %v3268_v3  ;;  %v867_v9 = vld [vmem:[%s3212_s10 + $0x6b0] sm:$0xff]  ;;  %v2538_v24 = vcombine.high %v775_v6, %v779_v7  ;;  %v2537_v17 = vcombine.low %v775_v6, %v779_v7 }
  0xf8   : > { %2131 = vmatpush1.bf16.msra.mxu0 %v2473_v13  ;;  %2162 = vmatprep.mubr.bf16.mxu0 %v3207_v27  ;;  %v2626_v12 = vcombine.high %v863_v8, %v867_v9  ;;  %v767_v13 = vld [vmem:[%s3212_s10 + $0x390] sm:$0xff]  ;;  %v2625_v18 = vcombine.low %v863_v8, %v867_v9  ;;  %v840_v9 = vld [vmem:[%s3212_s10 + $0x5d8] sm:$0xff] }
  0xf9   : > { %2081 = vmatmul.mubr.bf16.vlgmr.msra.gmra.mxu1 %v3298_v47  ;;  %2132 = vmatprep.subr.bf16.mxu0 %v2466_v15  ;;  %v855_v15 = vld [vmem:[%s3212_s10 + $0x650] sm:$0xff] }
  0xfa   : > { %2172 = vmatpush1.bf16.msra.mxu1 %v2601_v14  ;;  %2631 = vmatprep.mubr.msk.bf16.mxu1 %vm1962_vm0, %v3203_v26  ;;  %v771_v14 = vld [vmem:[%s3212_s10 + $0x3b0] sm:$0xff] }
  0xfb   : > { %2173 = vmatprep.subr.bf16.mxu1 %v2594_v16  ;;  %v859_v16 = vld [vmem:[%s3212_s10 + $0x670] sm:$0xff]  ;;  %v2530_v19 = vcombine.high %v767_v13, %v771_v14  ;;  %v2529_v29 = vcombine.low %v767_v13, %v771_v14 }
  0xfc   : > { %2133 = vmatpush1.bf16.msra.mxu0 %v2465_v21  ;;  %v2618_v20 = vcombine.high %v855_v15, %v859_v16  ;;  %v759_v21 = vld [vmem:[%s3212_s10 + $0x350] sm:$0xff]  ;;  %v2617_v30 = vcombine.low %v855_v15, %v859_v16  ;;  %v832_v16 = vld [vmem:[%s3212_s10 + $0x598] sm:$0xff] }
  0xfd   : > { %2134 = vmatprep.subr.bf16.mxu0 %v2458_v23  ;;  %v847_v23 = vld [vmem:[%s3212_s10 + $0x610] sm:$0xff] }
  0xfe   : > { %2174 = vmatpush1.bf16.msra.mxu1 %v2593_v22  ;;  %v763_v22 = vld [vmem:[%s3212_s10 + $0x370] sm:$0xff] }
  0xff   : > { %2175 = vmatprep.subr.bf16.mxu1 %v2586_v28  ;;  %v851_v28 = vld [vmem:[%s3212_s10 + $0x630] sm:$0xff]  ;;  %v2522_v31 = vcombine.high %v759_v21, %v763_v22  ;;  %v2521_v37 = vcombine.low %v759_v21, %v763_v22 }
 0x100   : > { %2135 = vmatpush1.bf16.msra.mxu0 %v2457_v33  ;;  %v2610_v32 = vcombine.high %v847_v23, %v851_v28  ;;  %v751_v33 = vld [vmem:[%s3212_s10 + $0x310] sm:$0xff]  ;;  %v2609_v38 = vcombine.low %v847_v23, %v851_v28  ;;  %v824_v28 = vld [vmem:[%s3212_s10 + $0x558] sm:$0xff] }
 0x101   : > { %2136 = vmatprep.subr.bf16.mxu0 %v2450_v35  ;;  %v712_v35 = vld [vmem:[%s3212_s10 + $0x1d8] sm:$0xff] }
 0x102   : > { %2176 = vmatpush1.bf16.msra.mxu1 %v2585_v34  ;;  %v755_v34 = vld [vmem:[%s3212_s10 + $0x330] sm:$0xff] }
 0x103   : > { %2177 = vmatprep.subr.bf16.mxu1 %v2578_v36  ;;  %v716_v36 = vld [vmem:[%s3212_s10 + $0x1f8] sm:$0xff]  ;;  %v2514_v39 = vcombine.high %v751_v33, %v755_v34  ;;  %v2513_v45 = vcombine.low %v751_v33, %v755_v34 }
 0x104   : > { %2137 = vmatpush1.bf16.msra.mxu0 %v2449_v41  ;;  %v2476_v40 = vcombine.high %v712_v35, %v716_v36  ;;  %v743_v41 = vld [vmem:[%s3212_s10 + $0x2d0] sm:$0xff]  ;;  %v2475_v46 = vcombine.low %v712_v35, %v716_v36  ;;  %v816_v36 = vld [vmem:[%s3212_s10 + $0x518] sm:$0xff] }
 0x105   : > { %2138 = vmatprep.subr.bf16.mxu0 %v2442_v43  ;;  %v704_v43 = vld [vmem:[%s3212_s10 + $0x198] sm:$0xff] }
 0x106   : > { %2178 = vmatpush1.bf16.msra.mxu1 %v2577_v42  ;;  %v747_v42 = vld [vmem:[%s3212_s10 + $0x2f0] sm:$0xff] }
 0x107   : > { %2179 = vmatprep.subr.bf16.mxu1 %v2570_v44  ;;  %v708_v44 = vld [vmem:[%s3212_s10 + $0x1b8] sm:$0xff]  ;;  %v2506_v48 = vcombine.high %v743_v41, %v747_v42  ;;  %v2505_v54 = vcombine.low %v743_v41, %v747_v42 }
 0x108   : > { %2139 = vmatpush1.bf16.msra.mxu0 %v2441_v50  ;;  %v2468_v49 = vcombine.high %v704_v43, %v708_v44  ;;  %v735_v50 = vld [vmem:[%s3212_s10 + $0x290] sm:$0xff]  ;;  %v2467_v55 = vcombine.low %v704_v43, %v708_v44  ;;  %v808_v43 = vld [vmem:[%s3212_s10 + $0x4d8] sm:$0xff] }
 0x109   : > { %2140 = vmatprep.subr.bf16.mxu0 %v2434_v52  ;;  %v696_v52 = vld [vmem:[%s3212_s10 + $0x158] sm:$0xff] }
 0x10a   : > { %2180 = vmatpush1.bf16.msra.mxu1 %v2569_v51  ;;  %v739_v51 = vld [vmem:[%s3212_s10 + $0x2b0] sm:$0xff]  ;;  %v812_v44 = vld [vmem:[%s3212_s10 + $0x4f8] sm:$0xff] }
 0x10b   : > { %2181 = vmatprep.subr.bf16.mxu1 %v2562_v53  ;;  %v700_v53 = vld [vmem:[%s3212_s10 + $0x178] sm:$0xff]  ;;  %v2498_v25 = vcombine.high %v735_v50, %v739_v51  ;;  %v2497_v61 = vcombine.low %v735_v50, %v739_v51  ;;  %v2572_v50 = vcombine.high %v808_v43, %v812_v44 }
 0x10c   : > { %2141 = vmatpush1.bf16.msra.mxu0 %v2433_v57  ;;  %v2460_v56 = vcombine.high %v696_v52, %v700_v53  ;;  %v727_v57 = vld [vmem:[%s3212_s10 + $0x250] sm:$0xff]  ;;  %v2459_v62 = vcombine.low %v696_v52, %v700_v53  ;;  %v800_v52 = vld [vmem:[%s3212_s10 + $0x498] sm:$0xff] }
 0x10d   : > { %2142 = vmatprep.subr.bf16.mxu0 %v2426_v59  ;;  %v688_v59 = vld [vmem:[%s3212_s10 + $0x118] sm:$0xff] }
 0x10e   : > { %2182 = vmatpush1.bf16.msra.mxu1 %v2561_v58  ;;  %v731_v58 = vld [vmem:[%s3212_s10 + $0x270] sm:$0xff]  ;;  %v804_v53 = vld [vmem:[%s3212_s10 + $0x4b8] sm:$0xff] }
 0x10f   : > { %2183 = vmatprep.subr.bf16.mxu1 %v2554_v60  ;;  %v692_v60 = vld [vmem:[%s3212_s10 + $0x138] sm:$0xff]  ;;  %v2490_v63 = vcombine.high %v727_v57, %v731_v58 }
 0x110   : > { %2143 = vmatpush1.bf16.msra.mxu0 %v2425_v1  ;;  %v2452_v0 = vcombine.high %v688_v59, %v692_v60  ;;  %v719_v1 = vld [vmem:[%s3212_s10 + $0x210] sm:$0xff]  ;;  %v2451_v6 = vcombine.low %v688_v59, %v692_v60  ;;  %v792_v59 = vld [vmem:[%s3212_s10 + $0x458] sm:$0xff] }
 0x111   : > { %2144 = vmatprep.subr.bf16.mxu0 %v2418_v4  ;;  %v680_v4 = vld [vmem:[%s3212_s10 + $0xd8] sm:$0xff] }
 0x112   : > { %2184 = vmatpush1.bf16.msra.mxu1 %v2553_v2  ;;  %v723_v2 = vld [vmem:[%s3212_s10 + $0x230] sm:$0xff]  ;;  %v796_v60 = vld [vmem:[%s3212_s10 + $0x478] sm:$0xff] }
 0x113   : > { %2185 = vmatprep.subr.bf16.mxu1 %v2546_v5  ;;  %v684_v5 = vld [vmem:[%s3212_s10 + $0xf8] sm:$0xff]  ;;  %v2482_v7 = vcombine.high %v719_v1, %v723_v2 }
 0x114   : > { %2145 = vmatpush1.bf16.msra.mxu0 %v2417_v10  ;;  %v2444_v8 = vcombine.high %v680_v4, %v684_v5  ;;  %v844_v10 = vld [vmem:[%s3212_s10 + $0x5f8] sm:$0xff]  ;;  %v2443_v13 = vcombine.low %v680_v4, %v684_v5 }
 0x115   : > { %2146 = vmatprep.subr.bf16.mxu0 %v2538_v24  ;;  %v676_v24 = vld [vmem:[%s3212_s10 + $0xb8] sm:$0xff]  ;;  %v2604_v14 = vcombine.high %v840_v9, %v844_v10 }
 0x116   : > { %2186 = vmatpush1.bf16.msra.mxu1 %v2545_v11  ;;  %v672_v11 = vld [vmem:[%s3212_s10 + $0x98] sm:$0xff] }
 0x117   : > { %2197 = vmatprep.subr.bf16.mxu1 %v2626_v12  ;;  %v2481_v12 = vcombine.low %v719_v1, %v723_v2  ;;  %v2436_v15 = vcombine.high %v672_v11, %v676_v24  ;;  %v2435_v21 = vcombine.low %v672_v11, %v676_v24  ;;  %v2556_v1 = vcombine.high %v792_v59, %v796_v60  ;;  %v784_v4 = vld [vmem:[%s3212_s10 + $0x418] sm:$0xff] }
 0x118   : > { %2147 = vmatpush2.bf16.msra.mxu0 %v2537_v17  ;;  %v836_v17 = vld [vmem:[%s3212_s10 + $0x5b8] sm:$0xff] }
 0x119   : > { %2148 = vmatprep.subr.bf16.mxu0 %v2530_v19  ;;  %v668_v19 = vld [vmem:[%s3212_s10 + $0x78] sm:$0xff]  ;;  %v2596_v22 = vcombine.high %v832_v16, %v836_v17 }
 0x11a   : > { %2198 = vmatpush2.bf16.msra.mxu1 %v2625_v18  ;;  %v664_v18 = vld [vmem:[%s3212_s10 + $0x58] sm:$0xff] }
 0x11b   : > { %2199 = vmatprep.subr.bf16.mxu1 %v2618_v20  ;;  %v2603_v20 = vcombine.low %v840_v9, %v844_v10  ;;  %v2428_v23 = vcombine.high %v664_v18, %v668_v19  ;;  %v2427_v33 = vcombine.low %v664_v18, %v668_v19  ;;  %v788_v5 = vld [vmem:[%s3212_s10 + $0x438] sm:$0xff] }
 0x11c   : > { %2149 = vmatpush2.bf16.msra.mxu0 %v2529_v29  ;;  %v828_v29 = vld [vmem:[%s3212_s10 + $0x578] sm:$0xff]  ;;  %v2548_v9 = vcombine.high %v784_v4, %v788_v5 }
 0x11d   : > { %2150 = vmatprep.subr.bf16.mxu0 %v2522_v31  ;;  %v660_v31 = vld [vmem:[%s3212_s10 + $0x38] sm:$0xff]  ;;  %v2588_v34 = vcombine.high %v824_v28, %v828_v29 }
 0x11e   : > { %2200 = vmatpush2.bf16.msra.mxu1 %v2617_v30  ;;  %v656_v30 = vld [vmem:[%s3212_s10 + $0x18] sm:$0xff] }
 0x11f   : > { %2201 = vmatprep.subr.bf16.mxu1 %v2610_v32  ;;  %v2595_v32 = vcombine.low %v832_v16, %v836_v17  ;;  %v2420_v35 = vcombine.high %v656_v30, %v660_v31  ;;  %v2419_v41 = vcombine.low %v656_v30, %v660_v31  ;;  %v864_v11 = vld [vmem:[%s3212_s10 + $0x698] sm:$0xff] }
 0x120   : > { %2151 = vmatpush2.bf16.msra.mxu0 %v2521_v37  ;;  %v820_v37 = vld [vmem:[%s3212_s10 + $0x538] sm:$0xff] }
 0x121   : > { %2152 = vmatprep.subr.bf16.mxu0 %v2514_v39  ;;  %v780_v39 = vld [vmem:[%s3212_s10 + $0x3f8] sm:$0xff] }
 0x122   : > { %2202 = vmatpush2.bf16.msra.mxu1 %v2609_v38  ;;  %v776_v38 = vld [vmem:[%s3212_s10 + $0x3d8] sm:$0xff] }
 0x123   : > { %2212 = vmatprep.subr.bf16.mxu1 %v2476_v40  ;;  %v2587_v40 = vcombine.low %v824_v28, %v828_v29  ;;  %v2540_v42 = vcombine.high %v776_v38, %v780_v39  ;;  %v868_v24 = vld [vmem:[%s3212_s10 + $0x6b8] sm:$0xff] }
 0x124   : > { %2153 = vmatpush2.bf16.msra.mxu0 %v2513_v45  ;;  %v768_v45 = vld [vmem:[%s3212_s10 + $0x398] sm:$0xff]  ;;  %v2628_v16 = vcombine.high %v864_v11, %v868_v24 }
 0x125   : > { %2204 = vmatmul.mubr.bf16.vlgmr.msra.gmra.mxu1 %v3268_v3  ;;  %2154 = vmatprep.subr.bf16.mxu0 %v2506_v48  ;;  %v2579_v48 = vcombine.low %v816_v36, %v820_v37  ;;  %v856_v18 = vld [vmem:[%s3212_s10 + $0x658] sm:$0xff] }
 0x126   : > { %2213 = vmatpush1.bf16.msra.mxu1 %v2475_v46  ;;  %2244 = vmatprep.mubr.bf16.mxu1 %v3207_v27  ;;  %v2489_v27 = vcombine.low %v727_v57, %v731_v58  ;;  %v772_v46 = vld [vmem:[%s3212_s10 + $0x3b8] sm:$0xff]  ;;  %v2564_v57 = vcombine.high %v800_v52, %v804_v53 }
 0x127   : > { %2214 = vmatprep.subr.bf16.mxu1 %v2468_v49  ;;  %v2539_v49 = vcombine.low %v776_v38, %v780_v39  ;;  %v2532_v51 = vcombine.high %v768_v45, %v772_v46  ;;  %v860_v19 = vld [vmem:[%s3212_s10 + $0x678] sm:$0xff] }
 0x128   : > { %2155 = vmatpush2.bf16.msra.mxu0 %v2505_v54  ;;  %v760_v54 = vld [vmem:[%s3212_s10 + $0x358] sm:$0xff]  ;;  %v2620_v28 = vcombine.high %v856_v18, %v860_v19 }
 0x129   : > { %2156 = vmatprep.subr.bf16.mxu0 %v2498_v25  ;;  %v2571_v25 = vcombine.low %v808_v43, %v812_v44  ;;  %v848_v30 = vld [vmem:[%s3212_s10 + $0x618] sm:$0xff] }
 0x12a   : > { %2215 = vmatpush1.bf16.msra.mxu1 %v2467_v55  ;;  %v764_v55 = vld [vmem:[%s3212_s10 + $0x378] sm:$0xff] }
 0x12b   : > { %2216 = vmatprep.subr.bf16.mxu1 %v2460_v56  ;;  %v2531_v56 = vcombine.low %v768_v45, %v772_v46  ;;  %v2524_v58 = vcombine.high %v760_v54, %v764_v55  ;;  %v852_v31 = vld [vmem:[%s3212_s10 + $0x638] sm:$0xff] }
 0x12c   : > { %2157 = vmatpush2.bf16.msra.mxu0 %v2497_v61  ;;  %v752_v61 = vld [vmem:[%s3212_s10 + $0x318] sm:$0xff]  ;;  %v2611_v38 = vcombine.low %v848_v30, %v852_v31 }
 0x12d   : > { %2158 = vmatprep.subr.bf16.mxu0 %v2490_v63  ;;  %v2563_v63 = vcombine.low %v800_v52, %v804_v53 }
 0x12e   : > { %2217 = vmatpush1.bf16.msra.mxu1 %v2459_v62  ;;  %v756_v62 = vld [vmem:[%s3212_s10 + $0x338] sm:$0xff] }
 0x12f   : > { %2218 = vmatprep.subr.bf16.mxu1 %v2452_v0  ;;  %v2523_v0 = vcombine.low %v760_v54, %v764_v55  ;;  %v2516_v2 = vcombine.high %v752_v61, %v756_v62 }
 0x130   : > { %2159 = vmatpush2.bf16.msra.mxu0 %v2489_v27  ;;  %v744_v27 = vld [vmem:[%s3212_s10 + $0x2d8] sm:$0xff] }
 0x131   : > { %2160 = vmatprep.subr.bf16.mxu0 %v2482_v7  ;;  %v2555_v7 = vcombine.low %v792_v59, %v796_v60 }
 0x132   : > { %2219 = vmatpush1.bf16.msra.mxu1 %v2451_v6  ;;  %v748_v6 = vld [vmem:[%s3212_s10 + $0x2f8] sm:$0xff] }
 0x133   : > { %2220 = vmatprep.subr.bf16.mxu1 %v2444_v8  ;;  %v2515_v8 = vcombine.low %v752_v61, %v756_v62  ;;  %v2508_v10 = vcombine.high %v744_v27, %v748_v6  ;;  %v3463_v43 = vpop.permute.xlu0 %2297 }
 0x134   : > { %2161 = vmatpush2.bf16.msra.mxu0 %v2481_v12  ;;  %v736_v12 = vld [vmem:[%s3212_s10 + $0x298] sm:$0xff] }
 0x135   : > { %2253 = vmatprep.subr.bf16.mxu0 %v2604_v14  ;;  %v2547_v14 = vcombine.low %v784_v4, %v788_v5 }
 0x136   : > { %2221 = vmatpush1.bf16.msra.mxu1 %v2443_v13  ;;  %v740_v13 = vld [vmem:[%s3212_s10 + $0x2b8] sm:$0xff] }
 0x137   : > { %2222 = vmatprep.subr.bf16.mxu1 %v2436_v15  ;;  %2163 = vmatmul.mubr.bf16.vlgmr.msra.gmra.mxu0 %v3298_v47  ;;  %v2507_v15 = vcombine.low %v744_v27, %v748_v6  ;;  %v2500_v17 = vcombine.high %v736_v12, %v740_v13 }
 0x138   : > { %2254 = vmatpush1.bf16.msra.mxu0 %v2603_v20  ;;  %2632 = vmatprep.mubr.msk.bf16.mxu0 %vm1962_vm0, %v3203_v26  ;;  %v2580_v26 = vcombine.high %v816_v36, %v820_v37  ;;  %v728_v20 = vld [vmem:[%s3212_s10 + $0x258] sm:$0xff]  ;;  %v2612_v36 = vcombine.high %v848_v30, %v852_v31 }
 0x139   : > { %2255 = vmatprep.subr.bf16.mxu0 %v2596_v22  ;;  %v2627_v22 = vcombine.low %v864_v11, %v868_v24 }
 0x13a   : > { %2223 = vmatpush1.bf16.msra.mxu1 %v2435_v21  ;;  %v732_v21 = vld [vmem:[%s3212_s10 + $0x278] sm:$0xff] }
 0x13b   : > { %2224 = vmatprep.subr.bf16.mxu1 %v2428_v23  ;;  %v2499_v23 = vcombine.low %v736_v12, %v740_v13  ;;  %v2492_v29 = vcombine.high %v728_v20, %v732_v21 }
 0x13c   : > { %2256 = vmatpush1.bf16.msra.mxu0 %v2595_v32  ;;  %v720_v32 = vld [vmem:[%s3212_s10 + $0x218] sm:$0xff] }
 0x13d   : > { %2257 = vmatprep.subr.bf16.mxu0 %v2588_v34  ;;  %v2619_v34 = vcombine.low %v856_v18, %v860_v19 }
 0x13e   : > { %2225 = vmatpush1.bf16.msra.mxu1 %v2427_v33  ;;  %v724_v33 = vld [vmem:[%s3212_s10 + $0x238] sm:$0xff] }
 0x13f   : > { %2226 = vmatprep.subr.bf16.mxu1 %v2420_v35  ;;  %v2491_v35 = vcombine.low %v728_v20, %v732_v21  ;;  %v2484_v37 = vcombine.high %v720_v32, %v724_v33  ;;  %v2483_v39 = vcombine.low %v720_v32, %v724_v33 }
 0x140   : > { %2258 = vmatpush1.bf16.msra.mxu0 %v2587_v40 }
 0x141   : > { %2259 = vmatprep.subr.bf16.mxu0 %v2580_v26 }
 0x142   : > { %2227 = vmatpush1.bf16.msra.mxu1 %v2419_v41 }
 0x143   : > { %2228 = vmatprep.subr.bf16.mxu1 %v2540_v42 }
 0x144   : > { %2260 = vmatpush1.bf16.msra.mxu0 %v2579_v48  ;;  %v3465_v48 = vpop.permute.xlu0 %2311 }
 0x145   : > { %2261 = vmatprep.subr.bf16.mxu0 %v2572_v50 }
 0x146   : > { %2229 = vmatpush2.bf16.msra.mxu1 %v2539_v49 }
 0x147   : > { %2230 = vmatprep.subr.bf16.mxu1 %v2532_v51 }
 0x148   : > { %2262 = vmatpush1.bf16.msra.mxu0 %v2571_v25 }
 0x149   : > { %2263 = vmatprep.subr.bf16.mxu0 %v2564_v57 }
 0x14a   : > { %2231 = vmatpush2.bf16.msra.mxu1 %v2531_v56 }
 0x14b   : > { %2232 = vmatprep.subr.bf16.mxu1 %v2524_v58 }
 0x14c   : > { %2264 = vmatpush1.bf16.msra.mxu0 %v2563_v63 }
 0x14d   : > { %2265 = vmatprep.subr.bf16.mxu0 %v2556_v1 }
 0x14e   : > { %2233 = vmatpush2.bf16.msra.mxu1 %v2523_v0 }
 0x14f   : > { %2234 = vmatprep.subr.bf16.mxu1 %v2516_v2 }
 0x150   : > { %2266 = vmatpush1.bf16.msra.mxu0 %v2555_v7 }
 0x151   : > { %2267 = vmatprep.subr.bf16.mxu0 %v2548_v9 }
 0x152   : > { %2235 = vmatpush2.bf16.msra.mxu1 %v2515_v8 }
 0x153   : > { %2236 = vmatprep.subr.bf16.mxu1 %v2508_v10 }
 0x154   : > { %2268 = vmatpush1.bf16.msra.mxu0 %v2547_v14 }
 0x155   : > { %2279 = vmatprep.subr.bf16.mxu0 %v2628_v16 }
 0x156   : > { %2237 = vmatpush2.bf16.msra.mxu1 %v2507_v15 }
 0x157   : > { %2238 = vmatprep.subr.bf16.mxu1 %v2500_v17 }
 0x158   : > { %2280 = vmatpush2.bf16.msra.mxu0 %v2627_v22 }
 0x159   : > { %2281 = vmatprep.subr.bf16.mxu0 %v2620_v28 }
 0x15a   : > { %2239 = vmatpush2.bf16.msra.mxu1 %v2499_v23 }
 0x15b   : > { %2240 = vmatprep.subr.bf16.mxu1 %v2492_v29 }
 0x15c   : > { %2282 = vmatpush2.bf16.msra.mxu0 %v2619_v34 }
 0x15d   : > { %2283 = vmatprep.subr.bf16.mxu0 %v2612_v36 }
 0x15e   : > { %2241 = vmatpush2.bf16.msra.mxu1 %v2491_v35 }
 0x15f   : > { %2242 = vmatprep.subr.bf16.mxu1 %v2484_v37 }
 0x160   : > { %2284 = vmatpush2.bf16.msra.mxu0 %v2611_v38 }
 0x162   : > { %2243 = vmatpush2.bf16.msra.mxu1 %v2483_v39 }
 0x163   : > { %2286 = vmatmul.mubr.bf16.vlgmr.msra.gmra.mxu0 %v3268_v3 }
 0x165   : > { %2245 = vmatmul.mubr.bf16.vlgmr.msra.gmra.mxu1 %v3298_v47 }
 0x179   : > { %v2041_v40 = vpop.f32.mrf.mxu1 }
 0x17b   : > { %v2043_v41 = vpop.f32.mrf.mxu1 }
 0x17d   : > { %v2045_v26 = vpop.f32.mrf.mxu1 }
 0x17f   : > { %v2046_v42 = vpop.f32.mrf.mxu1 }
 0x18b   : > { %v2000_v44 = vpop.f32.mrf.mxu0 }
 0x18c   : > { %v2042_v45 = vadd.f32 %v2041_v40, %v2000_v44 }
 0x18d   : > { %v2002_v46 = vpop.f32.mrf.mxu0 }
 0x18e   : > { %v2300_v49 = vmul.f32 %v3463_v43, %v2042_v45  ;;  %v2044_v3 = vadd.f32 %v2043_v41, %v2002_v46 }
 0x18f   : > { %v2004_v47 = vpop.f32.mrf.mxu0 }
 0x190   : > { %v2301_v50 = vmul.f32 %v3463_v43, %v2044_v3  ;;  %v2314_v51 = vadd.f32 %v3465_v48, %v2300_v49 }
 0x191   : > { %v2005_v52 = vpop.f32.mrf.mxu0 }
 0x192   : > { %v2315_v53 = vadd.f32 %v3465_v48, %v2301_v50  ;;  %v2322_v54 = vmax.f32 %v2314_v51, 0.0 }
 0x194   : > { %v2323_v55 = vmax.f32 %v2315_v53, 0.0  ;;  %2330 = vst [vmem:[%s3473_s21] sm:$0xff] %v2322_v54 }
 0x196   : > { %2331 = vst [vmem:[%s3473_s21 + $0x8] sm:$0xff] %v2323_v55 }
 0x1b7   : > { %v2123_v25 = vpop.f32.mrf.mxu0 }
 0x1b9   : > { %v2082_v56 = vpop.f32.mrf.mxu1  ;;  %v2125_v58 = vpop.f32.mrf.mxu0 }
 0x1ba   : > { %v2124_v57 = vadd.f32 %v2123_v25, %v2082_v56 }
 0x1bb   : > { %v2084_v59 = vpop.f32.mrf.mxu1  ;;  %v2127_v62 = vpop.f32.mrf.mxu0 }
 0x1bc   : > { %v2302_v60 = vmul.f32 %v3463_v43, %v2124_v57  ;;  %v2126_v61 = vadd.f32 %v2125_v58, %v2084_v59 }
 0x1bd   : > { %v2086_v63 = vpop.f32.mrf.mxu1  ;;  %v2128_v2 = vpop.f32.mrf.mxu0 }
 0x1be   : > { %v2316_v0 = vadd.f32 %v3465_v48, %v2302_v60  ;;  %v2303_v1 = vmul.f32 %v3463_v43, %v2126_v61 }
 0x1bf   : > { %v2087_v4 = vpop.f32.mrf.mxu1 }
 0x1c0   : > { %v2324_v5 = vmax.f32 %v2316_v0, 0.0  ;;  %v2317_v27 = vadd.f32 %v3465_v48, %v2303_v1 }
 0x1c2   : > { %2332 = vst [vmem:[%s3473_s21 + $0x10] sm:$0xff] %v2324_v5  ;;  %v2325_v6 = vmax.f32 %v2317_v27, 0.0 }
 0x1c4   : > { %2333 = vst [vmem:[%s3473_s21 + $0x18] sm:$0xff] %v2325_v6 }
 0x1e5   : > { %v2205_v7 = vpop.f32.mrf.mxu1 }
 0x1e7   : > { %v2207_v8 = vpop.f32.mrf.mxu1 }
 0x1e9   : > { %v2209_v9 = vpop.f32.mrf.mxu1 }
 0x1eb   : > { %v2210_v10 = vpop.f32.mrf.mxu1 }
 0x1f7   : > { %v2164_v11 = vpop.f32.mrf.mxu0 }
 0x1f8   : > { %v2206_v24 = vadd.f32 %v2205_v7, %v2164_v11 }
 0x1f9   : > { %v2166_v12 = vpop.f32.mrf.mxu0 }
 0x1fa   : > { %v2304_v13 = vmul.f32 %v3463_v43, %v2206_v24  ;;  %v2208_v14 = vadd.f32 %v2207_v8, %v2166_v12 }
 0x1fb   : > { %v2168_v15 = vpop.f32.mrf.mxu0 }
 0x1fc   : > { %v2318_v16 = vadd.f32 %v3465_v48, %v2304_v13  ;;  %v2305_v17 = vmul.f32 %v3463_v43, %v2208_v14 }
 0x1fd   : > { %v2169_v18 = vpop.f32.mrf.mxu0 }
 0x1fe   : > { %v2326_v19 = vmax.f32 %v2318_v16, 0.0  ;;  %v2319_v20 = vadd.f32 %v3465_v48, %v2305_v17 }
 0x200   : > { %2334 = vst [vmem:[%s3473_s21 + $0x20] sm:$0xff] %v2326_v19  ;;  %v2327_v21 = vmax.f32 %v2319_v20, 0.0 }
 0x202   : > { %2335 = vst [vmem:[%s3473_s21 + $0x28] sm:$0xff] %v2327_v21 }
 0x223   : > { %v2287_v22 = vpop.f32.mrf.mxu0 }
 0x225   : > { %v2246_v23 = vpop.f32.mrf.mxu1  ;;  %v2289_v29 = vpop.f32.mrf.mxu0 }
 0x226   : > { %v2288_v28 = vadd.f32 %v2287_v22, %v2246_v23 }
 0x227   : > { %v2248_v30 = vpop.f32.mrf.mxu1  ;;  %v2291_v33 = vpop.f32.mrf.mxu0 }
 0x228   : > { %v2306_v31 = vmul.f32 %v3463_v43, %v2288_v28  ;;  %v2290_v32 = vadd.f32 %v2289_v29, %v2248_v30 }
 0x229   : > { %v2250_v34 = vpop.f32.mrf.mxu1  ;;  %v2292_v37 = vpop.f32.mrf.mxu0 }
 0x22a   : > { %v2320_v35 = vadd.f32 %v3465_v48, %v2306_v31  ;;  %v2307_v36 = vmul.f32 %v3463_v43, %v2290_v32 }
 0x22b   : > { %v2251_v38 = vpop.f32.mrf.mxu1 }
 0x22c   : > { %v2328_v39 = vmax.f32 %v2320_v35, 0.0  ;;  %v2321_v40 = vadd.f32 %v3465_v48, %v2307_v36 }
 0x22e   : > { %2336 = vst [vmem:[%s3473_s21 + $0x30] sm:$0xff] %v2328_v39  ;;  %v2329_v41 = vmax.f32 %v2321_v40, 0.0 }
 0x230   : > { %2337 = vst [vmem:[%s3473_s21 + $0x38] sm:$0xff] %v2329_v41 }
 0x231 PF: > { %p11_p9 = scmp.ge.s32.totalorder %s2735_s19, 6   ;;  %s3511_s15 = smov %s2686_s16 }
 0x232   : > { %s3512_s16 = smov %s2744_s22  ;;  %s3513_s17 = smov %s2735_s19 }
 0x233   :  { %13 = sbr.rel (!%p11_p9) target bundleno = 2 (0x2), region = 94 }

// kernel: depth_net.36
= control target key start
LH: loop header
LB: loop body
LE: loop exit
PB: predicated region body
PF: predicated region fallthrough
CT: control target
= control target key end

     0   :  { %v666_v1 = vmov 0   ;;  %vm357_vm0 = vcmask 1043456   ;;  %vm353_vm1 = vcmask 719872   ;;  %s896_s1 = inlined_call_operand.vmem [shape: bf16[216,512], index: 1, kind: input, shape index: {}]   ;;  %s897_s0 = inlined_call_operand.vmem [shape: bf16[16,216], index: 0, kind: input, shape index: {}]   ;;  %s898_s2 = inlined_call_operand.vmem [shape: f32[16,1], index: 2, kind: input, shape index: {}]   ;;  %s899_s3 = inlined_call_operand.vmem [shape: f32[16,1], index: 3, kind: input, shape index: {}]   ;;  %s900_s4 = inlined_call_operand.vmem [shape: f32[16,512], index: 4, kind: output, shape index: {}]  }
   0x1   :  { %v581_v0 = vld [vmem:[%s896_s1 + $0xe4] ss:$16 sps:$4 sm:$0xff]   ;;  %579 = vset.pattern.permute.xlu0 %v666_v1  ;;  %580 = vset.pattern.permute.xlu1 %v666_v1  ;;  %v583_v2 = vld [vmem:[%s896_s1 + $0xec] ss:$16 sps:$4 sm:$0xff]   ;;  %v585_v3 = vld [vmem:[%s896_s1 + $0xe0] ss:$16 sps:$4 sm:$0xff]  }
   0x2   :  { %370 = vmatprep.subr.bf16.mxu0 %v581_v0  ;;  %v586_v4 = vld [vmem:[%s896_s1 + $0xe8] ss:$16 sps:$4 sm:$0xff]   ;;  %413 = vmatprep.subr.bf16.mxu1 %v583_v2  ;;  %v587_v5 = vld [vmem:[%s896_s1 + $0xc4] ss:$16 sps:$4 sm:$0xff]   ;;  %v589_v6 = vld [vmem:[%s896_s1 + $0xcc] ss:$16 sps:$4 sm:$0xff]  }
   0x3   :  { %371 = vmatpush1.bf16.msra.mxu0 %v585_v3  ;;  %414 = vmatpush1.bf16.msra.mxu1 %v586_v4  ;;  %v591_v7 = vld [vmem:[%s896_s1 + $0xc0] ss:$16 sps:$4 sm:$0xff]   ;;  %v592_v8 = vld [vmem:[%s896_s1 + $0xc8] ss:$16 sps:$4 sm:$0xff]   ;;  %v593_v9 = vld [vmem:[%s896_s1 + $0xa4] ss:$16 sps:$4 sm:$0xff]  }
   0x4   :  { %372 = vmatprep.subr.bf16.mxu0 %v587_v5  ;;  %415 = vmatprep.subr.bf16.mxu1 %v589_v6  ;;  %v595_v10 = vld [vmem:[%s896_s1 + $0xac] ss:$16 sps:$4 sm:$0xff]   ;;  %v597_v11 = vld [vmem:[%s896_s1 + $0xa0] ss:$16 sps:$4 sm:$0xff]   ;;  %v598_v12 = vld [vmem:[%s896_s1 + $0xa8] ss:$16 sps:$4 sm:$0xff]  }
   0x5   :  { %v599_v13 = vld [vmem:[%s896_s1 + $0x84] ss:$16 sps:$4 sm:$0xff]   ;;  %v601_v14 = vld [vmem:[%s896_s1 + $0x8c] ss:$16 sps:$4 sm:$0xff]   ;;  %v603_v15 = vld [vmem:[%s896_s1 + $0x80] ss:$16 sps:$4 sm:$0xff]  }
   0x6   :  { %v604_v16 = vld [vmem:[%s896_s1 + $0x88] ss:$16 sps:$4 sm:$0xff]   ;;  %v605_v17 = vld [vmem:[%s896_s1 + $0x64] ss:$16 sps:$4 sm:$0xff]   ;;  %v607_v18 = vld [vmem:[%s896_s1 + $0x6c] ss:$16 sps:$4 sm:$0xff]  }
   0x7   :  { %373 = vmatpush1.bf16.msra.mxu0 %v591_v7  ;;  %416 = vmatpush1.bf16.msra.mxu1 %v592_v8  ;;  %v609_v19 = vld [vmem:[%s896_s1 + $0x60] ss:$16 sps:$4 sm:$0xff]   ;;  %v610_v20 = vld [vmem:[%s896_s1 + $0x68] ss:$16 sps:$4 sm:$0xff]   ;;  %v611_v21 = vld [vmem:[%s896_s1 + $0x44] ss:$16 sps:$4 sm:$0xff]  }
   0x8   :  { %374 = vmatprep.subr.bf16.mxu0 %v593_v9  ;;  %417 = vmatprep.subr.bf16.mxu1 %v595_v10  ;;  %v613_v22 = vld [vmem:[%s896_s1 + $0x4c] ss:$16 sps:$4 sm:$0xff]   ;;  %v615_v23 = vld [vmem:[%s896_s1 + $0x40] ss:$16 sps:$4 sm:$0xff]   ;;  %v616_v24 = vld [vmem:[%s896_s1 + $0x48] ss:$16 sps:$4 sm:$0xff]  }
   0x9   :  { %v617_v25 = vld [vmem:[%s896_s1 + $0x24] ss:$16 sps:$4 sm:$0xff]   ;;  %v619_v26 = vld [vmem:[%s896_s1 + $0x2c] ss:$16 sps:$4 sm:$0xff]   ;;  %v621_v27 = vld [vmem:[%s896_s1 + $0x20] ss:$16 sps:$4 sm:$0xff]  }
   0xa   :  { %v622_v28 = vld [vmem:[%s896_s1 + $0x28] ss:$16 sps:$4 sm:$0xff]   ;;  %v623_v29 = vld [vmem:[%s896_s1 + $0x4] ss:$16 sps:$4 sm:$0xff]   ;;  %v625_v30 = vld [vmem:[%s896_s1 + $0xc] ss:$16 sps:$4 sm:$0xff]  }
   0xb   :  { %375 = vmatpush1.bf16.msra.mxu0 %v597_v11  ;;  %418 = vmatpush1.bf16.msra.mxu1 %v598_v12  ;;  %v72_v31 = vld [vmem:[%s896_s1 + $0x1a0] sm:$0xff]  ;;  %v73_v32 = vld [vmem:[%s896_s1 + $0x1a8] sm:$0xff] }
   0xc   :  { %376 = vmatprep.subr.bf16.mxu0 %v599_v13  ;;  %419 = vmatprep.subr.bf16.mxu1 %v601_v14  ;;  %v627_v33 = vld [vmem:[%s896_s1] ss:$16 sps:$4 sm:$0xff]   ;;  %v628_v34 = vld [vmem:[%s896_s1 + $0x8] ss:$16 sps:$4 sm:$0xff]   ;;  %v571_v35 = vcombine.high %v72_v31, %v72_v31  ;;  %v573_v36 = vcombine.high %v73_v32, %v73_v32  ;;  %v570_v37 = vcombine.low %v72_v31, %v72_v31  ;;  %v633_v39 = vld [vmem:[%s896_s1 + $0x184] ss:$16 sps:$4 sm:$0xff]  }
   0xd   :  { %v572_v38 = vcombine.low %v73_v32, %v73_v32  ;;  %v635_v42 = vld [vmem:[%s896_s1 + $0x18c] ss:$16 sps:$4 sm:$0xff]   ;;  %v637_v43 = vld [vmem:[%s896_s1 + $0x180] ss:$16 sps:$4 sm:$0xff]   ;;  %v638_v44 = vld [vmem:[%s896_s1 + $0x188] ss:$16 sps:$4 sm:$0xff]  }
   0xe   :  { %v359_v40 = vsel %vm357_vm0, %v570_v37, 0  ;;  %v639_v45 = vld [vmem:[%s896_s1 + $0x164] ss:$16 sps:$4 sm:$0xff]   ;;  %v641_v47 = vld [vmem:[%s896_s1 + $0x16c] ss:$16 sps:$4 sm:$0xff]  }
   0xf   :  { %377 = vmatpush1.bf16.msra.mxu0 %v603_v15  ;;  %420 = vmatpush1.bf16.msra.mxu1 %v604_v16  ;;  %v365_v41 = vsel %vm357_vm0, %v572_v38, 0  ;;  %v665_v46 = vld [vmem:[%s897_s0 + $0x4] ss:$8 sps:$4 sm:$0xff]   ;;  %v643_v50 = vld [vmem:[%s896_s1 + $0x160] ss:$16 sps:$4 sm:$0xff]  }
  0x10   :  { %378 = vmatprep.subr.bf16.mxu0 %v605_v17  ;;  %421 = vmatprep.subr.bf16.mxu1 %v607_v18  ;;  %v456_v48 = vld [vmem:[%s898_s2] sm:$0xff]  ;;  %v644_v51 = vld [vmem:[%s896_s1 + $0x168] ss:$16 sps:$4 sm:$0xff]   ;;  %v647_v55 = vld [vmem:[%s896_s1 + $0x14c] ss:$16 sps:$4 sm:$0xff]  }
  0x11   :  { %v476_v49 = vld [vmem:[%s899_s3] sm:$0xff]  ;;  %575 = vmatprep.mubr.msk.bf16.mxu0 %vm353_vm1, %v665_v46  ;;  %577 = vmatprep.mubr.msk.bf16.mxu1 %vm353_vm1, %v665_v46  ;;  %v457_v52 = vld [vmem:[%s898_s2 + $0x8] sm:$0xff] }
  0x12   :  { %460 = vperm.xlu0 %579, %v456_v48   ;;  %480 = vperm.xlu1 %580, %v476_v49   ;;  %v477_v53 = vld [vmem:[%s899_s3 + $0x8] sm:$0xff]  ;;  %v645_v54 = vld [vmem:[%s896_s1 + $0x144] ss:$16 sps:$4 sm:$0xff]   ;;  %v649_v56 = vld [vmem:[%s896_s1 + $0x140] ss:$16 sps:$4 sm:$0xff]  }
  0x13   :  { %379 = vmatpush1.bf16.msra.mxu0 %v609_v19  ;;  %422 = vmatpush1.bf16.msra.mxu1 %v610_v20  ;;  %v650_v57 = vld [vmem:[%s896_s1 + $0x148] ss:$16 sps:$4 sm:$0xff]   ;;  %v651_v58 = vld [vmem:[%s896_s1 + $0x124] ss:$16 sps:$4 sm:$0xff]   ;;  %v653_v59 = vld [vmem:[%s896_s1 + $0x12c] ss:$16 sps:$4 sm:$0xff]  }
  0x14   :  { %380 = vmatprep.subr.bf16.mxu0 %v611_v21  ;;  %423 = vmatprep.subr.bf16.mxu1 %v613_v22  ;;  %v655_v60 = vld [vmem:[%s896_s1 + $0x120] ss:$16 sps:$4 sm:$0xff]   ;;  %v656_v61 = vld [vmem:[%s896_s1 + $0x128] ss:$16 sps:$4 sm:$0xff]   ;;  %v657_v62 = vld [vmem:[%s896_s1 + $0x104] ss:$16 sps:$4 sm:$0xff]  }
  0x15   :  { %v659_v63 = vld [vmem:[%s896_s1 + $0x10c] ss:$16 sps:$4 sm:$0xff]   ;;  %v661_v0 = vld [vmem:[%s896_s1 + $0x100] ss:$16 sps:$4 sm:$0xff]   ;;  %v662_v1 = vld [vmem:[%s896_s1 + $0x108] ss:$16 sps:$4 sm:$0xff]  }
  0x16   :  { %465 = vperm.xlu0 %579, %v457_v52   ;;  %485 = vperm.xlu1 %580, %v477_v53   ;;  %v663_v2 = vld [vmem:[%s897_s0] ss:$8 sps:$4 sm:$0xff]  }
  0x17   :  { %381 = vmatpush1.bf16.msra.mxu0 %v615_v23  ;;  %424 = vmatpush1.bf16.msra.mxu1 %v616_v24 }
  0x18   :  { %382 = vmatprep.subr.bf16.mxu0 %v617_v25  ;;  %425 = vmatprep.subr.bf16.mxu1 %v619_v26 }
  0x1b   :  { %383 = vmatpush1.bf16.msra.mxu0 %v621_v27  ;;  %426 = vmatpush1.bf16.msra.mxu1 %v622_v28 }
  0x1c   :  { %384 = vmatprep.subr.bf16.mxu0 %v623_v29  ;;  %427 = vmatprep.subr.bf16.mxu1 %v625_v30 }
  0x1f   :  { %385 = vmatpush1.bf16.msra.mxu0 %v627_v33  ;;  %428 = vmatpush1.bf16.msra.mxu1 %v628_v34 }
  0x20   :  { %574 = vmatprep.subr.msk.bf16.mxu0 %vm357_vm0, %v571_v35  ;;  %576 = vmatprep.subr.msk.bf16.mxu1 %vm357_vm0, %v573_v36 }
  0x23   :  { %391 = vmatpush2.bf16.msra.mxu0 %v359_v40  ;;  %434 = vmatpush2.bf16.msra.mxu1 %v365_v41 }
  0x24   :  { %392 = vmatprep.subr.bf16.mxu0 %v633_v39  ;;  %435 = vmatprep.subr.bf16.mxu1 %v635_v42 }
  0x27   :  { %393 = vmatpush2.bf16.msra.mxu0 %v637_v43  ;;  %436 = vmatpush2.bf16.msra.mxu1 %v638_v44 }
  0x28   :  { %394 = vmatprep.subr.bf16.mxu0 %v639_v45  ;;  %437 = vmatprep.subr.bf16.mxu1 %v641_v47 }
  0x2b   :  { %395 = vmatpush2.bf16.msra.mxu0 %v643_v50  ;;  %438 = vmatpush2.bf16.msra.mxu1 %v644_v51 }
  0x2c   :  { %396 = vmatprep.subr.bf16.mxu0 %v645_v54  ;;  %439 = vmatprep.subr.bf16.mxu1 %v647_v55 }
  0x2f   :  { %397 = vmatpush2.bf16.msra.mxu0 %v649_v56  ;;  %440 = vmatpush2.bf16.msra.mxu1 %v650_v57 }
  0x30   :  { %398 = vmatprep.subr.bf16.mxu0 %v651_v58  ;;  %441 = vmatprep.subr.bf16.mxu1 %v653_v59 }
  0x33   :  { %399 = vmatpush2.bf16.msra.mxu0 %v655_v60  ;;  %442 = vmatpush2.bf16.msra.mxu1 %v656_v61 }
  0x34   :  { %400 = vmatprep.subr.bf16.mxu0 %v657_v62  ;;  %443 = vmatprep.subr.bf16.mxu1 %v659_v63 }
  0x37   :  { %401 = vmatpush2.bf16.msra.mxu0 %v661_v0  ;;  %444 = vmatpush2.bf16.msra.mxu1 %v662_v1 }
  0x3a   :  { %403 = vmatmul.mubr.bf16.vlgmr.msra.gmra.mxu0 %v663_v2  ;;  %446 = vmatmul.mubr.bf16.vlgmr.msra.gmra.mxu1 %v663_v2 }
  0x8d   :  { %v461_v3 = vpop.permute.xlu0 %460  ;;  %v481_v6 = vpop.permute.xlu1 %480 }
  0x91   :  { %v466_v19 = vpop.permute.xlu0 %465  ;;  %v486_v28 = vpop.permute.xlu1 %485 }
  0xfa   :  { %v404_v4 = vpop.f32.mrf.mxu0  ;;  %v447_v5 = vpop.f32.mrf.mxu1 }
  0xfb   :  { %v468_v7 = vmul.f32 %v461_v3, %v404_v4  ;;  %v470_v8 = vmul.f32 %v461_v3, %v447_v5 }
  0xfc   :  { %v406_v9 = vpop.f32.mrf.mxu0  ;;  %v449_v10 = vpop.f32.mrf.mxu1 }
  0xfd   :  { %v488_v11 = vadd.f32 %v481_v6, %v468_v7  ;;  %v490_v12 = vadd.f32 %v481_v6, %v470_v8  ;;  %v469_v13 = vmul.f32 %v461_v3, %v406_v9  ;;  %v471_v14 = vmul.f32 %v461_v3, %v449_v10 }
  0xfe   :  { %v408_v15 = vpop.f32.mrf.mxu0  ;;  %v451_v16 = vpop.f32.mrf.mxu1 }
  0xff   :  { %v496_v17 = vmax.f32 %v488_v11, 0.0  ;;  %v498_v18 = vmax.f32 %v490_v12, 0.0  ;;  %v489_v20 = vadd.f32 %v481_v6, %v469_v13  ;;  %v491_v21 = vadd.f32 %v481_v6, %v471_v14 }
 0x100   :  { %v472_v22 = vmul.f32 %v466_v19, %v408_v15  ;;  %v474_v23 = vmul.f32 %v466_v19, %v451_v16  ;;  %v410_v24 = vpop.f32.mrf.mxu0  ;;  %v453_v25 = vpop.f32.mrf.mxu1 }
 0x101   :  { %504 = vst [vmem:[%s900_s4] sm:$0xff] %v496_v17  ;;  %506 = vst [vmem:[%s900_s4 + $0x10] sm:$0xff] %v498_v18  ;;  %v497_v26 = vmax.f32 %v489_v20, 0.0  ;;  %v499_v27 = vmax.f32 %v491_v21, 0.0  ;;  %v473_v29 = vmul.f32 %v466_v19, %v410_v24  ;;  %v475_v30 = vmul.f32 %v466_v19, %v453_v25 }
 0x102   :  { %v492_v31 = vadd.f32 %v486_v28, %v472_v22  ;;  %v494_v32 = vadd.f32 %v486_v28, %v474_v23 }
 0x103   :  { %505 = vst [vmem:[%s900_s4 + $0x8] sm:$0xff] %v497_v26  ;;  %507 = vst [vmem:[%s900_s4 + $0x18] sm:$0xff] %v499_v27  ;;  %v493_v33 = vadd.f32 %v486_v28, %v473_v29  ;;  %v495_v34 = vadd.f32 %v486_v28, %v475_v30 }
 0x104   :  { %v500_v35 = vmax.f32 %v492_v31, 0.0  ;;  %v502_v36 = vmax.f32 %v494_v32, 0.0 }
 0x105   :  { %v501_v37 = vmax.f32 %v493_v33, 0.0  ;;  %v503_v38 = vmax.f32 %v495_v34, 0.0 }
 0x106   :  { %508 = vst [vmem:[%s900_s4 + $0x20] sm:$0xff] %v500_v35  ;;  %510 = vst [vmem:[%s900_s4 + $0x30] sm:$0xff] %v502_v36 }
 0x107   :  { %509 = vst [vmem:[%s900_s4 + $0x28] sm:$0xff] %v501_v37  ;;  %511 = vst [vmem:[%s900_s4 + $0x38] sm:$0xff] %v503_v38 }

// kernel: depth_net.37
= control target key start
LH: loop header
LB: loop body
LE: loop exit
PB: predicated region body
PF: predicated region fallthrough
CT: control target
= control target key end

     0   :  { %v1210_v1 = vmov 0   ;;  %vm689_vm0 = vcmask 392192   ;;  %s1622_s1 = inlined_call_operand.vmem [shape: bf16[432,512], index: 1, kind: input, shape index: {}]   ;;  %s1623_s0 = inlined_call_operand.vmem [shape: bf16[16,432], index: 0, kind: input, shape index: {}]   ;;  %s1624_s2 = inlined_call_operand.vmem [shape: f32[16,1], index: 2, kind: input, shape index: {}]   ;;  %s1625_s3 = inlined_call_operand.vmem [shape: f32[16,1], index: 3, kind: input, shape index: {}]   ;;  %s1626_s4 = inlined_call_operand.vmem [shape: f32[16,512], index: 4, kind: output, shape index: {}]  }
   0x1   :  { %v1042_v0 = vld [vmem:[%s1622_s1 + $0xe4] ss:$16 sps:$4 sm:$0xff]   ;;  %1040 = vset.pattern.permute.xlu0 %v1210_v1  ;;  %1041 = vset.pattern.permute.xlu1 %v1210_v1  ;;  %v1046_v3 = vld [vmem:[%s1622_s1 + $0xe0] ss:$16 sps:$4 sm:$0xff]   ;;  %v1341_v35 = vld [vmem:[%s1623_s0 + $0xc] ss:$16 sps:$4 sm:$0xff]  }
   0x2   :  { %v1044_v2 = vld [vmem:[%s1622_s1 + $0x2e4] ss:$16 sps:$4 sm:$0xff]   ;;  %693 = vmatprep.subr.bf16.mxu0 %v1042_v0  ;;  %v1047_v4 = vld [vmem:[%s1622_s1 + $0x2e0] ss:$16 sps:$4 sm:$0xff]   ;;  %1037 = vmatprep.mubr.msk.bf16.mxu1 %vm689_vm0, %v1341_v35  ;;  %v1115_v47 = vld [vmem:[%s1622_s1 + $0xec] ss:$16 sps:$4 sm:$0xff]  }
   0x3   :  { %736 = vmatprep.subr.bf16.mxu1 %v1044_v2  ;;  %v1048_v5 = vld [vmem:[%s1622_s1 + $0xc4] ss:$16 sps:$4 sm:$0xff]   ;;  %694 = vmatpush1.bf16.msra.mxu0 %v1046_v3  ;;  %v1052_v7 = vld [vmem:[%s1622_s1 + $0xc0] ss:$16 sps:$4 sm:$0xff]   ;;  %v1384_v48 = vld [vmem:[%s1623_s0 + $0x8] ss:$16 sps:$4 sm:$0xff]  }
   0x4   :  { %737 = vmatpush1.bf16.msra.mxu1 %v1047_v4  ;;  %v1050_v6 = vld [vmem:[%s1622_s1 + $0x2c4] ss:$16 sps:$4 sm:$0xff]   ;;  %695 = vmatprep.subr.bf16.mxu0 %v1048_v5  ;;  %v1053_v8 = vld [vmem:[%s1622_s1 + $0x2c0] ss:$16 sps:$4 sm:$0xff]   ;;  %v1113_v49 = vld [vmem:[%s1622_s1 + $0xe8] ss:$16 sps:$4 sm:$0xff]  }
   0x5   :  { %738 = vmatprep.subr.bf16.mxu1 %v1050_v6  ;;  %v1054_v9 = vld [vmem:[%s1622_s1 + $0xa4] ss:$16 sps:$4 sm:$0xff]   ;;  %v1058_v11 = vld [vmem:[%s1622_s1 + $0xa0] ss:$16 sps:$4 sm:$0xff]   ;;  %v1121_v52 = vld [vmem:[%s1622_s1 + $0xcc] ss:$16 sps:$4 sm:$0xff]  }
   0x6   :  { %v1056_v10 = vld [vmem:[%s1622_s1 + $0x2a4] ss:$16 sps:$4 sm:$0xff]   ;;  %v1059_v12 = vld [vmem:[%s1622_s1 + $0x2a0] ss:$16 sps:$4 sm:$0xff]   ;;  %v1119_v54 = vld [vmem:[%s1622_s1 + $0xc8] ss:$16 sps:$4 sm:$0xff]  }
   0x7   :  { %696 = vmatpush1.bf16.msra.mxu0 %v1052_v7  ;;  %v1060_v13 = vld [vmem:[%s1622_s1 + $0x84] ss:$16 sps:$4 sm:$0xff]   ;;  %v1064_v15 = vld [vmem:[%s1622_s1 + $0x80] ss:$16 sps:$4 sm:$0xff]   ;;  %v1127_v57 = vld [vmem:[%s1622_s1 + $0xac] ss:$16 sps:$4 sm:$0xff]  }
   0x8   :  { %739 = vmatpush1.bf16.msra.mxu1 %v1053_v8  ;;  %697 = vmatprep.subr.bf16.mxu0 %v1054_v9  ;;  %v1062_v14 = vld [vmem:[%s1622_s1 + $0x284] ss:$16 sps:$4 sm:$0xff]   ;;  %v1065_v16 = vld [vmem:[%s1622_s1 + $0x280] ss:$16 sps:$4 sm:$0xff]   ;;  %v1125_v58 = vld [vmem:[%s1622_s1 + $0xa8] ss:$16 sps:$4 sm:$0xff]  }
   0x9   :  { %740 = vmatprep.subr.bf16.mxu1 %v1056_v10  ;;  %v1066_v17 = vld [vmem:[%s1622_s1 + $0x64] ss:$16 sps:$4 sm:$0xff]   ;;  %v1070_v19 = vld [vmem:[%s1622_s1 + $0x60] ss:$16 sps:$4 sm:$0xff]   ;;  %v1133_v61 = vld [vmem:[%s1622_s1 + $0x8c] ss:$16 sps:$4 sm:$0xff]  }
   0xa   :  { %v1068_v18 = vld [vmem:[%s1622_s1 + $0x264] ss:$16 sps:$4 sm:$0xff]   ;;  %v1071_v20 = vld [vmem:[%s1622_s1 + $0x260] ss:$16 sps:$4 sm:$0xff]   ;;  %v1131_v62 = vld [vmem:[%s1622_s1 + $0x88] ss:$16 sps:$4 sm:$0xff]  }
   0xb   :  { %698 = vmatpush1.bf16.msra.mxu0 %v1058_v11  ;;  %v1072_v21 = vld [vmem:[%s1622_s1 + $0x44] ss:$16 sps:$4 sm:$0xff]   ;;  %v1076_v23 = vld [vmem:[%s1622_s1 + $0x40] ss:$16 sps:$4 sm:$0xff]   ;;  %v1139_v1 = vld [vmem:[%s1622_s1 + $0x6c] ss:$16 sps:$4 sm:$0xff]  }
   0xc   :  { %741 = vmatpush1.bf16.msra.mxu1 %v1059_v12  ;;  %699 = vmatprep.subr.bf16.mxu0 %v1060_v13  ;;  %v1074_v22 = vld [vmem:[%s1622_s1 + $0x244] ss:$16 sps:$4 sm:$0xff]   ;;  %v1077_v24 = vld [vmem:[%s1622_s1 + $0x240] ss:$16 sps:$4 sm:$0xff]   ;;  %v1137_v2 = vld [vmem:[%s1622_s1 + $0x68] ss:$16 sps:$4 sm:$0xff]  }
   0xd   :  { %742 = vmatprep.subr.bf16.mxu1 %v1062_v14  ;;  %v1078_v25 = vld [vmem:[%s1622_s1 + $0x24] ss:$16 sps:$4 sm:$0xff]   ;;  %v1082_v27 = vld [vmem:[%s1622_s1 + $0x20] ss:$16 sps:$4 sm:$0xff]   ;;  %v1146_v4 = vld [vmem:[%s1622_s1 + $0x4c] ss:$16 sps:$4 sm:$0xff]  }
   0xe   :  { %v1080_v26 = vld [vmem:[%s1622_s1 + $0x224] ss:$16 sps:$4 sm:$0xff]   ;;  %v1083_v28 = vld [vmem:[%s1622_s1 + $0x220] ss:$16 sps:$4 sm:$0xff]   ;;  %v1149_v5 = vld [vmem:[%s1622_s1 + $0x2ec] ss:$16 sps:$4 sm:$0xff]  }
   0xf   :  { %700 = vmatpush1.bf16.msra.mxu0 %v1064_v15  ;;  %v1084_v29 = vld [vmem:[%s1622_s1 + $0x4] ss:$16 sps:$4 sm:$0xff]   ;;  %v1088_v31 = vld [vmem:[%s1622_s1] ss:$16 sps:$4 sm:$0xff]   ;;  %v1144_v7 = vld [vmem:[%s1622_s1 + $0x48] ss:$16 sps:$4 sm:$0xff]  }
  0x10   :  { %743 = vmatpush1.bf16.msra.mxu1 %v1065_v16  ;;  %701 = vmatprep.subr.bf16.mxu0 %v1066_v17  ;;  %v1086_v30 = vld [vmem:[%s1622_s1 + $0x204] ss:$16 sps:$4 sm:$0xff]   ;;  %v1089_v32 = vld [vmem:[%s1622_s1 + $0x200] ss:$16 sps:$4 sm:$0xff]   ;;  %v1147_v8 = vld [vmem:[%s1622_s1 + $0x2e8] ss:$16 sps:$4 sm:$0xff]  }
  0x11   :  { %744 = vmatprep.subr.bf16.mxu1 %v1068_v18  ;;  %v1090_v33 = vld [vmem:[%s1622_s1 + $0x1e4] ss:$16 sps:$4 sm:$0xff]   ;;  %v1094_v36 = vld [vmem:[%s1622_s1 + $0x1e0] ss:$16 sps:$4 sm:$0xff]   ;;  %v1152_v9 = vld [vmem:[%s1622_s1 + $0x2c] ss:$16 sps:$4 sm:$0xff]  }
  0x12   :  { %v1092_v34 = vld [vmem:[%s1622_s1 + $0x344] ss:$16 sps:$4 sm:$0xff]   ;;  %v1095_v37 = vld [vmem:[%s1622_s1 + $0x340] ss:$16 sps:$4 sm:$0xff]   ;;  %v1155_v10 = vld [vmem:[%s1622_s1 + $0x2cc] ss:$16 sps:$4 sm:$0xff]  }
  0x13   :  { %702 = vmatpush1.bf16.msra.mxu0 %v1070_v19  ;;  %v1096_v38 = vld [vmem:[%s1622_s1 + $0x1c4] ss:$16 sps:$4 sm:$0xff]   ;;  %v1100_v40 = vld [vmem:[%s1622_s1 + $0x1c0] ss:$16 sps:$4 sm:$0xff]   ;;  %v1150_v11 = vld [vmem:[%s1622_s1 + $0x28] ss:$16 sps:$4 sm:$0xff]  }
  0x14   :  { %745 = vmatpush1.bf16.msra.mxu1 %v1071_v20  ;;  %703 = vmatprep.subr.bf16.mxu0 %v1072_v21  ;;  %v1098_v39 = vld [vmem:[%s1622_s1 + $0x324] ss:$16 sps:$4 sm:$0xff]   ;;  %v1101_v41 = vld [vmem:[%s1622_s1 + $0x320] ss:$16 sps:$4 sm:$0xff]   ;;  %v1153_v12 = vld [vmem:[%s1622_s1 + $0x2c8] ss:$16 sps:$4 sm:$0xff]  }
  0x15   :  { %746 = vmatprep.subr.bf16.mxu1 %v1074_v22  ;;  %v1102_v42 = vld [vmem:[%s1622_s1 + $0x1a4] ss:$16 sps:$4 sm:$0xff]   ;;  %v1106_v44 = vld [vmem:[%s1622_s1 + $0x1a0] ss:$16 sps:$4 sm:$0xff]   ;;  %v1158_v13 = vld [vmem:[%s1622_s1 + $0xc] ss:$16 sps:$4 sm:$0xff]  }
  0x16   :  { %v1104_v43 = vld [vmem:[%s1622_s1 + $0x304] ss:$16 sps:$4 sm:$0xff]   ;;  %v1107_v45 = vld [vmem:[%s1622_s1 + $0x300] ss:$16 sps:$4 sm:$0xff]   ;;  %v1161_v14 = vld [vmem:[%s1622_s1 + $0x2ac] ss:$16 sps:$4 sm:$0xff]  }
  0x17   :  { %704 = vmatpush1.bf16.msra.mxu0 %v1076_v23  ;;  %v1111_v46 = vld [vmem:[%s1622_s1 + $0x184] ss:$16 sps:$4 sm:$0xff]   ;;  %v1116_v50 = vld [vmem:[%s1622_s1 + $0x180] ss:$16 sps:$4 sm:$0xff]   ;;  %v1156_v15 = vld [vmem:[%s1622_s1 + $0x8] ss:$16 sps:$4 sm:$0xff]  }
  0x18   :  { %747 = vmatpush1.bf16.msra.mxu1 %v1077_v24  ;;  %705 = vmatprep.subr.bf16.mxu0 %v1078_v25  ;;  %v1117_v51 = vld [vmem:[%s1622_s1 + $0x164] ss:$16 sps:$4 sm:$0xff]   ;;  %v1122_v55 = vld [vmem:[%s1622_s1 + $0x160] ss:$16 sps:$4 sm:$0xff]   ;;  %v1159_v16 = vld [vmem:[%s1622_s1 + $0x2a8] ss:$16 sps:$4 sm:$0xff]  }
  0x19   :  { %748 = vmatprep.subr.bf16.mxu1 %v1080_v26  ;;  %v1143_v53 = vld [vmem:[%s1623_s0 + $0x4] ss:$16 sps:$4 sm:$0xff]   ;;  %v1128_v59 = vld [vmem:[%s1622_s1 + $0x140] ss:$16 sps:$4 sm:$0xff]   ;;  %v1164_v17 = vld [vmem:[%s1622_s1 + $0x1ec] ss:$16 sps:$4 sm:$0xff]  }
  0x1a   :  { %725 = vmatprep.mubr.bf16.mxu0 %v1143_v53  ;;  %v1123_v56 = vld [vmem:[%s1622_s1 + $0x144] ss:$16 sps:$4 sm:$0xff]   ;;  %v1134_v63 = vld [vmem:[%s1622_s1 + $0x120] ss:$16 sps:$4 sm:$0xff]   ;;  %v1167_v18 = vld [vmem:[%s1622_s1 + $0x28c] ss:$16 sps:$4 sm:$0xff]  }
  0x1b   :  { %706 = vmatpush1.bf16.msra.mxu0 %v1082_v27  ;;  %v1129_v60 = vld [vmem:[%s1622_s1 + $0x124] ss:$16 sps:$4 sm:$0xff]   ;;  %v1140_v3 = vld [vmem:[%s1622_s1 + $0x100] ss:$16 sps:$4 sm:$0xff]   ;;  %v1162_v21 = vld [vmem:[%s1622_s1 + $0x1e8] ss:$16 sps:$4 sm:$0xff]  }
  0x1c   :  { %749 = vmatpush1.bf16.msra.mxu1 %v1083_v28  ;;  %707 = vmatprep.subr.bf16.mxu0 %v1084_v29  ;;  %v1135_v0 = vld [vmem:[%s1622_s1 + $0x104] ss:$16 sps:$4 sm:$0xff]   ;;  %v1453_v6 = vld [vmem:[%s1623_s0] ss:$16 sps:$4 sm:$0xff]   ;;  %v1165_v22 = vld [vmem:[%s1622_s1 + $0x288] ss:$16 sps:$4 sm:$0xff]  }
  0x1d   :  { %750 = vmatprep.subr.bf16.mxu1 %v1086_v30  ;;  %v865_v19 = vld [vmem:[%s1624_s2] sm:$0xff]  ;;  %v866_v23 = vld [vmem:[%s1624_s2 + $0x8] sm:$0xff] }
  0x1e   :  { %869 = vperm.xlu0 %1040, %v865_v19   ;;  %v885_v20 = vld [vmem:[%s1625_s3] sm:$0xff]  ;;  %v1170_v24 = vld [vmem:[%s1622_s1 + $0x1cc] ss:$16 sps:$4 sm:$0xff]   ;;  %v1168_v27 = vld [vmem:[%s1622_s1 + $0x1c8] ss:$16 sps:$4 sm:$0xff]  }
  0x1f   :  { %708 = vmatpush1.bf16.msra.mxu0 %v1088_v31  ;;  %v1173_v25 = vld [vmem:[%s1622_s1 + $0x26c] ss:$16 sps:$4 sm:$0xff]   ;;  %889 = vperm.xlu1 %1041, %v885_v20   ;;  %v1171_v28 = vld [vmem:[%s1622_s1 + $0x268] ss:$16 sps:$4 sm:$0xff]  }
  0x20   :  { %751 = vmatpush1.bf16.msra.mxu1 %v1089_v32  ;;  %709 = vmatprep.subr.bf16.mxu0 %v1090_v33  ;;  %v886_v26 = vld [vmem:[%s1625_s3 + $0x8] sm:$0xff] }
  0x21   :  { %762 = vmatprep.subr.bf16.mxu1 %v1092_v34  ;;  %v1176_v29 = vld [vmem:[%s1622_s1 + $0x1ac] ss:$16 sps:$4 sm:$0xff]   ;;  %v1174_v31 = vld [vmem:[%s1622_s1 + $0x1a8] ss:$16 sps:$4 sm:$0xff]  }
  0x22   :  { %874 = vperm.xlu0 %1040, %v866_v23   ;;  %v1179_v30 = vld [vmem:[%s1622_s1 + $0x24c] ss:$16 sps:$4 sm:$0xff]   ;;  %v1177_v32 = vld [vmem:[%s1622_s1 + $0x248] ss:$16 sps:$4 sm:$0xff]  }
  0x23   :  { %710 = vmatpush2.bf16.msra.mxu0 %v1094_v36  ;;  %894 = vperm.xlu1 %1041, %v886_v26   ;;  %v1182_v33 = vld [vmem:[%s1622_s1 + $0x18c] ss:$16 sps:$4 sm:$0xff]   ;;  %v1183_v36 = vld [vmem:[%s1622_s1 + $0x228] ss:$16 sps:$4 sm:$0xff]  }
  0x24   :  { %763 = vmatpush2.bf16.msra.mxu1 %v1095_v37  ;;  %711 = vmatprep.subr.bf16.mxu0 %v1096_v38  ;;  %v1185_v34 = vld [vmem:[%s1622_s1 + $0x22c] ss:$16 sps:$4 sm:$0xff]  }
  0x25   :  { %764 = vmatprep.subr.bf16.mxu1 %v1098_v39  ;;  %v1188_v37 = vld [vmem:[%s1622_s1 + $0x16c] ss:$16 sps:$4 sm:$0xff]   ;;  %v1186_v39 = vld [vmem:[%s1622_s1 + $0x168] ss:$16 sps:$4 sm:$0xff]  }
  0x26   :  { %v1191_v38 = vld [vmem:[%s1622_s1 + $0x20c] ss:$16 sps:$4 sm:$0xff]  }
  0x27   :  { %712 = vmatpush2.bf16.msra.mxu0 %v1100_v40  ;;  %v1189_v40 = vld [vmem:[%s1622_s1 + $0x208] ss:$16 sps:$4 sm:$0xff]  }
  0x28   :  { %765 = vmatpush2.bf16.msra.mxu1 %v1101_v41  ;;  %713 = vmatprep.subr.bf16.mxu0 %v1102_v42  ;;  %v1194_v41 = vld [vmem:[%s1622_s1 + $0x14c] ss:$16 sps:$4 sm:$0xff]  }
  0x29   :  { %766 = vmatprep.subr.bf16.mxu1 %v1104_v43  ;;  %v1197_v42 = vld [vmem:[%s1622_s1 + $0x34c] ss:$16 sps:$4 sm:$0xff]   ;;  %v1192_v43 = vld [vmem:[%s1622_s1 + $0x148] ss:$16 sps:$4 sm:$0xff]  }
  0x2b   :  { %714 = vmatpush2.bf16.msra.mxu0 %v1106_v44  ;;  %v1195_v44 = vld [vmem:[%s1622_s1 + $0x348] ss:$16 sps:$4 sm:$0xff]  }
  0x2c   :  { %767 = vmatpush2.bf16.msra.mxu1 %v1107_v45  ;;  %715 = vmatprep.subr.bf16.mxu0 %v1111_v46  ;;  %v1200_v45 = vld [vmem:[%s1622_s1 + $0x12c] ss:$16 sps:$4 sm:$0xff]  }
  0x2d   :  { %779 = vmatprep.subr.bf16.mxu1 %v1115_v47  ;;  %v1203_v46 = vld [vmem:[%s1622_s1 + $0x32c] ss:$16 sps:$4 sm:$0xff]   ;;  %v1198_v47 = vld [vmem:[%s1622_s1 + $0x128] ss:$16 sps:$4 sm:$0xff]  }
  0x2f   :  { %769 = vmatmul.mubr.bf16.vlgmr.msra.gmra.mxu1 %v1384_v48  ;;  %716 = vmatpush2.bf16.msra.mxu0 %v1116_v50  ;;  %v1206_v50 = vld [vmem:[%s1622_s1 + $0x10c] ss:$16 sps:$4 sm:$0xff]  }
  0x30   :  { %780 = vmatpush1.bf16.msra.mxu1 %v1113_v49  ;;  %717 = vmatprep.subr.bf16.mxu0 %v1117_v51  ;;  %v1201_v49 = vld [vmem:[%s1622_s1 + $0x328] ss:$16 sps:$4 sm:$0xff]   ;;  %v1209_v51 = vld [vmem:[%s1622_s1 + $0x30c] ss:$16 sps:$4 sm:$0xff]  }
  0x31   :  { %781 = vmatprep.subr.bf16.mxu1 %v1121_v52  ;;  %811 = vmatprep.mubr.bf16.mxu1 %v1143_v53  ;;  %v1204_v52 = vld [vmem:[%s1622_s1 + $0x108] ss:$16 sps:$4 sm:$0xff]  }
  0x32   :  { %v1207_v53 = vld [vmem:[%s1622_s1 + $0x308] ss:$16 sps:$4 sm:$0xff]  }
  0x33   :  { %718 = vmatpush2.bf16.msra.mxu0 %v1122_v55 }
  0x34   :  { %782 = vmatpush1.bf16.msra.mxu1 %v1119_v54  ;;  %719 = vmatprep.subr.bf16.mxu0 %v1123_v56 }
  0x35   :  { %783 = vmatprep.subr.bf16.mxu1 %v1127_v57 }
  0x37   :  { %720 = vmatpush2.bf16.msra.mxu0 %v1128_v59 }
  0x38   :  { %784 = vmatpush1.bf16.msra.mxu1 %v1125_v58  ;;  %721 = vmatprep.subr.bf16.mxu0 %v1129_v60 }
  0x39   :  { %785 = vmatprep.subr.bf16.mxu1 %v1133_v61 }
  0x3b   :  { %722 = vmatpush2.bf16.msra.mxu0 %v1134_v63 }
  0x3c   :  { %786 = vmatpush1.bf16.msra.mxu1 %v1131_v62  ;;  %723 = vmatprep.subr.bf16.mxu0 %v1135_v0 }
  0x3d   :  { %787 = vmatprep.subr.bf16.mxu1 %v1139_v1 }
  0x3f   :  { %724 = vmatpush2.bf16.msra.mxu0 %v1140_v3 }
  0x40   :  { %788 = vmatpush1.bf16.msra.mxu1 %v1137_v2  ;;  %822 = vmatprep.subr.bf16.mxu0 %v1149_v5 }
  0x41   :  { %789 = vmatprep.subr.bf16.mxu1 %v1146_v4 }
  0x42   :  { %726 = vmatmul.mubr.bf16.vlgmr.msra.gmra.mxu0 %v1453_v6 }
  0x43   :  { %823 = vmatpush1.bf16.msra.mxu0 %v1147_v8  ;;  %1038 = vmatprep.mubr.msk.bf16.mxu0 %vm689_vm0, %v1341_v35  ;;  %v1180_v35 = vld [vmem:[%s1622_s1 + $0x188] ss:$16 sps:$4 sm:$0xff]  }
  0x44   :  { %790 = vmatpush1.bf16.msra.mxu1 %v1144_v7  ;;  %824 = vmatprep.subr.bf16.mxu0 %v1155_v10 }
  0x45   :  { %791 = vmatprep.subr.bf16.mxu1 %v1152_v9 }
  0x47   :  { %825 = vmatpush1.bf16.msra.mxu0 %v1153_v12 }
  0x48   :  { %792 = vmatpush1.bf16.msra.mxu1 %v1150_v11  ;;  %826 = vmatprep.subr.bf16.mxu0 %v1161_v14 }
  0x49   :  { %793 = vmatprep.subr.bf16.mxu1 %v1158_v13 }
  0x4b   :  { %827 = vmatpush1.bf16.msra.mxu0 %v1159_v16 }
  0x4c   :  { %794 = vmatpush1.bf16.msra.mxu1 %v1156_v15  ;;  %828 = vmatprep.subr.bf16.mxu0 %v1167_v18 }
  0x4d   :  { %795 = vmatprep.subr.bf16.mxu1 %v1164_v17 }
  0x4f   :  { %829 = vmatpush1.bf16.msra.mxu0 %v1165_v22 }
  0x50   :  { %796 = vmatpush2.bf16.msra.mxu1 %v1162_v21  ;;  %830 = vmatprep.subr.bf16.mxu0 %v1173_v25 }
  0x51   :  { %797 = vmatprep.subr.bf16.mxu1 %v1170_v24 }
  0x53   :  { %831 = vmatpush1.bf16.msra.mxu0 %v1171_v28 }
  0x54   :  { %798 = vmatpush2.bf16.msra.mxu1 %v1168_v27  ;;  %832 = vmatprep.subr.bf16.mxu0 %v1179_v30 }
  0x55   :  { %799 = vmatprep.subr.bf16.mxu1 %v1176_v29 }
  0x57   :  { %833 = vmatpush1.bf16.msra.mxu0 %v1177_v32 }
  0x58   :  { %800 = vmatpush2.bf16.msra.mxu1 %v1174_v31  ;;  %834 = vmatprep.subr.bf16.mxu0 %v1185_v34 }
  0x59   :  { %801 = vmatprep.subr.bf16.mxu1 %v1182_v33 }
  0x5b   :  { %835 = vmatpush1.bf16.msra.mxu0 %v1183_v36 }
  0x5c   :  { %802 = vmatpush2.bf16.msra.mxu1 %v1180_v35  ;;  %836 = vmatprep.subr.bf16.mxu0 %v1191_v38 }
  0x5d   :  { %803 = vmatprep.subr.bf16.mxu1 %v1188_v37 }
  0x5f   :  { %837 = vmatpush1.bf16.msra.mxu0 %v1189_v40 }
  0x60   :  { %804 = vmatpush2.bf16.msra.mxu1 %v1186_v39  ;;  %848 = vmatprep.subr.bf16.mxu0 %v1197_v42 }
  0x61   :  { %805 = vmatprep.subr.bf16.mxu1 %v1194_v41 }
  0x63   :  { %849 = vmatpush2.bf16.msra.mxu0 %v1195_v44 }
  0x64   :  { %806 = vmatpush2.bf16.msra.mxu1 %v1192_v43  ;;  %850 = vmatprep.subr.bf16.mxu0 %v1203_v46 }
  0x65   :  { %807 = vmatprep.subr.bf16.mxu1 %v1200_v45 }
  0x67   :  { %851 = vmatpush2.bf16.msra.mxu0 %v1201_v49 }
  0x68   :  { %808 = vmatpush2.bf16.msra.mxu1 %v1198_v47  ;;  %852 = vmatprep.subr.bf16.mxu0 %v1209_v51 }
  0x69   :  { %809 = vmatprep.subr.bf16.mxu1 %v1206_v50 }
  0x6b   :  { %853 = vmatpush2.bf16.msra.mxu0 %v1207_v53 }
  0x6c   :  { %810 = vmatpush2.bf16.msra.mxu1 %v1204_v52 }
  0x6e   :  { %855 = vmatmul.mubr.bf16.vlgmr.msra.gmra.mxu0 %v1384_v48 }
  0x6f   :  { %812 = vmatmul.mubr.bf16.vlgmr.msra.gmra.mxu1 %v1453_v6 }
  0x99   :  { %v870_v56 = vpop.permute.xlu0 %869 }
  0x9a   :  { %v890_v57 = vpop.permute.xlu1 %889 }
  0x9d   :  { %v875_v1 = vpop.permute.xlu0 %874 }
  0x9e   :  { %v895_v5 = vpop.permute.xlu1 %894 }
  0xef   :  { %v770_v54 = vpop.f32.mrf.mxu1 }
  0xf1   :  { %v772_v55 = vpop.f32.mrf.mxu1 }
  0xf3   :  { %v774_v60 = vpop.f32.mrf.mxu1 }
  0xf5   :  { %v776_v7 = vpop.f32.mrf.mxu1 }
 0x102   :  { %v727_v58 = vpop.f32.mrf.mxu0 }
 0x103   :  { %v771_v59 = vadd.f32 %v770_v54, %v727_v58 }
 0x104   :  { %v729_v61 = vpop.f32.mrf.mxu0 }
 0x105   :  { %v877_v62 = vmul.f32 %v870_v56, %v771_v59  ;;  %v773_v63 = vadd.f32 %v772_v55, %v729_v61 }
 0x106   :  { %v731_v0 = vpop.f32.mrf.mxu0 }
 0x107   :  { %v878_v2 = vmul.f32 %v870_v56, %v773_v63  ;;  %v897_v3 = vadd.f32 %v890_v57, %v877_v62  ;;  %v775_v4 = vadd.f32 %v774_v60, %v731_v0 }
 0x108   :  { %v733_v6 = vpop.f32.mrf.mxu0 }
 0x109   :  { %v898_v8 = vadd.f32 %v890_v57, %v878_v2  ;;  %v905_v48 = vmax.f32 %v897_v3, 0.0  ;;  %v881_v9 = vmul.f32 %v875_v1, %v775_v4  ;;  %v777_v10 = vadd.f32 %v776_v7, %v733_v6 }
 0x10b   :  { %v906_v11 = vmax.f32 %v898_v8, 0.0  ;;  %913 = vst [vmem:[%s1626_s4] sm:$0xff] %v905_v48  ;;  %v882_v12 = vmul.f32 %v875_v1, %v777_v10  ;;  %v901_v13 = vadd.f32 %v895_v5, %v881_v9 }
 0x10d   :  { %914 = vst [vmem:[%s1626_s4 + $0x8] sm:$0xff] %v906_v11  ;;  %v902_v14 = vadd.f32 %v895_v5, %v882_v12  ;;  %v909_v15 = vmax.f32 %v901_v13, 0.0 }
 0x10f   :  { %v910_v16 = vmax.f32 %v902_v14, 0.0  ;;  %917 = vst [vmem:[%s1626_s4 + $0x20] sm:$0xff] %v909_v15 }
 0x111   :  { %918 = vst [vmem:[%s1626_s4 + $0x28] sm:$0xff] %v910_v16 }
 0x12e   :  { %v856_v18 = vpop.f32.mrf.mxu0 }
 0x12f   :  { %v813_v17 = vpop.f32.mrf.mxu1 }
 0x130   :  { %v857_v19 = vadd.f32 %v856_v18, %v813_v17  ;;  %v858_v21 = vpop.f32.mrf.mxu0 }
 0x131   :  { %v815_v20 = vpop.f32.mrf.mxu1 }
 0x132   :  { %v879_v22 = vmul.f32 %v870_v56, %v857_v19  ;;  %v859_v23 = vadd.f32 %v858_v21, %v815_v20  ;;  %v860_v25 = vpop.f32.mrf.mxu0 }
 0x133   :  { %v817_v24 = vpop.f32.mrf.mxu1 }
 0x134   :  { %v899_v26 = vadd.f32 %v890_v57, %v879_v22  ;;  %v880_v27 = vmul.f32 %v870_v56, %v859_v23  ;;  %v861_v28 = vadd.f32 %v860_v25, %v817_v24  ;;  %v862_v30 = vpop.f32.mrf.mxu0 }
 0x135   :  { %v819_v29 = vpop.f32.mrf.mxu1 }
 0x136   :  { %v907_v31 = vmax.f32 %v899_v26, 0.0  ;;  %v900_v32 = vadd.f32 %v890_v57, %v880_v27  ;;  %v883_v33 = vmul.f32 %v875_v1, %v861_v28  ;;  %v863_v34 = vadd.f32 %v862_v30, %v819_v29 }
 0x138   :  { %915 = vst [vmem:[%s1626_s4 + $0x10] sm:$0xff] %v907_v31  ;;  %v908_v35 = vmax.f32 %v900_v32, 0.0  ;;  %v903_v36 = vadd.f32 %v895_v5, %v883_v33  ;;  %v884_v37 = vmul.f32 %v875_v1, %v863_v34 }
 0x13a   :  { %916 = vst [vmem:[%s1626_s4 + $0x18] sm:$0xff] %v908_v35  ;;  %v911_v38 = vmax.f32 %v903_v36, 0.0  ;;  %v904_v39 = vadd.f32 %v895_v5, %v884_v37 }
 0x13c   :  { %919 = vst [vmem:[%s1626_s4 + $0x30] sm:$0xff] %v911_v38  ;;  %v912_v40 = vmax.f32 %v904_v39, 0.0 }
 0x13e   :  { %920 = vst [vmem:[%s1626_s4 + $0x38] sm:$0xff] %v912_v40 }

// kernel: depth_net.38
= control target key start
LH: loop header
LB: loop body
LE: loop exit
PB: predicated region body
PF: predicated region fallthrough
CT: control target
= control target key end

     0   :  { %v561_v0 = vmov 0   ;;  %vm280_vm0 = vcmask 392192   ;;  %vm445_vm1 = vcmask 523264   ;;  %s747_s1 = inlined_call_operand.vmem [shape: bf16[432,64], index: 1, kind: input, shape index: {}]   ;;  %s748_s0 = inlined_call_operand.vmem [shape: bf16[32,432], index: 0, kind: input, shape index: {}]   ;;  %s749_s2 = inlined_call_operand.vmem [shape: f32[32,1], index: 2, kind: input, shape index: {}]   ;;  %s750_s3 = inlined_call_operand.vmem [shape: f32[32,1], index: 3, kind: input, shape index: {}]   ;;  %s751_s4 = inlined_call_operand.vmem [shape: f32[32,64], index: 4, kind: output, shape index: {}]  }
   0x1   :  { %336 = vmatprep.subr.bf16.mxu1 %v561_v0  ;;  %v522_v1 = vld [vmem:[%s747_s1 + $0xb8] sm:$0xff]   ;;  %521 = vset.pattern.permute.xlu1 %v561_v0  ;;  %v525_v4 = vld [vmem:[%s747_s1 + $0xb0] sm:$0xff]   ;;  %v528_v7 = vld [vmem:[%s747_s1 + $0xa8] sm:$0xff]  }
   0x2   :  { %v523_v2 = vld [vmem:[%s747_s1 + $0x78] sm:$0xff]   ;;  %520 = vset.pattern.permute.xlu0 %v561_v0  ;;  %337 = vmatpush1.bf16.msra.mxu1 %v522_v1  ;;  %v526_v5 = vld [vmem:[%s747_s1 + $0x70] sm:$0xff]   ;;  %v529_v8 = vld [vmem:[%s747_s1 + $0x68] sm:$0xff]  }
   0x3   :  { %v524_v3 = vld [vmem:[%s747_s1 + $0x38] sm:$0xff]   ;;  %491 = vmatprep.subr.bf16.mxu0 %v523_v2  ;;  %338 = vmatprep.subr.bf16.mxu1 %v561_v0  ;;  %v527_v6 = vld [vmem:[%s747_s1 + $0x30] sm:$0xff]   ;;  %v530_v9 = vld [vmem:[%s747_s1 + $0x28] sm:$0xff]  }
   0x4   :  { %492 = vmatpush3.bf16.msra.mxu0 %v524_v3  ;;  %v531_v10 = vld [vmem:[%s747_s1 + $0xa0] sm:$0xff]   ;;  %v535_v13 = vld [vmem:[%s747_s1 + $0x58] sm:$0xff]   ;;  %v538_v16 = vld [vmem:[%s747_s1 + $0x50] sm:$0xff]  }
   0x5   :  { %493 = vmatprep.subr.bf16.mxu0 %v526_v5  ;;  %v532_v11 = vld [vmem:[%s747_s1 + $0x60] sm:$0xff]   ;;  %v534_v14 = vld [vmem:[%s747_s1 + $0x98] sm:$0xff]   ;;  %v537_v17 = vld [vmem:[%s747_s1 + $0x90] sm:$0xff]  }
   0x6   :  { %339 = vmatpush1.bf16.msra.mxu1 %v525_v4  ;;  %v533_v12 = vld [vmem:[%s747_s1 + $0x20] sm:$0xff]   ;;  %v536_v15 = vld [vmem:[%s747_s1 + $0x18] sm:$0xff]   ;;  %v539_v18 = vld [vmem:[%s747_s1 + $0x10] sm:$0xff]  }
   0x7   :  { %340 = vmatprep.subr.bf16.mxu1 %v561_v0  ;;  %v541_v19 = vld [vmem:[%s747_s1 + $0x48] sm:$0xff]   ;;  %v544_v22 = vld [vmem:[%s747_s1 + $0x40] sm:$0xff]   ;;  %v549_v26 = vld [vmem:[%s747_s1 + $0xd0] sm:$0xff]  }
   0x8   :  { %494 = vmatpush3.bf16.msra.mxu0 %v527_v6  ;;  %v540_v20 = vld [vmem:[%s747_s1 + $0x88] sm:$0xff]   ;;  %v548_v23 = vld [vmem:[%s748_s0 + $0x4] ss:$16 sps:$4 sm:$0xff]   ;;  %v546_v28 = vld [vmem:[%s748_s0] ss:$16 sps:$4 sm:$0xff]  }
   0x9   :  { %495 = vmatprep.subr.bf16.mxu0 %v529_v8  ;;  %v542_v21 = vld [vmem:[%s747_s1 + $0x8] sm:$0xff]   ;;  %v543_v24 = vld [vmem:[%s747_s1 + $0x80] sm:$0xff]   ;;  %319 = vmatprep.mubr.bf16.mxu0 %v548_v23  ;;  %v387_v30 = vld [vmem:[%s749_s2 + $0x10] sm:$0xff] }
   0xa   :  { %341 = vmatpush1.bf16.msra.mxu1 %v528_v7  ;;  %v545_v25 = vld [vmem:[%s747_s1] sm:$0xff]   ;;  %v557_v27 = vld [vmem:[%s748_s0 + $0xc] ss:$16 sps:$4 sm:$0xff]   ;;  %401 = vperm.xlu1 %521, %v387_v30   ;;  %v555_v39 = vld [vmem:[%s748_s0 + $0x8] ss:$16 sps:$4 sm:$0xff]  }
   0xb   :  { %342 = vmatprep.subr.bf16.mxu1 %v561_v0  ;;  %v551_v29 = vld [vmem:[%s748_s0 + $0x24] ss:$16 sps:$4 sm:$0xff]   ;;  %489 = vmatprep.mubr.msk.bf16.mxu1 %vm280_vm0, %v557_v27  ;;  %v550_v32 = vld [vmem:[%s747_s1 + $0xc8] sm:$0xff]   ;;  %v388_v33 = vld [vmem:[%s749_s2 + $0x18] sm:$0xff] }
   0xc   :  { %496 = vmatpush3.bf16.msra.mxu0 %v530_v9  ;;  %v385_v31 = vld [vmem:[%s749_s2] sm:$0xff]  ;;  %v386_v34 = vld [vmem:[%s749_s2 + $0x8] sm:$0xff]  ;;  %v416_v41 = vld [vmem:[%s750_s3 + $0x18] sm:$0xff] }
   0xd   :  { %497 = vmatprep.subr.bf16.mxu0 %v532_v11  ;;  %391 = vperm.xlu0 %520, %v385_v31   ;;  %v553_v35 = vld [vmem:[%s747_s1 + $0xc0] sm:$0xff]   ;;  %v414_v36 = vld [vmem:[%s750_s3 + $0x8] sm:$0xff]  ;;  %v415_v42 = vld [vmem:[%s750_s3 + $0x10] sm:$0xff] }
   0xe   :  { %343 = vmatpush1.bf16.msra.mxu1 %v531_v10  ;;  %406 = vperm.xlu1 %521, %v388_v33   ;;  %v413_v37 = vld [vmem:[%s750_s3] sm:$0xff]  ;;  %v558_v40 = vld [vmem:[%s748_s0 + $0x2c] ss:$16 sps:$4 sm:$0xff]   ;;  %v560_v43 = vld [vmem:[%s748_s0 + $0x28] ss:$16 sps:$4 sm:$0xff]  }
   0xf   :  { %344 = vmatprep.subr.bf16.mxu1 %v561_v0  ;;  %v554_v38 = vld [vmem:[%s748_s0 + $0x20] ss:$16 sps:$4 sm:$0xff]  }
  0x10   :  { %498 = vmatpush3.bf16.msra.mxu0 %v533_v12 }
  0x11   :  { %499 = vmatprep.subr.bf16.mxu0 %v535_v13  ;;  %396 = vperm.xlu0 %520, %v386_v34  }
  0x12   :  { %345 = vmatpush1.bf16.msra.mxu1 %v534_v14  ;;  %424 = vperm.xlu1 %521, %v414_v36  }
  0x13   :  { %346 = vmatprep.subr.bf16.mxu1 %v561_v0 }
  0x14   :  { %500 = vmatpush3.bf16.msra.mxu0 %v536_v15 }
  0x15   :  { %501 = vmatprep.subr.bf16.mxu0 %v538_v16  ;;  %419 = vperm.xlu0 %520, %v413_v37  }
  0x16   :  { %347 = vmatpush1.bf16.msra.mxu1 %v537_v17  ;;  %434 = vperm.xlu1 %521, %v416_v41  }
  0x17   :  { %348 = vmatprep.subr.bf16.mxu1 %v561_v0 }
  0x18   :  { %502 = vmatpush3.bf16.msra.mxu0 %v539_v18 }
  0x19   :  { %503 = vmatprep.subr.bf16.mxu0 %v541_v19  ;;  %429 = vperm.xlu0 %520, %v415_v42  }
  0x1a   :  { %349 = vmatpush1.bf16.msra.mxu1 %v540_v20 }
  0x1b   :  { %350 = vmatprep.subr.bf16.mxu1 %v561_v0 }
  0x1c   :  { %504 = vmatpush3.bf16.msra.mxu0 %v542_v21 }
  0x1d   :  { %505 = vmatprep.subr.bf16.mxu0 %v544_v22 }
  0x1e   :  { %351 = vmatpush1.bf16.msra.mxu1 %v543_v24 }
  0x1f   :  { %362 = vmatprep.subr.bf16.mxu1 %v561_v0 }
  0x20   :  { %506 = vmatpush3.bf16.msra.mxu0 %v545_v25 }
  0x22   :  { %363 = vmatpush2.bf16.msra.mxu1 %v549_v26 }
  0x23   :  { %320 = vmatmul.mubr.bf16.vlgmr.msra.gmra.mxu0 %v546_v28  ;;  %364 = vmatprep.subr.bf16.mxu1 %v561_v0 }
  0x24   :  { %327 = vmatprep.mubr.bf16.mxu0 %v551_v29 }
  0x26   :  { %365 = vmatpush2.bf16.msra.mxu1 %v550_v32 }
  0x27   :  { %366 = vmatprep.subr.bf16.mxu1 %v561_v0 }
  0x2a   :  { %367 = vmatpush2.bf16.msra.mxu1 %v553_v35 }
  0x2b   :  { %328 = vmatmul.mubr.bf16.gmra.mxu0 %v554_v38 }
  0x2d   :  { %369 = vmatmul.mubr.bf16.vlgmr.msra.gmra.mxu1 %v555_v39 }
  0x2e   :  { %490 = vmatprep.mubr.msk.bf16.mxu1 %vm280_vm0, %v558_v40 }
  0x35   :  { %377 = vmatmul.mubr.bf16.gmra.mxu1 %v560_v43 }
  0x85   :  { %v402_v48 = vpop.permute.xlu1 %401 }
  0x88   :  { %v392_v45 = vpop.permute.xlu0 %391 }
  0x89   :  { %v407_v55 = vpop.permute.xlu1 %406 }
  0x8c   :  { %v397_v50 = vpop.permute.xlu0 %396 }
  0x8d   :  { %v425_v2 = vpop.permute.xlu1 %424 }
  0x90   :  { %v420_v59 = vpop.permute.xlu0 %419 }
  0x91   :  { %v435_v21 = vpop.permute.xlu1 %434 }
  0x94   :  { %v430_v14 = vpop.permute.xlu0 %429 }
  0xe3   :  { %v507_v44 = vpop.f32.mrf.mxu0 }
  0xe5   :  { %v508_v46 = vpop.f32.mrf.mxu0 }
  0xe6   :  { %v509_v52 = vadd.f32 %v508_v46, %v507_v44 }
  0xe7   :  { %v510_v47 = vpop.f32.mrf.mxu0 }
  0xe9   :  { %v511_v49 = vpop.f32.mrf.mxu0 }
  0xea   :  { %v512_v58 = vadd.f32 %v511_v49, %v510_v47 }
  0xeb   :  { %v513_v51 = vpop.f32.mrf.mxu0 }
  0xed   :  { %v514_v53 = vpop.f32.mrf.mxu0  ;;  %v370_v54 = vpop.f32.mrf.mxu1 }
  0xee   :  { %v371_v56 = vadd.f32 %v509_v52, %v370_v54  ;;  %v515_v3 = vadd.f32 %v514_v53, %v513_v51 }
  0xef   :  { %v372_v57 = vpop.f32.mrf.mxu1  ;;  %v516_v61 = vpop.f32.mrf.mxu0 }
  0xf0   :  { %v409_v60 = vmul.f32 %v392_v45, %v371_v56 }
  0xf1   :  { %v373_v62 = vpop.f32.mrf.mxu1  ;;  %v517_v6 = vpop.f32.mrf.mxu0 }
  0xf2   :  { %v437_v63 = vadd.f32 %v420_v59, %v409_v60  ;;  %v374_v0 = vadd.f32 %v512_v58, %v373_v62  ;;  %v518_v11 = vadd.f32 %v517_v6, %v516_v61 }
  0xf3   :  { %v375_v1 = vpop.f32.mrf.mxu1 }
  0xf4   :  { %v441_v4 = vmax.f32 %v437_v63, 0.0  ;;  %v410_v5 = vmul.f32 %v397_v50, %v374_v0 }
  0xf5   :  { %v378_v7 = vpop.f32.mrf.mxu1 }
  0xf6   :  { %446 = vst.msk [vmem:[%s751_s4] sm:$0xff] %vm445_vm1, %v441_v4  ;;  %v438_v8 = vadd.f32 %v425_v2, %v410_v5  ;;  %v379_v9 = vadd.f32 %v515_v3, %v378_v7 }
  0xf7   :  { %v380_v10 = vpop.f32.mrf.mxu1 }
  0xf8   :  { %v442_v12 = vmax.f32 %v438_v8, 0.0  ;;  %v411_v13 = vmul.f32 %v402_v48, %v379_v9 }
  0xf9   :  { %v381_v15 = vpop.f32.mrf.mxu1 }
  0xfa   :  { %447 = vst.msk [vmem:[%s751_s4 + $0x8] sm:$0xff] %vm445_vm1, %v442_v12  ;;  %v439_v16 = vadd.f32 %v430_v14, %v411_v13  ;;  %v382_v17 = vadd.f32 %v518_v11, %v381_v15 }
  0xfb   :  { %v383_v18 = vpop.f32.mrf.mxu1 }
  0xfc   :  { %v443_v19 = vmax.f32 %v439_v16, 0.0  ;;  %v412_v20 = vmul.f32 %v407_v55, %v382_v17 }
  0xfe   :  { %448 = vst.msk [vmem:[%s751_s4 + $0x10] sm:$0xff] %vm445_vm1, %v443_v19  ;;  %v440_v22 = vadd.f32 %v435_v21, %v412_v20 }
 0x100   :  { %v444_v23 = vmax.f32 %v440_v22, 0.0 }
 0x102   :  { %449 = vst.msk [vmem:[%s751_s4 + $0x18] sm:$0xff] %vm445_vm1, %v444_v23 }

// kernel: depth_net.39
= control target key start
LH: loop header
LB: loop body
LE: loop exit
PB: predicated region body
PF: predicated region fallthrough
CT: control target
= control target key end

     0   :  { %v1063_v1 = vmov 0   ;;  %vm536_vm0 = vcmask 785408   ;;  %vm799_vm1 = vcmask 523264   ;;  %s1335_s1 = inlined_call_operand.vmem [shape: bf16[864,64], index: 1, kind: input, shape index: {}]   ;;  %s1336_s0 = inlined_call_operand.vmem [shape: bf16[32,864], index: 0, kind: input, shape index: {}]   ;;  %s1337_s2 = inlined_call_operand.vmem [shape: f32[32,1], index: 2, kind: input, shape index: {}]   ;;  %s1338_s3 = inlined_call_operand.vmem [shape: f32[32,1], index: 3, kind: input, shape index: {}]   ;;  %s1339_s4 = inlined_call_operand.vmem [shape: f32[32,64], index: 4, kind: output, shape index: {}]  }
   0x1   :  { %v989_v0 = vld [vmem:[%s1335_s1 + $0x78] sm:$0xff]   ;;  %988 = vset.pattern.permute.xlu1 %v1063_v1  ;;  %987 = vset.pattern.permute.xlu0 %v1063_v1  ;;  %v993_v5 = vld [vmem:[%s1335_s1 + $0x70] sm:$0xff]   ;;  %v997_v9 = vld [vmem:[%s1335_s1 + $0x68] sm:$0xff]  }
   0x2   :  { %v990_v2 = vld [vmem:[%s1335_s1 + $0xf8] sm:$0xff]   ;;  %878 = vmatprep.subr.bf16.mxu0 %v989_v0  ;;  %v994_v6 = vld [vmem:[%s1335_s1 + $0xf0] sm:$0xff]   ;;  %v998_v10 = vld [vmem:[%s1335_s1 + $0xe8] sm:$0xff]  }
   0x3   :  { %v991_v3 = vld [vmem:[%s1335_s1 + $0x38] sm:$0xff]   ;;  %906 = vmatprep.subr.bf16.mxu1 %v990_v2  ;;  %v995_v7 = vld [vmem:[%s1335_s1 + $0x30] sm:$0xff]   ;;  %v999_v11 = vld [vmem:[%s1335_s1 + $0x28] sm:$0xff]  }
   0x4   :  { %v992_v4 = vld [vmem:[%s1335_s1 + $0xb8] sm:$0xff]   ;;  %879 = vmatpush3.bf16.msra.mxu0 %v991_v3  ;;  %v996_v8 = vld [vmem:[%s1335_s1 + $0xb0] sm:$0xff]   ;;  %v1000_v12 = vld [vmem:[%s1335_s1 + $0xa8] sm:$0xff]  }
   0x5   :  { %907 = vmatpush3.bf16.msra.mxu1 %v992_v4  ;;  %880 = vmatprep.subr.bf16.mxu0 %v993_v5  ;;  %v1001_v13 = vld [vmem:[%s1335_s1 + $0x60] sm:$0xff]   ;;  %v1005_v17 = vld [vmem:[%s1335_s1 + $0x58] sm:$0xff]   ;;  %v1009_v21 = vld [vmem:[%s1335_s1 + $0x50] sm:$0xff]  }
   0x6   :  { %908 = vmatprep.subr.bf16.mxu1 %v994_v6  ;;  %v1002_v14 = vld [vmem:[%s1335_s1 + $0xe0] sm:$0xff]   ;;  %v1006_v18 = vld [vmem:[%s1335_s1 + $0xd8] sm:$0xff]   ;;  %v1010_v22 = vld [vmem:[%s1335_s1 + $0xd0] sm:$0xff]  }
   0x7   :  { %v1003_v15 = vld [vmem:[%s1335_s1 + $0x20] sm:$0xff]   ;;  %v1007_v19 = vld [vmem:[%s1335_s1 + $0x18] sm:$0xff]   ;;  %v1011_v23 = vld [vmem:[%s1335_s1 + $0x10] sm:$0xff]  }
   0x8   :  { %881 = vmatpush3.bf16.msra.mxu0 %v995_v7  ;;  %v1004_v16 = vld [vmem:[%s1335_s1 + $0xa0] sm:$0xff]   ;;  %v1008_v20 = vld [vmem:[%s1335_s1 + $0x98] sm:$0xff]   ;;  %v1012_v24 = vld [vmem:[%s1335_s1 + $0x90] sm:$0xff]  }
   0x9   :  { %909 = vmatpush3.bf16.msra.mxu1 %v996_v8  ;;  %882 = vmatprep.subr.bf16.mxu0 %v997_v9  ;;  %v1013_v25 = vld [vmem:[%s1335_s1 + $0x48] sm:$0xff]   ;;  %v1017_v29 = vld [vmem:[%s1335_s1 + $0x40] sm:$0xff]   ;;  %v1027_v37 = vld [vmem:[%s1335_s1 + $0x178] sm:$0xff]  }
   0xa   :  { %910 = vmatprep.subr.bf16.mxu1 %v998_v10  ;;  %v1014_v26 = vld [vmem:[%s1335_s1 + $0xc8] sm:$0xff]   ;;  %v1018_v30 = vld [vmem:[%s1335_s1 + $0xc0] sm:$0xff]   ;;  %v1028_v38 = vld [vmem:[%s1335_s1 + $0x138] sm:$0xff]  }
   0xb   :  { %v1015_v27 = vld [vmem:[%s1335_s1 + $0x8] sm:$0xff]   ;;  %v1019_v31 = vld [vmem:[%s1335_s1] sm:$0xff]   ;;  %v1029_v39 = vld [vmem:[%s1335_s1 + $0x170] sm:$0xff]  }
   0xc   :  { %883 = vmatpush3.bf16.msra.mxu0 %v999_v11  ;;  %v1016_v28 = vld [vmem:[%s1335_s1 + $0x88] sm:$0xff]   ;;  %v1020_v32 = vld [vmem:[%s1335_s1 + $0x80] sm:$0xff]   ;;  %v1030_v40 = vld [vmem:[%s1335_s1 + $0x130] sm:$0xff]  }
   0xd   :  { %911 = vmatpush3.bf16.msra.mxu1 %v1000_v12  ;;  %884 = vmatprep.subr.bf16.mxu0 %v1001_v13  ;;  %v1021_v33 = vld [vmem:[%s1336_s0] ss:$28 sps:$4 sm:$0xff]   ;;  %v1024_v35 = vld [vmem:[%s1336_s0 + $0x8] ss:$28 sps:$4 sm:$0xff]   ;;  %v1043_v51 = vld [vmem:[%s1336_s0 + $0x38] ss:$28 sps:$4 sm:$0xff]  }
   0xe   :  { %912 = vmatprep.subr.bf16.mxu1 %v1002_v14  ;;  %v1023_v34 = vld [vmem:[%s1336_s0 + $0x4] ss:$28 sps:$4 sm:$0xff]   ;;  %v1026_v36 = vld [vmem:[%s1336_s0 + $0xc] ss:$28 sps:$4 sm:$0xff]   ;;  %v1036_v46 = vld [vmem:[%s1335_s1 + $0x158] sm:$0xff]  }
   0xf   :  { %575 = vmatprep.mubr.bf16.mxu0 %v1023_v34  ;;  %624 = vmatprep.mubr.bf16.mxu1 %v1026_v36  ;;  %v1031_v41 = vld [vmem:[%s1335_s1 + $0x168] sm:$0xff]   ;;  %v1033_v44 = vld [vmem:[%s1335_s1 + $0x160] sm:$0xff]   ;;  %v1038_v48 = vld [vmem:[%s1336_s0 + $0x3c] ss:$28 sps:$4 sm:$0xff]  }
  0x10   :  { %885 = vmatpush3.bf16.msra.mxu0 %v1003_v15  ;;  %v1032_v42 = vld [vmem:[%s1335_s1 + $0x128] sm:$0xff]   ;;  %v1035_v45 = vld [vmem:[%s1335_s1 + $0x120] sm:$0xff]   ;;  %v1042_v50 = vld [vmem:[%s1335_s1 + $0x118] sm:$0xff]  }
  0x11   :  { %913 = vmatpush3.bf16.msra.mxu1 %v1004_v16  ;;  %886 = vmatprep.subr.bf16.mxu0 %v1005_v17  ;;  %v1034_v43 = vld [vmem:[%s1335_s1 + $0x1a8] sm:$0xff]   ;;  %v1037_v47 = vld [vmem:[%s1335_s1 + $0x1a0] sm:$0xff]   ;;  %v1045_v53 = vld [vmem:[%s1335_s1 + $0x150] sm:$0xff]  }
  0x12   :  { %914 = vmatprep.subr.bf16.mxu1 %v1006_v18  ;;  %v1040_v49 = vld [vmem:[%s1336_s0 + $0x44] ss:$28 sps:$4 sm:$0xff]   ;;  %v1046_v54 = vld [vmem:[%s1335_s1 + $0x198] sm:$0xff]   ;;  %v1047_v55 = vld [vmem:[%s1335_s1 + $0x110] sm:$0xff]  }
  0x13   :  { %v1044_v52 = vld [vmem:[%s1336_s0 + $0x40] ss:$28 sps:$4 sm:$0xff]   ;;  %v1049_v56 = vld [vmem:[%s1335_s1 + $0x190] sm:$0xff]   ;;  %v1048_v57 = vld [vmem:[%s1335_s1 + $0x148] sm:$0xff]  }
  0x14   :  { %887 = vmatpush3.bf16.msra.mxu0 %v1007_v19  ;;  %v1052_v58 = vld [vmem:[%s1335_s1 + $0x188] sm:$0xff]   ;;  %v1051_v60 = vld [vmem:[%s1335_s1 + $0x140] sm:$0xff]   ;;  %v1056_v61 = vld [vmem:[%s1336_s0 + $0x14] ss:$28 sps:$4 sm:$0xff]  }
  0x15   :  { %915 = vmatpush3.bf16.msra.mxu1 %v1008_v20  ;;  %888 = vmatprep.subr.bf16.mxu0 %v1009_v21  ;;  %v1050_v59 = vld [vmem:[%s1335_s1 + $0x108] sm:$0xff]   ;;  %v1057_v62 = vld [vmem:[%s1335_s1 + $0x180] sm:$0xff]   ;;  %v1058_v63 = vld [vmem:[%s1336_s0 + $0x18] ss:$28 sps:$4 sm:$0xff]  }
  0x16   :  { %916 = vmatprep.subr.bf16.mxu1 %v1010_v22  ;;  %v1053_v0 = vld [vmem:[%s1335_s1 + $0x100] sm:$0xff]   ;;  %v741_v1 = vld [vmem:[%s1337_s2 + $0x10] sm:$0xff]  ;;  %v1060_v5 = vld [vmem:[%s1336_s0 + $0x4c] ss:$28 sps:$4 sm:$0xff]  }
  0x17   :  { %v739_v2 = vld [vmem:[%s1337_s2] sm:$0xff]  ;;  %v1054_v3 = vld [vmem:[%s1336_s0 + $0x10] ss:$28 sps:$4 sm:$0xff]   ;;  %755 = vperm.xlu1 %988, %v741_v1   ;;  %v742_v6 = vld [vmem:[%s1337_s2 + $0x18] sm:$0xff] }
  0x18   :  { %889 = vmatpush3.bf16.msra.mxu0 %v1011_v23  ;;  %v1059_v4 = vld [vmem:[%s1336_s0 + $0x50] ss:$28 sps:$4 sm:$0xff]   ;;  %745 = vperm.xlu0 %987, %v739_v2   ;;  %v767_v9 = vld [vmem:[%s1338_s3] sm:$0xff]  ;;  %v770_v11 = vld [vmem:[%s1338_s3 + $0x18] sm:$0xff] }
  0x19   :  { %917 = vmatpush3.bf16.msra.mxu1 %v1012_v24  ;;  %890 = vmatprep.subr.bf16.mxu0 %v1013_v25  ;;  %v740_v7 = vld [vmem:[%s1337_s2 + $0x8] sm:$0xff]  ;;  %v769_v12 = vld [vmem:[%s1338_s3 + $0x10] sm:$0xff] }
  0x1a   :  { %918 = vmatprep.subr.bf16.mxu1 %v1014_v26  ;;  %v768_v8 = vld [vmem:[%s1338_s3 + $0x8] sm:$0xff] }
  0x1b   :  { %760 = vperm.xlu1 %988, %v742_v6   ;;  %v1062_v10 = vld [vmem:[%s1336_s0 + $0x48] ss:$28 sps:$4 sm:$0xff]  }
  0x1c   :  { %891 = vmatpush3.bf16.msra.mxu0 %v1015_v27  ;;  %750 = vperm.xlu0 %987, %v740_v7  }
  0x1d   :  { %919 = vmatpush3.bf16.msra.mxu1 %v1016_v28  ;;  %892 = vmatprep.subr.bf16.mxu0 %v1017_v29 }
  0x1e   :  { %920 = vmatprep.subr.bf16.mxu1 %v1018_v30 }
  0x1f   :  { %778 = vperm.xlu1 %988, %v768_v8  }
  0x20   :  { %893 = vmatpush3.bf16.msra.mxu0 %v1019_v31  ;;  %773 = vperm.xlu0 %987, %v767_v9  }
  0x21   :  { %921 = vmatpush3.bf16.msra.mxu1 %v1020_v32  ;;  %934 = vmatprep.subr.bf16.mxu0 %v1027_v37 }
  0x22   :  { %970 = vmatprep.subr.bf16.mxu1 %v1034_v43 }
  0x23   :  { %576 = vmatmul.mubr.bf16.vlgmr.msra.gmra.mxu0 %v1021_v33  ;;  %788 = vperm.xlu1 %988, %v770_v11  }
  0x24   :  { %625 = vmatmul.mubr.bf16.vlgmr.msra.gmra.mxu1 %v1024_v35  ;;  %935 = vmatpush3.bf16.msra.mxu0 %v1028_v38 }
  0x25   :  { %936 = vmatprep.subr.bf16.mxu0 %v1029_v39  ;;  %971 = vmatpush3.bf16.msra.mxu1 %v1034_v43 }
  0x26   :  { %972 = vmatprep.subr.bf16.mxu1 %v1037_v47  ;;  %583 = vmatprep.mubr.bf16.mxu0 %v1038_v48 }
  0x27   :  { %632 = vmatprep.mubr.bf16.mxu1 %v1040_v49  ;;  %783 = vperm.xlu0 %987, %v769_v12  }
  0x28   :  { %937 = vmatpush3.bf16.msra.mxu0 %v1030_v40 }
  0x29   :  { %938 = vmatprep.subr.bf16.mxu0 %v1031_v41  ;;  %973 = vmatpush3.bf16.msra.mxu1 %v1037_v47 }
  0x2a   :  { %974 = vmatprep.subr.bf16.mxu1 %v1046_v54 }
  0x2b   :  { %584 = vmatmul.mubr.bf16.gmra.mxu0 %v1043_v51 }
  0x2c   :  { %939 = vmatpush3.bf16.msra.mxu0 %v1032_v42  ;;  %633 = vmatmul.mubr.bf16.gmra.mxu1 %v1044_v52 }
  0x2d   :  { %940 = vmatprep.subr.bf16.mxu0 %v1033_v44  ;;  %975 = vmatpush3.bf16.msra.mxu1 %v1046_v54 }
  0x2e   :  { %976 = vmatprep.subr.bf16.mxu1 %v1049_v56  ;;  %673 = vmatprep.mubr.bf16.mxu0 %v1056_v61 }
  0x2f   :  { %982 = vmatprep.mubr.msk.bf16.mxu1 %vm536_vm0, %v1058_v63 }
  0x30   :  { %941 = vmatpush3.bf16.msra.mxu0 %v1035_v45 }
  0x31   :  { %942 = vmatprep.subr.bf16.mxu0 %v1036_v46  ;;  %977 = vmatpush3.bf16.msra.mxu1 %v1049_v56 }
  0x32   :  { %978 = vmatprep.subr.bf16.mxu1 %v1052_v58 }
  0x34   :  { %943 = vmatpush3.bf16.msra.mxu0 %v1042_v50 }
  0x35   :  { %944 = vmatprep.subr.bf16.mxu0 %v1045_v53  ;;  %979 = vmatpush3.bf16.msra.mxu1 %v1052_v58 }
  0x36   :  { %980 = vmatprep.subr.bf16.mxu1 %v1057_v62 }
  0x38   :  { %945 = vmatpush3.bf16.msra.mxu0 %v1047_v55 }
  0x39   :  { %946 = vmatprep.subr.bf16.mxu0 %v1048_v57  ;;  %981 = vmatpush3.bf16.msra.mxu1 %v1057_v62 }
  0x3c   :  { %947 = vmatpush3.bf16.msra.mxu0 %v1050_v59  ;;  %983 = vmatmul.mubr.msk.bf16.vlgmr.msra.gmra.mxu1 %vm536_vm0, %v1059_v4 }
  0x3d   :  { %948 = vmatprep.subr.bf16.mxu0 %v1051_v60 }
  0x40   :  { %949 = vmatpush3.bf16.msra.mxu0 %v1053_v0 }
  0x43   :  { %674 = vmatmul.mubr.bf16.vlgmr.msra.gmra.mxu0 %v1054_v3 }
  0x44   :  { %681 = vmatprep.mubr.bf16.mxu0 %v1060_v5 }
  0x4b   :  { %682 = vmatmul.mubr.bf16.gmra.mxu0 %v1062_v10 }
  0x92   :  { %v756_v34 = vpop.permute.xlu1 %755 }
  0x93   :  { %v746_v27 = vpop.permute.xlu0 %745 }
  0x96   :  { %v761_v49 = vpop.permute.xlu1 %760 }
  0x97   :  { %v751_v40 = vpop.permute.xlu0 %750 }
  0x9a   :  { %v779_v4 = vpop.permute.xlu1 %778 }
  0x9b   :  { %v774_v58 = vpop.permute.xlu0 %773 }
  0xe3   :  { %v894_v13 = vpop.f32.mrf.mxu0 }
  0xe4   :  { %v922_v14 = vpop.f32.mrf.mxu1 }
  0xe5   :  { %v895_v15 = vpop.f32.mrf.mxu0 }
  0xe6   :  { %v923_v16 = vpop.f32.mrf.mxu1  ;;  %v896_v30 = vadd.f32 %v895_v15, %v894_v13  ;;  %v784_v13 = vpop.permute.xlu0 %783 }
  0xe7   :  { %v897_v17 = vpop.f32.mrf.mxu0  ;;  %v924_v31 = vadd.f32 %v923_v16, %v922_v14 }
  0xe8   :  { %v925_v18 = vpop.f32.mrf.mxu1 }
  0xe9   :  { %v898_v19 = vpop.f32.mrf.mxu0  ;;  %v627_v37 = vadd.f32 %v924_v31, %v896_v30 }
  0xea   :  { %v926_v20 = vpop.f32.mrf.mxu1  ;;  %v899_v38 = vadd.f32 %v898_v19, %v897_v17 }
  0xeb   :  { %v900_v21 = vpop.f32.mrf.mxu0  ;;  %v927_v39 = vadd.f32 %v926_v20, %v925_v18  ;;  %v789_v18 = vpop.permute.xlu1 %788 }
  0xec   :  { %v928_v22 = vpop.f32.mrf.mxu1 }
  0xed   :  { %v901_v23 = vpop.f32.mrf.mxu0  ;;  %v630_v48 = vadd.f32 %v927_v39, %v899_v38 }
  0xee   :  { %v929_v24 = vpop.f32.mrf.mxu1  ;;  %v902_v45 = vadd.f32 %v901_v23, %v900_v21 }
  0xef   :  { %v903_v25 = vpop.f32.mrf.mxu0  ;;  %v930_v46 = vadd.f32 %v929_v24, %v928_v22 }
  0xf0   :  { %v931_v26 = vpop.f32.mrf.mxu1 }
  0xf1   :  { %v904_v28 = vpop.f32.mrf.mxu0  ;;  %v635_v56 = vadd.f32 %v930_v46, %v902_v45 }
  0xf2   :  { %v932_v29 = vpop.f32.mrf.mxu1  ;;  %v905_v57 = vadd.f32 %v904_v28, %v903_v25 }
  0xf3   :  { %v933_v60 = vadd.f32 %v932_v29, %v931_v26 }
  0xf5   :  { %v638_v6 = vadd.f32 %v933_v60, %v905_v57 }
  0xfc   :  { %v984_v33 = vpop.f32.mrf.mxu1 }
  0xfe   :  { %v724_v36 = vpop.f32.mrf.mxu1 }
 0x100   :  { %v985_v43 = vpop.f32.mrf.mxu1 }
 0x102   :  { %v727_v53 = vpop.f32.mrf.mxu1 }
 0x103   :  { %v950_v32 = vpop.f32.mrf.mxu0 }
 0x105   :  { %v951_v35 = vpop.f32.mrf.mxu0 }
 0x106   :  { %v952_v41 = vadd.f32 %v951_v35, %v950_v32 }
 0x107   :  { %v953_v42 = vpop.f32.mrf.mxu0 }
 0x108   :  { %v676_v44 = vadd.f32 %v952_v41, %v627_v37 }
 0x109   :  { %v954_v47 = vpop.f32.mrf.mxu0 }
 0x10a   :  { %v955_v50 = vadd.f32 %v954_v47, %v953_v42  ;;  %v725_v51 = vadd.f32 %v724_v36, %v676_v44 }
 0x10b   :  { %v956_v52 = vpop.f32.mrf.mxu0 }
 0x10c   :  { %v763_v54 = vmul.f32 %v746_v27, %v725_v51  ;;  %v679_v55 = vadd.f32 %v955_v50, %v630_v48 }
 0x10d   :  { %v957_v59 = vpop.f32.mrf.mxu0 }
 0x10e   :  { %v791_v61 = vadd.f32 %v774_v58, %v763_v54  ;;  %v958_v62 = vadd.f32 %v957_v59, %v956_v52  ;;  %v728_v63 = vadd.f32 %v727_v53, %v679_v55 }
 0x10f   :  { %v959_v0 = vpop.f32.mrf.mxu0 }
 0x110   :  { %v795_v1 = vmax.f32 %v791_v61, 0.0  ;;  %v684_v2 = vadd.f32 %v958_v62, %v635_v56  ;;  %v764_v3 = vmul.f32 %v751_v40, %v728_v63 }
 0x111   :  { %v960_v5 = vpop.f32.mrf.mxu0 }
 0x112   :  { %800 = vst.msk [vmem:[%s1339_s4] sm:$0xff] %vm799_vm1, %v795_v1  ;;  %v733_v7 = vadd.f32 %v984_v33, %v684_v2  ;;  %v792_v8 = vadd.f32 %v779_v4, %v764_v3  ;;  %v961_v9 = vadd.f32 %v960_v5, %v959_v0 }
 0x114   :  { %v765_v10 = vmul.f32 %v756_v34, %v733_v7  ;;  %v796_v11 = vmax.f32 %v792_v8, 0.0  ;;  %v687_v12 = vadd.f32 %v961_v9, %v638_v6 }
 0x116   :  { %v793_v14 = vadd.f32 %v784_v13, %v765_v10  ;;  %801 = vst.msk [vmem:[%s1339_s4 + $0x8] sm:$0xff] %vm799_vm1, %v796_v11  ;;  %v736_v15 = vadd.f32 %v985_v43, %v687_v12 }
 0x118   :  { %v797_v16 = vmax.f32 %v793_v14, 0.0  ;;  %v766_v17 = vmul.f32 %v761_v49, %v736_v15 }
 0x11a   :  { %802 = vst.msk [vmem:[%s1339_s4 + $0x10] sm:$0xff] %vm799_vm1, %v797_v16  ;;  %v794_v19 = vadd.f32 %v789_v18, %v766_v17 }
 0x11c   :  { %v798_v20 = vmax.f32 %v794_v19, 0.0 }
 0x11e   :  { %803 = vst.msk [vmem:[%s1339_s4 + $0x18] sm:$0xff] %vm799_vm1, %v798_v20 }

// kernel: depth_net.40
= control target key start
LH: loop header
LB: loop body
LE: loop exit
PB: predicated region body
PF: predicated region fallthrough
CT: control target
= control target key end

     0   :  { %v1361_v1 = vmov 0   ;;  %vm622_vm0 = vcmask 785408   ;;  %vm1015_vm1 = vcmask 64512   ;;  %s1774_s1 = inlined_call_operand.vmem [shape: bf16[864,8], index: 1, kind: input, shape index: {}]   ;;  %s1775_s0 = inlined_call_operand.vmem [shape: bf16[64,864], index: 0, kind: input, shape index: {}]   ;;  %s1776_s2 = inlined_call_operand.vmem [shape: f32[64,1], index: 2, kind: input, shape index: {}]   ;;  %s1777_s3 = inlined_call_operand.vmem [shape: f32[64,1], index: 3, kind: input, shape index: {}]   ;;  %s1778_s4 = inlined_call_operand.vmem [shape: f32[64,8], index: 4, kind: output, shape index: {}]  }
   0x1   :  { %v1267_v0 = vld [vmem:[%s1774_s1 + $0x78] sm:$0xff]   ;;  %1266 = vset.pattern.permute.xlu1 %v1361_v1  ;;  %1265 = vset.pattern.permute.xlu0 %v1361_v1  ;;  %v1271_v5 = vld [vmem:[%s1774_s1 + $0x70] sm:$0xff]   ;;  %v1275_v9 = vld [vmem:[%s1774_s1 + $0x68] sm:$0xff]  }
   0x2   :  { %v1268_v2 = vld [vmem:[%s1774_s1 + $0xf8] sm:$0xff]   ;;  %1114 = vmatprep.subr.bf16.mxu0 %v1267_v0  ;;  %v1272_v6 = vld [vmem:[%s1774_s1 + $0xf0] sm:$0xff]   ;;  %v1276_v10 = vld [vmem:[%s1774_s1 + $0xe8] sm:$0xff]  }
   0x3   :  { %v1269_v3 = vld [vmem:[%s1774_s1 + $0x38] sm:$0xff]   ;;  %1154 = vmatprep.subr.bf16.mxu1 %v1268_v2  ;;  %v1273_v7 = vld [vmem:[%s1774_s1 + $0x30] sm:$0xff]   ;;  %v1277_v11 = vld [vmem:[%s1774_s1 + $0x28] sm:$0xff]  }
   0x4   :  { %v1270_v4 = vld [vmem:[%s1774_s1 + $0xb8] sm:$0xff]   ;;  %1115 = vmatpush3.bf16.msra.mxu0 %v1269_v3  ;;  %v1274_v8 = vld [vmem:[%s1774_s1 + $0xb0] sm:$0xff]   ;;  %v1278_v12 = vld [vmem:[%s1774_s1 + $0xa8] sm:$0xff]  }
   0x5   :  { %1155 = vmatpush3.bf16.msra.mxu1 %v1270_v4  ;;  %1116 = vmatprep.subr.bf16.mxu0 %v1271_v5  ;;  %v1279_v13 = vld [vmem:[%s1774_s1 + $0x60] sm:$0xff]   ;;  %v1283_v17 = vld [vmem:[%s1774_s1 + $0x58] sm:$0xff]   ;;  %v1287_v21 = vld [vmem:[%s1774_s1 + $0x50] sm:$0xff]  }
   0x6   :  { %1156 = vmatprep.subr.bf16.mxu1 %v1272_v6  ;;  %v1280_v14 = vld [vmem:[%s1774_s1 + $0xe0] sm:$0xff]   ;;  %v1284_v18 = vld [vmem:[%s1774_s1 + $0xd8] sm:$0xff]   ;;  %v1288_v22 = vld [vmem:[%s1774_s1 + $0xd0] sm:$0xff]  }
   0x7   :  { %v1281_v15 = vld [vmem:[%s1774_s1 + $0x20] sm:$0xff]   ;;  %v1285_v19 = vld [vmem:[%s1774_s1 + $0x18] sm:$0xff]   ;;  %v1289_v23 = vld [vmem:[%s1774_s1 + $0x10] sm:$0xff]  }
   0x8   :  { %1117 = vmatpush3.bf16.msra.mxu0 %v1273_v7  ;;  %v1282_v16 = vld [vmem:[%s1774_s1 + $0xa0] sm:$0xff]   ;;  %v1286_v20 = vld [vmem:[%s1774_s1 + $0x98] sm:$0xff]   ;;  %v1290_v24 = vld [vmem:[%s1774_s1 + $0x90] sm:$0xff]  }
   0x9   :  { %1157 = vmatpush3.bf16.msra.mxu1 %v1274_v8  ;;  %1118 = vmatprep.subr.bf16.mxu0 %v1275_v9  ;;  %v1291_v25 = vld [vmem:[%s1774_s1 + $0x48] sm:$0xff]   ;;  %v1295_v29 = vld [vmem:[%s1774_s1 + $0x40] sm:$0xff]   ;;  %v1305_v37 = vld [vmem:[%s1774_s1 + $0x178] sm:$0xff]  }
   0xa   :  { %1158 = vmatprep.subr.bf16.mxu1 %v1276_v10  ;;  %v1292_v26 = vld [vmem:[%s1774_s1 + $0xc8] sm:$0xff]   ;;  %v1296_v30 = vld [vmem:[%s1774_s1 + $0xc0] sm:$0xff]   ;;  %v1306_v38 = vld [vmem:[%s1774_s1 + $0x138] sm:$0xff]  }
   0xb   :  { %v1293_v27 = vld [vmem:[%s1774_s1 + $0x8] sm:$0xff]   ;;  %v1297_v31 = vld [vmem:[%s1774_s1] sm:$0xff]   ;;  %v1307_v39 = vld [vmem:[%s1774_s1 + $0x170] sm:$0xff]  }
   0xc   :  { %1119 = vmatpush3.bf16.msra.mxu0 %v1277_v11  ;;  %v1294_v28 = vld [vmem:[%s1774_s1 + $0x88] sm:$0xff]   ;;  %v1298_v32 = vld [vmem:[%s1774_s1 + $0x80] sm:$0xff]   ;;  %v1308_v40 = vld [vmem:[%s1774_s1 + $0x130] sm:$0xff]  }
   0xd   :  { %1159 = vmatpush3.bf16.msra.mxu1 %v1278_v12  ;;  %1120 = vmatprep.subr.bf16.mxu0 %v1279_v13  ;;  %v1299_v33 = vld [vmem:[%s1775_s0] ss:$28 sps:$4 sm:$0xff]   ;;  %v1302_v35 = vld [vmem:[%s1775_s0 + $0x8] ss:$28 sps:$4 sm:$0xff]   ;;  %v1313_v43 = vld [vmem:[%s1775_s0 + $0x38] ss:$28 sps:$4 sm:$0xff]  }
   0xe   :  { %1160 = vmatprep.subr.bf16.mxu1 %v1280_v14  ;;  %v1301_v34 = vld [vmem:[%s1775_s0 + $0x4] ss:$28 sps:$4 sm:$0xff]   ;;  %v1304_v36 = vld [vmem:[%s1775_s0 + $0xc] ss:$28 sps:$4 sm:$0xff]   ;;  %v1309_v41 = vld [vmem:[%s1775_s0 + $0x3c] ss:$28 sps:$4 sm:$0xff]  }
   0xf   :  { %667 = vmatprep.mubr.bf16.mxu0 %v1301_v34  ;;  %732 = vmatprep.mubr.bf16.mxu1 %v1304_v36  ;;  %v1311_v42 = vld [vmem:[%s1775_s0 + $0x44] ss:$28 sps:$4 sm:$0xff]   ;;  %v1315_v45 = vld [vmem:[%s1774_s1 + $0x168] sm:$0xff]   ;;  %v1320_v50 = vld [vmem:[%s1775_s0 + $0x74] ss:$28 sps:$4 sm:$0xff]  }
  0x10   :  { %1121 = vmatpush3.bf16.msra.mxu0 %v1281_v15  ;;  %v1314_v44 = vld [vmem:[%s1775_s0 + $0x40] ss:$28 sps:$4 sm:$0xff]   ;;  %v1316_v46 = vld [vmem:[%s1774_s1 + $0x128] sm:$0xff]   ;;  %v1325_v53 = vld [vmem:[%s1775_s0 + $0x78] ss:$28 sps:$4 sm:$0xff]  }
  0x11   :  { %1161 = vmatpush3.bf16.msra.mxu1 %v1282_v16  ;;  %1122 = vmatprep.subr.bf16.mxu0 %v1283_v17  ;;  %v1317_v47 = vld [vmem:[%s1774_s1 + $0x160] sm:$0xff]   ;;  %v1318_v48 = vld [vmem:[%s1774_s1 + $0x1a8] sm:$0xff]   ;;  %v1322_v51 = vld [vmem:[%s1775_s0 + $0x7c] ss:$28 sps:$4 sm:$0xff]  }
  0x12   :  { %1162 = vmatprep.subr.bf16.mxu1 %v1284_v18  ;;  %v1319_v49 = vld [vmem:[%s1774_s1 + $0x120] sm:$0xff]   ;;  %v1324_v52 = vld [vmem:[%s1775_s0 + $0x70] ss:$28 sps:$4 sm:$0xff]   ;;  %v1326_v54 = vld [vmem:[%s1774_s1 + $0x158] sm:$0xff]  }
  0x13   :  { %v1327_v55 = vld [vmem:[%s1774_s1 + $0x1a0] sm:$0xff]   ;;  %v1328_v56 = vld [vmem:[%s1774_s1 + $0x118] sm:$0xff]   ;;  %v1329_v57 = vld [vmem:[%s1774_s1 + $0x150] sm:$0xff]  }
  0x14   :  { %1123 = vmatpush3.bf16.msra.mxu0 %v1285_v19  ;;  %v1330_v58 = vld [vmem:[%s1774_s1 + $0x198] sm:$0xff]   ;;  %v1331_v59 = vld [vmem:[%s1774_s1 + $0x110] sm:$0xff]   ;;  %v1332_v60 = vld [vmem:[%s1775_s0 + $0xac] ss:$28 sps:$4 sm:$0xff]  }
  0x15   :  { %1163 = vmatpush3.bf16.msra.mxu1 %v1286_v20  ;;  %1124 = vmatprep.subr.bf16.mxu0 %v1287_v21  ;;  %v1334_v61 = vld [vmem:[%s1775_s0 + $0xb4] ss:$28 sps:$4 sm:$0xff]   ;;  %v1336_v62 = vld [vmem:[%s1775_s0 + $0xa8] ss:$28 sps:$4 sm:$0xff]   ;;  %v898_v17 = vld [vmem:[%s1776_s2 + $0x18] sm:$0xff] }
  0x16   :  { %1164 = vmatprep.subr.bf16.mxu1 %v1288_v22  ;;  %v1337_v63 = vld [vmem:[%s1775_s0 + $0xb0] ss:$28 sps:$4 sm:$0xff]   ;;  %v1341_v3 = vld [vmem:[%s1774_s1 + $0x140] sm:$0xff]   ;;  %v1348_v9 = vld [vmem:[%s1775_s0 + $0x18] ss:$28 sps:$4 sm:$0xff]  }
  0x17   :  { %v1338_v0 = vld [vmem:[%s1774_s1 + $0x148] sm:$0xff]   ;;  %v1339_v1 = vld [vmem:[%s1774_s1 + $0x190] sm:$0xff]   ;;  %v1343_v5 = vld [vmem:[%s1774_s1 + $0x100] sm:$0xff]  }
  0x18   :  { %1125 = vmatpush3.bf16.msra.mxu0 %v1289_v23  ;;  %v1340_v2 = vld [vmem:[%s1774_s1 + $0x108] sm:$0xff]   ;;  %v1346_v7 = vld [vmem:[%s1775_s0 + $0x14] ss:$28 sps:$4 sm:$0xff]   ;;  %v1347_v8 = vld [vmem:[%s1774_s1 + $0x180] sm:$0xff]  }
  0x19   :  { %1165 = vmatpush3.bf16.msra.mxu1 %v1290_v24  ;;  %1126 = vmatprep.subr.bf16.mxu0 %v1291_v25  ;;  %v1342_v4 = vld [vmem:[%s1774_s1 + $0x188] sm:$0xff]   ;;  %v1353_v14 = vld [vmem:[%s1775_s0 + $0x84] ss:$28 sps:$4 sm:$0xff]   ;;  %v897_v15 = vld [vmem:[%s1776_s2 + $0x10] sm:$0xff] }
  0x1a   :  { %1166 = vmatprep.subr.bf16.mxu1 %v1292_v26  ;;  %v1344_v6 = vld [vmem:[%s1775_s0 + $0x10] ss:$28 sps:$4 sm:$0xff]   ;;  %v1356_v12 = vld [vmem:[%s1775_s0 + $0x88] ss:$28 sps:$4 sm:$0xff]   ;;  %915 = vperm.xlu1 %1266, %v897_v15   ;;  %v1357_v19 = vld [vmem:[%s1775_s0 + $0xc0] ss:$28 sps:$4 sm:$0xff]  }
  0x1b   :  { %v1350_v10 = vld [vmem:[%s1775_s0 + $0x4c] ss:$28 sps:$4 sm:$0xff]   ;;  %v895_v16 = vld [vmem:[%s1776_s2] sm:$0xff]  ;;  %v1358_v23 = vld [vmem:[%s1775_s0 + $0xbc] ss:$28 sps:$4 sm:$0xff]  }
  0x1c   :  { %1127 = vmatpush3.bf16.msra.mxu0 %v1293_v27  ;;  %v1349_v11 = vld [vmem:[%s1775_s0 + $0x50] ss:$28 sps:$4 sm:$0xff]   ;;  %v1352_v13 = vld [vmem:[%s1775_s0 + $0x48] ss:$28 sps:$4 sm:$0xff]   ;;  %905 = vperm.xlu0 %1265, %v895_v16   ;;  %v1355_v22 = vld [vmem:[%s1775_s0 + $0x80] ss:$28 sps:$4 sm:$0xff]  }
  0x1d   :  { %1167 = vmatpush3.bf16.msra.mxu1 %v1294_v28  ;;  %1128 = vmatprep.subr.bf16.mxu0 %v1295_v29  ;;  %v896_v18 = vld [vmem:[%s1776_s2 + $0x8] sm:$0xff]  ;;  %v899_v21 = vld [vmem:[%s1776_s2 + $0x20] sm:$0xff]  ;;  %v902_v24 = vld [vmem:[%s1776_s2 + $0x38] sm:$0xff] }
  0x1e   :  { %1168 = vmatprep.subr.bf16.mxu1 %v1296_v30  ;;  %920 = vperm.xlu1 %1266, %v898_v17   ;;  %v900_v20 = vld [vmem:[%s1776_s2 + $0x28] sm:$0xff]  ;;  %v901_v25 = vld [vmem:[%s1776_s2 + $0x30] sm:$0xff]  ;;  %v951_v27 = vld [vmem:[%s1777_s3] sm:$0xff] }
  0x1f   :  { %v952_v26 = vld [vmem:[%s1777_s3 + $0x8] sm:$0xff]  ;;  %v1360_v28 = vld [vmem:[%s1775_s0 + $0xb8] ss:$28 sps:$4 sm:$0xff]  }
  0x20   :  { %1129 = vmatpush3.bf16.msra.mxu0 %v1297_v31  ;;  %910 = vperm.xlu0 %1265, %v896_v18   ;;  %v954_v29 = vld [vmem:[%s1777_s3 + $0x18] sm:$0xff]  ;;  %v953_v30 = vld [vmem:[%s1777_s3 + $0x10] sm:$0xff]  ;;  %v956_v31 = vld [vmem:[%s1777_s3 + $0x28] sm:$0xff] }
  0x21   :  { %1169 = vmatpush3.bf16.msra.mxu1 %v1298_v32  ;;  %1194 = vmatprep.subr.bf16.mxu0 %v1305_v37  ;;  %v955_v32 = vld [vmem:[%s1777_s3 + $0x20] sm:$0xff]  ;;  %v957_v34 = vld [vmem:[%s1777_s3 + $0x30] sm:$0xff] }
  0x22   :  { %1244 = vmatprep.subr.bf16.mxu1 %v1318_v48  ;;  %930 = vperm.xlu1 %1266, %v900_v20  }
  0x23   :  { %668 = vmatmul.mubr.bf16.vlgmr.msra.gmra.mxu0 %v1299_v33  ;;  %v958_v33 = vld [vmem:[%s1777_s3 + $0x38] sm:$0xff] }
  0x24   :  { %733 = vmatmul.mubr.bf16.vlgmr.msra.gmra.mxu1 %v1302_v35  ;;  %1195 = vmatpush3.bf16.msra.mxu0 %v1306_v38 }
  0x25   :  { %1196 = vmatprep.subr.bf16.mxu0 %v1307_v39  ;;  %675 = vmatprep.mubr.bf16.mxu0 %v1309_v41 }
  0x26   :  { %740 = vmatprep.mubr.bf16.mxu1 %v1311_v42  ;;  %1245 = vmatpush3.bf16.msra.mxu1 %v1318_v48 }
  0x27   :  { %1246 = vmatprep.subr.bf16.mxu1 %v1327_v55  ;;  %925 = vperm.xlu0 %1265, %v899_v21  }
  0x28   :  { %1197 = vmatpush3.bf16.msra.mxu0 %v1308_v40  ;;  %940 = vperm.xlu1 %1266, %v902_v24  }
  0x29   :  { %1198 = vmatprep.subr.bf16.mxu0 %v1315_v45 }
  0x2a   :  { %1247 = vmatpush3.bf16.msra.mxu1 %v1327_v55 }
  0x2b   :  { %676 = vmatmul.mubr.bf16.gmra.mxu0 %v1313_v43  ;;  %1248 = vmatprep.subr.bf16.mxu1 %v1330_v58 }
  0x2c   :  { %741 = vmatmul.mubr.bf16.gmra.mxu1 %v1314_v44  ;;  %1199 = vmatpush3.bf16.msra.mxu0 %v1316_v46 }
  0x2d   :  { %1200 = vmatprep.subr.bf16.mxu0 %v1317_v47  ;;  %683 = vmatprep.mubr.bf16.mxu0 %v1320_v50 }
  0x2e   :  { %748 = vmatprep.mubr.bf16.mxu1 %v1322_v51  ;;  %1249 = vmatpush3.bf16.msra.mxu1 %v1330_v58 }
  0x2f   :  { %1250 = vmatprep.subr.bf16.mxu1 %v1339_v1  ;;  %935 = vperm.xlu0 %1265, %v901_v25  }
  0x30   :  { %1201 = vmatpush3.bf16.msra.mxu0 %v1319_v49  ;;  %966 = vperm.xlu1 %1266, %v952_v26  }
  0x31   :  { %1202 = vmatprep.subr.bf16.mxu0 %v1326_v54 }
  0x32   :  { %1251 = vmatpush3.bf16.msra.mxu1 %v1339_v1 }
  0x33   :  { %684 = vmatmul.mubr.bf16.gmra.mxu0 %v1324_v52  ;;  %1252 = vmatprep.subr.bf16.mxu1 %v1342_v4 }
  0x34   :  { %749 = vmatmul.mubr.bf16.gmra.mxu1 %v1325_v53  ;;  %1203 = vmatpush3.bf16.msra.mxu0 %v1328_v56 }
  0x35   :  { %1204 = vmatprep.subr.bf16.mxu0 %v1329_v57  ;;  %691 = vmatprep.mubr.bf16.mxu0 %v1332_v60 }
  0x36   :  { %756 = vmatprep.mubr.bf16.mxu1 %v1334_v61  ;;  %1253 = vmatpush3.bf16.msra.mxu1 %v1342_v4 }
  0x37   :  { %1254 = vmatprep.subr.bf16.mxu1 %v1347_v8  ;;  %961 = vperm.xlu0 %1265, %v951_v27  }
  0x38   :  { %1205 = vmatpush3.bf16.msra.mxu0 %v1331_v59  ;;  %976 = vperm.xlu1 %1266, %v954_v29  }
  0x39   :  { %1206 = vmatprep.subr.bf16.mxu0 %v1338_v0 }
  0x3a   :  { %1255 = vmatpush3.bf16.msra.mxu1 %v1347_v8 }
  0x3b   :  { %692 = vmatmul.mubr.bf16.gmra.mxu0 %v1336_v62  ;;  %971 = vperm.xlu0 %1265, %v953_v30  }
  0x3c   :  { %757 = vmatmul.mubr.bf16.gmra.mxu1 %v1337_v63  ;;  %1207 = vmatpush3.bf16.msra.mxu0 %v1340_v2 }
  0x3d   :  { %1208 = vmatprep.subr.bf16.mxu0 %v1341_v3  ;;  %797 = vmatprep.mubr.bf16.mxu0 %v1346_v7 }
  0x3e   :  { %1256 = vmatprep.mubr.msk.bf16.mxu1 %vm622_vm0, %v1348_v9  ;;  %986 = vperm.xlu1 %1266, %v956_v31  }
  0x3f   :  { %981 = vperm.xlu0 %1265, %v955_v32  }
  0x40   :  { %1209 = vmatpush3.bf16.msra.mxu0 %v1343_v5 }
  0x42   :  { %996 = vperm.xlu1 %1266, %v958_v33  }
  0x43   :  { %798 = vmatmul.mubr.bf16.vlgmr.msra.gmra.mxu0 %v1344_v6  ;;  %991 = vperm.xlu0 %1265, %v957_v34  }
  0x44   :  { %805 = vmatprep.mubr.bf16.mxu0 %v1350_v10  ;;  %1257 = vmatmul.mubr.msk.bf16.vlgmr.msra.gmra.mxu1 %vm622_vm0, %v1349_v11 }
  0x45   :  { %1260 = vmatprep.mubr.msk.bf16.mxu1 %vm622_vm0, %v1356_v12 }
  0x4b   :  { %806 = vmatmul.mubr.bf16.gmra.mxu0 %v1352_v13 }
  0x4c   :  { %813 = vmatprep.mubr.bf16.mxu0 %v1353_v14  ;;  %1261 = vmatmul.mubr.msk.bf16.gmra.mxu1 %vm622_vm0, %v1357_v19 }
  0x53   :  { %814 = vmatmul.mubr.bf16.gmra.mxu0 %v1355_v22 }
  0x54   :  { %821 = vmatprep.mubr.bf16.mxu0 %v1358_v23 }
  0x5b   :  { %822 = vmatmul.mubr.bf16.gmra.mxu0 %v1360_v28 }
  0x95   :  { %v1689_v58 = vpop.permute.xlu1 %915 }
  0x97   :  { %v906_v53 = vpop.permute.xlu0 %905 }
  0x99   :  { %v1703_v2 = vpop.permute.xlu1 %920 }
  0x9b   :  { %v911_v61 = vpop.permute.xlu0 %910 }
  0x9d   :  { %v1713_v10 = vpop.permute.xlu1 %930 }
  0xa2   :  { %v1707_v4 = vpop.permute.xlu0 %925 }
  0xa3   :  { %v1719_v26 = vpop.permute.xlu1 %940 }
  0xaa   :  { %v1717_v16 = vpop.permute.xlu0 %935 }
  0xb2   :  { %v962_v31 = vpop.permute.xlu0 %961 }
  0xe3   :  { %v1130_v35 = vpop.f32.mrf.mxu0 }
  0xe4   :  { %v1170_v36 = vpop.f32.mrf.mxu1 }
  0xe5   :  { %v1131_v37 = vpop.f32.mrf.mxu0 }
  0xe6   :  { %v1171_v38 = vpop.f32.mrf.mxu1  ;;  %v1132_v7 = vadd.f32 %v1131_v37, %v1130_v35 }
  0xe7   :  { %v1133_v39 = vpop.f32.mrf.mxu0  ;;  %v1172_v8 = vadd.f32 %v1171_v38, %v1170_v36 }
  0xe8   :  { %v1173_v40 = vpop.f32.mrf.mxu1 }
  0xe9   :  { %v1134_v41 = vpop.f32.mrf.mxu0  ;;  %v735_v13 = vadd.f32 %v1172_v8, %v1132_v7 }
  0xea   :  { %v1174_v42 = vpop.f32.mrf.mxu1  ;;  %v1135_v14 = vadd.f32 %v1134_v41, %v1133_v39 }
  0xeb   :  { %v1136_v43 = vpop.f32.mrf.mxu0  ;;  %v1175_v15 = vadd.f32 %v1174_v42, %v1173_v40 }
  0xec   :  { %v1176_v44 = vpop.f32.mrf.mxu1 }
  0xed   :  { %v1137_v45 = vpop.f32.mrf.mxu0  ;;  %v738_v25 = vadd.f32 %v1175_v15, %v1135_v14 }
  0xee   :  { %v1177_v46 = vpop.f32.mrf.mxu1  ;;  %v1138_v21 = vadd.f32 %v1137_v45, %v1136_v43 }
  0xef   :  { %v1139_v47 = vpop.f32.mrf.mxu0  ;;  %v1178_v22 = vadd.f32 %v1177_v46, %v1176_v44 }
  0xf0   :  { %v1179_v48 = vpop.f32.mrf.mxu1 }
  0xf1   :  { %v1140_v49 = vpop.f32.mrf.mxu0  ;;  %v743_v34 = vadd.f32 %v1178_v22, %v1138_v21 }
  0xf2   :  { %v1180_v50 = vpop.f32.mrf.mxu1  ;;  %v1141_v35 = vadd.f32 %v1140_v49, %v1139_v47 }
  0xf3   :  { %v1142_v51 = vpop.f32.mrf.mxu0  ;;  %v1181_v38 = vadd.f32 %v1180_v50, %v1179_v48 }
  0xf4   :  { %v1182_v52 = vpop.f32.mrf.mxu1 }
  0xf5   :  { %v1143_v54 = vpop.f32.mrf.mxu0 }
  0xf6   :  { %v1183_v55 = vpop.f32.mrf.mxu1  ;;  %v1144_v7 = vadd.f32 %v1143_v54, %v1142_v51 }
  0xf7   :  { %v1685_v56 = vpop.f32.mrf.mxu0  ;;  %v1184_v8 = vadd.f32 %v1183_v55, %v1182_v52  ;;  %v972_v52 = vpop.permute.xlu0 %971 }
  0xf8   :  { %v1687_v57 = vpop.f32.mrf.mxu1 }
  0xf9   :  { %v1691_v59 = vpop.f32.mrf.mxu0 }
  0xfa   :  { %v1693_v60 = vpop.f32.mrf.mxu1  ;;  %v1147_v51 = vadd.f32 %v1691_v59, %v1685_v56 }
  0xfb   :  { %v1695_v62 = vpop.f32.mrf.mxu0  ;;  %v1187_v55 = vadd.f32 %v1693_v60, %v1687_v57 }
  0xfc   :  { %v1697_v63 = vpop.f32.mrf.mxu1 }
  0xfd   :  { %v1699_v0 = vpop.f32.mrf.mxu0 }
  0xfe   :  { %v1701_v1 = vpop.f32.mrf.mxu1  ;;  %v1150_v56 = vadd.f32 %v1699_v0, %v1695_v62 }
  0xff   :  { %v1705_v3 = vpop.f32.mrf.mxu0  ;;  %v1190_v57 = vadd.f32 %v1701_v1, %v1697_v63  ;;  %v982_v1 = vpop.permute.xlu0 %981 }
 0x100   :  { %v1711_v6 = vpop.f32.mrf.mxu1 }
 0x101   :  { %v1709_v5 = vpop.f32.mrf.mxu0  ;;  %v759_v0 = vadd.f32 %v1190_v57, %v1150_v56 }
 0x102   :  { %v1715_v11 = vpop.f32.mrf.mxu1  ;;  %v1153_v63 = vadd.f32 %v1709_v5, %v1705_v3 }
 0x103   :  { %v1210_v9 = vpop.f32.mrf.mxu0 }
 0x104   :  { %v1258_v19 = vpop.f32.mrf.mxu1 }
 0x105   :  { %v1211_v12 = vpop.f32.mrf.mxu0 }
 0x106   :  { %v1212_v17 = vadd.f32 %v1211_v12, %v1210_v9  ;;  %v864_v24 = vpop.f32.mrf.mxu1  ;;  %v967_v9 = vpop.permute.xlu1 %966  ;;  %v746_v12 = vadd.f32 %v1181_v38, %v1141_v35 }
 0x107   :  { %v1213_v18 = vpop.f32.mrf.mxu0 }
 0x108   :  { %v800_v20 = vadd.f32 %v1212_v17, %v735_v13  ;;  %v1259_v30 = vpop.f32.mrf.mxu1 }
 0x109   :  { %v1214_v23 = vpop.f32.mrf.mxu0 }
 0x10a   :  { %v1215_v27 = vadd.f32 %v1214_v23, %v1213_v18  ;;  %v865_v28 = vadd.f32 %v864_v24, %v800_v20  ;;  %v867_v37 = vpop.f32.mrf.mxu1  ;;  %v977_v59 = vpop.permute.xlu1 %976 }
 0x10b   :  { %v1216_v29 = vpop.f32.mrf.mxu0 }
 0x10c   :  { %v943_v32 = vmul.f32 %v906_v53, %v865_v28  ;;  %v803_v33 = vadd.f32 %v1215_v27, %v738_v25  ;;  %v1721_v43 = vpop.f32.mrf.mxu1  ;;  %v754_v25 = vadd.f32 %v1187_v55, %v1147_v51 }
 0x10d   :  { %v1217_v36 = vpop.f32.mrf.mxu0 }
 0x10e   :  { %v999_v39 = vadd.f32 %v962_v31, %v943_v32  ;;  %v1218_v40 = vadd.f32 %v1217_v36, %v1216_v29  ;;  %v868_v41 = vadd.f32 %v867_v37, %v803_v33  ;;  %v880_v13 = vpop.f32.mrf.mxu1 }
 0x10f   :  { %v1219_v42 = vpop.f32.mrf.mxu0 }
 0x110   :  { %v1007_v44 = vmax.f32 %v999_v39, 0.0  ;;  %v808_v45 = vadd.f32 %v1218_v40, %v743_v34  ;;  %v944_v46 = vmul.f32 %v911_v61, %v868_v41  ;;  %v751_v61 = vadd.f32 %v1184_v8, %v1144_v7  ;;  %v1263_v21 = vpop.f32.mrf.mxu1  ;;  %v987_v41 = vpop.permute.xlu1 %986 }
 0x111   :  { %v1220_v53 = vpop.f32.mrf.mxu0  ;;  %v1193_v34 = vadd.f32 %v1715_v11, %v1711_v6  ;;  %v992_v7 = vpop.permute.xlu0 %991 }
 0x112   :  { %1016 = vst.msk [vmem:[%s1778_s4] sm:$0xff] %vm1015_vm1, %v1007_v44  ;;  %v873_v47 = vadd.f32 %v1258_v19, %v808_v45  ;;  %v1000_v48 = vadd.f32 %v967_v9, %v944_v46  ;;  %v1221_v49 = vadd.f32 %v1220_v53, %v1219_v42 }
 0x113   :  { %v1222_v50 = vpop.f32.mrf.mxu0  ;;  %v762_v5 = vadd.f32 %v1193_v34, %v1153_v63 }
 0x114   :  { %v945_v14 = vmul.f32 %v1689_v58, %v873_v47  ;;  %v1008_v15 = vmax.f32 %v1000_v48, 0.0  ;;  %v811_v17 = vadd.f32 %v1221_v49, %v746_v12  ;;  %v997_v12 = vpop.permute.xlu1 %996 }
 0x115   :  { %v1223_v54 = vpop.f32.mrf.mxu0 }
 0x116   :  { %v1001_v18 = vadd.f32 %v972_v52, %v945_v14  ;;  %1017 = vst.msk [vmem:[%s1778_s4 + $0x8] sm:$0xff] %vm1015_vm1, %v1008_v15  ;;  %v876_v19 = vadd.f32 %v1259_v30, %v811_v17  ;;  %v1224_v20 = vadd.f32 %v1223_v54, %v1222_v50 }
 0x117   :  { %v1225_v58 = vpop.f32.mrf.mxu0 }
 0x118   :  { %v1009_v22 = vmax.f32 %v1001_v18, 0.0  ;;  %v946_v23 = vmul.f32 %v1703_v2, %v876_v19  ;;  %v816_v24 = vadd.f32 %v1224_v20, %v751_v61  ;;  %v883_v2 = vpop.f32.mrf.mxu1 }
 0x119   :  { %v1226_v60 = vpop.f32.mrf.mxu0 }
 0x11a   :  { %1018 = vst.msk [vmem:[%s1778_s4 + $0x10] sm:$0xff] %vm1015_vm1, %v1009_v22  ;;  %v1002_v27 = vadd.f32 %v977_v59, %v946_v23  ;;  %v1227_v28 = vadd.f32 %v1226_v60, %v1225_v58  ;;  %v881_v29 = vadd.f32 %v880_v13, %v816_v24 }
 0x11b   :  { %v1228_v30 = vpop.f32.mrf.mxu0 }
 0x11c   :  { %v1010_v31 = vmax.f32 %v1002_v27, 0.0  ;;  %v947_v32 = vmul.f32 %v1707_v4, %v881_v29  ;;  %v819_v62 = vadd.f32 %v1227_v28, %v754_v25 }
 0x11d   :  { %v1229_v33 = vpop.f32.mrf.mxu0 }
 0x11e   :  { %1019 = vst.msk [vmem:[%s1778_s4 + $0x18] sm:$0xff] %vm1015_vm1, %v1010_v31  ;;  %v1003_v35 = vadd.f32 %v982_v1, %v947_v32  ;;  %v1230_v36 = vadd.f32 %v1229_v33, %v1228_v30  ;;  %v884_v37 = vadd.f32 %v883_v2, %v819_v62 }
 0x11f   :  { %v1231_v38 = vpop.f32.mrf.mxu0 }
 0x120   :  { %v1011_v4 = vmax.f32 %v1003_v35, 0.0  ;;  %v824_v39 = vadd.f32 %v1230_v36, %v759_v0  ;;  %v948_v40 = vmul.f32 %v1713_v10, %v884_v37 }
 0x121   :  { %v1232_v3 = vpop.f32.mrf.mxu0 }
 0x122   :  { %1020 = vst.msk [vmem:[%s1778_s4 + $0x20] sm:$0xff] %vm1015_vm1, %v1011_v4  ;;  %v889_v6 = vadd.f32 %v1721_v43, %v824_v39  ;;  %v1004_v11 = vadd.f32 %v987_v41, %v948_v40  ;;  %v1233_v42 = vadd.f32 %v1232_v3, %v1231_v38 }
 0x124   :  { %v949_v44 = vmul.f32 %v1717_v16, %v889_v6  ;;  %v1012_v45 = vmax.f32 %v1004_v11, 0.0  ;;  %v827_v46 = vadd.f32 %v1233_v42, %v762_v5 }
 0x126   :  { %v1005_v8 = vadd.f32 %v992_v7, %v949_v44  ;;  %1021 = vst.msk [vmem:[%s1778_s4 + $0x28] sm:$0xff] %vm1015_vm1, %v1012_v45  ;;  %v892_v10 = vadd.f32 %v1263_v21, %v827_v46 }
 0x128   :  { %v1013_v9 = vmax.f32 %v1005_v8, 0.0  ;;  %v950_v53 = vmul.f32 %v1719_v26, %v892_v10 }
 0x12a   :  { %1022 = vst.msk [vmem:[%s1778_s4 + $0x30] sm:$0xff] %vm1015_vm1, %v1013_v9  ;;  %v1006_v16 = vadd.f32 %v997_v12, %v950_v53 }
 0x12c   :  { %v1014_v43 = vmax.f32 %v1006_v16, 0.0 }
 0x12e   :  { %1023 = vst.msk [vmem:[%s1778_s4 + $0x38] sm:$0xff] %vm1015_vm1, %v1014_v43 }

// kernel: depth_net.49
= control target key start
LH: loop header
LB: loop body
LE: loop exit
PB: predicated region body
PF: predicated region fallthrough
CT: control target
= control target key end

     0   :  { %v632_v1 = vmov 0   ;;  %vm480_vm0 = vcmask 64512   ;;  %s818_s1 = inlined_call_operand.vmem [shape: bf16[512,8], index: 1, kind: input, shape index: {}]   ;;  %s819_s0 = inlined_call_operand.vmem [shape: bf16[32,512], index: 0, kind: input, shape index: {}]   ;;  %s820_s2 = inlined_call_operand.vmem [shape: f32[32,1], index: 2, kind: input, shape index: {}]   ;;  %s821_s3 = inlined_call_operand.vmem [shape: f32[32,1], index: 3, kind: input, shape index: {}]   ;;  %s822_s4 = inlined_call_operand.vmem [shape: f32[32,8], index: 4, kind: output, shape index: {}]  }
   0x1   :  { %v588_v0 = vld [vmem:[%s818_s1 + $0x78] sm:$0xff]   ;;  %587 = vset.pattern.permute.xlu1 %v632_v1  ;;  %586 = vset.pattern.permute.xlu0 %v632_v1  ;;  %v592_v5 = vld [vmem:[%s818_s1 + $0x70] sm:$0xff]   ;;  %v596_v9 = vld [vmem:[%s818_s1 + $0x68] sm:$0xff]  }
   0x2   :  { %v589_v2 = vld [vmem:[%s818_s1 + $0xf8] sm:$0xff]   ;;  %529 = vmatprep.subr.bf16.mxu0 %v588_v0  ;;  %v593_v6 = vld [vmem:[%s818_s1 + $0xf0] sm:$0xff]   ;;  %v597_v10 = vld [vmem:[%s818_s1 + $0xe8] sm:$0xff]  }
   0x3   :  { %v590_v3 = vld [vmem:[%s818_s1 + $0x38] sm:$0xff]   ;;  %557 = vmatprep.subr.bf16.mxu1 %v589_v2  ;;  %v594_v7 = vld [vmem:[%s818_s1 + $0x30] sm:$0xff]   ;;  %v598_v11 = vld [vmem:[%s818_s1 + $0x28] sm:$0xff]  }
   0x4   :  { %v591_v4 = vld [vmem:[%s818_s1 + $0xb8] sm:$0xff]   ;;  %530 = vmatpush3.bf16.msra.mxu0 %v590_v3  ;;  %v595_v8 = vld [vmem:[%s818_s1 + $0xb0] sm:$0xff]   ;;  %v599_v12 = vld [vmem:[%s818_s1 + $0xa8] sm:$0xff]  }
   0x5   :  { %558 = vmatpush3.bf16.msra.mxu1 %v591_v4  ;;  %531 = vmatprep.subr.bf16.mxu0 %v592_v5  ;;  %v600_v13 = vld [vmem:[%s818_s1 + $0x60] sm:$0xff]   ;;  %v604_v17 = vld [vmem:[%s818_s1 + $0x58] sm:$0xff]   ;;  %v608_v21 = vld [vmem:[%s818_s1 + $0x50] sm:$0xff]  }
   0x6   :  { %559 = vmatprep.subr.bf16.mxu1 %v593_v6  ;;  %v601_v14 = vld [vmem:[%s818_s1 + $0xe0] sm:$0xff]   ;;  %v605_v18 = vld [vmem:[%s818_s1 + $0xd8] sm:$0xff]   ;;  %v609_v22 = vld [vmem:[%s818_s1 + $0xd0] sm:$0xff]  }
   0x7   :  { %v602_v15 = vld [vmem:[%s818_s1 + $0x20] sm:$0xff]   ;;  %v606_v19 = vld [vmem:[%s818_s1 + $0x18] sm:$0xff]   ;;  %v610_v23 = vld [vmem:[%s818_s1 + $0x10] sm:$0xff]  }
   0x8   :  { %532 = vmatpush3.bf16.msra.mxu0 %v594_v7  ;;  %v603_v16 = vld [vmem:[%s818_s1 + $0xa0] sm:$0xff]   ;;  %v607_v20 = vld [vmem:[%s818_s1 + $0x98] sm:$0xff]   ;;  %v611_v24 = vld [vmem:[%s818_s1 + $0x90] sm:$0xff]  }
   0x9   :  { %560 = vmatpush3.bf16.msra.mxu1 %v595_v8  ;;  %533 = vmatprep.subr.bf16.mxu0 %v596_v9  ;;  %v612_v25 = vld [vmem:[%s818_s1 + $0x48] sm:$0xff]   ;;  %v616_v29 = vld [vmem:[%s818_s1 + $0x40] sm:$0xff]   ;;  %v422_v39 = vld [vmem:[%s820_s2 + $0x10] sm:$0xff] }
   0xa   :  { %561 = vmatprep.subr.bf16.mxu1 %v597_v10  ;;  %v613_v26 = vld [vmem:[%s818_s1 + $0xc8] sm:$0xff]   ;;  %v617_v30 = vld [vmem:[%s818_s1 + $0xc0] sm:$0xff]   ;;  %436 = vperm.xlu1 %587, %v422_v39   ;;  %v423_v41 = vld [vmem:[%s820_s2 + $0x18] sm:$0xff] }
   0xb   :  { %v614_v27 = vld [vmem:[%s818_s1 + $0x8] sm:$0xff]   ;;  %v618_v31 = vld [vmem:[%s818_s1] sm:$0xff]   ;;  %v451_v47 = vld [vmem:[%s821_s3 + $0x18] sm:$0xff] }
   0xc   :  { %534 = vmatpush3.bf16.msra.mxu0 %v598_v11  ;;  %v615_v28 = vld [vmem:[%s818_s1 + $0x88] sm:$0xff]   ;;  %v619_v32 = vld [vmem:[%s818_s1 + $0x80] sm:$0xff]   ;;  %v450_v48 = vld [vmem:[%s821_s3 + $0x10] sm:$0xff] }
   0xd   :  { %562 = vmatpush3.bf16.msra.mxu1 %v599_v12  ;;  %535 = vmatprep.subr.bf16.mxu0 %v600_v13  ;;  %v620_v33 = vld [vmem:[%s819_s0] ss:$16 sps:$4 sm:$0xff]   ;;  %v622_v34 = vld [vmem:[%s819_s0 + $0x4] ss:$16 sps:$4 sm:$0xff]   ;;  %v623_v35 = vld [vmem:[%s819_s0 + $0x8] ss:$16 sps:$4 sm:$0xff]  }
   0xe   :  { %563 = vmatprep.subr.bf16.mxu1 %v601_v14  ;;  %v625_v36 = vld [vmem:[%s819_s0 + $0xc] ss:$16 sps:$4 sm:$0xff]   ;;  %354 = vmatprep.mubr.bf16.mxu0 %v622_v34  ;;  %v626_v37 = vld [vmem:[%s819_s0 + $0x24] ss:$16 sps:$4 sm:$0xff]   ;;  %v630_v42 = vld [vmem:[%s819_s0 + $0x20] ss:$16 sps:$4 sm:$0xff]  }
   0xf   :  { %403 = vmatprep.mubr.bf16.mxu1 %v625_v36  ;;  %v628_v38 = vld [vmem:[%s819_s0 + $0x2c] ss:$16 sps:$4 sm:$0xff]   ;;  %v420_v40 = vld [vmem:[%s820_s2] sm:$0xff]  ;;  %v631_v44 = vld [vmem:[%s819_s0 + $0x28] ss:$16 sps:$4 sm:$0xff]   ;;  %441 = vperm.xlu1 %587, %v423_v41  }
  0x10   :  { %536 = vmatpush3.bf16.msra.mxu0 %v602_v15  ;;  %426 = vperm.xlu0 %586, %v420_v40   ;;  %v421_v43 = vld [vmem:[%s820_s2 + $0x8] sm:$0xff]  ;;  %v448_v46 = vld [vmem:[%s821_s3] sm:$0xff] }
  0x11   :  { %564 = vmatpush3.bf16.msra.mxu1 %v603_v16  ;;  %537 = vmatprep.subr.bf16.mxu0 %v604_v17  ;;  %v449_v45 = vld [vmem:[%s821_s3 + $0x8] sm:$0xff] }
  0x12   :  { %565 = vmatprep.subr.bf16.mxu1 %v605_v18 }
  0x13   :  { %459 = vperm.xlu1 %587, %v449_v45  }
  0x14   :  { %538 = vmatpush3.bf16.msra.mxu0 %v606_v19  ;;  %431 = vperm.xlu0 %586, %v421_v43  }
  0x15   :  { %566 = vmatpush3.bf16.msra.mxu1 %v607_v20  ;;  %539 = vmatprep.subr.bf16.mxu0 %v608_v21 }
  0x16   :  { %567 = vmatprep.subr.bf16.mxu1 %v609_v22 }
  0x17   :  { %469 = vperm.xlu1 %587, %v451_v47  }
  0x18   :  { %540 = vmatpush3.bf16.msra.mxu0 %v610_v23  ;;  %454 = vperm.xlu0 %586, %v448_v46  }
  0x19   :  { %568 = vmatpush3.bf16.msra.mxu1 %v611_v24  ;;  %541 = vmatprep.subr.bf16.mxu0 %v612_v25 }
  0x1a   :  { %569 = vmatprep.subr.bf16.mxu1 %v613_v26 }
  0x1c   :  { %542 = vmatpush3.bf16.msra.mxu0 %v614_v27  ;;  %464 = vperm.xlu0 %586, %v450_v48  }
  0x1d   :  { %570 = vmatpush3.bf16.msra.mxu1 %v615_v28  ;;  %543 = vmatprep.subr.bf16.mxu0 %v616_v29 }
  0x1e   :  { %571 = vmatprep.subr.bf16.mxu1 %v617_v30 }
  0x20   :  { %544 = vmatpush3.bf16.msra.mxu0 %v618_v31 }
  0x21   :  { %572 = vmatpush3.bf16.msra.mxu1 %v619_v32 }
  0x23   :  { %355 = vmatmul.mubr.bf16.vlgmr.msra.gmra.mxu0 %v620_v33 }
  0x24   :  { %404 = vmatmul.mubr.bf16.vlgmr.msra.gmra.mxu1 %v623_v35  ;;  %362 = vmatprep.mubr.bf16.mxu0 %v626_v37 }
  0x25   :  { %411 = vmatprep.mubr.bf16.mxu1 %v628_v38 }
  0x2b   :  { %363 = vmatmul.mubr.bf16.gmra.mxu0 %v630_v42 }
  0x2c   :  { %412 = vmatmul.mubr.bf16.gmra.mxu1 %v631_v44 }
  0x85   :  { %v437_v51 = vpop.permute.xlu1 %436 }
  0x8a   :  { %v442_v62 = vpop.permute.xlu1 %441 }
  0x8b   :  { %v427_v49 = vpop.permute.xlu0 %426 }
  0x8e   :  { %v460_v15 = vpop.permute.xlu1 %459 }
  0x8f   :  { %v432_v54 = vpop.permute.xlu0 %431 }
  0x92   :  { %v470_v30 = vpop.permute.xlu1 %469 }
  0x93   :  { %v455_v4 = vpop.permute.xlu0 %454 }
  0x97   :  { %v465_v25 = vpop.permute.xlu0 %464 }
  0xe3   :  { %v545_v50 = vpop.f32.mrf.mxu0 }
  0xe4   :  { %v573_v52 = vpop.f32.mrf.mxu1 }
  0xe5   :  { %v546_v53 = vpop.f32.mrf.mxu0 }
  0xe6   :  { %v547_v55 = vadd.f32 %v546_v53, %v545_v50  ;;  %v574_v56 = vpop.f32.mrf.mxu1 }
  0xe7   :  { %v575_v57 = vadd.f32 %v574_v56, %v573_v52  ;;  %v548_v58 = vpop.f32.mrf.mxu0 }
  0xe8   :  { %v576_v59 = vpop.f32.mrf.mxu1 }
  0xe9   :  { %v406_v60 = vadd.f32 %v575_v57, %v547_v55  ;;  %v549_v61 = vpop.f32.mrf.mxu0 }
  0xea   :  { %v550_v63 = vadd.f32 %v549_v61, %v548_v58  ;;  %v577_v0 = vpop.f32.mrf.mxu1 }
  0xeb   :  { %v444_v1 = vmul.f32 %v427_v49, %v406_v60  ;;  %v578_v2 = vadd.f32 %v577_v0, %v576_v59  ;;  %v551_v3 = vpop.f32.mrf.mxu0 }
  0xec   :  { %v579_v5 = vpop.f32.mrf.mxu1 }
  0xed   :  { %v472_v6 = vadd.f32 %v455_v4, %v444_v1  ;;  %v409_v7 = vadd.f32 %v578_v2, %v550_v63  ;;  %v552_v8 = vpop.f32.mrf.mxu0 }
  0xee   :  { %v553_v9 = vadd.f32 %v552_v8, %v551_v3  ;;  %v580_v10 = vpop.f32.mrf.mxu1 }
  0xef   :  { %v476_v11 = vmax.f32 %v472_v6, 0.0  ;;  %v445_v12 = vmul.f32 %v432_v54, %v409_v7  ;;  %v581_v13 = vadd.f32 %v580_v10, %v579_v5  ;;  %v554_v14 = vpop.f32.mrf.mxu0 }
  0xf0   :  { %v582_v16 = vpop.f32.mrf.mxu1 }
  0xf1   :  { %481 = vst.msk [vmem:[%s822_s4] sm:$0xff] %vm480_vm0, %v476_v11  ;;  %v473_v17 = vadd.f32 %v460_v15, %v445_v12  ;;  %v414_v18 = vadd.f32 %v581_v13, %v553_v9  ;;  %v555_v19 = vpop.f32.mrf.mxu0 }
  0xf2   :  { %v556_v20 = vadd.f32 %v555_v19, %v554_v14  ;;  %v583_v21 = vpop.f32.mrf.mxu1 }
  0xf3   :  { %v477_v22 = vmax.f32 %v473_v17, 0.0  ;;  %v446_v23 = vmul.f32 %v437_v51, %v414_v18  ;;  %v584_v24 = vadd.f32 %v583_v21, %v582_v16 }
  0xf5   :  { %482 = vst.msk [vmem:[%s822_s4 + $0x8] sm:$0xff] %vm480_vm0, %v477_v22  ;;  %v474_v26 = vadd.f32 %v465_v25, %v446_v23  ;;  %v417_v27 = vadd.f32 %v584_v24, %v556_v20 }
  0xf7   :  { %v478_v28 = vmax.f32 %v474_v26, 0.0  ;;  %v447_v29 = vmul.f32 %v442_v62, %v417_v27 }
  0xf9   :  { %483 = vst.msk [vmem:[%s822_s4 + $0x10] sm:$0xff] %vm480_vm0, %v478_v28  ;;  %v475_v31 = vadd.f32 %v470_v30, %v447_v29 }
  0xfb   :  { %v479_v32 = vmax.f32 %v475_v31, 0.0 }
  0xfd   :  { %484 = vst.msk [vmem:[%s822_s4 + $0x18] sm:$0xff] %vm480_vm0, %v479_v32 }

// kernel: depth_net.41
= control target key start
LH: loop header
LB: loop body
LE: loop exit
PB: predicated region body
PF: predicated region fallthrough
CT: control target
= control target key end

     0   :  { %v2418_v1 = vmov 0   ;;  %vm1214_vm0 = vcmask 523264   ;;  %vm1802_vm1 = vcmask 64512   ;;  %s3217_s1 = inlined_call_operand.vmem [shape: bf16[1728,8], index: 1, kind: input, shape index: {}]   ;;  %s3218_s0 = inlined_call_operand.vmem [shape: bf16[64,1728], index: 0, kind: input, shape index: {}]   ;;  %s3219_s2 = inlined_call_operand.vmem [shape: f32[64,1], index: 2, kind: input, shape index: {}]   ;;  %s3220_s3 = inlined_call_operand.vmem [shape: f32[64,1], index: 3, kind: input, shape index: {}]   ;;  %s3221_s4 = inlined_call_operand.vmem [shape: f32[64,8], index: 4, kind: output, shape index: {}]  }
   0x1   :  { %v2226_v0 = vld [vmem:[%s3217_s1 + $0x78] sm:$0xff]   ;;  %2225 = vset.pattern.permute.xlu1 %v2418_v1  ;;  %2224 = vset.pattern.permute.xlu0 %v2418_v1  ;;  %v2228_v3 = vld [vmem:[%s3217_s1 + $0x70] sm:$0xff]   ;;  %v2230_v5 = vld [vmem:[%s3217_s1 + $0x68] sm:$0xff]  }
   0x2   :  { %v2227_v2 = vld [vmem:[%s3217_s1 + $0x38] sm:$0xff]   ;;  %1983 = vmatprep.subr.bf16.mxu1 %v2226_v0  ;;  %v2229_v4 = vld [vmem:[%s3217_s1 + $0x30] sm:$0xff]   ;;  %v2231_v6 = vld [vmem:[%s3217_s1 + $0x28] sm:$0xff]  }
   0x3   :  { %1984 = vmatpush3.bf16.msra.mxu1 %v2227_v2  ;;  %v2232_v7 = vld [vmem:[%s3217_s1 + $0x60] sm:$0xff]   ;;  %v2236_v9 = vld [vmem:[%s3217_s1 + $0x178] sm:$0xff]   ;;  %v2240_v13 = vld [vmem:[%s3217_s1 + $0x170] sm:$0xff]  }
   0x4   :  { %1985 = vmatprep.subr.bf16.mxu1 %v2228_v3  ;;  %v2233_v8 = vld [vmem:[%s3217_s1 + $0x20] sm:$0xff]   ;;  %v2237_v10 = vld [vmem:[%s3217_s1 + $0x138] sm:$0xff]   ;;  %2063 = vmatprep.subr.bf16.mxu0 %v2236_v9  ;;  %v2241_v14 = vld [vmem:[%s3217_s1 + $0x130] sm:$0xff]  }
   0x5   :  { %v2234_v11 = vld [vmem:[%s3217_s1 + $0x58] sm:$0xff]   ;;  %2064 = vmatpush3.bf16.msra.mxu0 %v2237_v10  ;;  %v2238_v15 = vld [vmem:[%s3217_s1 + $0x50] sm:$0xff]   ;;  %v2244_v17 = vld [vmem:[%s3217_s1 + $0x168] sm:$0xff]  }
   0x6   :  { %v2235_v12 = vld [vmem:[%s3217_s1 + $0x18] sm:$0xff]   ;;  %2065 = vmatprep.subr.bf16.mxu0 %v2240_v13  ;;  %v2239_v16 = vld [vmem:[%s3217_s1 + $0x10] sm:$0xff]   ;;  %v2245_v18 = vld [vmem:[%s3217_s1 + $0x128] sm:$0xff]  }
   0x7   :  { %1986 = vmatpush3.bf16.msra.mxu1 %v2229_v4  ;;  %v2242_v19 = vld [vmem:[%s3217_s1 + $0x48] sm:$0xff]   ;;  %v2248_v21 = vld [vmem:[%s3217_s1 + $0x160] sm:$0xff]   ;;  %v2253_v26 = vld [vmem:[%s3217_s1 + $0xf8] sm:$0xff]  }
   0x8   :  { %1987 = vmatprep.subr.bf16.mxu1 %v2230_v5  ;;  %v2243_v20 = vld [vmem:[%s3217_s1 + $0x8] sm:$0xff]   ;;  %v2249_v22 = vld [vmem:[%s3217_s1 + $0x120] sm:$0xff]   ;;  %v2255_v28 = vld [vmem:[%s3217_s1 + $0x158] sm:$0xff]  }
   0x9   :  { %2066 = vmatpush3.bf16.msra.mxu0 %v2241_v14  ;;  %v2246_v23 = vld [vmem:[%s3217_s1 + $0x40] sm:$0xff]   ;;  %v2256_v29 = vld [vmem:[%s3217_s1 + $0x118] sm:$0xff]   ;;  %v2257_v31 = vld [vmem:[%s3217_s1 + $0xf0] sm:$0xff]  }
   0xa   :  { %2067 = vmatprep.subr.bf16.mxu0 %v2244_v17  ;;  %v2252_v24 = vld [vmem:[%s3218_s0 + $0x4] ss:$56 sps:$4 sm:$0xff]   ;;  %v2250_v27 = vld [vmem:[%s3218_s0] ss:$56 sps:$4 sm:$0xff]   ;;  %v2259_v32 = vld [vmem:[%s3217_s1 + $0x150] sm:$0xff]  }
   0xb   :  { %1988 = vmatpush3.bf16.msra.mxu1 %v2231_v6  ;;  %v2247_v25 = vld [vmem:[%s3217_s1] sm:$0xff]   ;;  %1259 = vmatprep.mubr.bf16.mxu1 %v2252_v24  ;;  %v2254_v30 = vld [vmem:[%s3217_s1 + $0xb8] sm:$0xff]   ;;  %v2260_v33 = vld [vmem:[%s3217_s1 + $0x110] sm:$0xff]  }
   0xc   :  { %1989 = vmatprep.subr.bf16.mxu1 %v2232_v7  ;;  %v2261_v34 = vld [vmem:[%s3218_s0 + $0x74] ss:$56 sps:$4 sm:$0xff]   ;;  %v2263_v36 = vld [vmem:[%s3218_s0 + $0x70] ss:$56 sps:$4 sm:$0xff]   ;;  %v2268_v41 = vld [vmem:[%s3217_s1 + $0xe0] sm:$0xff]  }
   0xd   :  { %2068 = vmatpush3.bf16.msra.mxu0 %v2245_v18  ;;  %v2258_v35 = vld [vmem:[%s3217_s1 + $0xb0] sm:$0xff]   ;;  %v2264_v37 = vld [vmem:[%s3217_s1 + $0xe8] sm:$0xff]   ;;  %v2270_v42 = vld [vmem:[%s3217_s1 + $0x140] sm:$0xff]  }
   0xe   :  { %2069 = vmatprep.subr.bf16.mxu0 %v2248_v21  ;;  %v2266_v38 = vld [vmem:[%s3217_s1 + $0x148] sm:$0xff]   ;;  %v2271_v43 = vld [vmem:[%s3217_s1 + $0x100] sm:$0xff]   ;;  %v2275_v47 = vld [vmem:[%s3217_s1 + $0xd8] sm:$0xff]  }
   0xf   :  { %1990 = vmatpush3.bf16.msra.mxu1 %v2233_v8  ;;  %v2267_v39 = vld [vmem:[%s3217_s1 + $0x108] sm:$0xff]   ;;  %v2269_v44 = vld [vmem:[%s3217_s1 + $0xa0] sm:$0xff]   ;;  %v2276_v48 = vld [vmem:[%s3217_s1 + $0x98] sm:$0xff]  }
  0x10   :  { %1991 = vmatprep.subr.bf16.mxu1 %v2234_v11  ;;  %v2265_v40 = vld [vmem:[%s3217_s1 + $0xa8] sm:$0xff]   ;;  %v2272_v45 = vld [vmem:[%s3218_s0 + $0xe4] ss:$56 sps:$4 sm:$0xff]   ;;  %v2274_v46 = vld [vmem:[%s3218_s0 + $0xe0] ss:$56 sps:$4 sm:$0xff]  }
  0x11   :  { %2070 = vmatpush3.bf16.msra.mxu0 %v2249_v22  ;;  %v2277_v49 = vld [vmem:[%s3218_s0 + $0x10] ss:$56 sps:$4 sm:$0xff]   ;;  %v2279_v50 = vld [vmem:[%s3218_s0 + $0x14] ss:$56 sps:$4 sm:$0xff]   ;;  %v2280_v51 = vld [vmem:[%s3217_s1 + $0x278] sm:$0xff]  }
  0x12   :  { %2071 = vmatprep.subr.bf16.mxu0 %v2255_v28  ;;  %1389 = vmatprep.mubr.bf16.mxu0 %v2279_v50  ;;  %v2281_v52 = vld [vmem:[%s3217_s1 + $0x238] sm:$0xff]   ;;  %v2282_v53 = vld [vmem:[%s3217_s1 + $0xd0] sm:$0xff]   ;;  %v2289_v59 = vld [vmem:[%s3217_s1 + $0xc8] sm:$0xff]  }
  0x13   :  { %1992 = vmatpush3.bf16.msra.mxu1 %v2235_v12  ;;  %v2283_v54 = vld [vmem:[%s3217_s1 + $0x90] sm:$0xff]   ;;  %v2290_v60 = vld [vmem:[%s3217_s1 + $0x88] sm:$0xff]   ;;  %v2291_v61 = vld [vmem:[%s3218_s0 + $0x84] ss:$56 sps:$4 sm:$0xff]  }
  0x14   :  { %1993 = vmatprep.subr.bf16.mxu1 %v2238_v15  ;;  %v2284_v55 = vld [vmem:[%s3217_s1 + $0x270] sm:$0xff]   ;;  %v2293_v62 = vld [vmem:[%s3217_s1 + $0x268] sm:$0xff]   ;;  %v2294_v63 = vld [vmem:[%s3218_s0 + $0x80] ss:$56 sps:$4 sm:$0xff]  }
  0x15   :  { %2072 = vmatpush3.bf16.msra.mxu0 %v2256_v29  ;;  %v2285_v56 = vld [vmem:[%s3217_s1 + $0x230] sm:$0xff]   ;;  %v2295_v0 = vld [vmem:[%s3217_s1 + $0x228] sm:$0xff]   ;;  %v2296_v2 = vld [vmem:[%s3217_s1 + $0xc0] sm:$0xff]  }
  0x16   :  { %2073 = vmatprep.subr.bf16.mxu0 %v2259_v32  ;;  %v2286_v57 = vld [vmem:[%s3218_s0 + $0x154] ss:$56 sps:$4 sm:$0xff]   ;;  %v2288_v58 = vld [vmem:[%s3218_s0 + $0x150] ss:$56 sps:$4 sm:$0xff]   ;;  %v2297_v3 = vld [vmem:[%s3217_s1 + $0x80] sm:$0xff]  }
  0x17   :  { %1994 = vmatpush3.bf16.msra.mxu1 %v2239_v16  ;;  %v2298_v4 = vld [vmem:[%s3217_s1 + $0x260] sm:$0xff]   ;;  %v2303_v8 = vld [vmem:[%s3217_s1 + $0x1f8] sm:$0xff]   ;;  %v2304_v9 = vld [vmem:[%s3218_s0 + $0xf4] ss:$56 sps:$4 sm:$0xff]  }
  0x18   :  { %1995 = vmatprep.subr.bf16.mxu1 %v2242_v19  ;;  %v2299_v5 = vld [vmem:[%s3217_s1 + $0x220] sm:$0xff]   ;;  %v2306_v10 = vld [vmem:[%s3217_s1 + $0x1b8] sm:$0xff]   ;;  %v2308_v12 = vld [vmem:[%s3218_s0 + $0xf0] ss:$56 sps:$4 sm:$0xff]  }
  0x19   :  { %2074 = vmatpush3.bf16.msra.mxu0 %v2260_v33  ;;  %v2300_v6 = vld [vmem:[%s3218_s0 + $0x8] ss:$56 sps:$4 sm:$0xff]   ;;  %v2302_v7 = vld [vmem:[%s3218_s0 + $0xc] ss:$56 sps:$4 sm:$0xff]   ;;  %v2307_v11 = vld [vmem:[%s3217_s1 + $0x258] sm:$0xff]  }
  0x1a   :  { %2075 = vmatprep.subr.bf16.mxu0 %v2266_v38  ;;  %v2309_v13 = vld [vmem:[%s3217_s1 + $0x218] sm:$0xff]   ;;  %v2310_v14 = vld [vmem:[%s3217_s1 + $0x1f0] sm:$0xff]   ;;  %v2320_v22 = vld [vmem:[%s3217_s1 + $0x1a8] sm:$0xff]  }
  0x1b   :  { %1996 = vmatpush3.bf16.msra.mxu1 %v2243_v20  ;;  %v2311_v15 = vld [vmem:[%s3217_s1 + $0x1b0] sm:$0xff]   ;;  %v2317_v20 = vld [vmem:[%s3217_s1 + $0x1e8] sm:$0xff]   ;;  %v2318_v21 = vld [vmem:[%s3218_s0 + $0x164] ss:$56 sps:$4 sm:$0xff]  }
  0x1c   :  { %1997 = vmatprep.subr.bf16.mxu1 %v2246_v23  ;;  %v2312_v16 = vld [vmem:[%s3217_s1 + $0x250] sm:$0xff]   ;;  %v2321_v23 = vld [vmem:[%s3217_s1 + $0x248] sm:$0xff]   ;;  %v2322_v24 = vld [vmem:[%s3218_s0 + $0x160] ss:$56 sps:$4 sm:$0xff]  }
  0x1d   :  { %2076 = vmatpush3.bf16.msra.mxu0 %v2267_v39  ;;  %v2313_v17 = vld [vmem:[%s3217_s1 + $0x210] sm:$0xff]   ;;  %v2326_v28 = vld [vmem:[%s3217_s1 + $0x240] sm:$0xff]   ;;  %v2331_v32 = vld [vmem:[%s3217_s1 + $0x1d8] sm:$0xff]  }
  0x1e   :  { %2077 = vmatprep.subr.bf16.mxu0 %v2270_v42  ;;  %v2314_v18 = vld [vmem:[%s3218_s0 + $0x7c] ss:$56 sps:$4 sm:$0xff]   ;;  %v2316_v19 = vld [vmem:[%s3218_s0 + $0x78] ss:$56 sps:$4 sm:$0xff]   ;;  %v2327_v29 = vld [vmem:[%s3217_s1 + $0x200] sm:$0xff]  }
  0x1f   :  { %1998 = vmatpush3.bf16.msra.mxu1 %v2247_v25  ;;  %v2323_v25 = vld [vmem:[%s3217_s1 + $0x208] sm:$0xff]   ;;  %v2332_v33 = vld [vmem:[%s3217_s1 + $0x198] sm:$0xff]   ;;  %v2338_v38 = vld [vmem:[%s3217_s1 + $0x190] sm:$0xff]  }
  0x20   :  { %2023 = vmatprep.subr.bf16.mxu1 %v2253_v26  ;;  %v2324_v26 = vld [vmem:[%s3217_s1 + $0x1e0] sm:$0xff]   ;;  %v2339_v39 = vld [vmem:[%s3217_s1 + $0x330] sm:$0xff]   ;;  %v2343_v42 = vld [vmem:[%s3217_s1 + $0x1c8] sm:$0xff]  }
  0x21   :  { %2078 = vmatpush3.bf16.msra.mxu0 %v2271_v43  ;;  %v2344_v43 = vld [vmem:[%s3217_s1 + $0x188] sm:$0xff]   ;;  %v2352_v50 = vld [vmem:[%s3217_s1 + $0x2f8] sm:$0xff]  }
  0x22   :  { %1260 = vmatmul.mubr.bf16.vlgmr.msra.gmra.mxu1 %v2250_v27  ;;  %2143 = vmatprep.subr.bf16.mxu0 %v2280_v51  ;;  %v2325_v27 = vld [vmem:[%s3217_s1 + $0x1a0] sm:$0xff]   ;;  %v2353_v51 = vld [vmem:[%s3217_s1 + $0x2b8] sm:$0xff]  }
  0x23   :  { %2024 = vmatpush3.bf16.msra.mxu1 %v2254_v30  ;;  %1267 = vmatprep.mubr.bf16.mxu1 %v2261_v34  ;;  %v2328_v30 = vld [vmem:[%s3218_s0 + $0xec] ss:$56 sps:$4 sm:$0xff]   ;;  %v2333_v34 = vld [vmem:[%s3218_s0 + $0x20] ss:$56 sps:$4 sm:$0xff]  }
  0x24   :  { %2025 = vmatprep.subr.bf16.mxu1 %v2257_v31  ;;  %1390 = vmatmul.mubr.bf16.vlgmr.msra.gmra.mxu0 %v2277_v49  ;;  %v2330_v31 = vld [vmem:[%s3218_s0 + $0xe8] ss:$56 sps:$4 sm:$0xff]   ;;  %v2351_v49 = vld [vmem:[%s3218_s0 + $0x1c] ss:$56 sps:$4 sm:$0xff]  }
  0x25   :  { %2144 = vmatpush3.bf16.msra.mxu0 %v2281_v52  ;;  %1397 = vmatprep.mubr.bf16.mxu0 %v2291_v61  ;;  %v2354_v52 = vld [vmem:[%s3217_s1 + $0x318] sm:$0xff]   ;;  %v2365_v61 = vld [vmem:[%s3217_s1 + $0x2a8] sm:$0xff]  }
  0x26   :  { %2145 = vmatprep.subr.bf16.mxu0 %v2284_v55  ;;  %v2357_v55 = vld [vmem:[%s3217_s1 + $0x310] sm:$0xff]  }
  0x27   :  { %2026 = vmatpush3.bf16.msra.mxu1 %v2258_v35  ;;  %v2335_v35 = vld [vmem:[%s3218_s0 + $0x24] ss:$56 sps:$4 sm:$0xff]  }
  0x28   :  { %2027 = vmatprep.subr.bf16.mxu1 %v2264_v37  ;;  %v2337_v37 = vld [vmem:[%s3217_s1 + $0x1d0] sm:$0xff]  }
  0x29   :  { %2146 = vmatpush3.bf16.msra.mxu0 %v2285_v56  ;;  %v2358_v56 = vld [vmem:[%s3218_s0 + $0x8c] ss:$56 sps:$4 sm:$0xff]  }
  0x2a   :  { %1268 = vmatmul.mubr.bf16.gmra.mxu1 %v2263_v36  ;;  %2147 = vmatprep.subr.bf16.mxu0 %v2293_v62  ;;  %v2336_v36 = vld [vmem:[%s3217_s1 + $0x338] sm:$0xff]   ;;  %v2366_v62 = vld [vmem:[%s3217_s1 + $0x308] sm:$0xff]  }
  0x2b   :  { %2028 = vmatpush3.bf16.msra.mxu1 %v2265_v40  ;;  %1275 = vmatprep.mubr.bf16.mxu1 %v2272_v45  ;;  %v2340_v40 = vld [vmem:[%s3218_s0 + $0x15c] ss:$56 sps:$4 sm:$0xff]   ;;  %v2346_v45 = vld [vmem:[%s3217_s1 + $0x1c0] sm:$0xff]  }
  0x2c   :  { %2029 = vmatprep.subr.bf16.mxu1 %v2268_v41  ;;  %1398 = vmatmul.mubr.bf16.gmra.mxu0 %v2294_v63  ;;  %v2342_v41 = vld [vmem:[%s3218_s0 + $0x158] ss:$56 sps:$4 sm:$0xff]   ;;  %v2367_v63 = vld [vmem:[%s3217_s1 + $0x2e0] sm:$0xff]  }
  0x2d   :  { %2148 = vmatpush3.bf16.msra.mxu0 %v2295_v0  ;;  %1405 = vmatprep.mubr.bf16.mxu0 %v2304_v9  ;;  %v2368_v0 = vld [vmem:[%s3217_s1 + $0x2a0] sm:$0xff]   ;;  %v2378_v9 = vld [vmem:[%s3217_s1 + $0x358] sm:$0xff]  }
  0x2e   :  { %2149 = vmatprep.subr.bf16.mxu0 %v2298_v4  ;;  %v2372_v4 = vld [vmem:[%s3218_s0 + $0xf8] ss:$56 sps:$4 sm:$0xff]  }
  0x2f   :  { %2030 = vmatpush3.bf16.msra.mxu1 %v2269_v44  ;;  %v2345_v44 = vld [vmem:[%s3217_s1 + $0x328] sm:$0xff]  }
  0x30   :  { %2031 = vmatprep.subr.bf16.mxu1 %v2275_v47  ;;  %v2348_v47 = vld [vmem:[%s3217_s1 + $0x320] sm:$0xff]  }
  0x31   :  { %2150 = vmatpush3.bf16.msra.mxu0 %v2299_v5  ;;  %v2373_v5 = vld [vmem:[%s3218_s0 + $0x104] ss:$56 sps:$4 sm:$0xff]  }
  0x32   :  { %1276 = vmatmul.mubr.bf16.gmra.mxu1 %v2274_v46  ;;  %2151 = vmatprep.subr.bf16.mxu0 %v2307_v11  ;;  %v2347_v46 = vld [vmem:[%s3217_s1 + $0x180] sm:$0xff]   ;;  %v2380_v11 = vld [vmem:[%s3217_s1 + $0x290] sm:$0xff]  }
  0x33   :  { %2032 = vmatpush3.bf16.msra.mxu1 %v2276_v48  ;;  %1283 = vmatprep.mubr.bf16.mxu1 %v2286_v57  ;;  %v2349_v48 = vld [vmem:[%s3218_s0 + $0x18] ss:$56 sps:$4 sm:$0xff]   ;;  %v2360_v57 = vld [vmem:[%s3218_s0 + $0x88] ss:$56 sps:$4 sm:$0xff]  }
  0x34   :  { %2033 = vmatprep.subr.bf16.mxu1 %v2282_v53  ;;  %1406 = vmatmul.mubr.bf16.gmra.mxu0 %v2308_v12  ;;  %v2355_v53 = vld [vmem:[%s3217_s1 + $0x2f0] sm:$0xff]  }
  0x35   :  { %2152 = vmatpush3.bf16.msra.mxu0 %v2309_v13  ;;  %1413 = vmatprep.mubr.bf16.mxu0 %v2318_v21  ;;  %v2381_v12 = vld [vmem:[%s3217_s1 + $0x350] sm:$0xff]   ;;  %v2382_v13 = vld [vmem:[%s3218_s0 + $0x16c] ss:$56 sps:$4 sm:$0xff]  }
  0x36   :  { %2153 = vmatprep.subr.bf16.mxu0 %v2312_v16  ;;  %v2387_v16 = vld [vmem:[%s3217_s1 + $0x2c8] sm:$0xff]   ;;  %v2392_v21 = vld [vmem:[%s3217_s1 + $0x280] sm:$0xff]  }
  0x37   :  { %2034 = vmatpush3.bf16.msra.mxu1 %v2283_v54  ;;  %v2356_v54 = vld [vmem:[%s3217_s1 + $0x2b0] sm:$0xff]  }
  0x38   :  { %2035 = vmatprep.subr.bf16.mxu1 %v2289_v59  ;;  %v2363_v59 = vld [vmem:[%s3217_s1 + $0x2e8] sm:$0xff]  }
  0x39   :  { %2154 = vmatpush3.bf16.msra.mxu0 %v2313_v17  ;;  %v2388_v17 = vld [vmem:[%s3218_s0 + $0x170] ss:$56 sps:$4 sm:$0xff]  }
  0x3a   :  { %1284 = vmatmul.mubr.bf16.gmra.mxu1 %v2288_v58  ;;  %2155 = vmatprep.subr.bf16.mxu0 %v2321_v23  ;;  %v2361_v58 = vld [vmem:[%s3218_s0 + $0x94] ss:$56 sps:$4 sm:$0xff]   ;;  %v2394_v23 = vld [vmem:[%s3218_s0 + $0x28] ss:$56 sps:$4 sm:$0xff]  }
  0x3b   :  { %2036 = vmatpush3.bf16.msra.mxu1 %v2290_v60  ;;  %1324 = vmatprep.mubr.bf16.mxu1 %v2302_v7  ;;  %v2364_v60 = vld [vmem:[%s3218_s0 + $0x90] ss:$56 sps:$4 sm:$0xff]   ;;  %v2376_v7 = vld [vmem:[%s3218_s0 + $0x100] ss:$56 sps:$4 sm:$0xff]  }
  0x3c   :  { %2037 = vmatprep.subr.bf16.mxu1 %v2296_v2  ;;  %1414 = vmatmul.mubr.bf16.gmra.mxu0 %v2322_v24  ;;  %v2369_v2 = vld [vmem:[%s3217_s1 + $0x300] sm:$0xff]  }
  0x3d   :  { %2156 = vmatpush3.bf16.msra.mxu0 %v2323_v25  ;;  %1519 = vmatprep.mubr.bf16.mxu0 %v2335_v35  ;;  %v2396_v24 = vld [vmem:[%s3218_s0 + $0x2c] ss:$56 sps:$4 sm:$0xff]   ;;  %v2397_v25 = vld [vmem:[%s3218_s0 + $0x30] ss:$56 sps:$4 sm:$0xff]  }
  0x3e   :  { %2157 = vmatprep.subr.bf16.mxu0 %v2326_v28  ;;  %v2402_v28 = vld [vmem:[%s3218_s0 + $0x98] ss:$56 sps:$4 sm:$0xff]   ;;  %v1683_v35 = vld [vmem:[%s3219_s2 + $0x8] sm:$0xff] }
  0x3f   :  { %2038 = vmatpush3.bf16.msra.mxu1 %v2297_v3  ;;  %v2370_v3 = vld [vmem:[%s3218_s0 + $0xfc] ss:$56 sps:$4 sm:$0xff]  }
  0x40   :  { %2103 = vmatprep.subr.bf16.mxu1 %v2303_v8  ;;  %v2377_v8 = vld [vmem:[%s3217_s1 + $0x298] sm:$0xff]  }
  0x41   :  { %2158 = vmatpush3.bf16.msra.mxu0 %v2327_v29  ;;  %v2405_v29 = vld [vmem:[%s3218_s0 + $0xa0] ss:$56 sps:$4 sm:$0xff]  }
  0x42   :  { %1325 = vmatmul.mubr.bf16.vlgmr.msra.gmra.mxu1 %v2300_v6  ;;  %1617 = vmatprep.subr.bf16.mxu0 %v2418_v1  ;;  %v2375_v6 = vld [vmem:[%s3217_s1 + $0x2d8] sm:$0xff]  }
  0x43   :  { %2104 = vmatpush3.bf16.msra.mxu1 %v2306_v10  ;;  %1332 = vmatprep.mubr.bf16.mxu1 %v2314_v18  ;;  %v2379_v10 = vld [vmem:[%s3217_s1 + $0x2d0] sm:$0xff]   ;;  %v2389_v18 = vld [vmem:[%s3217_s1 + $0x288] sm:$0xff]  }
  0x44   :  { %2105 = vmatprep.subr.bf16.mxu1 %v2310_v14  ;;  %1520 = vmatmul.mubr.bf16.vlgmr.msra.gmra.mxu0 %v2333_v34  ;;  %v2384_v14 = vld [vmem:[%s3218_s0 + $0x168] ss:$56 sps:$4 sm:$0xff]   ;;  %v1685_v34 = vld [vmem:[%s3219_s2 + $0x18] sm:$0xff] }
  0x45   :  { %1618 = vmatpush1.bf16.msra.mxu0 %v2336_v36  ;;  %1527 = vmatprep.mubr.bf16.mxu0 %v2361_v58  ;;  %v2408_v36 = vld [vmem:[%s3218_s0 + $0x108] ss:$56 sps:$4 sm:$0xff]  }
  0x46   :  { %1619 = vmatprep.subr.bf16.mxu0 %v2418_v1 }
  0x47   :  { %2106 = vmatpush3.bf16.msra.mxu1 %v2311_v15  ;;  %v2385_v15 = vld [vmem:[%s3218_s0 + $0x174] ss:$56 sps:$4 sm:$0xff]  }
  0x48   :  { %2107 = vmatprep.subr.bf16.mxu1 %v2317_v20  ;;  %v2391_v20 = vld [vmem:[%s3217_s1 + $0x2c0] sm:$0xff]  }
  0x49   :  { %1620 = vmatpush1.bf16.msra.mxu0 %v2339_v39  ;;  %v2411_v39 = vld [vmem:[%s3218_s0 + $0x110] ss:$56 sps:$4 sm:$0xff]  }
  0x4a   :  { %1333 = vmatmul.mubr.bf16.gmra.mxu1 %v2316_v19  ;;  %1621 = vmatprep.subr.bf16.mxu0 %v2418_v1  ;;  %v2390_v19 = vld [vmem:[%s3217_s1 + $0x348] sm:$0xff]  }
  0x4b   :  { %2108 = vmatpush3.bf16.msra.mxu1 %v2320_v22  ;;  %1340 = vmatprep.mubr.bf16.mxu1 %v2328_v30  ;;  %v2393_v22 = vld [vmem:[%s3217_s1 + $0x340] sm:$0xff]  }
  0x4c   :  { %2109 = vmatprep.subr.bf16.mxu1 %v2324_v26  ;;  %1528 = vmatmul.mubr.bf16.gmra.mxu0 %v2364_v60  ;;  %v2400_v26 = vld [vmem:[%s3218_s0 + $0x9c] ss:$56 sps:$4 sm:$0xff]   ;;  %v2406_v30 = vld [vmem:[%s3218_s0 + $0x10c] ss:$56 sps:$4 sm:$0xff]  }
  0x4d   :  { %1622 = vmatpush1.bf16.msra.mxu0 %v2345_v44  ;;  %1535 = vmatprep.mubr.bf16.mxu0 %v2373_v5  ;;  %v2414_v44 = vld [vmem:[%s3218_s0 + $0x178] ss:$56 sps:$4 sm:$0xff]  }
  0x4e   :  { %1623 = vmatprep.subr.bf16.mxu0 %v2418_v1 }
  0x4f   :  { %2110 = vmatpush3.bf16.msra.mxu1 %v2325_v27  ;;  %v2403_v27 = vld [vmem:[%s3218_s0 + $0xa4] ss:$56 sps:$4 sm:$0xff]  }
  0x50   :  { %2111 = vmatprep.subr.bf16.mxu1 %v2331_v32  ;;  %v1684_v32 = vld [vmem:[%s3219_s2 + $0x10] sm:$0xff] }
  0x51   :  { %1624 = vmatpush1.bf16.msra.mxu0 %v2348_v47  ;;  %1702 = vperm.xlu1 %2225, %v1684_v32   ;;  %v2417_v47 = vld [vmem:[%s3218_s0 + $0x180] ss:$56 sps:$4 sm:$0xff]  }
  0x52   :  { %1341 = vmatmul.mubr.bf16.gmra.mxu1 %v2330_v31  ;;  %1625 = vmatprep.subr.bf16.mxu0 %v2418_v1  ;;  %v2409_v31 = vld [vmem:[%s3218_s0 + $0x114] ss:$56 sps:$4 sm:$0xff]  }
  0x53   :  { %2112 = vmatpush3.bf16.msra.mxu1 %v2332_v33  ;;  %1348 = vmatprep.mubr.bf16.mxu1 %v2340_v40  ;;  %v1682_v33 = vld [vmem:[%s3219_s2] sm:$0xff]  ;;  %v2412_v40 = vld [vmem:[%s3218_s0 + $0x17c] ss:$56 sps:$4 sm:$0xff]  }
  0x54   :  { %2113 = vmatprep.subr.bf16.mxu1 %v2337_v37  ;;  %1536 = vmatmul.mubr.bf16.gmra.mxu0 %v2376_v7  ;;  %v1687_v37 = vld [vmem:[%s3219_s2 + $0x28] sm:$0xff] }
  0x55   :  { %1626 = vmatpush1.bf16.msra.mxu0 %v2354_v52  ;;  %1543 = vmatprep.mubr.bf16.mxu0 %v2385_v15  ;;  %v1745_v52 = vld [vmem:[%s3220_s3 + $0x38] sm:$0xff] }
  0x56   :  { %1627 = vmatprep.subr.bf16.mxu0 %v2418_v1  ;;  %1692 = vperm.xlu0 %2224, %v1682_v33  }
  0x57   :  { %2114 = vmatpush3.bf16.msra.mxu1 %v2338_v38  ;;  %1707 = vperm.xlu1 %2225, %v1685_v34   ;;  %v1686_v38 = vld [vmem:[%s3219_s2 + $0x20] sm:$0xff] }
  0x58   :  { %2115 = vmatprep.subr.bf16.mxu1 %v2343_v42  ;;  %v1689_v42 = vld [vmem:[%s3219_s2 + $0x38] sm:$0xff] }
  0x59   :  { %1628 = vmatpush1.bf16.msra.mxu0 %v2357_v55 }
  0x5a   :  { %1349 = vmatmul.mubr.bf16.gmra.mxu1 %v2342_v41  ;;  %1629 = vmatprep.subr.bf16.mxu0 %v2418_v1  ;;  %v2415_v41 = vld [vmem:[%s3218_s0 + $0x184] ss:$56 sps:$4 sm:$0xff]  }
  0x5b   :  { %2116 = vmatpush3.bf16.msra.mxu1 %v2344_v43  ;;  %1454 = vmatprep.mubr.bf16.mxu1 %v2351_v49  ;;  %v1688_v43 = vld [vmem:[%s3219_s2 + $0x30] sm:$0xff] }
  0x5c   :  { %2117 = vmatprep.subr.bf16.mxu1 %v2346_v45  ;;  %1544 = vmatmul.mubr.bf16.gmra.mxu0 %v2388_v17  ;;  %v1739_v45 = vld [vmem:[%s3220_s3 + $0x8] sm:$0xff]  ;;  %v1740_v49 = vld [vmem:[%s3220_s3 + $0x10] sm:$0xff] }
  0x5d   :  { %1630 = vmatpush1.bf16.msra.mxu0 %v2366_v62  ;;  %1697 = vperm.xlu0 %2224, %v1683_v35  }
  0x5e   :  { %1631 = vmatprep.subr.bf16.mxu0 %v2418_v1  ;;  %1717 = vperm.xlu1 %2225, %v1687_v37  }
  0x5f   :  { %2118 = vmatpush3.bf16.msra.mxu1 %v2347_v46  ;;  %v1738_v46 = vld [vmem:[%s3220_s3] sm:$0xff] }
  0x60   :  { %2183 = vmatprep.subr.bf16.mxu1 %v2352_v50  ;;  %v1743_v50 = vld [vmem:[%s3220_s3 + $0x28] sm:$0xff] }
  0x61   :  { %1632 = vmatpush1.bf16.msra.mxu0 %v2369_v2  ;;  %1712 = vperm.xlu0 %2224, %v1686_v38  }
  0x62   :  { %1455 = vmatmul.mubr.bf16.vlgmr.msra.gmra.mxu1 %v2349_v48  ;;  %1641 = vmatprep.subr.bf16.mxu0 %v2418_v1  ;;  %v1741_v48 = vld [vmem:[%s3220_s3 + $0x18] sm:$0xff] }
  0x63   :  { %2184 = vmatpush3.bf16.msra.mxu1 %v2353_v51  ;;  %1462 = vmatprep.mubr.bf16.mxu1 %v2358_v56  ;;  %v1742_v51 = vld [vmem:[%s3220_s3 + $0x20] sm:$0xff] }
  0x64   :  { %2185 = vmatprep.subr.bf16.mxu1 %v2355_v53  ;;  %1727 = vperm.xlu1 %2225, %v1689_v42   ;;  %v1744_v53 = vld [vmem:[%s3220_s3 + $0x30] sm:$0xff] }
  0x65   :  { %1642 = vmatpush2.bf16.msra.mxu0 %v2378_v9  ;;  %1722 = vperm.xlu0 %2224, %v1688_v43  }
  0x66   :  { %1643 = vmatprep.subr.bf16.mxu0 %v2418_v1 }
  0x67   :  { %2186 = vmatpush3.bf16.msra.mxu1 %v2356_v54 }
  0x68   :  { %2187 = vmatprep.subr.bf16.mxu1 %v2363_v59  ;;  %1753 = vperm.xlu1 %2225, %v1739_v45  }
  0x69   :  { %1644 = vmatpush2.bf16.msra.mxu0 %v2381_v12  ;;  %1748 = vperm.xlu0 %2224, %v1738_v46  }
  0x6a   :  { %1463 = vmatmul.mubr.bf16.gmra.mxu1 %v2360_v57  ;;  %1645 = vmatprep.subr.bf16.mxu0 %v2418_v1 }
  0x6b   :  { %2188 = vmatpush3.bf16.msra.mxu1 %v2365_v61  ;;  %1470 = vmatprep.mubr.bf16.mxu1 %v2370_v3 }
  0x6c   :  { %2189 = vmatprep.subr.bf16.mxu1 %v2367_v63  ;;  %1763 = vperm.xlu1 %2225, %v1741_v48  }
  0x6d   :  { %1646 = vmatpush2.bf16.msra.mxu0 %v2390_v19  ;;  %1758 = vperm.xlu0 %2224, %v1740_v49  }
  0x6e   :  { %1647 = vmatprep.subr.bf16.mxu0 %v2418_v1  ;;  %v2399_v1 = vld [vmem:[%s3218_s0 + $0x34] ss:$56 sps:$4 sm:$0xff]  }
  0x6f   :  { %2190 = vmatpush3.bf16.msra.mxu1 %v2368_v0  ;;  %1979 = vmatprep.mubr.msk.bf16.mxu0 %vm1214_vm0, %v2399_v1 }
  0x70   :  { %2191 = vmatprep.subr.bf16.mxu1 %v2375_v6  ;;  %1773 = vperm.xlu1 %2225, %v1743_v50  }
  0x71   :  { %1648 = vmatpush2.bf16.msra.mxu0 %v2393_v22  ;;  %1768 = vperm.xlu0 %2224, %v1742_v51  }
  0x72   :  { %1471 = vmatmul.mubr.bf16.gmra.mxu1 %v2372_v4 }
  0x73   :  { %2192 = vmatpush3.bf16.msra.mxu1 %v2377_v8  ;;  %1478 = vmatprep.mubr.bf16.mxu1 %v2382_v13 }
  0x74   :  { %2193 = vmatprep.subr.bf16.mxu1 %v2379_v10  ;;  %1650 = vmatmul.mubr.bf16.vlgmr.msra.gmra.mxu0 %v2397_v25 }
  0x75   :  { %1980 = vmatprep.mubr.msk.bf16.mxu0 %vm1214_vm0, %v2403_v27  ;;  %1783 = vperm.xlu1 %2225, %v1745_v52  }
  0x76   :  { %1778 = vperm.xlu0 %2224, %v1744_v53  }
  0x77   :  { %2194 = vmatpush3.bf16.msra.mxu1 %v2380_v11 }
  0x78   :  { %2195 = vmatprep.subr.bf16.mxu1 %v2387_v16 }
  0x7a   :  { %1479 = vmatmul.mubr.bf16.gmra.mxu1 %v2384_v14 }
  0x7b   :  { %2196 = vmatpush3.bf16.msra.mxu1 %v2389_v18  ;;  %1584 = vmatprep.mubr.bf16.mxu1 %v2396_v24 }
  0x7c   :  { %2197 = vmatprep.subr.bf16.mxu1 %v2391_v20  ;;  %1658 = vmatmul.mubr.bf16.gmra.mxu0 %v2405_v29 }
  0x7d   :  { %1981 = vmatprep.mubr.msk.bf16.mxu0 %vm1214_vm0, %v2409_v31 }
  0x7f   :  { %2198 = vmatpush3.bf16.msra.mxu1 %v2392_v21 }
  0x82   :  { %1585 = vmatmul.mubr.bf16.vlgmr.msra.gmra.mxu1 %v2394_v23 }
  0x83   :  { %1592 = vmatprep.mubr.bf16.mxu1 %v2400_v26 }
  0x84   :  { %1666 = vmatmul.mubr.bf16.gmra.mxu0 %v2411_v39 }
  0x85   :  { %1982 = vmatprep.mubr.msk.bf16.mxu0 %vm1214_vm0, %v2415_v41 }
  0x8a   :  { %1593 = vmatmul.mubr.bf16.gmra.mxu1 %v2402_v28 }
  0x8b   :  { %1600 = vmatprep.mubr.bf16.mxu1 %v2406_v30 }
  0x8c   :  { %1674 = vmatmul.mubr.bf16.gmra.mxu0 %v2417_v47 }
  0x92   :  { %1601 = vmatmul.mubr.bf16.gmra.mxu1 %v2408_v36 }
  0x93   :  { %1608 = vmatprep.mubr.bf16.mxu1 %v2412_v40 }
  0x9a   :  { %1609 = vmatmul.mubr.bf16.gmra.mxu1 %v2414_v44 }
  0xe2   :  { %v1999_v54 = vpop.f32.mrf.mxu1 }
  0xe4   :  { %v2000_v55 = vpop.f32.mrf.mxu1  ;;  %v3010_v4 = vpop.f32.mrf.mxu0 }
  0xe5   :  { %v3002_v56 = vadd.f32 %v2000_v55, %v1999_v54 }
  0xe6   :  { %v2002_v57 = vpop.f32.mrf.mxu1  ;;  %v3014_v7 = vpop.f32.mrf.mxu0 }
  0xe8   :  { %v2003_v58 = vpop.f32.mrf.mxu1  ;;  %v3016_v9 = vpop.f32.mrf.mxu0 }
  0xe9   :  { %v3004_v59 = vadd.f32 %v2003_v58, %v2002_v57 }
  0xea   :  { %v2005_v60 = vpop.f32.mrf.mxu1  ;;  %v3020_v12 = vpop.f32.mrf.mxu0 }
  0xec   :  { %v2006_v61 = vpop.f32.mrf.mxu1  ;;  %v3022_v15 = vpop.f32.mrf.mxu0 }
  0xed   :  { %v3006_v62 = vadd.f32 %v2006_v61, %v2005_v60 }
  0xee   :  { %v2008_v63 = vpop.f32.mrf.mxu1  ;;  %v3026_v18 = vpop.f32.mrf.mxu0 }
  0xf0   :  { %v2009_v0 = vpop.f32.mrf.mxu1  ;;  %v3028_v20 = vpop.f32.mrf.mxu0 }
  0xf1   :  { %v3008_v2 = vadd.f32 %v2009_v0, %v2008_v63 }
  0xf2   :  { %v2011_v3 = vpop.f32.mrf.mxu1  ;;  %v3032_v22 = vpop.f32.mrf.mxu0 }
  0xf4   :  { %v2012_v5 = vpop.f32.mrf.mxu1  ;;  %v3034_v25 = vpop.f32.mrf.mxu0 }
  0xf5   :  { %v3012_v6 = vadd.f32 %v2012_v5, %v2011_v3 }
  0xf6   :  { %v2014_v8 = vpop.f32.mrf.mxu1  ;;  %v3036_v26 = vpop.f32.mrf.mxu0 }
  0xf8   :  { %v2015_v10 = vpop.f32.mrf.mxu1  ;;  %v3038_v28 = vpop.f32.mrf.mxu0 }
  0xf9   :  { %v3018_v11 = vadd.f32 %v2015_v10, %v2014_v8  ;;  %v3082_v10 = vpop.permute.xlu0 %1692 }
  0xfa   :  { %v2017_v13 = vpop.f32.mrf.mxu1  ;;  %v3040_v30 = vpop.f32.mrf.mxu0 }
  0xfc   :  { %v2018_v14 = vpop.f32.mrf.mxu1  ;;  %v3044_v33 = vpop.f32.mrf.mxu0 }
  0xfd   :  { %v3024_v16 = vadd.f32 %v2018_v14, %v2017_v13  ;;  %3224 = vst [vmem:[#allocation4_spill] sm:$0xff] %v3044_v33  ;;  %v3098_v33 = vpop.permute.xlu0 %1697 }
  0xfe   :  { %v2020_v17 = vpop.f32.mrf.mxu1  ;;  %v3046_v35 = vpop.f32.mrf.mxu0 }
  0xff   :  { %3222 = vst [vmem:[#allocation2_spill] sm:$0xff] %v3024_v16  ;;  %3225 = vst [vmem:[#allocation5_spill] sm:$0xff] %v3046_v35 }
 0x100   :  { %v2021_v19 = vpop.f32.mrf.mxu1  ;;  %v3052_v38 = vpop.f32.mrf.mxu0 }
 0x101   :  { %v3030_v21 = vadd.f32 %v2021_v19, %v2020_v17  ;;  %3226 = vst [vmem:[#allocation6_spill] sm:$0xff] %v3052_v38  ;;  %v3092_v38 = vpop.permute.xlu1 %1702 }
 0x102   :  { %v2039_v23 = vpop.f32.mrf.mxu1  ;;  %v3058_v41 = vpop.f32.mrf.mxu0  ;;  %3234 = vst [vmem:[#allocation14_spill] sm:$0xff] %v3092_v38 }
 0x103   :  { %3223 = vst [vmem:[#allocation3_spill] sm:$0xff] %v3030_v21  ;;  %3227 = vst [vmem:[#allocation7_spill] sm:$0xff] %v3058_v41 }
 0x104   :  { %v2040_v24 = vpop.f32.mrf.mxu1  ;;  %v2159_v44 = vpop.f32.mrf.mxu0 }
 0x105   :  { %v2041_v19 = vadd.f32 %v2040_v24, %v2039_v23  ;;  %v2081_v23 = vadd.f32 %v3014_v7, %v3010_v4  ;;  %v3111_v38 = vpop.permute.xlu1 %1707  ;;  %v2084_v4 = vadd.f32 %v3020_v12, %v3016_v9 }
 0x106   :  { %v2042_v1 = vpop.f32.mrf.mxu1  ;;  %v2160_v47 = vpop.f32.mrf.mxu0 }
 0x108   :  { %v2043_v27 = vpop.f32.mrf.mxu1  ;;  %v3068_v49 = vpop.f32.mrf.mxu0 }
 0x109   :  { %v2044_v16 = vadd.f32 %v2043_v27, %v2042_v1  ;;  %v3118_v1 = vpop.permute.xlu0 %1712 }
 0x10a   :  { %v2045_v29 = vpop.f32.mrf.mxu1  ;;  %v2163_v52 = vpop.f32.mrf.mxu0  ;;  %3240 = vst [vmem:[#allocation20_spill] sm:$0xff] %v3118_v1 }
 0x10c   :  { %v2046_v31 = vpop.f32.mrf.mxu1  ;;  %v3070_v55 = vpop.f32.mrf.mxu0 }
 0x10e   :  { %v3042_v32 = vpop.f32.mrf.mxu1  ;;  %v2166_v58 = vpop.f32.mrf.mxu0 }
 0x110   :  { %v2049_v34 = vpop.f32.mrf.mxu1  ;;  %v3072_v61 = vpop.f32.mrf.mxu0 }
 0x112   :  { %v3048_v36 = vpop.f32.mrf.mxu1  ;;  %v3074_v0 = vpop.f32.mrf.mxu0 }
 0x114   :  { %v3050_v37 = vpop.f32.mrf.mxu1  ;;  %v3078_v5 = vpop.f32.mrf.mxu0 }
 0x116   :  { %v3054_v39 = vpop.f32.mrf.mxu1  ;;  %v3084_v13 = vpop.f32.mrf.mxu0 }
 0x117   :  { %3230 = vst [vmem:[#allocation10_spill] sm:$0xff] %v3084_v13 }
 0x118   :  { %v3056_v40 = vpop.f32.mrf.mxu1  ;;  %v3088_v17 = vpop.f32.mrf.mxu0 }
 0x119   :  { %3232 = vst [vmem:[#allocation12_spill] sm:$0xff] %v3088_v17 }
 0x11a   :  { %v3060_v42 = vpop.f32.mrf.mxu1  ;;  %v3094_v21 = vpop.f32.mrf.mxu0 }
 0x11b   :  { %3235 = vst [vmem:[#allocation15_spill] sm:$0xff] %v3094_v21  ;;  %v2047_v21 = vadd.f32 %v2046_v31, %v2045_v29  ;;  %v2050_v31 = vadd.f32 %v2049_v34, %v3042_v32  ;;  %v2053_v34 = vadd.f32 %v3050_v37, %v3048_v36 }
 0x11c   :  { %v3062_v43 = vpop.f32.mrf.mxu1 }
 0x11d   :  { %v1335_v29 = vadd.f32 %v2047_v21, %v3006_v62  ;;  %v3131_v21 = vpop.permute.xlu0 %1722 }
 0x11e   :  { %v3064_v45 = vpop.f32.mrf.mxu1 }
 0x11f   :  { %3228 = vst [vmem:[#allocation8_spill] sm:$0xff] %v3064_v45  ;;  %v1327_v45 = vadd.f32 %v2041_v19, %v3002_v56  ;;  %v2161_v19 = vadd.f32 %v2160_v47, %v2159_v44  ;;  %v2164_v44 = vadd.f32 %v2163_v52, %v3068_v49  ;;  %v2167_v47 = vadd.f32 %v2166_v58, %v3070_v55 }
 0x120   :  { %v3066_v46 = vpop.f32.mrf.mxu1  ;;  %v1343_v52 = vadd.f32 %v2053_v34, %v3012_v6  ;;  %v2093_v55 = vadd.f32 %v3036_v26, %v3034_v25 }
 0x121   :  { %3229 = vst [vmem:[#allocation9_spill] sm:$0xff] %v3066_v46  ;;  %v3100_v46 = vpop.f32.mrf.mxu0 }
 0x122   :  { %v2119_v48 = vpop.f32.mrf.mxu1  ;;  %3237 = vst [vmem:[#allocation17_spill] sm:$0xff] %v3100_v46  ;;  %v1330_v46 = vadd.f32 %v2044_v16, %v3004_v59  ;;  %v2087_v16 = vadd.f32 %v3026_v18, %v3022_v15  ;;  %v1408_v26 = vadd.f32 %v2093_v55, %v1343_v52 }
 0x124   :  { %v2120_v50 = vpop.f32.mrf.mxu1  ;;  %v1400_v62 = vadd.f32 %v2087_v16, %v1335_v29  ;;  %v2170_v29 = vadd.f32 %v3074_v0, %v3072_v61 }
 0x125   :  { %v2121_v24 = vadd.f32 %v2120_v50, %v2119_v48 }
 0x126   :  { %v2122_v51 = vpop.f32.mrf.mxu1 }
 0x128   :  { %v2123_v53 = vpop.f32.mrf.mxu1 }
 0x129   :  { %v2124_v48 = vadd.f32 %v2123_v53, %v2122_v51 }
 0x12a   :  { %v2125_v54 = vpop.f32.mrf.mxu1 }
 0x12c   :  { %v2126_v57 = vpop.f32.mrf.mxu1 }
 0x12e   :  { %v2128_v60 = vpop.f32.mrf.mxu1 }
 0x130   :  { %v2129_v63 = vpop.f32.mrf.mxu1 }
 0x131   :  { %v2130_v51 = vadd.f32 %v2129_v63, %v2128_v60  ;;  %v1749_v63 = vpop.permute.xlu0 %1748 }
 0x132   :  { %v3076_v3 = vpop.f32.mrf.mxu1 }
 0x134   :  { %v3080_v8 = vpop.f32.mrf.mxu1 }
 0x136   :  { %v3086_v14 = vpop.f32.mrf.mxu1 }
 0x137   :  { %3231 = vst [vmem:[#allocation11_spill] sm:$0xff] %v3086_v14  ;;  %v3105_v14 = vpop.f32.mrf.mxu0 }
 0x138   :  { %v3090_v41 = vpop.f32.mrf.mxu1 }
 0x139   :  { %3233 = vst [vmem:[#allocation13_spill] sm:$0xff] %v3090_v41  ;;  %v1392_v41 = vadd.f32 %v2081_v23, %v1327_v45  ;;  %v2127_v45 = vadd.f32 %v2126_v57, %v2125_v54  ;;  %v3128_v23 = vpop.permute.xlu1 %1717 }
 0x13a   :  { %v3096_v35 = vpop.f32.mrf.mxu1 }
 0x13b   :  { %3236 = vst [vmem:[#allocation16_spill] sm:$0xff] %v3096_v35  ;;  %v3113_v35 = vpop.f32.mrf.mxu0  ;;  %v1457_v7 = vadd.f32 %v2121_v24, %v1392_v41  ;;  %v1338_v41 = vadd.f32 %v2050_v31, %v3008_v2 }
 0x13c   :  { %v3103_v13 = vpop.f32.mrf.mxu1  ;;  %3238 = vst [vmem:[#allocation18_spill] sm:$0xff] %v3113_v35  ;;  %v1395_v35 = vadd.f32 %v2084_v4, %v1330_v46  ;;  %v2090_v46 = vadd.f32 %v3032_v22, %v3028_v20 }
 0x13d   :  { %v3120_v27 = vpop.f32.mrf.mxu0  ;;  %v3141_v37 = vpop.permute.xlu1 %1727 }
 0x13e   :  { %v3109_v17 = vpop.f32.mrf.mxu1  ;;  %3241 = vst [vmem:[#allocation21_spill] sm:$0xff] %v3120_v27  ;;  %v1460_v1 = vadd.f32 %v2124_v48, %v1395_v35  ;;  %v1465_v35 = vadd.f32 %v2127_v45, %v1400_v62  ;;  %v1403_v36 = vadd.f32 %v2090_v46, %v1338_v41  ;;  %v3243_v45 = vld [vmem:[#allocation11_spill] sm:$0xff]  ;;  %v3248_v46 = vld [vmem:[#allocation14_spill] sm:$0xff] }
 0x13f   :  { %v1651_v59 = vpop.f32.mrf.mxu0 }
 0x140   :  { %v3116_v56 = vpop.f32.mrf.mxu1  ;;  %v1525_v54 = vadd.f32 %v2164_v44, %v1460_v1  ;;  %v1530_v58 = vadd.f32 %v2167_v47, %v1465_v35  ;;  %v1468_v60 = vadd.f32 %v2130_v51, %v1403_v36  ;;  %v3247_v44 = vld [vmem:[#allocation9_spill] sm:$0xff]  ;;  %v1759_v36 = vpop.permute.xlu0 %1758 }
 0x141   :  { %3239 = vst [vmem:[#allocation19_spill] sm:$0xff] %v3116_v56  ;;  %v1522_v56 = vadd.f32 %v2161_v19, %v1457_v7  ;;  %v1653_v12 = vpop.f32.mrf.mxu0 }
 0x142   :  { %v2199_v50 = vpop.f32.mrf.mxu1 }
 0x143   :  { %v1654_v18 = vpop.f32.mrf.mxu0 }
 0x144   :  { %v2200_v27 = vpop.f32.mrf.mxu1 }
 0x145   :  { %v2201_v9 = vadd.f32 %v2200_v27, %v2199_v50  ;;  %v1656_v24 = vpop.f32.mrf.mxu0  ;;  %v2056_v27 = vadd.f32 %v3056_v40, %v3054_v39  ;;  %v2133_v39 = vadd.f32 %v3080_v8, %v3076_v3  ;;  %v2096_v8 = vadd.f32 %v3040_v30, %v3038_v28  ;;  %v3245_v28 = vld [vmem:[#allocation2_spill] sm:$0xff] }
 0x146   :  { %v2202_v32 = vpop.f32.mrf.mxu1  ;;  %v3251_v24 = vld [vmem:[#allocation16_spill] sm:$0xff] }
 0x147   :  { %v1587_v15 = vadd.f32 %v2201_v9, %v1522_v56  ;;  %v1659_v56 = vpop.f32.mrf.mxu0  ;;  %v1346_v6 = vadd.f32 %v2056_v27, %v3018_v11  ;;  %v3242_v11 = vld [vmem:[#allocation10_spill] sm:$0xff]  ;;  %v1754_v9 = vpop.permute.xlu1 %1753  ;;  %v1473_v0 = vadd.f32 %v2133_v39, %v1408_v26  ;;  %v2139_v27 = vadd.f32 %v3103_v13, %v3251_v24 }
 0x148   :  { %v2203_v53 = vpop.f32.mrf.mxu1  ;;  %v2173_v16 = vadd.f32 %v3242_v11, %v3078_v5  ;;  %v3246_v5 = vld [vmem:[#allocation8_spill] sm:$0xff] }
 0x149   :  { %v1652_v2 = vadd.f32 %v1651_v59, %v1587_v15  ;;  %v2204_v57 = vadd.f32 %v2203_v53, %v2202_v32  ;;  %v1661_v48 = vpop.f32.mrf.mxu0  ;;  %v1533_v59 = vadd.f32 %v2170_v29, %v1468_v60  ;;  %v1411_v32 = vadd.f32 %v2096_v8, %v1346_v6  ;;  %v3249_v53 = vld [vmem:[#allocation4_spill] sm:$0xff]  ;;  %v3253_v60 = vld [vmem:[#allocation15_spill] sm:$0xff] }
 0x14a   :  { %v2205_v49 = vpop.f32.mrf.mxu1  ;;  %v2062_v15 = vadd.f32 %v3247_v44, %v3246_v5  ;;  %v1538_v52 = vadd.f32 %v2173_v16, %v1473_v0  ;;  %v3256_v29 = vld [vmem:[#allocation7_spill] sm:$0xff]  ;;  %v3259_v0 = vld [vmem:[#allocation20_spill] sm:$0xff] }
 0x14b   :  { %v1730_v20 = vmul.f32 %v3082_v10, %v1652_v2  ;;  %v1590_v22 = vadd.f32 %v2204_v57, %v1525_v54  ;;  %v2059_v10 = vadd.f32 %v3062_v43, %v3060_v42  ;;  %v1662_v3 = vpop.f32.mrf.mxu0  ;;  %v3244_v42 = vld [vmem:[#allocation13_spill] sm:$0xff] }
 0x14c   :  { %v2206_v1 = vpop.f32.mrf.mxu1  ;;  %v2136_v43 = vadd.f32 %v3244_v42, %v3243_v45  ;;  %v3250_v2 = vld [vmem:[#allocation5_spill] sm:$0xff] }
 0x14d   :  { %v1786_v40 = vadd.f32 %v1749_v63, %v1730_v20  ;;  %v1655_v4 = vadd.f32 %v1654_v18, %v1590_v22  ;;  %v2207_v7 = vadd.f32 %v2206_v1, %v2205_v49  ;;  %v1664_v62 = vpop.f32.mrf.mxu0  ;;  %v1351_v30 = vadd.f32 %v2059_v10, %v3245_v28  ;;  %v3255_v10 = vld [vmem:[#allocation6_spill] sm:$0xff] }
 0x14e   :  { %v2208_v25 = vpop.f32.mrf.mxu1  ;;  %v2099_v54 = vadd.f32 %v3250_v2, %v3249_v53  ;;  %v1476_v57 = vadd.f32 %v2136_v43, %v1411_v32  ;;  %v1769_v62 = vpop.permute.xlu0 %1768 }
 0x14f   :  { %v1794_v31 = vmax.f32 %v1786_v40, 0.0  ;;  %v1731_v50 = vmul.f32 %v3098_v33, %v1655_v4  ;;  %v1595_v19 = vadd.f32 %v2207_v7, %v1530_v58  ;;  %v1667_v51 = vpop.f32.mrf.mxu0  ;;  %v3252_v58 = vld [vmem:[#allocation12_spill] sm:$0xff]  ;;  %v3254_v40 = vld [vmem:[#allocation3_spill] sm:$0xff] }
 0x150   :  { %v2209_v61 = vpop.f32.mrf.mxu1  ;;  %v2176_v63 = vadd.f32 %v3253_v60, %v3252_v58  ;;  %v1416_v1 = vadd.f32 %v2099_v54, %v1351_v30  ;;  %v1354_v4 = vadd.f32 %v2062_v15, %v3254_v40  ;;  %v3260_v15 = vld [vmem:[#allocation18_spill] sm:$0xff] }
 0x151   :  { %1803 = vst.msk [vmem:[%s3221_s4] sm:$0xff] %vm1802_vm1, %v1794_v31  ;;  %v1787_v33 = vadd.f32 %v1754_v9, %v1731_v50  ;;  %v1660_v12 = vadd.f32 %v1659_v56, %v1595_v19  ;;  %v2210_v41 = vadd.f32 %v2209_v61, %v2208_v25  ;;  %v1669_v55 = vpop.f32.mrf.mxu0  ;;  %v2102_v25 = vadd.f32 %v3256_v29, %v3255_v10  ;;  %v3257_v50 = vld [vmem:[#allocation17_spill] sm:$0xff] }
 0x152   :  { %v2211_v34 = vpop.f32.mrf.mxu1  ;;  %v1541_v26 = vadd.f32 %v2176_v63, %v1476_v57  ;;  %v1481_v31 = vadd.f32 %v2139_v27, %v1416_v1  ;;  %v2179_v19 = vadd.f32 %v3105_v14, %v3257_v50 }
 0x153   :  { %v1795_v18 = vmax.f32 %v1787_v33, 0.0  ;;  %v1732_v35 = vmul.f32 %v3248_v46, %v1660_v12  ;;  %v1598_v47 = vadd.f32 %v2210_v41, %v1533_v59  ;;  %v1670_v6 = vpop.f32.mrf.mxu0  ;;  %v3258_v59 = vld [vmem:[#allocation19_spill] sm:$0xff]  ;;  %v1419_v9 = vadd.f32 %v2102_v25, %v1354_v4 }
 0x154   :  { %v2212_v49 = vpop.f32.mrf.mxu1  ;;  %v2142_v11 = vadd.f32 %v3258_v59, %v3109_v17  ;;  %v1546_v41 = vadd.f32 %v2179_v19, %v1481_v31 }
 0x155   :  { %1804 = vst.msk [vmem:[%s3221_s4 + $0x8] sm:$0xff] %vm1802_vm1, %v1795_v18  ;;  %v1788_v20 = vadd.f32 %v1759_v36, %v1732_v35  ;;  %v1663_v22 = vadd.f32 %v1662_v3, %v1598_v47  ;;  %v2213_v56 = vadd.f32 %v2212_v49, %v2211_v34  ;;  %v1764_v3 = vpop.permute.xlu1 %1763  ;;  %v1672_v42 = vpop.f32.mrf.mxu0  ;;  %v3261_v18 = vld [vmem:[#allocation21_spill] sm:$0xff] }
 0x156   :  { %v2214_v39 = vpop.f32.mrf.mxu1  ;;  %v1484_v17 = vadd.f32 %v2142_v11, %v1419_v9  ;;  %v2182_v46 = vadd.f32 %v3261_v18, %v3260_v15 }
 0x157   :  { %v1796_v13 = vmax.f32 %v1788_v20, 0.0  ;;  %v1733_v7 = vmul.f32 %v3111_v38, %v1663_v22  ;;  %v1603_v48 = vadd.f32 %v2213_v56, %v1538_v52  ;;  %v1675_v12 = vpop.f32.mrf.mxu0  ;;  %v1779_v56 = vpop.permute.xlu0 %1778 }
 0x158   :  { %v2215_v8 = vpop.f32.mrf.mxu1  ;;  %v1549_v57 = vadd.f32 %v2182_v46, %v1484_v17 }
 0x159   :  { %1805 = vst.msk [vmem:[%s3221_s4 + $0x10] sm:$0xff] %vm1802_vm1, %v1796_v13  ;;  %v1789_v38 = vadd.f32 %v1764_v3, %v1733_v7  ;;  %v1668_v16 = vadd.f32 %v1667_v51, %v1603_v48  ;;  %v2216_v45 = vadd.f32 %v2215_v8, %v2214_v39  ;;  %v1677_v5 = vpop.f32.mrf.mxu0  ;;  %v1774_v2 = vpop.permute.xlu1 %1773 }
 0x15a   :  { %v2217_v43 = vpop.f32.mrf.mxu1 }
 0x15b   :  { %v1797_v61 = vmax.f32 %v1789_v38, 0.0  ;;  %v1734_v33 = vmul.f32 %v3259_v0, %v1668_v16  ;;  %v1606_v14 = vadd.f32 %v2216_v45, %v1541_v26  ;;  %v1678_v53 = vpop.f32.mrf.mxu0 }
 0x15c   :  { %v2218_v28 = vpop.f32.mrf.mxu1 }
 0x15d   :  { %1806 = vst.msk [vmem:[%s3221_s4 + $0x18] sm:$0xff] %vm1802_vm1, %v1797_v61  ;;  %v1790_v30 = vadd.f32 %v1769_v62, %v1734_v33  ;;  %v1671_v32 = vadd.f32 %v1670_v6, %v1606_v14  ;;  %v2219_v34 = vadd.f32 %v2218_v28, %v2217_v43  ;;  %v1680_v49 = vpop.f32.mrf.mxu0  ;;  %v1784_v63 = vpop.permute.xlu1 %1783 }
 0x15e   :  { %v2220_v44 = vpop.f32.mrf.mxu1 }
 0x15f   :  { %v1798_v35 = vmax.f32 %v1790_v30, 0.0  ;;  %v1735_v47 = vmul.f32 %v3128_v23, %v1671_v32  ;;  %v1611_v51 = vadd.f32 %v2219_v34, %v1546_v41 }
 0x160   :  { %v2221_v54 = vpop.f32.mrf.mxu1 }
 0x161   :  { %1807 = vst.msk [vmem:[%s3221_s4 + $0x20] sm:$0xff] %vm1802_vm1, %v1798_v35  ;;  %v1791_v24 = vadd.f32 %v1774_v2, %v1735_v47  ;;  %v1676_v27 = vadd.f32 %v1675_v12, %v1611_v51  ;;  %v2222_v36 = vadd.f32 %v2221_v54, %v2220_v44 }
 0x163   :  { %v1799_v52 = vmax.f32 %v1791_v24, 0.0  ;;  %v1736_v20 = vmul.f32 %v3131_v21, %v1676_v27  ;;  %v1614_v22 = vadd.f32 %v2222_v36, %v1549_v57 }
 0x165   :  { %1808 = vst.msk [vmem:[%s3221_s4 + $0x28] sm:$0xff] %vm1802_vm1, %v1799_v52  ;;  %v1792_v23 = vadd.f32 %v1779_v56, %v1736_v20  ;;  %v1679_v55 = vadd.f32 %v1678_v53, %v1614_v22 }
 0x167   :  { %v1800_v58 = vmax.f32 %v1792_v23, 0.0  ;;  %v1737_v60 = vmul.f32 %v3141_v37, %v1679_v55 }
 0x169   :  { %1809 = vst.msk [vmem:[%s3221_s4 + $0x30] sm:$0xff] %vm1802_vm1, %v1800_v58  ;;  %v1793_v1 = vadd.f32 %v1784_v63, %v1737_v60 }
 0x16b   :  { %v1801_v21 = vmax.f32 %v1793_v1, 0.0 }
 0x16d   :  { %1810 = vst.msk [vmem:[%s3221_s4 + $0x38] sm:$0xff] %vm1802_vm1, %v1801_v21 }

// kernel: depth_net.45
= control target key start
LH: loop header
LB: loop body
LE: loop exit
PB: predicated region body
PF: predicated region fallthrough
CT: control target
= control target key end

     0   :  { %v377_v1 = vmov 0   ;;  %vm279_vm0 = vcmask 64512   ;;  %s499_s1 = inlined_call_operand.vmem [shape: bf16[256,8], index: 1, kind: input, shape index: {}]   ;;  %s500_s0 = inlined_call_operand.vmem [shape: bf16[32,256], index: 0, kind: input, shape index: {}]   ;;  %s501_s2 = inlined_call_operand.vmem [shape: f32[32,1], index: 2, kind: input, shape index: {}]   ;;  %s502_s3 = inlined_call_operand.vmem [shape: f32[32,1], index: 3, kind: input, shape index: {}]   ;;  %s503_s4 = inlined_call_operand.vmem [shape: f32[32,8], index: 4, kind: output, shape index: {}]  }
   0x1   :  { %v355_v0 = vld [vmem:[%s499_s1 + $0x78] sm:$0xff]   ;;  %354 = vset.pattern.permute.xlu1 %v377_v1  ;;  %353 = vset.pattern.permute.xlu0 %v377_v1  ;;  %v357_v3 = vld [vmem:[%s499_s1 + $0x70] sm:$0xff]   ;;  %v359_v5 = vld [vmem:[%s499_s1 + $0x68] sm:$0xff]  }
   0x2   :  { %v356_v2 = vld [vmem:[%s499_s1 + $0x38] sm:$0xff]   ;;  %308 = vmatprep.subr.bf16.mxu0 %v355_v0  ;;  %336 = vmatprep.subr.bf16.mxu1 %v355_v0  ;;  %v358_v4 = vld [vmem:[%s499_s1 + $0x30] sm:$0xff]   ;;  %v360_v6 = vld [vmem:[%s499_s1 + $0x28] sm:$0xff]  }
   0x3   :  { %309 = vmatpush3.bf16.msra.mxu0 %v356_v2  ;;  %344 = vmatpush3.bf16.msra.mxu1 %v356_v2  ;;  %v361_v7 = vld [vmem:[%s499_s1 + $0x60] sm:$0xff]   ;;  %v363_v9 = vld [vmem:[%s499_s1 + $0x58] sm:$0xff]   ;;  %v365_v11 = vld [vmem:[%s499_s1 + $0x50] sm:$0xff]  }
   0x4   :  { %310 = vmatprep.subr.bf16.mxu0 %v357_v3  ;;  %337 = vmatprep.subr.bf16.mxu1 %v357_v3  ;;  %v362_v8 = vld [vmem:[%s499_s1 + $0x20] sm:$0xff]   ;;  %v364_v10 = vld [vmem:[%s499_s1 + $0x18] sm:$0xff]   ;;  %v366_v14 = vld [vmem:[%s499_s1 + $0x10] sm:$0xff]  }
   0x5   :  { %v373_v12 = vld [vmem:[%s500_s0 + $0x4] ss:$8 sps:$4 sm:$0xff]   ;;  %v376_v13 = vld [vmem:[%s500_s0 + $0x14] ss:$8 sps:$4 sm:$0xff]   ;;  %v371_v25 = vld [vmem:[%s500_s0] ss:$8 sps:$4 sm:$0xff]  }
   0x6   :  { %v221_v15 = vld [vmem:[%s501_s2 + $0x10] sm:$0xff]  ;;  %v219_v16 = vld [vmem:[%s501_s2] sm:$0xff]  ;;  %v367_v17 = vld [vmem:[%s499_s1 + $0x48] sm:$0xff]   ;;  %202 = vmatprep.mubr.bf16.mxu0 %v373_v12  ;;  %210 = vmatprep.mubr.bf16.mxu1 %v376_v13 }
   0x7   :  { %311 = vmatpush3.bf16.msra.mxu0 %v358_v4  ;;  %345 = vmatpush3.bf16.msra.mxu1 %v358_v4  ;;  %v368_v18 = vld [vmem:[%s499_s1 + $0x8] sm:$0xff]   ;;  %v222_v19 = vld [vmem:[%s501_s2 + $0x18] sm:$0xff]  ;;  %v369_v21 = vld [vmem:[%s499_s1 + $0x40] sm:$0xff]  }
   0x8   :  { %312 = vmatprep.subr.bf16.mxu0 %v359_v5  ;;  %338 = vmatprep.subr.bf16.mxu1 %v359_v5  ;;  %v220_v20 = vld [vmem:[%s501_s2 + $0x8] sm:$0xff]  ;;  %v370_v22 = vld [vmem:[%s499_s1] sm:$0xff]   ;;  %v374_v26 = vld [vmem:[%s500_s0 + $0x10] ss:$8 sps:$4 sm:$0xff]  }
   0x9   :  { %235 = vperm.xlu1 %354, %v221_v15   ;;  %225 = vperm.xlu0 %353, %v219_v16   ;;  %v248_v23 = vld [vmem:[%s502_s3 + $0x8] sm:$0xff]  ;;  %v247_v24 = vld [vmem:[%s502_s3] sm:$0xff]  ;;  %v250_v27 = vld [vmem:[%s502_s3 + $0x18] sm:$0xff] }
   0xa   :  { %v249_v28 = vld [vmem:[%s502_s3 + $0x10] sm:$0xff] }
   0xb   :  { %313 = vmatpush3.bf16.msra.mxu0 %v360_v6  ;;  %346 = vmatpush3.bf16.msra.mxu1 %v360_v6 }
   0xc   :  { %314 = vmatprep.subr.bf16.mxu0 %v361_v7  ;;  %339 = vmatprep.subr.bf16.mxu1 %v361_v7 }
   0xd   :  { %240 = vperm.xlu1 %354, %v222_v19   ;;  %230 = vperm.xlu0 %353, %v220_v20  }
   0xf   :  { %315 = vmatpush3.bf16.msra.mxu0 %v362_v8  ;;  %347 = vmatpush3.bf16.msra.mxu1 %v362_v8 }
  0x10   :  { %316 = vmatprep.subr.bf16.mxu0 %v363_v9  ;;  %340 = vmatprep.subr.bf16.mxu1 %v363_v9 }
  0x11   :  { %258 = vperm.xlu1 %354, %v248_v23   ;;  %253 = vperm.xlu0 %353, %v247_v24  }
  0x13   :  { %317 = vmatpush3.bf16.msra.mxu0 %v364_v10  ;;  %348 = vmatpush3.bf16.msra.mxu1 %v364_v10 }
  0x14   :  { %318 = vmatprep.subr.bf16.mxu0 %v365_v11  ;;  %341 = vmatprep.subr.bf16.mxu1 %v365_v11 }
  0x15   :  { %268 = vperm.xlu1 %354, %v250_v27   ;;  %263 = vperm.xlu0 %353, %v249_v28  }
  0x17   :  { %319 = vmatpush3.bf16.msra.mxu0 %v366_v14  ;;  %349 = vmatpush3.bf16.msra.mxu1 %v366_v14 }
  0x18   :  { %320 = vmatprep.subr.bf16.mxu0 %v367_v17  ;;  %342 = vmatprep.subr.bf16.mxu1 %v367_v17 }
  0x1b   :  { %321 = vmatpush3.bf16.msra.mxu0 %v368_v18  ;;  %350 = vmatpush3.bf16.msra.mxu1 %v368_v18 }
  0x1c   :  { %322 = vmatprep.subr.bf16.mxu0 %v369_v21  ;;  %343 = vmatprep.subr.bf16.mxu1 %v369_v21 }
  0x1f   :  { %323 = vmatpush3.bf16.msra.mxu0 %v370_v22  ;;  %351 = vmatpush3.bf16.msra.mxu1 %v370_v22 }
  0x22   :  { %203 = vmatmul.mubr.bf16.vlgmr.msra.gmra.mxu0 %v371_v25  ;;  %211 = vmatmul.mubr.bf16.vlgmr.msra.gmra.mxu1 %v374_v26 }
  0x84   :  { %v226_v29 = vpop.permute.xlu0 %225  ;;  %v236_v30 = vpop.permute.xlu1 %235 }
  0x88   :  { %v231_v31 = vpop.permute.xlu0 %230  ;;  %v241_v32 = vpop.permute.xlu1 %240 }
  0x8c   :  { %v254_v33 = vpop.permute.xlu0 %253  ;;  %v259_v38 = vpop.permute.xlu1 %258 }
  0x90   :  { %v264_v43 = vpop.permute.xlu0 %263  ;;  %v269_v56 = vpop.permute.xlu1 %268 }
  0xe2   :  { %v324_v34 = vpop.f32.mrf.mxu0  ;;  %v330_v35 = vpop.f32.mrf.mxu1 }
  0xe4   :  { %v325_v36 = vpop.f32.mrf.mxu0  ;;  %v331_v37 = vpop.f32.mrf.mxu1 }
  0xe5   :  { %v326_v39 = vadd.f32 %v325_v36, %v324_v34  ;;  %v332_v40 = vadd.f32 %v331_v37, %v330_v35 }
  0xe6   :  { %v327_v41 = vpop.f32.mrf.mxu0  ;;  %v333_v42 = vpop.f32.mrf.mxu1 }
  0xe7   :  { %v243_v44 = vmul.f32 %v326_v39, %v226_v29  ;;  %v245_v45 = vmul.f32 %v332_v40, %v236_v30 }
  0xe8   :  { %v328_v46 = vpop.f32.mrf.mxu0  ;;  %v334_v47 = vpop.f32.mrf.mxu1 }
  0xe9   :  { %v271_v48 = vadd.f32 %v254_v33, %v243_v44  ;;  %v273_v49 = vadd.f32 %v264_v43, %v245_v45  ;;  %v329_v50 = vadd.f32 %v328_v46, %v327_v41  ;;  %v335_v51 = vadd.f32 %v334_v47, %v333_v42 }
  0xeb   :  { %v275_v52 = vmax.f32 %v271_v48, 0.0  ;;  %v277_v53 = vmax.f32 %v273_v49, 0.0  ;;  %v244_v54 = vmul.f32 %v329_v50, %v231_v31  ;;  %v246_v55 = vmul.f32 %v335_v51, %v241_v32 }
  0xed   :  { %280 = vst.msk [vmem:[%s503_s4] sm:$0xff] %vm279_vm0, %v275_v52  ;;  %282 = vst.msk [vmem:[%s503_s4 + $0x10] sm:$0xff] %vm279_vm0, %v277_v53  ;;  %v272_v57 = vadd.f32 %v259_v38, %v244_v54  ;;  %v274_v58 = vadd.f32 %v269_v56, %v246_v55 }
  0xef   :  { %v276_v59 = vmax.f32 %v272_v57, 0.0  ;;  %v278_v60 = vmax.f32 %v274_v58, 0.0 }
  0xf1   :  { %281 = vst.msk [vmem:[%s503_s4 + $0x8] sm:$0xff] %vm279_vm0, %v276_v59  ;;  %283 = vst.msk [vmem:[%s503_s4 + $0x18] sm:$0xff] %vm279_vm0, %v278_v60 }

// kernel: depth_net.44
= control target key start
LH: loop header
LB: loop body
LE: loop exit
PB: predicated region body
PF: predicated region fallthrough
CT: control target
= control target key end

     0   :  { %v269_v1 = vmov 0   ;;  %vm207_vm0 = vcmask 64512   ;;  %s365_s1 = inlined_call_operand.vmem [shape: bf16[128,8], index: 1, kind: input, shape index: {}]   ;;  %s366_s0 = inlined_call_operand.vmem [shape: bf16[32,128], index: 0, kind: input, shape index: {}]   ;;  %s367_s2 = inlined_call_operand.vmem [shape: f32[32,1], index: 2, kind: input, shape index: {}]   ;;  %s368_s3 = inlined_call_operand.vmem [shape: f32[32,1], index: 3, kind: input, shape index: {}]   ;;  %s369_s4 = inlined_call_operand.vmem [shape: f32[32,8], index: 4, kind: output, shape index: {}]  }
   0x1   :  { %v259_v0 = vld [vmem:[%s365_s1 + $0x38] sm:$0xff]   ;;  %258 = vset.pattern.permute.xlu1 %v269_v1  ;;  %257 = vset.pattern.permute.xlu0 %v269_v1  ;;  %v260_v2 = vld [vmem:[%s365_s1 + $0x30] sm:$0xff]   ;;  %v261_v3 = vld [vmem:[%s365_s1 + $0x28] sm:$0xff]  }
   0x2   :  { %236 = vmatprep.subr.bf16.mxu0 %v259_v0  ;;  %v262_v4 = vld [vmem:[%s365_s1 + $0x20] sm:$0xff]   ;;  %v149_v6 = vld [vmem:[%s367_s2 + $0x10] sm:$0xff]  ;;  %v263_v8 = vld [vmem:[%s365_s1 + $0x18] sm:$0xff]  }
   0x3   :  { %237 = vmatpush3.bf16.msra.mxu0 %v259_v0  ;;  %v267_v5 = vld [vmem:[%s366_s0] sm:$0xff]   ;;  %163 = vperm.xlu1 %258, %v149_v6   ;;  %v150_v9 = vld [vmem:[%s367_s2 + $0x18] sm:$0xff]  ;;  %v148_v10 = vld [vmem:[%s367_s2 + $0x8] sm:$0xff] }
   0x4   :  { %238 = vmatprep.subr.bf16.mxu0 %v260_v2  ;;  %252 = vmatprep.mubr.bf16.mxu0 %v267_v5  ;;  %v147_v7 = vld [vmem:[%s367_s2] sm:$0xff]  ;;  %v264_v11 = vld [vmem:[%s365_s1 + $0x10] sm:$0xff]   ;;  %v176_v12 = vld [vmem:[%s368_s3 + $0x8] sm:$0xff] }
   0x5   :  { %153 = vperm.xlu0 %257, %v147_v7   ;;  %v175_v13 = vld [vmem:[%s368_s3] sm:$0xff]  ;;  %v265_v14 = vld [vmem:[%s365_s1 + $0x8] sm:$0xff]   ;;  %v178_v15 = vld [vmem:[%s368_s3 + $0x18] sm:$0xff] }
   0x6   :  { %v177_v16 = vld [vmem:[%s368_s3 + $0x10] sm:$0xff]  ;;  %v266_v17 = vld [vmem:[%s365_s1] sm:$0xff]   ;;  %v268_v18 = vld [vmem:[%s366_s0 + $0x8] sm:$0xff]  }
   0x7   :  { %239 = vmatpush3.bf16.msra.mxu0 %v260_v2  ;;  %168 = vperm.xlu1 %258, %v150_v9  }
   0x8   :  { %240 = vmatprep.subr.bf16.mxu0 %v261_v3 }
   0x9   :  { %158 = vperm.xlu0 %257, %v148_v10  }
   0xb   :  { %241 = vmatpush3.bf16.msra.mxu0 %v261_v3  ;;  %186 = vperm.xlu1 %258, %v176_v12  }
   0xc   :  { %242 = vmatprep.subr.bf16.mxu0 %v262_v4 }
   0xd   :  { %181 = vperm.xlu0 %257, %v175_v13  }
   0xf   :  { %243 = vmatpush3.bf16.msra.mxu0 %v262_v4  ;;  %196 = vperm.xlu1 %258, %v178_v15  }
  0x10   :  { %244 = vmatprep.subr.bf16.mxu0 %v263_v8 }
  0x11   :  { %191 = vperm.xlu0 %257, %v177_v16  }
  0x13   :  { %245 = vmatpush3.bf16.msra.mxu0 %v263_v8 }
  0x14   :  { %246 = vmatprep.subr.bf16.mxu0 %v264_v11 }
  0x17   :  { %247 = vmatpush3.bf16.msra.mxu0 %v264_v11 }
  0x18   :  { %248 = vmatprep.subr.bf16.mxu0 %v265_v14 }
  0x1b   :  { %249 = vmatpush3.bf16.msra.mxu0 %v265_v14 }
  0x1c   :  { %250 = vmatprep.subr.bf16.mxu0 %v266_v17 }
  0x1f   :  { %251 = vmatpush3.bf16.msra.mxu0 %v266_v17 }
  0x22   :  { %253 = vmatmul.mubr.bf16.vlgmr.msra.gmra.mxu0 %v268_v18 }
  0x7e   :  { %v164_v20 = vpop.permute.xlu1 %163 }
  0x80   :  { %v154_v19 = vpop.permute.xlu0 %153 }
  0x82   :  { %v169_v22 = vpop.permute.xlu1 %168 }
  0x84   :  { %v159_v21 = vpop.permute.xlu0 %158 }
  0x86   :  { %v187_v24 = vpop.permute.xlu1 %186 }
  0x88   :  { %v182_v23 = vpop.permute.xlu0 %181 }
  0x8a   :  { %v197_v35 = vpop.permute.xlu1 %196 }
  0x8c   :  { %v192_v27 = vpop.permute.xlu0 %191 }
  0xe2   :  { %v254_v25 = vpop.f32.mrf.mxu0 }
  0xe3   :  { %v173_v26 = vmul.f32 %v254_v25, %v164_v20 }
  0xe4   :  { %v132_v28 = vpop.f32.mrf.mxu0 }
  0xe5   :  { %v201_v29 = vadd.f32 %v192_v27, %v173_v26  ;;  %v171_v30 = vmul.f32 %v154_v19, %v132_v28 }
  0xe6   :  { %v255_v31 = vpop.f32.mrf.mxu0 }
  0xe7   :  { %v205_v32 = vmax.f32 %v201_v29, 0.0  ;;  %v199_v33 = vadd.f32 %v182_v23, %v171_v30  ;;  %v174_v34 = vmul.f32 %v255_v31, %v169_v22 }
  0xe8   :  { %v135_v36 = vpop.f32.mrf.mxu0 }
  0xe9   :  { %210 = vst.msk [vmem:[%s369_s4 + $0x10] sm:$0xff] %vm207_vm0, %v205_v32  ;;  %v203_v37 = vmax.f32 %v199_v33, 0.0  ;;  %v202_v38 = vadd.f32 %v197_v35, %v174_v34  ;;  %v172_v39 = vmul.f32 %v159_v21, %v135_v36 }
  0xeb   :  { %208 = vst.msk [vmem:[%s369_s4] sm:$0xff] %vm207_vm0, %v203_v37  ;;  %v206_v40 = vmax.f32 %v202_v38, 0.0  ;;  %v200_v41 = vadd.f32 %v187_v24, %v172_v39 }
  0xed   :  { %211 = vst.msk [vmem:[%s369_s4 + $0x18] sm:$0xff] %vm207_vm0, %v206_v40  ;;  %v204_v42 = vmax.f32 %v200_v41, 0.0 }
  0xef   :  { %209 = vst.msk [vmem:[%s369_s4 + $0x8] sm:$0xff] %vm207_vm0, %v204_v42 }

// kernel: depth_net.42
= control target key start
LH: loop header
LB: loop body
LE: loop exit
PB: predicated region body
PF: predicated region fallthrough
CT: control target
= control target key end

     0   :  { %v224_v1 = vmov 0   ;;  %vm64_vm0 = vcmask 523264   ;;  %vm180_vm1 = vcmask 64512   ;;  %s310_s1 = inlined_call_operand.vmem [shape: bf16[64,8], index: 1, kind: input, shape index: {}]   ;;  %s311_s0 = inlined_call_operand.vmem [shape: bf16[32,64], index: 0, kind: input, shape index: {}]   ;;  %s312_s2 = inlined_call_operand.vmem [shape: f32[32,1], index: 2, kind: input, shape index: {}]   ;;  %s313_s3 = inlined_call_operand.vmem [shape: f32[32,1], index: 3, kind: input, shape index: {}]   ;;  %s314_s4 = inlined_call_operand.vmem [shape: f32[32,8], index: 4, kind: output, shape index: {}]  }
   0x1   :  { %v218_v0 = vld [vmem:[%s310_s1 + $0x18] sm:$0xff]   ;;  %217 = vset.pattern.permute.xlu1 %v224_v1  ;;  %216 = vset.pattern.permute.xlu0 %v224_v1  ;;  %v219_v2 = vld [vmem:[%s310_s1 + $0x10] sm:$0xff]   ;;  %v220_v3 = vld [vmem:[%s310_s1 + $0x8] sm:$0xff]  }
   0x2   :  { %203 = vmatprep.subr.bf16.mxu0 %v218_v0  ;;  %v222_v4 = vld [vmem:[%s311_s0] sm:$0xff]   ;;  %v122_v5 = vld [vmem:[%s312_s2 + $0x10] sm:$0xff]  ;;  %v123_v8 = vld [vmem:[%s312_s2 + $0x18] sm:$0xff] }
   0x3   :  { %204 = vmatpush3.bf16.msra.mxu0 %v218_v0  ;;  %211 = vmatprep.mubr.msk.bf16.mxu0 %vm64_vm0, %v222_v4  ;;  %v120_v6 = vld [vmem:[%s312_s2] sm:$0xff]  ;;  %v121_v9 = vld [vmem:[%s312_s2 + $0x8] sm:$0xff]  ;;  %v151_v13 = vld [vmem:[%s313_s3 + $0x18] sm:$0xff] }
   0x4   :  { %205 = vmatprep.subr.bf16.mxu0 %v219_v2  ;;  %136 = vperm.xlu1 %217, %v122_v5   ;;  %v221_v7 = vld [vmem:[%s310_s1] sm:$0xff]   ;;  %v149_v10 = vld [vmem:[%s313_s3 + $0x8] sm:$0xff]  ;;  %v150_v14 = vld [vmem:[%s313_s3 + $0x10] sm:$0xff] }
   0x5   :  { %126 = vperm.xlu0 %216, %v120_v6   ;;  %v148_v11 = vld [vmem:[%s313_s3] sm:$0xff]  ;;  %v223_v12 = vld [vmem:[%s311_s0 + $0x8] sm:$0xff]  }
   0x7   :  { %206 = vmatpush3.bf16.msra.mxu0 %v219_v2 }
   0x8   :  { %207 = vmatprep.subr.bf16.mxu0 %v220_v3  ;;  %141 = vperm.xlu1 %217, %v123_v8  }
   0x9   :  { %131 = vperm.xlu0 %216, %v121_v9  }
   0xb   :  { %208 = vmatpush3.bf16.msra.mxu0 %v220_v3 }
   0xc   :  { %209 = vmatprep.subr.bf16.mxu0 %v221_v7  ;;  %159 = vperm.xlu1 %217, %v149_v10  }
   0xd   :  { %154 = vperm.xlu0 %216, %v148_v11  }
   0xf   :  { %210 = vmatpush3.bf16.msra.mxu0 %v221_v7 }
  0x10   :  { %169 = vperm.xlu1 %217, %v151_v13  }
  0x11   :  { %164 = vperm.xlu0 %216, %v150_v14  }
  0x12   :  { %212 = vmatmul.mubr.msk.bf16.vlgmr.msra.gmra.mxu0 %vm64_vm0, %v223_v12 }
  0x7f   :  { %v137_v16 = vpop.permute.xlu1 %136 }
  0x80   :  { %v127_v15 = vpop.permute.xlu0 %126 }
  0x83   :  { %v142_v18 = vpop.permute.xlu1 %141 }
  0x84   :  { %v132_v17 = vpop.permute.xlu0 %131 }
  0x87   :  { %v160_v20 = vpop.permute.xlu1 %159 }
  0x88   :  { %v155_v19 = vpop.permute.xlu0 %154 }
  0x8b   :  { %v170_v31 = vpop.permute.xlu1 %169 }
  0x8c   :  { %v165_v23 = vpop.permute.xlu0 %164 }
  0xd2   :  { %v213_v21 = vpop.f32.mrf.mxu0 }
  0xd3   :  { %v146_v22 = vmul.f32 %v213_v21, %v137_v16 }
  0xd4   :  { %v105_v24 = vpop.f32.mrf.mxu0 }
  0xd5   :  { %v174_v25 = vadd.f32 %v165_v23, %v146_v22  ;;  %v144_v26 = vmul.f32 %v127_v15, %v105_v24 }
  0xd6   :  { %v214_v27 = vpop.f32.mrf.mxu0 }
  0xd7   :  { %v178_v28 = vmax.f32 %v174_v25, 0.0  ;;  %v172_v29 = vadd.f32 %v155_v19, %v144_v26  ;;  %v147_v30 = vmul.f32 %v214_v27, %v142_v18 }
  0xd8   :  { %v108_v32 = vpop.f32.mrf.mxu0 }
  0xd9   :  { %183 = vst.msk [vmem:[%s314_s4 + $0x10] sm:$0xff] %vm180_vm1, %v178_v28  ;;  %v176_v33 = vmax.f32 %v172_v29, 0.0  ;;  %v175_v34 = vadd.f32 %v170_v31, %v147_v30  ;;  %v145_v35 = vmul.f32 %v132_v17, %v108_v32 }
  0xdb   :  { %181 = vst.msk [vmem:[%s314_s4] sm:$0xff] %vm180_vm1, %v176_v33  ;;  %v179_v36 = vmax.f32 %v175_v34, 0.0  ;;  %v173_v37 = vadd.f32 %v160_v20, %v145_v35 }
  0xdd   :  { %184 = vst.msk [vmem:[%s314_s4 + $0x18] sm:$0xff] %vm180_vm1, %v179_v36  ;;  %v177_v38 = vmax.f32 %v173_v37, 0.0 }
  0xdf   :  { %182 = vst.msk [vmem:[%s314_s4 + $0x8] sm:$0xff] %vm180_vm1, %v177_v38 }

// kernel: depth_net.57
= control target key start
LH: loop header
LB: loop body
LE: loop exit
PB: predicated region body
PF: predicated region fallthrough
CT: control target
= control target key end

     0   :  { %v298_v1 = vmov 0   ;;  %vm229_vm0 = vcmask 523264   ;;  %s396_s1 = inlined_call_operand.vmem [shape: bf16[256,64], index: 1, kind: input, shape index: {}]   ;;  %s397_s0 = inlined_call_operand.vmem [shape: bf16[16,256], index: 0, kind: input, shape index: {}]   ;;  %s398_s2 = inlined_call_operand.vmem [shape: f32[16,1], index: 2, kind: input, shape index: {}]   ;;  %s399_s3 = inlined_call_operand.vmem [shape: f32[16,1], index: 3, kind: input, shape index: {}]   ;;  %s400_s4 = inlined_call_operand.vmem [shape: f32[16,64], index: 4, kind: output, shape index: {}]  }
   0x1   :  { %v279_v0 = vld [vmem:[%s396_s1 + $0x78] sm:$0xff]   ;;  %277 = vset.pattern.permute.xlu0 %v298_v1  ;;  %278 = vset.pattern.permute.xlu1 %v298_v1  ;;  %v281_v3 = vld [vmem:[%s396_s1 + $0x70] sm:$0xff]   ;;  %v283_v5 = vld [vmem:[%s396_s1 + $0x68] sm:$0xff]  }
   0x2   :  { %v280_v2 = vld [vmem:[%s396_s1 + $0x38] sm:$0xff]   ;;  %254 = vmatprep.subr.bf16.mxu0 %v279_v0  ;;  %v282_v4 = vld [vmem:[%s396_s1 + $0x30] sm:$0xff]   ;;  %v284_v6 = vld [vmem:[%s396_s1 + $0x28] sm:$0xff]  }
   0x3   :  { %255 = vmatpush3.bf16.msra.mxu0 %v280_v2  ;;  %v285_v7 = vld [vmem:[%s396_s1 + $0x60] sm:$0xff]   ;;  %v287_v9 = vld [vmem:[%s396_s1 + $0x58] sm:$0xff]   ;;  %v289_v11 = vld [vmem:[%s396_s1 + $0x50] sm:$0xff]  }
   0x4   :  { %256 = vmatprep.subr.bf16.mxu0 %v281_v3  ;;  %v286_v8 = vld [vmem:[%s396_s1 + $0x20] sm:$0xff]   ;;  %v288_v10 = vld [vmem:[%s396_s1 + $0x18] sm:$0xff]   ;;  %v290_v15 = vld [vmem:[%s396_s1 + $0x10] sm:$0xff]  }
   0x5   :  { %v297_v12 = vld [vmem:[%s397_s0 + $0x4] ss:$8 sps:$4 sm:$0xff]   ;;  %v295_v22 = vld [vmem:[%s397_s0] ss:$8 sps:$4 sm:$0xff]  }
   0x6   :  { %v199_v13 = vld [vmem:[%s398_s2] sm:$0xff]  ;;  %190 = vmatprep.mubr.bf16.mxu0 %v297_v12  ;;  %v200_v16 = vld [vmem:[%s398_s2 + $0x8] sm:$0xff] }
   0x7   :  { %257 = vmatpush3.bf16.msra.mxu0 %v282_v4  ;;  %v213_v14 = vld [vmem:[%s399_s3] sm:$0xff]  ;;  %203 = vperm.xlu0 %277, %v199_v13   ;;  %v214_v17 = vld [vmem:[%s399_s3 + $0x8] sm:$0xff] }
   0x8   :  { %258 = vmatprep.subr.bf16.mxu0 %v283_v5  ;;  %217 = vperm.xlu1 %278, %v213_v14   ;;  %v291_v18 = vld [vmem:[%s396_s1 + $0x48] sm:$0xff]   ;;  %v293_v20 = vld [vmem:[%s396_s1 + $0x40] sm:$0xff]  }
   0x9   :  { %v292_v19 = vld [vmem:[%s396_s1 + $0x8] sm:$0xff]   ;;  %v294_v21 = vld [vmem:[%s396_s1] sm:$0xff]  }
   0xb   :  { %259 = vmatpush3.bf16.msra.mxu0 %v284_v6  ;;  %208 = vperm.xlu0 %277, %v200_v16  }
   0xc   :  { %260 = vmatprep.subr.bf16.mxu0 %v285_v7  ;;  %222 = vperm.xlu1 %278, %v214_v17  }
   0xf   :  { %261 = vmatpush3.bf16.msra.mxu0 %v286_v8 }
  0x10   :  { %262 = vmatprep.subr.bf16.mxu0 %v287_v9 }
  0x13   :  { %263 = vmatpush3.bf16.msra.mxu0 %v288_v10 }
  0x14   :  { %264 = vmatprep.subr.bf16.mxu0 %v289_v11 }
  0x17   :  { %265 = vmatpush3.bf16.msra.mxu0 %v290_v15 }
  0x18   :  { %266 = vmatprep.subr.bf16.mxu0 %v291_v18 }
  0x1b   :  { %267 = vmatpush3.bf16.msra.mxu0 %v292_v19 }
  0x1c   :  { %268 = vmatprep.subr.bf16.mxu0 %v293_v20 }
  0x1f   :  { %269 = vmatpush3.bf16.msra.mxu0 %v294_v21 }
  0x22   :  { %191 = vmatmul.mubr.bf16.vlgmr.msra.gmra.mxu0 %v295_v22 }
  0x82   :  { %v204_v24 = vpop.permute.xlu0 %203 }
  0x83   :  { %v218_v27 = vpop.permute.xlu1 %217 }
  0x86   :  { %v209_v33 = vpop.permute.xlu0 %208 }
  0x87   :  { %v223_v36 = vpop.permute.xlu1 %222 }
  0xe2   :  { %v270_v23 = vpop.f32.mrf.mxu0 }
  0xe4   :  { %v271_v25 = vpop.f32.mrf.mxu0 }
  0xe5   :  { %v272_v26 = vadd.f32 %v271_v25, %v270_v23 }
  0xe6   :  { %v273_v28 = vpop.f32.mrf.mxu0 }
  0xe7   :  { %v211_v29 = vmul.f32 %v272_v26, %v204_v24 }
  0xe8   :  { %v274_v30 = vpop.f32.mrf.mxu0 }
  0xe9   :  { %v225_v31 = vadd.f32 %v218_v27, %v211_v29  ;;  %v275_v32 = vadd.f32 %v274_v30, %v273_v28 }
  0xeb   :  { %v227_v34 = vmax.f32 %v225_v31, 0.0  ;;  %v212_v35 = vmul.f32 %v275_v32, %v209_v33 }
  0xed   :  { %230 = vst.msk [vmem:[%s400_s4] sm:$0xff] %vm229_vm0, %v227_v34  ;;  %v226_v37 = vadd.f32 %v223_v36, %v212_v35 }
  0xef   :  { %v228_v38 = vmax.f32 %v226_v37, 0.0 }
  0xf1   :  { %231 = vst.msk [vmem:[%s400_s4 + $0x8] sm:$0xff] %vm229_vm0, %v228_v38 }

// kernel: depth_net.53
= control target key start
LH: loop header
LB: loop body
LE: loop exit
PB: predicated region body
PF: predicated region fallthrough
CT: control target
= control target key end

     0   :  { %v220_v0 = vmov 0.0   ;;  %vm221_vm0 = vmmov 0   ;;  %v222_v2 = vmov 0   ;;  %vm161_vm1 = vcmask 523264   ;;  %s293_s1 = inlined_call_operand.vmem [shape: bf16[128,64], index: 1, kind: input, shape index: {}]   ;;  %s294_s2 = inlined_call_operand.vmem [shape: f32[16,1], index: 2, kind: input, shape index: {}]   ;;  %s295_s3 = inlined_call_operand.vmem [shape: f32[16,1], index: 3, kind: input, shape index: {}]   ;;  %s296_s0 = inlined_call_operand.vmem [shape: bf16[16,128], index: 0, kind: input, shape index: {}]   ;;  %s297_s4 = inlined_call_operand.vmem [shape: f32[16,64], index: 4, kind: output, shape index: {}]  }
   0x1   :  { %186 = vmatprep.subr.bf16.mxu0 %v220_v0  ;;  %v211_v1 = vld [vmem:[%s293_s1 + $0x38] sm:$0xff]   ;;  %202 = vmatprep.mubr.msk.bf16.mxu0 %vm221_vm0, %v220_v0  ;;  %v212_v3 = vld [vmem:[%s293_s1 + $0x30] sm:$0xff]   ;;  %v213_v4 = vld [vmem:[%s293_s1 + $0x28] sm:$0xff]  }
   0x2   :  { %209 = vset.pattern.permute.xlu0 %v222_v2  ;;  %210 = vset.pattern.permute.xlu1 %v222_v2  ;;  %v131_v5 = vld [vmem:[%s294_s2] sm:$0xff]  ;;  %v132_v8 = vld [vmem:[%s294_s2 + $0x8] sm:$0xff]  ;;  %v215_v10 = vld [vmem:[%s293_s1 + $0x18] sm:$0xff]  }
   0x3   :  { %187 = vmatpush3.bf16.msra.mxu0 %v211_v1  ;;  %v145_v6 = vld [vmem:[%s295_s3] sm:$0xff]  ;;  %135 = vperm.xlu0 %209, %v131_v5   ;;  %v146_v9 = vld [vmem:[%s295_s3 + $0x8] sm:$0xff]  ;;  %v216_v11 = vld [vmem:[%s293_s1 + $0x10] sm:$0xff]  }
   0x4   :  { %188 = vmatprep.subr.bf16.mxu0 %v220_v0  ;;  %v214_v7 = vld [vmem:[%s293_s1 + $0x20] sm:$0xff]   ;;  %149 = vperm.xlu1 %210, %v145_v6   ;;  %v217_v12 = vld [vmem:[%s293_s1 + $0x8] sm:$0xff]  }
   0x5   :  { %v218_v13 = vld [vmem:[%s293_s1] sm:$0xff]  }
   0x6   :  { %v219_v14 = vld [vmem:[%s296_s0] sm:$0xff]  }
   0x7   :  { %189 = vmatpush3.bf16.msra.mxu0 %v212_v3  ;;  %140 = vperm.xlu0 %209, %v132_v8  }
   0x8   :  { %190 = vmatprep.subr.bf16.mxu0 %v220_v0  ;;  %154 = vperm.xlu1 %210, %v146_v9  }
   0xb   :  { %191 = vmatpush3.bf16.msra.mxu0 %v213_v4 }
   0xc   :  { %192 = vmatprep.subr.bf16.mxu0 %v220_v0 }
   0xf   :  { %193 = vmatpush3.bf16.msra.mxu0 %v214_v7 }
  0x10   :  { %194 = vmatprep.subr.bf16.mxu0 %v220_v0 }
  0x13   :  { %195 = vmatpush3.bf16.msra.mxu0 %v215_v10 }
  0x14   :  { %196 = vmatprep.subr.bf16.mxu0 %v220_v0 }
  0x17   :  { %197 = vmatpush3.bf16.msra.mxu0 %v216_v11 }
  0x18   :  { %198 = vmatprep.subr.bf16.mxu0 %v220_v0 }
  0x1b   :  { %199 = vmatpush3.bf16.msra.mxu0 %v217_v12 }
  0x1c   :  { %200 = vmatprep.subr.bf16.mxu0 %v220_v0 }
  0x1f   :  { %201 = vmatpush3.bf16.msra.mxu0 %v218_v13 }
  0x22   :  { %203 = vmatmul.mubr.bf16.vlgmr.msra.gmra.mxu0 %v219_v14 }
  0x7e   :  { %v136_v15 = vpop.permute.xlu0 %135 }
  0x7f   :  { %v150_v16 = vpop.permute.xlu1 %149 }
  0x82   :  { %v141_v21 = vpop.permute.xlu0 %140 }
  0x83   :  { %v155_v25 = vpop.permute.xlu1 %154 }
  0xe2   :  { %v124_v17 = vpop.f32.mrf.mxu0 }
  0xe3   :  { %v143_v18 = vmul.f32 %v136_v15, %v124_v17 }
  0xe4   :  { %v204_v19 = vpop.f32.mrf.mxu0 }
  0xe5   :  { %v157_v20 = vadd.f32 %v150_v16, %v143_v18 }
  0xe6   :  { %v127_v22 = vpop.f32.mrf.mxu0 }
  0xe7   :  { %v159_v23 = vmax.f32 %v157_v20, 0.0  ;;  %v144_v24 = vmul.f32 %v141_v21, %v127_v22 }
  0xe8   :  { %v205_v26 = vpop.f32.mrf.mxu0 }
  0xe9   :  { %162 = vst.msk [vmem:[%s297_s4] sm:$0xff] %vm161_vm1, %v159_v23  ;;  %v158_v27 = vadd.f32 %v155_v25, %v144_v24 }
  0xeb   :  { %v160_v28 = vmax.f32 %v158_v27, 0.0 }
  0xed   :  { %163 = vst.msk [vmem:[%s297_s4 + $0x8] sm:$0xff] %vm161_vm1, %v160_v28 }

// kernel: depth_net.51
= control target key start
LH: loop header
LB: loop body
LE: loop exit
PB: predicated region body
PF: predicated region fallthrough
CT: control target
= control target key end

     0   :  { %v171_v0 = vmov 0.0   ;;  %vm172_vm0 = vmmov 0   ;;  %v173_v2 = vmov 0   ;;  %vm57_vm1 = vcmask 523264   ;;  %s235_s1 = inlined_call_operand.vmem [shape: bf16[64,64], index: 1, kind: input, shape index: {}]   ;;  %s236_s2 = inlined_call_operand.vmem [shape: f32[16,1], index: 2, kind: input, shape index: {}]   ;;  %s237_s3 = inlined_call_operand.vmem [shape: f32[16,1], index: 3, kind: input, shape index: {}]   ;;  %s238_s0 = inlined_call_operand.vmem [shape: bf16[16,64], index: 0, kind: input, shape index: {}]   ;;  %s239_s4 = inlined_call_operand.vmem [shape: f32[16,64], index: 4, kind: output, shape index: {}]  }
   0x1   :  { %149 = vmatprep.subr.bf16.mxu0 %v171_v0  ;;  %v166_v1 = vld [vmem:[%s235_s1 + $0x18] sm:$0xff]   ;;  %157 = vmatprep.mubr.msk.bf16.mxu0 %vm172_vm0, %v171_v0  ;;  %v167_v3 = vld [vmem:[%s235_s1 + $0x10] sm:$0xff]   ;;  %v102_v4 = vld [vmem:[%s236_s2] sm:$0xff] }
   0x2   :  { %164 = vset.pattern.permute.xlu0 %v173_v2  ;;  %165 = vset.pattern.permute.xlu1 %v173_v2  ;;  %v116_v5 = vld [vmem:[%s237_s3] sm:$0xff]  ;;  %v168_v6 = vld [vmem:[%s235_s1 + $0x8] sm:$0xff]  }
   0x3   :  { %150 = vmatpush3.bf16.msra.mxu0 %v166_v1  ;;  %106 = vperm.xlu0 %164, %v102_v4   ;;  %v103_v7 = vld [vmem:[%s236_s2 + $0x8] sm:$0xff]  ;;  %v169_v9 = vld [vmem:[%s235_s1] sm:$0xff]  }
   0x4   :  { %151 = vmatprep.subr.bf16.mxu0 %v171_v0  ;;  %120 = vperm.xlu1 %165, %v116_v5   ;;  %v117_v8 = vld [vmem:[%s237_s3 + $0x8] sm:$0xff]  ;;  %v170_v10 = vld [vmem:[%s238_s0] sm:$0xff]  }
   0x7   :  { %152 = vmatpush3.bf16.msra.mxu0 %v167_v3  ;;  %111 = vperm.xlu0 %164, %v103_v7  }
   0x8   :  { %153 = vmatprep.subr.bf16.mxu0 %v171_v0  ;;  %125 = vperm.xlu1 %165, %v117_v8  }
   0xb   :  { %154 = vmatpush3.bf16.msra.mxu0 %v168_v6 }
   0xc   :  { %155 = vmatprep.subr.bf16.mxu0 %v171_v0 }
   0xf   :  { %156 = vmatpush3.bf16.msra.mxu0 %v169_v9 }
  0x12   :  { %158 = vmatmul.mubr.msk.bf16.vlgmr.msra.gmra.mxu0 %vm57_vm1, %v170_v10 }
  0x7e   :  { %v107_v11 = vpop.permute.xlu0 %106 }
  0x7f   :  { %v121_v12 = vpop.permute.xlu1 %120 }
  0x82   :  { %v112_v17 = vpop.permute.xlu0 %111 }
  0x83   :  { %v126_v21 = vpop.permute.xlu1 %125 }
  0xd2   :  { %v95_v13 = vpop.f32.mrf.mxu0 }
  0xd3   :  { %v114_v14 = vmul.f32 %v107_v11, %v95_v13 }
  0xd4   :  { %v159_v15 = vpop.f32.mrf.mxu0 }
  0xd5   :  { %v128_v16 = vadd.f32 %v121_v12, %v114_v14 }
  0xd6   :  { %v98_v18 = vpop.f32.mrf.mxu0 }
  0xd7   :  { %v130_v19 = vmax.f32 %v128_v16, 0.0  ;;  %v115_v20 = vmul.f32 %v112_v17, %v98_v18 }
  0xd8   :  { %v160_v22 = vpop.f32.mrf.mxu0 }
  0xd9   :  { %132 = vst.msk [vmem:[%s239_s4] sm:$0xff] %vm57_vm1, %v130_v19  ;;  %v129_v23 = vadd.f32 %v126_v21, %v115_v20 }
  0xdb   :  { %v131_v24 = vmax.f32 %v129_v23, 0.0 }
  0xdd   :  { %133 = vst.msk [vmem:[%s239_s4 + $0x8] sm:$0xff] %vm57_vm1, %v131_v24 }

// kernel: depth_net.50
= control target key start
LH: loop header
LB: loop body
LE: loop exit
PB: predicated region body
PF: predicated region fallthrough
CT: control target
= control target key end

     0   :  { %v146_v0 = vmov 0.0   ;;  %vm147_vm0 = vmmov 0   ;;  %v148_v2 = vmov 0   ;;  %vm41_vm1 = vcmask 261120   ;;  %s201_s1 = inlined_call_operand.vmem [shape: bf16[32,64], index: 1, kind: input, shape index: {}]   ;;  %s202_s2 = inlined_call_operand.vmem [shape: f32[16,1], index: 2, kind: input, shape index: {}]   ;;  %s203_s3 = inlined_call_operand.vmem [shape: f32[16,1], index: 3, kind: input, shape index: {}]   ;;  %s204_s0 = inlined_call_operand.vmem [shape: bf16[16,32], index: 0, kind: input, shape index: {}]   ;;  %s205_s4 = inlined_call_operand.vmem [shape: f32[16,64], index: 4, kind: output, shape index: {}]  }
   0x1   :  { %130 = vmatprep.subr.bf16.mxu0 %v146_v0  ;;  %v143_v1 = vld [vmem:[%s201_s1 + $0x8] sm:$0xff]   ;;  %134 = vmatprep.mubr.msk.bf16.mxu0 %vm147_vm0, %v146_v0  ;;  %v144_v3 = vld [vmem:[%s201_s1] sm:$0xff]   ;;  %vm116_vm2 = vcmask 523264  }
   0x2   :  { %141 = vset.pattern.permute.xlu0 %v148_v2  ;;  %142 = vset.pattern.permute.xlu1 %v148_v2  ;;  %v86_v4 = vld [vmem:[%s202_s2] sm:$0xff]  ;;  %v87_v7 = vld [vmem:[%s202_s2 + $0x8] sm:$0xff] }
   0x3   :  { %131 = vmatpush3.bf16.msra.mxu0 %v143_v1  ;;  %v100_v5 = vld [vmem:[%s203_s3] sm:$0xff]  ;;  %90 = vperm.xlu0 %141, %v86_v4   ;;  %v101_v8 = vld [vmem:[%s203_s3 + $0x8] sm:$0xff] }
   0x4   :  { %132 = vmatprep.subr.bf16.mxu0 %v146_v0  ;;  %104 = vperm.xlu1 %142, %v100_v5   ;;  %v145_v6 = vld [vmem:[%s204_s0] sm:$0xff]  }
   0x7   :  { %133 = vmatpush3.bf16.msra.mxu0 %v144_v3  ;;  %95 = vperm.xlu0 %141, %v87_v7  }
   0x8   :  { %109 = vperm.xlu1 %142, %v101_v8  }
   0xa   :  { %135 = vmatmul.mubr.msk.bf16.vlgmr.msra.gmra.mxu0 %vm41_vm1, %v145_v6 }
  0x7e   :  { %v91_v9 = vpop.permute.xlu0 %90 }
  0x7f   :  { %v105_v10 = vpop.permute.xlu1 %104 }
  0x82   :  { %v96_v15 = vpop.permute.xlu0 %95 }
  0x83   :  { %v110_v19 = vpop.permute.xlu1 %109 }
  0xca   :  { %v79_v11 = vpop.f32.mrf.mxu0 }
  0xcb   :  { %v98_v12 = vmul.f32 %v91_v9, %v79_v11 }
  0xcc   :  { %v136_v13 = vpop.f32.mrf.mxu0 }
  0xcd   :  { %v112_v14 = vadd.f32 %v105_v10, %v98_v12 }
  0xce   :  { %v82_v16 = vpop.f32.mrf.mxu0 }
  0xcf   :  { %v114_v17 = vmax.f32 %v112_v14, 0.0  ;;  %v99_v18 = vmul.f32 %v96_v15, %v82_v16 }
  0xd0   :  { %v137_v20 = vpop.f32.mrf.mxu0 }
  0xd1   :  { %117 = vst.msk [vmem:[%s205_s4] sm:$0xff] %vm116_vm2, %v114_v17  ;;  %v113_v21 = vadd.f32 %v110_v19, %v99_v18 }
  0xd3   :  { %v115_v22 = vmax.f32 %v113_v21, 0.0 }
  0xd5   :  { %118 = vst.msk [vmem:[%s205_s4 + $0x8] sm:$0xff] %vm116_vm2, %v115_v22 }

// kernel: depth_net.65
= control target key start
LH: loop header
LB: loop body
LE: loop exit
PB: predicated region body
PF: predicated region fallthrough
CT: control target
= control target key end

     0   :  { %v407_v1 = vmov 0   ;;  %s550_s1 = inlined_call_operand.vmem [shape: bf16[128,512], index: 1, kind: input, shape index: {}]   ;;  %s551_s2 = inlined_call_operand.vmem [shape: f32[8,1], index: 2, kind: input, shape index: {}]   ;;  %s552_s3 = inlined_call_operand.vmem [shape: f32[8,1], index: 3, kind: input, shape index: {}]   ;;  %s553_s0 = inlined_call_operand.vmem [shape: bf16[8,128], index: 0, kind: input, shape index: {}]   ;;  %s554_s4 = inlined_call_operand.vmem [shape: f32[8,512], index: 4, kind: output, shape index: {}]  }
   0x1   :  { %v359_v0 = vld [vmem:[%s550_s1 + $0xe4] ss:$16 sps:$4 sm:$0xff]   ;;  %243 = vmatprep.mubr.bf16.mxu0 %v407_v1  ;;  %284 = vmatprep.mubr.bf16.mxu1 %v407_v1  ;;  %v361_v2 = vld [vmem:[%s550_s1 + $0xec] ss:$16 sps:$4 sm:$0xff]   ;;  %v363_v3 = vld [vmem:[%s550_s1 + $0xe0] ss:$16 sps:$4 sm:$0xff]  }
   0x2   :  { %358 = vset.pattern.permute.xlu0 %v407_v1  ;;  %211 = vmatprep.subr.bf16.mxu0 %v359_v0  ;;  %v364_v4 = vld [vmem:[%s550_s1 + $0xe8] ss:$16 sps:$4 sm:$0xff]   ;;  %v365_v5 = vld [vmem:[%s550_s1 + $0xc4] ss:$16 sps:$4 sm:$0xff]   ;;  %v367_v6 = vld [vmem:[%s550_s1 + $0xcc] ss:$16 sps:$4 sm:$0xff]  }
   0x3   :  { %252 = vmatprep.subr.bf16.mxu1 %v361_v2  ;;  %212 = vmatpush1.bf16.msra.mxu0 %v363_v3  ;;  %v369_v7 = vld [vmem:[%s550_s1 + $0xc0] ss:$16 sps:$4 sm:$0xff]   ;;  %v370_v8 = vld [vmem:[%s550_s1 + $0xc8] ss:$16 sps:$4 sm:$0xff]   ;;  %v371_v9 = vld [vmem:[%s550_s1 + $0xa4] ss:$16 sps:$4 sm:$0xff]  }
   0x4   :  { %253 = vmatpush1.bf16.msra.mxu1 %v364_v4  ;;  %213 = vmatprep.subr.bf16.mxu0 %v365_v5  ;;  %v373_v10 = vld [vmem:[%s550_s1 + $0xac] ss:$16 sps:$4 sm:$0xff]   ;;  %v375_v11 = vld [vmem:[%s550_s1 + $0xa0] ss:$16 sps:$4 sm:$0xff]   ;;  %v376_v12 = vld [vmem:[%s550_s1 + $0xa8] ss:$16 sps:$4 sm:$0xff]  }
   0x5   :  { %254 = vmatprep.subr.bf16.mxu1 %v367_v6  ;;  %v377_v13 = vld [vmem:[%s550_s1 + $0x84] ss:$16 sps:$4 sm:$0xff]   ;;  %v379_v14 = vld [vmem:[%s550_s1 + $0x8c] ss:$16 sps:$4 sm:$0xff]   ;;  %v381_v15 = vld [vmem:[%s550_s1 + $0x80] ss:$16 sps:$4 sm:$0xff]  }
   0x6   :  { %v382_v16 = vld [vmem:[%s550_s1 + $0x88] ss:$16 sps:$4 sm:$0xff]   ;;  %v383_v17 = vld [vmem:[%s550_s1 + $0x64] ss:$16 sps:$4 sm:$0xff]   ;;  %v385_v18 = vld [vmem:[%s550_s1 + $0x6c] ss:$16 sps:$4 sm:$0xff]  }
   0x7   :  { %214 = vmatpush1.bf16.msra.mxu0 %v369_v7  ;;  %v387_v19 = vld [vmem:[%s550_s1 + $0x60] ss:$16 sps:$4 sm:$0xff]   ;;  %v388_v20 = vld [vmem:[%s550_s1 + $0x68] ss:$16 sps:$4 sm:$0xff]   ;;  %v389_v21 = vld [vmem:[%s550_s1 + $0x44] ss:$16 sps:$4 sm:$0xff]  }
   0x8   :  { %255 = vmatpush1.bf16.msra.mxu1 %v370_v8  ;;  %215 = vmatprep.subr.bf16.mxu0 %v371_v9  ;;  %v391_v22 = vld [vmem:[%s550_s1 + $0x4c] ss:$16 sps:$4 sm:$0xff]   ;;  %v393_v23 = vld [vmem:[%s550_s1 + $0x40] ss:$16 sps:$4 sm:$0xff]   ;;  %v394_v24 = vld [vmem:[%s550_s1 + $0x48] ss:$16 sps:$4 sm:$0xff]  }
   0x9   :  { %256 = vmatprep.subr.bf16.mxu1 %v373_v10  ;;  %v395_v25 = vld [vmem:[%s550_s1 + $0x24] ss:$16 sps:$4 sm:$0xff]   ;;  %v397_v26 = vld [vmem:[%s550_s1 + $0x2c] ss:$16 sps:$4 sm:$0xff]   ;;  %v399_v29 = vld [vmem:[%s550_s1 + $0x20] ss:$16 sps:$4 sm:$0xff]  }
   0xa   :  { %v293_v27 = vld [vmem:[%s551_s2] sm:$0xff]  ;;  %v400_v30 = vld [vmem:[%s550_s1 + $0x28] ss:$16 sps:$4 sm:$0xff]   ;;  %v403_v32 = vld [vmem:[%s550_s1 + $0xc] ss:$16 sps:$4 sm:$0xff]  }
   0xb   :  { %216 = vmatpush1.bf16.msra.mxu0 %v375_v11  ;;  %296 = vperm.xlu0 %358, %v293_v27   ;;  %v303_v28 = vld [vmem:[%s552_s3] sm:$0xff]  ;;  %v406_v34 = vld [vmem:[%s550_s1 + $0x8] ss:$16 sps:$4 sm:$0xff]  }
   0xc   :  { %257 = vmatpush1.bf16.msra.mxu1 %v376_v12  ;;  %217 = vmatprep.subr.bf16.mxu0 %v377_v13  ;;  %v401_v31 = vld [vmem:[%s550_s1 + $0x4] ss:$16 sps:$4 sm:$0xff]   ;;  %v405_v33 = vld [vmem:[%s550_s1] ss:$16 sps:$4 sm:$0xff]  }
   0xd   :  { %258 = vmatprep.subr.bf16.mxu1 %v379_v14  ;;  %v18_v35 = vld [vmem:[%s553_s0] sm:$0xf] }
   0xf   :  { %218 = vmatpush1.bf16.msra.mxu0 %v381_v15  ;;  %306 = vperm.xlu0 %358, %v303_v28  }
  0x10   :  { %259 = vmatpush1.bf16.msra.mxu1 %v382_v16  ;;  %219 = vmatprep.subr.bf16.mxu0 %v383_v17 }
  0x11   :  { %260 = vmatprep.subr.bf16.mxu1 %v385_v18 }
  0x13   :  { %220 = vmatpush1.bf16.msra.mxu0 %v387_v19 }
  0x14   :  { %261 = vmatpush1.bf16.msra.mxu1 %v388_v20  ;;  %221 = vmatprep.subr.bf16.mxu0 %v389_v21 }
  0x15   :  { %262 = vmatprep.subr.bf16.mxu1 %v391_v22 }
  0x17   :  { %222 = vmatpush1.bf16.msra.mxu0 %v393_v23 }
  0x18   :  { %263 = vmatpush1.bf16.msra.mxu1 %v394_v24  ;;  %223 = vmatprep.subr.bf16.mxu0 %v395_v25 }
  0x19   :  { %264 = vmatprep.subr.bf16.mxu1 %v397_v26 }
  0x1b   :  { %224 = vmatpush1.bf16.msra.mxu0 %v399_v29 }
  0x1c   :  { %265 = vmatpush1.bf16.msra.mxu1 %v400_v30  ;;  %225 = vmatprep.subr.bf16.mxu0 %v401_v31 }
  0x1d   :  { %266 = vmatprep.subr.bf16.mxu1 %v403_v32 }
  0x1f   :  { %226 = vmatpush1.bf16.msra.mxu0 %v405_v33 }
  0x20   :  { %267 = vmatpush1.bf16.msra.mxu1 %v406_v34 }
  0x22   :  { %244 = vmatmul.mubr.bf16.vlgmr.msra.gmra.mxu0 %v18_v35 }
  0x23   :  { %285 = vmatmul.mubr.bf16.vlgmr.msra.gmra.mxu1 %v18_v35 }
  0x86   :  { %v297_v36 = vpop.permute.xlu0 %296 }
  0x8a   :  { %v307_v39 = vpop.permute.xlu0 %306 }
  0xe2   :  { %v245_v37 = vpop.f32.mrf.mxu0 }
  0xe3   :  { %v286_v38 = vpop.f32.mrf.mxu1  ;;  %v299_v40 = vmul.f32 %v297_v36, %v245_v37 }
  0xe4   :  { %v301_v41 = vmul.f32 %v297_v36, %v286_v38  ;;  %v247_v42 = vpop.f32.mrf.mxu0 }
  0xe5   :  { %v288_v43 = vpop.f32.mrf.mxu1  ;;  %v309_v44 = vadd.f32 %v307_v39, %v299_v40  ;;  %v300_v46 = vmul.f32 %v297_v36, %v247_v42 }
  0xe6   :  { %v311_v45 = vadd.f32 %v307_v39, %v301_v41  ;;  %v302_v47 = vmul.f32 %v297_v36, %v288_v43  ;;  %v249_v48 = vpop.f32.mrf.mxu0 }
  0xe7   :  { %v290_v49 = vpop.f32.mrf.mxu1  ;;  %v313_v50 = vmax.f32 %v309_v44, 0.0  ;;  %v310_v52 = vadd.f32 %v307_v39, %v300_v46 }
  0xe8   :  { %v315_v51 = vmax.f32 %v311_v45, 0.0  ;;  %v312_v53 = vadd.f32 %v307_v39, %v302_v47  ;;  %v250_v54 = vpop.f32.mrf.mxu0 }
  0xe9   :  { %v291_v55 = vpop.f32.mrf.mxu1  ;;  %317 = vst [vmem:[%s554_s4] sm:$0xff] %v313_v50  ;;  %v314_v56 = vmax.f32 %v310_v52, 0.0 }
  0xea   :  { %319 = vst [vmem:[%s554_s4 + $0x10] sm:$0xff] %v315_v51  ;;  %v316_v57 = vmax.f32 %v312_v53, 0.0 }
  0xeb   :  { %318 = vst [vmem:[%s554_s4 + $0x8] sm:$0xff] %v314_v56 }
  0xec   :  { %320 = vst [vmem:[%s554_s4 + $0x18] sm:$0xff] %v316_v57 }

// kernel: depth_net.61
= control target key start
LH: loop header
LB: loop body
LE: loop exit
PB: predicated region body
PF: predicated region fallthrough
CT: control target
= control target key end

     0   :  { %v277_v1 = vmov 0   ;;  %vm115_vm0 = vcmask 523264   ;;  %s372_s1 = inlined_call_operand.vmem [shape: bf16[64,512], index: 1, kind: input, shape index: {}]   ;;  %s373_s2 = inlined_call_operand.vmem [shape: f32[8,1], index: 2, kind: input, shape index: {}]   ;;  %s374_s3 = inlined_call_operand.vmem [shape: f32[8,1], index: 3, kind: input, shape index: {}]   ;;  %s375_s0 = inlined_call_operand.vmem [shape: bf16[8,64], index: 0, kind: input, shape index: {}]   ;;  %s376_s4 = inlined_call_operand.vmem [shape: f32[8,512], index: 4, kind: output, shape index: {}]  }
   0x1   :  { %v253_v0 = vld [vmem:[%s372_s1 + $0x64] ss:$16 sps:$4 sm:$0xff]   ;;  %151 = vmatprep.mubr.bf16.mxu0 %v277_v1  ;;  %192 = vmatprep.mubr.bf16.mxu1 %v277_v1  ;;  %v255_v2 = vld [vmem:[%s372_s1 + $0x6c] ss:$16 sps:$4 sm:$0xff]   ;;  %v257_v3 = vld [vmem:[%s372_s1 + $0x60] ss:$16 sps:$4 sm:$0xff]  }
   0x2   :  { %252 = vset.pattern.permute.xlu0 %v277_v1  ;;  %127 = vmatprep.subr.bf16.mxu0 %v253_v0  ;;  %v258_v4 = vld [vmem:[%s372_s1 + $0x68] ss:$16 sps:$4 sm:$0xff]   ;;  %v259_v5 = vld [vmem:[%s372_s1 + $0x44] ss:$16 sps:$4 sm:$0xff]   ;;  %v261_v6 = vld [vmem:[%s372_s1 + $0x4c] ss:$16 sps:$4 sm:$0xff]  }
   0x3   :  { %168 = vmatprep.subr.bf16.mxu1 %v255_v2  ;;  %128 = vmatpush1.bf16.msra.mxu0 %v257_v3  ;;  %v263_v7 = vld [vmem:[%s372_s1 + $0x40] ss:$16 sps:$4 sm:$0xff]   ;;  %v264_v8 = vld [vmem:[%s372_s1 + $0x48] ss:$16 sps:$4 sm:$0xff]   ;;  %v265_v9 = vld [vmem:[%s372_s1 + $0x24] ss:$16 sps:$4 sm:$0xff]  }
   0x4   :  { %169 = vmatpush1.bf16.msra.mxu1 %v258_v4  ;;  %129 = vmatprep.subr.bf16.mxu0 %v259_v5  ;;  %v267_v10 = vld [vmem:[%s372_s1 + $0x2c] ss:$16 sps:$4 sm:$0xff]   ;;  %v269_v11 = vld [vmem:[%s372_s1 + $0x20] ss:$16 sps:$4 sm:$0xff]   ;;  %v270_v12 = vld [vmem:[%s372_s1 + $0x28] ss:$16 sps:$4 sm:$0xff]  }
   0x5   :  { %170 = vmatprep.subr.bf16.mxu1 %v261_v6  ;;  %v271_v13 = vld [vmem:[%s372_s1 + $0x4] ss:$16 sps:$4 sm:$0xff]   ;;  %v273_v14 = vld [vmem:[%s372_s1 + $0xc] ss:$16 sps:$4 sm:$0xff]   ;;  %v275_v16 = vld [vmem:[%s372_s1] ss:$16 sps:$4 sm:$0xff]  }
   0x6   :  { %v201_v15 = vld [vmem:[%s373_s2] sm:$0xff]  ;;  %v276_v17 = vld [vmem:[%s372_s1 + $0x8] ss:$16 sps:$4 sm:$0xff]  }
   0x7   :  { %130 = vmatpush1.bf16.msra.mxu0 %v263_v7  ;;  %204 = vperm.xlu0 %252, %v201_v15   ;;  %v211_v18 = vld [vmem:[%s374_s3] sm:$0xff] }
   0x8   :  { %171 = vmatpush1.bf16.msra.mxu1 %v264_v8  ;;  %131 = vmatprep.subr.bf16.mxu0 %v265_v9  ;;  %v18_v19 = vld [vmem:[%s375_s0] sm:$0xf] }
   0x9   :  { %172 = vmatprep.subr.bf16.mxu1 %v267_v10 }
   0xb   :  { %132 = vmatpush1.bf16.msra.mxu0 %v269_v11  ;;  %214 = vperm.xlu0 %252, %v211_v18  }
   0xc   :  { %173 = vmatpush1.bf16.msra.mxu1 %v270_v12  ;;  %133 = vmatprep.subr.bf16.mxu0 %v271_v13 }
   0xd   :  { %174 = vmatprep.subr.bf16.mxu1 %v273_v14 }
   0xf   :  { %134 = vmatpush1.bf16.msra.mxu0 %v275_v16 }
  0x10   :  { %175 = vmatpush1.bf16.msra.mxu1 %v276_v17 }
  0x12   :  { %249 = vmatmul.mubr.msk.bf16.vlgmr.msra.gmra.mxu0 %vm115_vm0, %v18_v19 }
  0x13   :  { %250 = vmatmul.mubr.msk.bf16.vlgmr.msra.gmra.mxu1 %vm115_vm0, %v18_v19 }
  0x82   :  { %v205_v20 = vpop.permute.xlu0 %204 }
  0x86   :  { %v215_v23 = vpop.permute.xlu0 %214 }
  0xd2   :  { %v153_v21 = vpop.f32.mrf.mxu0 }
  0xd3   :  { %v194_v22 = vpop.f32.mrf.mxu1  ;;  %v207_v24 = vmul.f32 %v205_v20, %v153_v21 }
  0xd4   :  { %v209_v25 = vmul.f32 %v205_v20, %v194_v22  ;;  %v155_v26 = vpop.f32.mrf.mxu0 }
  0xd5   :  { %v196_v27 = vpop.f32.mrf.mxu1  ;;  %v217_v28 = vadd.f32 %v215_v23, %v207_v24  ;;  %v208_v30 = vmul.f32 %v205_v20, %v155_v26 }
  0xd6   :  { %v219_v29 = vadd.f32 %v215_v23, %v209_v25  ;;  %v210_v31 = vmul.f32 %v205_v20, %v196_v27  ;;  %v157_v32 = vpop.f32.mrf.mxu0 }
  0xd7   :  { %v198_v33 = vpop.f32.mrf.mxu1  ;;  %v221_v34 = vmax.f32 %v217_v28, 0.0  ;;  %v218_v36 = vadd.f32 %v215_v23, %v208_v30 }
  0xd8   :  { %v223_v35 = vmax.f32 %v219_v29, 0.0  ;;  %v220_v37 = vadd.f32 %v215_v23, %v210_v31  ;;  %v158_v38 = vpop.f32.mrf.mxu0 }
  0xd9   :  { %v199_v39 = vpop.f32.mrf.mxu1  ;;  %225 = vst [vmem:[%s376_s4] sm:$0xff] %v221_v34  ;;  %v222_v40 = vmax.f32 %v218_v36, 0.0 }
  0xda   :  { %227 = vst [vmem:[%s376_s4 + $0x10] sm:$0xff] %v223_v35  ;;  %v224_v41 = vmax.f32 %v220_v37, 0.0 }
  0xdb   :  { %226 = vst [vmem:[%s376_s4 + $0x8] sm:$0xff] %v222_v40 }
  0xdc   :  { %228 = vst [vmem:[%s376_s4 + $0x18] sm:$0xff] %v224_v41 }

// kernel: depth_net.59
= control target key start
LH: loop header
LB: loop body
LE: loop exit
PB: predicated region body
PF: predicated region fallthrough
CT: control target
= control target key end

     0   :  { %v209_v1 = vmov 0   ;;  %vm67_vm0 = vcmask 261120   ;;  %s280_s1 = inlined_call_operand.vmem [shape: bf16[32,512], index: 1, kind: input, shape index: {}]   ;;  %s281_s2 = inlined_call_operand.vmem [shape: f32[8,1], index: 2, kind: input, shape index: {}]   ;;  %s282_s3 = inlined_call_operand.vmem [shape: f32[8,1], index: 3, kind: input, shape index: {}]   ;;  %s283_s0 = inlined_call_operand.vmem [shape: bf16[8,32], index: 0, kind: input, shape index: {}]   ;;  %s284_s4 = inlined_call_operand.vmem [shape: f32[8,512], index: 4, kind: output, shape index: {}]  }
   0x1   :  { %v197_v0 = vld [vmem:[%s280_s1 + $0x24] ss:$16 sps:$4 sm:$0xff]   ;;  %103 = vmatprep.mubr.bf16.mxu0 %v209_v1  ;;  %144 = vmatprep.mubr.bf16.mxu1 %v209_v1  ;;  %v199_v2 = vld [vmem:[%s280_s1 + $0x2c] ss:$16 sps:$4 sm:$0xff]   ;;  %v201_v3 = vld [vmem:[%s280_s1 + $0x20] ss:$16 sps:$4 sm:$0xff]  }
   0x2   :  { %196 = vset.pattern.permute.xlu0 %v209_v1  ;;  %83 = vmatprep.subr.bf16.mxu0 %v197_v0  ;;  %v202_v4 = vld [vmem:[%s280_s1 + $0x28] ss:$16 sps:$4 sm:$0xff]   ;;  %v203_v5 = vld [vmem:[%s280_s1 + $0x4] ss:$16 sps:$4 sm:$0xff]   ;;  %v205_v6 = vld [vmem:[%s280_s1 + $0xc] ss:$16 sps:$4 sm:$0xff]  }
   0x3   :  { %124 = vmatprep.subr.bf16.mxu1 %v199_v2  ;;  %84 = vmatpush1.bf16.msra.mxu0 %v201_v3  ;;  %v207_v7 = vld [vmem:[%s280_s1] ss:$16 sps:$4 sm:$0xff]   ;;  %v208_v8 = vld [vmem:[%s280_s1 + $0x8] ss:$16 sps:$4 sm:$0xff]  }
   0x4   :  { %125 = vmatpush1.bf16.msra.mxu1 %v202_v4  ;;  %85 = vmatprep.subr.bf16.mxu0 %v203_v5  ;;  %v153_v9 = vld [vmem:[%s281_s2] sm:$0xff] }
   0x5   :  { %126 = vmatprep.subr.bf16.mxu1 %v205_v6  ;;  %156 = vperm.xlu0 %196, %v153_v9   ;;  %v163_v10 = vld [vmem:[%s282_s3] sm:$0xff] }
   0x6   :  { %v18_v11 = vld [vmem:[%s283_s0] sm:$0xf] }
   0x7   :  { %86 = vmatpush1.bf16.msra.mxu0 %v207_v7 }
   0x8   :  { %127 = vmatpush1.bf16.msra.mxu1 %v208_v8 }
   0x9   :  { %166 = vperm.xlu0 %196, %v163_v10  }
   0xa   :  { %193 = vmatmul.mubr.msk.bf16.vlgmr.msra.gmra.mxu0 %vm67_vm0, %v18_v11 }
   0xb   :  { %194 = vmatmul.mubr.msk.bf16.vlgmr.msra.gmra.mxu1 %vm67_vm0, %v18_v11 }
  0x80   :  { %v157_v12 = vpop.permute.xlu0 %156 }
  0x84   :  { %v167_v15 = vpop.permute.xlu0 %166 }
  0xca   :  { %v105_v13 = vpop.f32.mrf.mxu0 }
  0xcb   :  { %v146_v14 = vpop.f32.mrf.mxu1  ;;  %v159_v16 = vmul.f32 %v157_v12, %v105_v13 }
  0xcc   :  { %v161_v17 = vmul.f32 %v157_v12, %v146_v14  ;;  %v107_v18 = vpop.f32.mrf.mxu0 }
  0xcd   :  { %v148_v19 = vpop.f32.mrf.mxu1  ;;  %v169_v20 = vadd.f32 %v167_v15, %v159_v16  ;;  %v160_v22 = vmul.f32 %v157_v12, %v107_v18 }
  0xce   :  { %v171_v21 = vadd.f32 %v167_v15, %v161_v17  ;;  %v162_v23 = vmul.f32 %v157_v12, %v148_v19  ;;  %v109_v24 = vpop.f32.mrf.mxu0 }
  0xcf   :  { %v150_v25 = vpop.f32.mrf.mxu1  ;;  %v173_v26 = vmax.f32 %v169_v20, 0.0  ;;  %v170_v28 = vadd.f32 %v167_v15, %v160_v22 }
  0xd0   :  { %v175_v27 = vmax.f32 %v171_v21, 0.0  ;;  %v172_v29 = vadd.f32 %v167_v15, %v162_v23  ;;  %v110_v30 = vpop.f32.mrf.mxu0 }
  0xd1   :  { %v151_v31 = vpop.f32.mrf.mxu1  ;;  %177 = vst [vmem:[%s284_s4] sm:$0xff] %v173_v26  ;;  %v174_v32 = vmax.f32 %v170_v28, 0.0 }
  0xd2   :  { %179 = vst [vmem:[%s284_s4 + $0x10] sm:$0xff] %v175_v27  ;;  %v176_v33 = vmax.f32 %v172_v29, 0.0 }
  0xd3   :  { %178 = vst [vmem:[%s284_s4 + $0x8] sm:$0xff] %v174_v32 }
  0xd4   :  { %180 = vst [vmem:[%s284_s4 + $0x18] sm:$0xff] %v176_v33 }

// kernel: depth_net.58
= control target key start
LH: loop header
LB: loop body
LE: loop exit
PB: predicated region body
PF: predicated region fallthrough
CT: control target
= control target key end

     0   :  { %v175_v1 = vmov 0   ;;  %vm43_vm0 = vcmask 130048   ;;  %s234_s1 = inlined_call_operand.vmem [shape: bf16[16,512], index: 1, kind: input, shape index: {}]   ;;  %s235_s2 = inlined_call_operand.vmem [shape: f32[8,1], index: 2, kind: input, shape index: {}]   ;;  %s236_s0 = inlined_call_operand.vmem [shape: bf16[8,16], index: 0, kind: input, shape index: {}]   ;;  %s237_s3 = inlined_call_operand.vmem [shape: f32[8,1], index: 3, kind: input, shape index: {}]   ;;  %s238_s4 = inlined_call_operand.vmem [shape: f32[8,512], index: 4, kind: output, shape index: {}]  }
   0x1   :  { %v169_v0 = vld [vmem:[%s234_s1 + $0x4] ss:$16 sps:$4 sm:$0xff]   ;;  %79 = vmatprep.mubr.bf16.mxu0 %v175_v1  ;;  %120 = vmatprep.mubr.bf16.mxu1 %v175_v1  ;;  %v171_v2 = vld [vmem:[%s234_s1 + $0xc] ss:$16 sps:$4 sm:$0xff]   ;;  %v173_v3 = vld [vmem:[%s234_s1] ss:$16 sps:$4 sm:$0xff]  }
   0x2   :  { %168 = vset.pattern.permute.xlu0 %v175_v1  ;;  %61 = vmatprep.subr.bf16.mxu0 %v169_v0  ;;  %v174_v4 = vld [vmem:[%s234_s1 + $0x8] ss:$16 sps:$4 sm:$0xff]   ;;  %v129_v5 = vld [vmem:[%s235_s2] sm:$0xff] }
   0x3   :  { %102 = vmatprep.subr.bf16.mxu1 %v171_v2  ;;  %62 = vmatpush1.bf16.msra.mxu0 %v173_v3  ;;  %v18_v6 = vld [vmem:[%s236_s0] sm:$0xf] }
   0x4   :  { %103 = vmatpush1.bf16.msra.mxu1 %v174_v4  ;;  %132 = vperm.xlu0 %168, %v129_v5   ;;  %v139_v7 = vld [vmem:[%s237_s3] sm:$0xff] }
   0x6   :  { %165 = vmatmul.mubr.msk.bf16.vlgmr.msra.gmra.mxu0 %vm43_vm0, %v18_v6 }
   0x7   :  { %166 = vmatmul.mubr.msk.bf16.vlgmr.msra.gmra.mxu1 %vm43_vm0, %v18_v6 }
   0x8   :  { %142 = vperm.xlu0 %168, %v139_v7  }
  0x7f   :  { %v133_v8 = vpop.permute.xlu0 %132 }
  0x83   :  { %v143_v11 = vpop.permute.xlu0 %142 }
  0xc6   :  { %v81_v9 = vpop.f32.mrf.mxu0 }
  0xc7   :  { %v122_v10 = vpop.f32.mrf.mxu1  ;;  %v135_v12 = vmul.f32 %v133_v8, %v81_v9 }
  0xc8   :  { %v137_v13 = vmul.f32 %v133_v8, %v122_v10  ;;  %v83_v14 = vpop.f32.mrf.mxu0 }
  0xc9   :  { %v124_v15 = vpop.f32.mrf.mxu1  ;;  %v145_v16 = vadd.f32 %v143_v11, %v135_v12  ;;  %v136_v18 = vmul.f32 %v133_v8, %v83_v14 }
  0xca   :  { %v147_v17 = vadd.f32 %v143_v11, %v137_v13  ;;  %v138_v19 = vmul.f32 %v133_v8, %v124_v15  ;;  %v85_v20 = vpop.f32.mrf.mxu0 }
  0xcb   :  { %v126_v21 = vpop.f32.mrf.mxu1  ;;  %v149_v22 = vmax.f32 %v145_v16, 0.0  ;;  %v146_v24 = vadd.f32 %v143_v11, %v136_v18 }
  0xcc   :  { %v151_v23 = vmax.f32 %v147_v17, 0.0  ;;  %v148_v25 = vadd.f32 %v143_v11, %v138_v19  ;;  %v86_v26 = vpop.f32.mrf.mxu0 }
  0xcd   :  { %v127_v27 = vpop.f32.mrf.mxu1  ;;  %153 = vst [vmem:[%s238_s4] sm:$0xff] %v149_v22  ;;  %v150_v28 = vmax.f32 %v146_v24, 0.0 }
  0xce   :  { %155 = vst [vmem:[%s238_s4 + $0x10] sm:$0xff] %v151_v23  ;;  %v152_v29 = vmax.f32 %v148_v25, 0.0 }
  0xcf   :  { %154 = vst [vmem:[%s238_s4 + $0x8] sm:$0xff] %v150_v28 }
  0xd0   :  { %156 = vst [vmem:[%s238_s4 + $0x18] sm:$0xff] %v152_v29 }

// kernel: depth_net.66
= control target key start
LH: loop header
LB: loop body
LE: loop exit
PB: predicated region body
PF: predicated region fallthrough
CT: control target
= control target key end

     0   :  { %s2108_s0 = inlined_call_operand.vmem [shape: bf16[1,216], index: 0, kind: input, shape index: {}]   ;;  %s2109_s1 = inlined_call_operand.vmem [shape: bf16[216,4096], index: 1, kind: input, shape index: {}]   ;;  %s2110_s2 = inlined_call_operand.<no memory space> [shape: f32[1,1], index: 2, kind: input, shape index: {}]   ;;  %s2111_s4 = inlined_call_operand.vmem [shape: f32[1,4096], index: 4, kind: output, shape index: {}]   ;;  %s2112_s3 = inlined_call_operand.<no memory space> [shape: f32[1,1], index: 3, kind: input, shape index: {}]  }
   0x1   :  { %v9_v0 = vstv %s2110_s2  ;;  %v11_v1 = vstv %s2112_s3 }
   0x2   :  { %10 = vst [vmem:[#allocation2] sm:$0x1] %v9_v0  ;;  %12 = vst [vmem:[#allocation3] sm:$0x1] %v11_v1 }
   0x3   :  { %s1680_s19 = smov 0   ;;  %s1682_s20 = smov 0  }
   0x4   :  { %s1684_s21 = smov 0  }
   0x5 LB: > { %s1454_s2 = sadd.s32 4294967295, %s1645_s21   ;;  %s1697_s3 = sadd.s32 1, %s1645_s21   ;;  %s1645_s21 = sphi %s1684_s21, %s2115_s21   ;;  %s1641_s20 = sphi %s1682_s20, %s2114_s20   ;;  %s1637_s19 = sphi %s1680_s19, %s2113_s19  }
   0x6   : > { %s43_s22 = ssub.s32 %s1645_s21, %s1697_s3  ;;  %s46_s23 = sadd.s32 1, %s1641_s20 }
   0x7   : > { %p44_p0 = scmp.eq.s32.totalorder %s43_s22, 0  ;;  %p53_p1 = scmp.ne.s32.totalorder %s1641_s20, %s1637_s19 }
   0x8   : > { %p54_p2 = scmp.eq.s32.totalorder %s1645_s21, 0  ;;  %p1457_p4 = scmp.ge.s32.totalorder %s1645_s21, 4 }
   0x9   : > { %s1706_s24 = scalar_select %p44_p0, %s1641_s20, %s46_s23  }
   0xa   : > { %p55_p3 = por %p54_p2, %p53_p1  ;;  %156 = sbr.rel (%p1457_p4) target bundleno = 74 (0x4a), region = 28 }
   0xf   : > { %159 = sbr.rel (!%p55_p3) target bundleno = 74 (0x4a), region = 32  ;;  %s161_s25 = sand.u32 (%p55_p3), 1, %s1641_s20  }
  0x10   : > { %s1585_s26 = sshll.u32 (%p55_p3), %s1645_s21, 5  ;;  %s1586_s27 = smul.u32 (%p55_p3), 864, %s161_s25 }
  0x11   : > { %s1714_s30 = scalar_lea.vmem (%p55_p3), %s2109_s1, %s1585_s26 }
  0x12   : > { %v179_v2 = vld [vmem:[%s1714_s30] sm:$0xff] (%p55_p3)  ;;  %v181_v3 = vld [vmem:[%s1714_s30 + $0x8] sm:$0xff] (%p55_p3)  ;;  %v183_v4 = vld [vmem:[%s1714_s30 + $0x10] sm:$0xff] (%p55_p3)  ;;  %s1722_s5 = scalar_lea.vmem (%p55_p3), [#allocation4], %s1586_s27 }
  0x13   : > { %v185_v5 = vld [vmem:[%s1714_s30 + $0x18] sm:$0xff] (%p55_p3)  ;;  %v187_v6 = vld [vmem:[%s1714_s30 + $0x80] sm:$0xff] (%p55_p3)  ;;  %v189_v7 = vld [vmem:[%s1714_s30 + $0x88] sm:$0xff] (%p55_p3)  ;;  %180 = vst [vmem:[%s1722_s5] sm:$0xff] (%p55_p3), %v179_v2 }
  0x14   : > { %182 = vst [vmem:[%s1722_s5 + $0x8] sm:$0xff] %v181_v3  ;;  %184 = vst [vmem:[%s1722_s5 + $0x10] sm:$0xff] %v183_v4  ;;  %v191_v8 = vld [vmem:[%s1714_s30 + $0x90] sm:$0xff]  ;;  %v193_v9 = vld [vmem:[%s1714_s30 + $0x98] sm:$0xff] }
  0x15   : > { %186 = vst [vmem:[%s1722_s5 + $0x18] sm:$0xff] %v185_v5  ;;  %188 = vst [vmem:[%s1722_s5 + $0x20] sm:$0xff] %v187_v6  ;;  %v195_v10 = vld [vmem:[%s1714_s30 + $0x100] sm:$0xff]  ;;  %v197_v11 = vld [vmem:[%s1714_s30 + $0x108] sm:$0xff] }
  0x16   : > { %190 = vst [vmem:[%s1722_s5 + $0x28] sm:$0xff] %v189_v7  ;;  %192 = vst [vmem:[%s1722_s5 + $0x30] sm:$0xff] %v191_v8  ;;  %v199_v12 = vld [vmem:[%s1714_s30 + $0x110] sm:$0xff]  ;;  %v201_v13 = vld [vmem:[%s1714_s30 + $0x118] sm:$0xff] }
  0x17   : > { %194 = vst [vmem:[%s1722_s5 + $0x38] sm:$0xff] %v193_v9  ;;  %196 = vst [vmem:[%s1722_s5 + $0x40] sm:$0xff] %v195_v10  ;;  %v203_v14 = vld [vmem:[%s1714_s30 + $0x180] sm:$0xff]  ;;  %v205_v15 = vld [vmem:[%s1714_s30 + $0x188] sm:$0xff] }
  0x18   : > { %198 = vst [vmem:[%s1722_s5 + $0x48] sm:$0xff] %v197_v11  ;;  %200 = vst [vmem:[%s1722_s5 + $0x50] sm:$0xff] %v199_v12  ;;  %v207_v16 = vld [vmem:[%s1714_s30 + $0x190] sm:$0xff]  ;;  %v209_v17 = vld [vmem:[%s1714_s30 + $0x198] sm:$0xff] }
  0x19   : > { %202 = vst [vmem:[%s1722_s5 + $0x58] sm:$0xff] %v201_v13  ;;  %204 = vst [vmem:[%s1722_s5 + $0x60] sm:$0xff] %v203_v14  ;;  %v211_v18 = vld [vmem:[%s1714_s30 + $0x200] sm:$0xff]  ;;  %v213_v19 = vld [vmem:[%s1714_s30 + $0x208] sm:$0xff] }
  0x1a   : > { %206 = vst [vmem:[%s1722_s5 + $0x68] sm:$0xff] %v205_v15  ;;  %208 = vst [vmem:[%s1722_s5 + $0x70] sm:$0xff] %v207_v16  ;;  %v215_v20 = vld [vmem:[%s1714_s30 + $0x210] sm:$0xff]  ;;  %v217_v21 = vld [vmem:[%s1714_s30 + $0x218] sm:$0xff] }
  0x1b   : > { %210 = vst [vmem:[%s1722_s5 + $0x78] sm:$0xff] %v209_v17  ;;  %212 = vst [vmem:[%s1722_s5 + $0x80] sm:$0xff] %v211_v18  ;;  %v219_v22 = vld [vmem:[%s1714_s30 + $0x280] sm:$0xff]  ;;  %v221_v23 = vld [vmem:[%s1714_s30 + $0x288] sm:$0xff] }
  0x1c   : > { %214 = vst [vmem:[%s1722_s5 + $0x88] sm:$0xff] %v213_v19  ;;  %216 = vst [vmem:[%s1722_s5 + $0x90] sm:$0xff] %v215_v20  ;;  %v223_v24 = vld [vmem:[%s1714_s30 + $0x290] sm:$0xff]  ;;  %v225_v25 = vld [vmem:[%s1714_s30 + $0x298] sm:$0xff] }
  0x1d   : > { %218 = vst [vmem:[%s1722_s5 + $0x98] sm:$0xff] %v217_v21  ;;  %220 = vst [vmem:[%s1722_s5 + $0xa0] sm:$0xff] %v219_v22  ;;  %v227_v26 = vld [vmem:[%s1714_s30 + $0x300] sm:$0xff]  ;;  %v229_v27 = vld [vmem:[%s1714_s30 + $0x308] sm:$0xff] }
  0x1e   : > { %222 = vst [vmem:[%s1722_s5 + $0xa8] sm:$0xff] %v221_v23  ;;  %224 = vst [vmem:[%s1722_s5 + $0xb0] sm:$0xff] %v223_v24  ;;  %v231_v28 = vld [vmem:[%s1714_s30 + $0x310] sm:$0xff]  ;;  %v233_v29 = vld [vmem:[%s1714_s30 + $0x318] sm:$0xff] }
  0x1f   : > { %226 = vst [vmem:[%s1722_s5 + $0xb8] sm:$0xff] %v225_v25  ;;  %228 = vst [vmem:[%s1722_s5 + $0xc0] sm:$0xff] %v227_v26  ;;  %v235_v30 = vld [vmem:[%s1714_s30 + $0x380] sm:$0xff]  ;;  %v237_v31 = vld [vmem:[%s1714_s30 + $0x388] sm:$0xff] }
  0x20   : > { %230 = vst [vmem:[%s1722_s5 + $0xc8] sm:$0xff] %v229_v27  ;;  %232 = vst [vmem:[%s1722_s5 + $0xd0] sm:$0xff] %v231_v28  ;;  %v239_v32 = vld [vmem:[%s1714_s30 + $0x390] sm:$0xff]  ;;  %v241_v33 = vld [vmem:[%s1714_s30 + $0x398] sm:$0xff] }
  0x21   : > { %234 = vst [vmem:[%s1722_s5 + $0xd8] sm:$0xff] %v233_v29  ;;  %236 = vst [vmem:[%s1722_s5 + $0xe0] sm:$0xff] %v235_v30  ;;  %v243_v34 = vld [vmem:[%s1714_s30 + $0x400] sm:$0xff]  ;;  %v245_v35 = vld [vmem:[%s1714_s30 + $0x408] sm:$0xff] }
  0x22   : > { %238 = vst [vmem:[%s1722_s5 + $0xe8] sm:$0xff] %v237_v31  ;;  %240 = vst [vmem:[%s1722_s5 + $0xf0] sm:$0xff] %v239_v32  ;;  %v247_v36 = vld [vmem:[%s1714_s30 + $0x410] sm:$0xff]  ;;  %v249_v37 = vld [vmem:[%s1714_s30 + $0x418] sm:$0xff] }
  0x23   : > { %242 = vst [vmem:[%s1722_s5 + $0xf8] sm:$0xff] %v241_v33  ;;  %244 = vst [vmem:[%s1722_s5 + $0x100] sm:$0xff] %v243_v34  ;;  %v251_v38 = vld [vmem:[%s1714_s30 + $0x480] sm:$0xff]  ;;  %v253_v39 = vld [vmem:[%s1714_s30 + $0x488] sm:$0xff] }
  0x24   : > { %246 = vst [vmem:[%s1722_s5 + $0x108] sm:$0xff] %v245_v35  ;;  %248 = vst [vmem:[%s1722_s5 + $0x110] sm:$0xff] %v247_v36  ;;  %v255_v40 = vld [vmem:[%s1714_s30 + $0x490] sm:$0xff]  ;;  %v257_v41 = vld [vmem:[%s1714_s30 + $0x498] sm:$0xff] }
  0x25   : > { %250 = vst [vmem:[%s1722_s5 + $0x118] sm:$0xff] %v249_v37  ;;  %252 = vst [vmem:[%s1722_s5 + $0x120] sm:$0xff] %v251_v38  ;;  %v259_v42 = vld [vmem:[%s1714_s30 + $0x500] sm:$0xff]  ;;  %v261_v43 = vld [vmem:[%s1714_s30 + $0x508] sm:$0xff] }
  0x26   : > { %254 = vst [vmem:[%s1722_s5 + $0x128] sm:$0xff] %v253_v39  ;;  %256 = vst [vmem:[%s1722_s5 + $0x130] sm:$0xff] %v255_v40  ;;  %v263_v44 = vld [vmem:[%s1714_s30 + $0x510] sm:$0xff]  ;;  %v265_v45 = vld [vmem:[%s1714_s30 + $0x518] sm:$0xff] }
  0x27   : > { %258 = vst [vmem:[%s1722_s5 + $0x138] sm:$0xff] %v257_v41  ;;  %260 = vst [vmem:[%s1722_s5 + $0x140] sm:$0xff] %v259_v42  ;;  %v267_v46 = vld [vmem:[%s1714_s30 + $0x580] sm:$0xff]  ;;  %v269_v47 = vld [vmem:[%s1714_s30 + $0x588] sm:$0xff] }
  0x28   : > { %262 = vst [vmem:[%s1722_s5 + $0x148] sm:$0xff] %v261_v43  ;;  %264 = vst [vmem:[%s1722_s5 + $0x150] sm:$0xff] %v263_v44  ;;  %v271_v48 = vld [vmem:[%s1714_s30 + $0x590] sm:$0xff]  ;;  %v273_v49 = vld [vmem:[%s1714_s30 + $0x598] sm:$0xff] }
  0x29   : > { %266 = vst [vmem:[%s1722_s5 + $0x158] sm:$0xff] %v265_v45  ;;  %268 = vst [vmem:[%s1722_s5 + $0x160] sm:$0xff] %v267_v46  ;;  %v275_v50 = vld [vmem:[%s1714_s30 + $0x600] sm:$0xff]  ;;  %v277_v51 = vld [vmem:[%s1714_s30 + $0x608] sm:$0xff] }
  0x2a   : > { %270 = vst [vmem:[%s1722_s5 + $0x168] sm:$0xff] %v269_v47  ;;  %272 = vst [vmem:[%s1722_s5 + $0x170] sm:$0xff] %v271_v48  ;;  %v279_v52 = vld [vmem:[%s1714_s30 + $0x610] sm:$0xff]  ;;  %v281_v53 = vld [vmem:[%s1714_s30 + $0x618] sm:$0xff] }
  0x2b   : > { %274 = vst [vmem:[%s1722_s5 + $0x178] sm:$0xff] %v273_v49  ;;  %276 = vst [vmem:[%s1722_s5 + $0x180] sm:$0xff] %v275_v50  ;;  %v283_v54 = vld [vmem:[%s1714_s30 + $0x680] sm:$0xff]  ;;  %v285_v55 = vld [vmem:[%s1714_s30 + $0x688] sm:$0xff] }
  0x2c   : > { %278 = vst [vmem:[%s1722_s5 + $0x188] sm:$0xff] %v277_v51  ;;  %280 = vst [vmem:[%s1722_s5 + $0x190] sm:$0xff] %v279_v52  ;;  %v287_v56 = vld [vmem:[%s1714_s30 + $0x690] sm:$0xff]  ;;  %v289_v57 = vld [vmem:[%s1714_s30 + $0x698] sm:$0xff] }
  0x2d   : > { %282 = vst [vmem:[%s1722_s5 + $0x198] sm:$0xff] %v281_v53  ;;  %284 = vst [vmem:[%s1722_s5 + $0x1a0] sm:$0xff] %v283_v54  ;;  %v291_v58 = vld [vmem:[%s1714_s30 + $0x700] sm:$0xff]  ;;  %v293_v59 = vld [vmem:[%s1714_s30 + $0x708] sm:$0xff] }
  0x2e   : > { %286 = vst [vmem:[%s1722_s5 + $0x1a8] sm:$0xff] %v285_v55  ;;  %288 = vst [vmem:[%s1722_s5 + $0x1b0] sm:$0xff] %v287_v56  ;;  %v295_v60 = vld [vmem:[%s1714_s30 + $0x710] sm:$0xff]  ;;  %v297_v61 = vld [vmem:[%s1714_s30 + $0x718] sm:$0xff] }
  0x2f   : > { %290 = vst [vmem:[%s1722_s5 + $0x1b8] sm:$0xff] %v289_v57  ;;  %292 = vst [vmem:[%s1722_s5 + $0x1c0] sm:$0xff] %v291_v58  ;;  %v299_v62 = vld [vmem:[%s1714_s30 + $0x780] sm:$0xff]  ;;  %v301_v63 = vld [vmem:[%s1714_s30 + $0x788] sm:$0xff] }
  0x30   : > { %294 = vst [vmem:[%s1722_s5 + $0x1c8] sm:$0xff] %v293_v59  ;;  %296 = vst [vmem:[%s1722_s5 + $0x1d0] sm:$0xff] %v295_v60  ;;  %v303_v0 = vld [vmem:[%s1714_s30 + $0x790] sm:$0xff]  ;;  %v305_v1 = vld [vmem:[%s1714_s30 + $0x798] sm:$0xff] }
  0x31   : > { %298 = vst [vmem:[%s1722_s5 + $0x1d8] sm:$0xff] %v297_v61  ;;  %300 = vst [vmem:[%s1722_s5 + $0x1e0] sm:$0xff] %v299_v62  ;;  %v307_v2 = vld [vmem:[%s1714_s30 + $0x800] sm:$0xff]  ;;  %v309_v3 = vld [vmem:[%s1714_s30 + $0x808] sm:$0xff] }
  0x32   : > { %302 = vst [vmem:[%s1722_s5 + $0x1e8] sm:$0xff] %v301_v63  ;;  %304 = vst [vmem:[%s1722_s5 + $0x1f0] sm:$0xff] %v303_v0  ;;  %v311_v4 = vld [vmem:[%s1714_s30 + $0x810] sm:$0xff]  ;;  %v313_v5 = vld [vmem:[%s1714_s30 + $0x818] sm:$0xff] }
  0x33   : > { %306 = vst [vmem:[%s1722_s5 + $0x1f8] sm:$0xff] %v305_v1  ;;  %308 = vst [vmem:[%s1722_s5 + $0x200] sm:$0xff] %v307_v2  ;;  %v315_v6 = vld [vmem:[%s1714_s30 + $0x880] sm:$0xff]  ;;  %v317_v7 = vld [vmem:[%s1714_s30 + $0x888] sm:$0xff] }
  0x34   : > { %310 = vst [vmem:[%s1722_s5 + $0x208] sm:$0xff] %v309_v3  ;;  %312 = vst [vmem:[%s1722_s5 + $0x210] sm:$0xff] %v311_v4  ;;  %v319_v8 = vld [vmem:[%s1714_s30 + $0x890] sm:$0xff]  ;;  %v321_v9 = vld [vmem:[%s1714_s30 + $0x898] sm:$0xff] }
  0x35   : > { %314 = vst [vmem:[%s1722_s5 + $0x218] sm:$0xff] %v313_v5  ;;  %316 = vst [vmem:[%s1722_s5 + $0x220] sm:$0xff] %v315_v6  ;;  %v323_v10 = vld [vmem:[%s1714_s30 + $0x900] sm:$0xff]  ;;  %v325_v11 = vld [vmem:[%s1714_s30 + $0x908] sm:$0xff] }
  0x36   : > { %318 = vst [vmem:[%s1722_s5 + $0x228] sm:$0xff] %v317_v7  ;;  %320 = vst [vmem:[%s1722_s5 + $0x230] sm:$0xff] %v319_v8  ;;  %v327_v12 = vld [vmem:[%s1714_s30 + $0x910] sm:$0xff]  ;;  %v329_v13 = vld [vmem:[%s1714_s30 + $0x918] sm:$0xff] }
  0x37   : > { %322 = vst [vmem:[%s1722_s5 + $0x238] sm:$0xff] %v321_v9  ;;  %324 = vst [vmem:[%s1722_s5 + $0x240] sm:$0xff] %v323_v10  ;;  %v331_v14 = vld [vmem:[%s1714_s30 + $0x980] sm:$0xff]  ;;  %v333_v15 = vld [vmem:[%s1714_s30 + $0x988] sm:$0xff] }
  0x38   : > { %326 = vst [vmem:[%s1722_s5 + $0x248] sm:$0xff] %v325_v11  ;;  %328 = vst [vmem:[%s1722_s5 + $0x250] sm:$0xff] %v327_v12  ;;  %v335_v16 = vld [vmem:[%s1714_s30 + $0x990] sm:$0xff]  ;;  %v337_v17 = vld [vmem:[%s1714_s30 + $0x998] sm:$0xff] }
  0x39   : > { %330 = vst [vmem:[%s1722_s5 + $0x258] sm:$0xff] %v329_v13  ;;  %332 = vst [vmem:[%s1722_s5 + $0x260] sm:$0xff] %v331_v14  ;;  %v339_v18 = vld [vmem:[%s1714_s30 + $0xa00] sm:$0xff]  ;;  %v341_v19 = vld [vmem:[%s1714_s30 + $0xa08] sm:$0xff] }
  0x3a   : > { %334 = vst [vmem:[%s1722_s5 + $0x268] sm:$0xff] %v333_v15  ;;  %336 = vst [vmem:[%s1722_s5 + $0x270] sm:$0xff] %v335_v16  ;;  %v343_v20 = vld [vmem:[%s1714_s30 + $0xa10] sm:$0xff]  ;;  %v345_v21 = vld [vmem:[%s1714_s30 + $0xa18] sm:$0xff] }
  0x3b   : > { %338 = vst [vmem:[%s1722_s5 + $0x278] sm:$0xff] %v337_v17  ;;  %340 = vst [vmem:[%s1722_s5 + $0x280] sm:$0xff] %v339_v18  ;;  %v347_v22 = vld [vmem:[%s1714_s30 + $0xa80] sm:$0xff]  ;;  %v349_v23 = vld [vmem:[%s1714_s30 + $0xa88] sm:$0xff] }
  0x3c   : > { %342 = vst [vmem:[%s1722_s5 + $0x288] sm:$0xff] %v341_v19  ;;  %344 = vst [vmem:[%s1722_s5 + $0x290] sm:$0xff] %v343_v20  ;;  %v351_v24 = vld [vmem:[%s1714_s30 + $0xa90] sm:$0xff]  ;;  %v353_v25 = vld [vmem:[%s1714_s30 + $0xa98] sm:$0xff] }
  0x3d   : > { %346 = vst [vmem:[%s1722_s5 + $0x298] sm:$0xff] %v345_v21  ;;  %348 = vst [vmem:[%s1722_s5 + $0x2a0] sm:$0xff] %v347_v22  ;;  %v355_v26 = vld [vmem:[%s1714_s30 + $0xb00] sm:$0xff]  ;;  %v357_v27 = vld [vmem:[%s1714_s30 + $0xb08] sm:$0xff] }
  0x3e   : > { %350 = vst [vmem:[%s1722_s5 + $0x2a8] sm:$0xff] %v349_v23  ;;  %352 = vst [vmem:[%s1722_s5 + $0x2b0] sm:$0xff] %v351_v24  ;;  %v359_v28 = vld [vmem:[%s1714_s30 + $0xb10] sm:$0xff]  ;;  %v361_v29 = vld [vmem:[%s1714_s30 + $0xb18] sm:$0xff] }
  0x3f   : > { %354 = vst [vmem:[%s1722_s5 + $0x2b8] sm:$0xff] %v353_v25  ;;  %356 = vst [vmem:[%s1722_s5 + $0x2c0] sm:$0xff] %v355_v26  ;;  %v363_v30 = vld [vmem:[%s1714_s30 + $0xb80] sm:$0xff]  ;;  %v365_v31 = vld [vmem:[%s1714_s30 + $0xb88] sm:$0xff] }
  0x40   : > { %358 = vst [vmem:[%s1722_s5 + $0x2c8] sm:$0xff] %v357_v27  ;;  %360 = vst [vmem:[%s1722_s5 + $0x2d0] sm:$0xff] %v359_v28  ;;  %v367_v32 = vld [vmem:[%s1714_s30 + $0xb90] sm:$0xff]  ;;  %v369_v33 = vld [vmem:[%s1714_s30 + $0xb98] sm:$0xff] }
  0x41   : > { %362 = vst [vmem:[%s1722_s5 + $0x2d8] sm:$0xff] %v361_v29  ;;  %364 = vst [vmem:[%s1722_s5 + $0x2e0] sm:$0xff] %v363_v30  ;;  %v371_v34 = vld [vmem:[%s1714_s30 + $0xc00] sm:$0xff]  ;;  %v373_v35 = vld [vmem:[%s1714_s30 + $0xc08] sm:$0xff] }
  0x42   : > { %366 = vst [vmem:[%s1722_s5 + $0x2e8] sm:$0xff] %v365_v31  ;;  %368 = vst [vmem:[%s1722_s5 + $0x2f0] sm:$0xff] %v367_v32  ;;  %v375_v36 = vld [vmem:[%s1714_s30 + $0xc10] sm:$0xff]  ;;  %v377_v37 = vld [vmem:[%s1714_s30 + $0xc18] sm:$0xff] }
  0x43   : > { %370 = vst [vmem:[%s1722_s5 + $0x2f8] sm:$0xff] %v369_v33  ;;  %372 = vst [vmem:[%s1722_s5 + $0x300] sm:$0xff] %v371_v34  ;;  %v379_v38 = vld [vmem:[%s1714_s30 + $0xc80] sm:$0xff]  ;;  %v381_v39 = vld [vmem:[%s1714_s30 + $0xc88] sm:$0xff] }
  0x44   : > { %374 = vst [vmem:[%s1722_s5 + $0x308] sm:$0xff] %v373_v35  ;;  %376 = vst [vmem:[%s1722_s5 + $0x310] sm:$0xff] %v375_v36  ;;  %v383_v40 = vld [vmem:[%s1714_s30 + $0xc90] sm:$0xff]  ;;  %v385_v41 = vld [vmem:[%s1714_s30 + $0xc98] sm:$0xff] }
  0x45   : > { %378 = vst [vmem:[%s1722_s5 + $0x318] sm:$0xff] %v377_v37  ;;  %380 = vst [vmem:[%s1722_s5 + $0x320] sm:$0xff] %v379_v38  ;;  %v387_v42 = vld [vmem:[%s1714_s30 + $0xd00] sm:$0xff]  ;;  %v389_v43 = vld [vmem:[%s1714_s30 + $0xd08] sm:$0xff] }
  0x46   : > { %382 = vst [vmem:[%s1722_s5 + $0x328] sm:$0xff] %v381_v39  ;;  %384 = vst [vmem:[%s1722_s5 + $0x330] sm:$0xff] %v383_v40  ;;  %v391_v44 = vld [vmem:[%s1714_s30 + $0xd10] sm:$0xff]  ;;  %v393_v45 = vld [vmem:[%s1714_s30 + $0xd18] sm:$0xff] }
  0x47   : > { %386 = vst [vmem:[%s1722_s5 + $0x338] sm:$0xff] %v385_v41  ;;  %388 = vst [vmem:[%s1722_s5 + $0x340] sm:$0xff] %v387_v42 }
  0x48   : > { %390 = vst [vmem:[%s1722_s5 + $0x348] sm:$0xff] %v389_v43  ;;  %392 = vst [vmem:[%s1722_s5 + $0x350] sm:$0xff] %v391_v44 }
  0x49   : > { %394 = vst [vmem:[%s1722_s5 + $0x358] sm:$0xff] %v393_v45 }
  0x4a PF: > { %p1460_p5 = scmp.ge.s32.totalorder %s1645_s21, 1  ;;  %p399_p6 = scmp.lt.s32.totalorder %s1645_s21, 5 }
  0x4c   : > { %p400_p7 = pnand %p1460_p5, %p399_p6 }
  0x4d   : > { %s406_s6 = sand.u32 (!%p400_p7), 1, %s1637_s19   ;;  %s1461_s11 = sshll.u32 (!%p400_p7), %s1454_s2, 3 }
  0x4e   : > { %403 = sbr.rel (%p400_p7) target bundleno = 411 (0x19b), region = 55  ;;  %p432_p8 = scmp.lt.s32.totalorder (!%p400_p7), %s1461_s11, 31 }
  0x4f   : > { %s1587_s7 = smul.u32 (!%p400_p7), 864, %s406_s6 }
  0x51   : > { %s1944_s10 = scalar_lea.vmem (!%p400_p7), [#allocation4], %s1587_s7 }
  0x53   : > { %v558_v46 = vlaneseq  ;;  %v1940_v47 = vld.sshfl [vmem:[%s2108_s0] sm:$0x11 pattern:$0x75316420]  ;;  %v1647_v48 = vmov 1966171168  }
  0x54   : > { %v556_v49 = vunpack.c.l.s4 %v1647_v48  ;;  %v1648_v50 = vmov 0   ;;  %v1303_v51 = vld [vmem:[#allocation2] sm:$0x1]  ;;  %v1321_v53 = vld [vmem:[#allocation3] sm:$0x1]  ;;  %v494_v54 = vld [vmem:[%s1944_s10 + $0x1c0] sm:$0xff]  ;;  %v554_v9 = vcombine.high %v1940_v47, %v1940_v47 }
  0x55   : > { %1614 = vset.pattern.permute.xlu0 %v1648_v50  ;;  %v1942_v52 = vshrl.u32 %v558_v46, 7  ;;  %v498_v55 = vld [vmem:[%s1944_s10 + $0x1e0] sm:$0xff]  ;;  %v495_v56 = vld [vmem:[%s1944_s10 + $0x1c8] sm:$0xff]  ;;  %vm1110_vm0 = vcmask 719872   ;;  %vm1114_vm1 = vcmask 1043456   ;;  %s2117_s11 = smov (!%p432_p8, %s1461_s11), 31 }
  0x56   : > { %1306 = vperm.xlu0 %1614, %v1303_v51   ;;  %v557_v57 = vunpack.c.0.s8 %v556_v49  ;;  %v1520_v58 = vcombine.high %v494_v54, %v498_v55  ;;  %v499_v59 = vld [vmem:[%s1944_s10 + $0x1e8] sm:$0xff]  ;;  %v1519_v60 = vcombine.low %v494_v54, %v498_v55  ;;  %v486_v61 = vld [vmem:[%s1944_s10 + $0x180] sm:$0xff]  ;;  %s434_s14 = scalar_lea.vmem %s2111_s4, %s2117_s11 }
  0x57   : > { %v490_v62 = vld [vmem:[%s1944_s10 + $0x1a0] sm:$0xff]  ;;  %v1522_v63 = vcombine.high %v495_v56, %v499_v59  ;;  %v1521_v0 = vcombine.low %v495_v56, %v499_v59  ;;  %v487_v2 = vld [vmem:[%s1944_s10 + $0x188] sm:$0xff] }
  0x58   : > { %v1512_v1 = vcombine.high %v486_v61, %v490_v62  ;;  %v491_v3 = vld [vmem:[%s1944_s10 + $0x1a8] sm:$0xff]  ;;  %v478_v4 = vld [vmem:[%s1944_s10 + $0x140] sm:$0xff]  ;;  %1139 = vmatprep.subr.bf16.mxu0 %v1520_v58  ;;  %v1961_v10 = vsub.s32 %v557_v57, %v1942_v52  ;;  %v1511_v11 = vcombine.low %v486_v61, %v490_v62 }
  0x59   : > { %v1514_v5 = vcombine.high %v487_v2, %v491_v3  ;;  %v482_v6 = vld [vmem:[%s1944_s10 + $0x160] sm:$0xff]  ;;  %v479_v7 = vld [vmem:[%s1944_s10 + $0x148] sm:$0xff]  ;;  %1180 = vmatprep.subr.bf16.mxu1 %v1522_v63  ;;  %1140 = vmatpush1.bf16.msra.mxu0 %v1519_v60  ;;  %v1513_v12 = vcombine.low %v487_v2, %v491_v3 }
  0x5a   : > { %v483_v8 = vld [vmem:[%s1944_s10 + $0x168] sm:$0xff]  ;;  %1324 = vperm.xlu0 %1614, %v1321_v53   ;;  %1181 = vmatpush1.bf16.msra.mxu1 %v1521_v0  ;;  %v1504_v13 = vcombine.high %v478_v4, %v482_v6  ;;  %v470_v15 = vld [vmem:[%s1944_s10 + $0x100] sm:$0xff]  ;;  %v1968_v19 = vrot.slane %v554_v9, %v1961_v10  ;;  %v1503_v20 = vcombine.low %v478_v4, %v482_v6 }
  0x5b   : > { %1141 = vmatprep.subr.bf16.mxu0 %v1512_v1  ;;  %1182 = vmatprep.subr.bf16.mxu1 %v1514_v5  ;;  %v1506_v14 = vcombine.high %v479_v7, %v483_v8  ;;  %v474_v16 = vld [vmem:[%s1944_s10 + $0x120] sm:$0xff]  ;;  %v471_v17 = vld [vmem:[%s1944_s10 + $0x108] sm:$0xff]  ;;  %v1505_v21 = vcombine.low %v479_v7, %v483_v8 }
  0x5c   : > { %v475_v18 = vld [vmem:[%s1944_s10 + $0x128] sm:$0xff]  ;;  %v1496_v22 = vcombine.high %v470_v15, %v474_v16  ;;  %v462_v24 = vld [vmem:[%s1944_s10 + $0xc0] sm:$0xff]  ;;  %1576 = vmatprep.mubr.msk.bf16.mxu0 %vm1110_vm0, %v1968_v19  ;;  %v1495_v28 = vcombine.low %v470_v15, %v474_v16  ;;  %1578 = vmatprep.mubr.msk.bf16.mxu1 %vm1110_vm0, %v1968_v19 }
  0x5d   : > { %1142 = vmatpush1.bf16.msra.mxu0 %v1511_v11  ;;  %v1498_v23 = vcombine.high %v471_v17, %v475_v18  ;;  %v466_v25 = vld [vmem:[%s1944_s10 + $0xe0] sm:$0xff]  ;;  %v463_v26 = vld [vmem:[%s1944_s10 + $0xc8] sm:$0xff]  ;;  %v1497_v29 = vcombine.low %v471_v17, %v475_v18 }
  0x5e   : > { %1183 = vmatpush1.bf16.msra.mxu1 %v1513_v12  ;;  %1143 = vmatprep.subr.bf16.mxu0 %v1504_v13  ;;  %v467_v27 = vld [vmem:[%s1944_s10 + $0xe8] sm:$0xff]  ;;  %v1488_v30 = vcombine.high %v462_v24, %v466_v25  ;;  %v454_v32 = vld [vmem:[%s1944_s10 + $0x80] sm:$0xff]  ;;  %v1487_v36 = vcombine.low %v462_v24, %v466_v25 }
  0x5f   : > { %1184 = vmatprep.subr.bf16.mxu1 %v1506_v14  ;;  %v1490_v31 = vcombine.high %v463_v26, %v467_v27  ;;  %v458_v33 = vld [vmem:[%s1944_s10 + $0xa0] sm:$0xff]  ;;  %v455_v34 = vld [vmem:[%s1944_s10 + $0x88] sm:$0xff]  ;;  %v1489_v37 = vcombine.low %v463_v26, %v467_v27 }
  0x60   : > { %v459_v35 = vld [vmem:[%s1944_s10 + $0xa8] sm:$0xff]  ;;  %v1480_v38 = vcombine.high %v454_v32, %v458_v33  ;;  %v446_v40 = vld [vmem:[%s1944_s10 + $0x40] sm:$0xff]  ;;  %v1479_v44 = vcombine.low %v454_v32, %v458_v33 }
  0x61   : > { %1144 = vmatpush1.bf16.msra.mxu0 %v1503_v20  ;;  %v1482_v39 = vcombine.high %v455_v34, %v459_v35  ;;  %v450_v41 = vld [vmem:[%s1944_s10 + $0x60] sm:$0xff]  ;;  %v447_v42 = vld [vmem:[%s1944_s10 + $0x48] sm:$0xff]  ;;  %v1481_v45 = vcombine.low %v455_v34, %v459_v35 }
  0x62   : > { %1185 = vmatpush1.bf16.msra.mxu1 %v1505_v21  ;;  %1145 = vmatprep.subr.bf16.mxu0 %v1496_v22  ;;  %v451_v43 = vld [vmem:[%s1944_s10 + $0x68] sm:$0xff]  ;;  %v1472_v46 = vcombine.high %v446_v40, %v450_v41  ;;  %v438_v49 = vld [vmem:[%s1944_s10] sm:$0xff]  ;;  %v1471_v54 = vcombine.low %v446_v40, %v450_v41 }
  0x63   : > { %1186 = vmatprep.subr.bf16.mxu1 %v1498_v23  ;;  %v1474_v48 = vcombine.high %v447_v42, %v451_v43  ;;  %v442_v50 = vld [vmem:[%s1944_s10 + $0x20] sm:$0xff]  ;;  %v439_v51 = vld [vmem:[%s1944_s10 + $0x8] sm:$0xff]  ;;  %v1473_v55 = vcombine.low %v447_v42, %v451_v43 }
  0x64   : > { %v443_v53 = vld [vmem:[%s1944_s10 + $0x28] sm:$0xff]  ;;  %v1464_v56 = vcombine.high %v438_v49, %v442_v50  ;;  %v542_v58 = vld [vmem:[%s1944_s10 + $0x340] sm:$0xff]  ;;  %v1463_v60 = vcombine.low %v438_v49, %v442_v50 }
  0x65   : > { %1146 = vmatpush1.bf16.msra.mxu0 %v1495_v28  ;;  %v1466_v57 = vcombine.high %v439_v51, %v443_v53  ;;  %v543_v59 = vld [vmem:[%s1944_s10 + $0x348] sm:$0xff]  ;;  %v1465_v61 = vcombine.low %v439_v51, %v443_v53  ;;  %v1568_v62 = vcombine.high %v542_v58, %v542_v58  ;;  %v1567_v63 = vcombine.low %v542_v58, %v542_v58  ;;  %v534_v2 = vld [vmem:[%s1944_s10 + $0x300] sm:$0xff]  ;;  %v493_v58 = vld [vmem:[%s1944_s10 + $0x1b8] sm:$0xff] }
  0x66   : > { %1187 = vmatpush1.bf16.msra.mxu1 %v1497_v29  ;;  %1147 = vmatprep.subr.bf16.mxu0 %v1488_v30  ;;  %v1570_v0 = vcombine.high %v543_v59, %v543_v59  ;;  %v1569_v1 = vcombine.low %v543_v59, %v543_v59  ;;  %v538_v3 = vld [vmem:[%s1944_s10 + $0x320] sm:$0xff]  ;;  %v535_v4 = vld [vmem:[%s1944_s10 + $0x308] sm:$0xff] }
  0x67   : > { %1188 = vmatprep.subr.bf16.mxu1 %v1490_v31  ;;  %v539_v5 = vld [vmem:[%s1944_s10 + $0x328] sm:$0xff]  ;;  %v1116_v6 = vsel %vm1114_vm1, %v1567_v63, 0  ;;  %v1560_v7 = vcombine.high %v534_v2, %v538_v3  ;;  %v526_v11 = vld [vmem:[%s1944_s10 + $0x2c0] sm:$0xff]  ;;  %v1559_v15 = vcombine.low %v534_v2, %v538_v3  ;;  %v480_v63 = vld [vmem:[%s1944_s10 + $0x150] sm:$0xff] }
  0x68   : > { %v1122_v8 = vsel %vm1114_vm1, %v1569_v1, 0  ;;  %v1562_v9 = vcombine.high %v535_v4, %v539_v5  ;;  %v530_v12 = vld [vmem:[%s1944_s10 + $0x2e0] sm:$0xff]  ;;  %v527_v13 = vld [vmem:[%s1944_s10 + $0x2c8] sm:$0xff]  ;;  %v1561_v16 = vcombine.low %v535_v4, %v539_v5  ;;  %v485_v1 = vld [vmem:[%s1944_s10 + $0x178] sm:$0xff] }
  0x69   : > { %1148 = vmatpush1.bf16.msra.mxu0 %v1487_v36  ;;  %v531_v14 = vld [vmem:[%s1944_s10 + $0x2e8] sm:$0xff]  ;;  %v1552_v17 = vcombine.high %v526_v11, %v530_v12  ;;  %v518_v20 = vld [vmem:[%s1944_s10 + $0x280] sm:$0xff]  ;;  %v1551_v24 = vcombine.low %v526_v11, %v530_v12 }
  0x6a   : > { %1189 = vmatpush1.bf16.msra.mxu1 %v1489_v37  ;;  %1149 = vmatprep.subr.bf16.mxu0 %v1480_v38  ;;  %v1554_v18 = vcombine.high %v527_v13, %v531_v14  ;;  %v522_v21 = vld [vmem:[%s1944_s10 + $0x2a0] sm:$0xff]  ;;  %v519_v22 = vld [vmem:[%s1944_s10 + $0x288] sm:$0xff]  ;;  %v1553_v25 = vcombine.low %v527_v13, %v531_v14 }
  0x6b   : > { %1190 = vmatprep.subr.bf16.mxu1 %v1482_v39  ;;  %v523_v23 = vld [vmem:[%s1944_s10 + $0x2a8] sm:$0xff]  ;;  %v1544_v26 = vcombine.high %v518_v20, %v522_v21  ;;  %v510_v28 = vld [vmem:[%s1944_s10 + $0x240] sm:$0xff]  ;;  %v1543_v32 = vcombine.low %v518_v20, %v522_v21 }
  0x6c   : > { %v1546_v27 = vcombine.high %v519_v22, %v523_v23  ;;  %v514_v29 = vld [vmem:[%s1944_s10 + $0x260] sm:$0xff]  ;;  %v511_v30 = vld [vmem:[%s1944_s10 + $0x248] sm:$0xff]  ;;  %v1545_v33 = vcombine.low %v519_v22, %v523_v23  ;;  %v456_v23 = vld [vmem:[%s1944_s10 + $0x90] sm:$0xff] }
  0x6d   : > { %1150 = vmatpush1.bf16.msra.mxu0 %v1479_v44  ;;  %v515_v31 = vld [vmem:[%s1944_s10 + $0x268] sm:$0xff]  ;;  %v1536_v34 = vcombine.high %v510_v28, %v514_v29  ;;  %v502_v36 = vld [vmem:[%s1944_s10 + $0x200] sm:$0xff]  ;;  %v1535_v40 = vcombine.low %v510_v28, %v514_v29  ;;  %v496_v44 = vld [vmem:[%s1944_s10 + $0x1d0] sm:$0xff] }
  0x6e   : > { %1191 = vmatpush1.bf16.msra.mxu1 %v1481_v45  ;;  %1151 = vmatprep.subr.bf16.mxu0 %v1472_v46  ;;  %v1538_v35 = vcombine.high %v511_v30, %v515_v31  ;;  %v506_v37 = vld [vmem:[%s1944_s10 + $0x220] sm:$0xff]  ;;  %v503_v38 = vld [vmem:[%s1944_s10 + $0x208] sm:$0xff]  ;;  %v1537_v41 = vcombine.low %v511_v30, %v515_v31  ;;  %v500_v45 = vld [vmem:[%s1944_s10 + $0x1f0] sm:$0xff] }
  0x6f   : > { %1192 = vmatprep.subr.bf16.mxu1 %v1474_v48  ;;  %v507_v39 = vld [vmem:[%s1944_s10 + $0x228] sm:$0xff]  ;;  %v1528_v42 = vcombine.high %v502_v36, %v506_v37  ;;  %v497_v46 = vld [vmem:[%s1944_s10 + $0x1d8] sm:$0xff]  ;;  %v1527_v49 = vcombine.low %v502_v36, %v506_v37  ;;  %v1524_v51 = vcombine.high %v496_v44, %v500_v45  ;;  %v1523_v59 = vcombine.low %v496_v44, %v500_v45  ;;  %v448_v31 = vld [vmem:[%s1944_s10 + $0x50] sm:$0xff] }
  0x70   : > { %v1530_v43 = vcombine.high %v503_v38, %v507_v39  ;;  %v501_v48 = vld [vmem:[%s1944_s10 + $0x1f8] sm:$0xff]  ;;  %v1529_v50 = vcombine.low %v503_v38, %v507_v39  ;;  %v440_v39 = vld [vmem:[%s1944_s10 + $0x10] sm:$0xff] }
  0x71   : > { %1152 = vmatpush1.bf16.msra.mxu0 %v1471_v54  ;;  %v1526_v53 = vcombine.high %v497_v46, %v501_v48  ;;  %v488_v54 = vld [vmem:[%s1944_s10 + $0x190] sm:$0xff] }
  0x72   : > { %1193 = vmatpush1.bf16.msra.mxu1 %v1473_v55  ;;  %1153 = vmatprep.subr.bf16.mxu0 %v1464_v56  ;;  %v492_v55 = vld [vmem:[%s1944_s10 + $0x1b0] sm:$0xff]  ;;  %v2024_v56 = vrot.slane %v1940_v47, %v1961_v10  ;;  %v481_v47 = vld [vmem:[%s1944_s10 + $0x158] sm:$0xff] }
  0x73   : > { %1194 = vmatprep.subr.bf16.mxu1 %v1466_v57  ;;  %v489_v57 = vld [vmem:[%s1944_s10 + $0x198] sm:$0xff]  ;;  %v1515_v2 = vcombine.low %v488_v54, %v492_v55  ;;  %v1510_v5 = vcombine.high %v481_v47, %v485_v1  ;;  %v1509_v12 = vcombine.low %v481_v47, %v485_v1  ;;  %v528_v1 = vld [vmem:[%s1944_s10 + $0x2d0] sm:$0xff] }
  0x74   : > { %v1517_v3 = vcombine.low %v489_v57, %v493_v58 }
  0x75   : > { %1154 = vmatpush1.bf16.msra.mxu0 %v1463_v60  ;;  %v1525_v60 = vcombine.low %v497_v46, %v501_v48  ;;  %v544_v48 = vld [vmem:[%s1944_s10 + $0x350] sm:$0xff] }
  0x76   : > { %1195 = vmatpush1.bf16.msra.mxu1 %v1465_v61  ;;  %1575 = vmatprep.subr.msk.bf16.mxu0 %vm1114_vm1, %v1568_v62  ;;  %v1516_v61 = vcombine.high %v488_v54, %v492_v55  ;;  %v1518_v62 = vcombine.high %v489_v57, %v493_v58  ;;  %v1571_v54 = vcombine.low %v544_v48, %v544_v48  ;;  %v536_v58 = vld [vmem:[%s1944_s10 + $0x310] sm:$0xff] }
  0x77   : > { %1577 = vmatprep.subr.msk.bf16.mxu1 %vm1114_vm1, %v1570_v0  ;;  %v484_v0 = vld [vmem:[%s1944_s10 + $0x170] sm:$0xff] }
  0x78   : > { %v1508_v4 = vcombine.high %v480_v63, %v484_v0  ;;  %v1507_v11 = vcombine.low %v480_v63, %v484_v0 }
  0x79   : > { %1160 = vmatpush2.bf16.msra.mxu0 %v1116_v6  ;;  %v472_v6 = vld [vmem:[%s1944_s10 + $0x110] sm:$0xff] }
  0x7a   : > { %1201 = vmatpush2.bf16.msra.mxu1 %v1122_v8  ;;  %1161 = vmatprep.subr.bf16.mxu0 %v1560_v7  ;;  %v476_v7 = vld [vmem:[%s1944_s10 + $0x130] sm:$0xff]  ;;  %v473_v8 = vld [vmem:[%s1944_s10 + $0x118] sm:$0xff] }
  0x7b   : > { %1202 = vmatprep.subr.bf16.mxu1 %v1562_v9  ;;  %v477_v9 = vld [vmem:[%s1944_s10 + $0x138] sm:$0xff]  ;;  %v1500_v13 = vcombine.high %v472_v6, %v476_v7  ;;  %v1499_v20 = vcombine.low %v472_v6, %v476_v7 }
  0x7c   : > { %v1502_v14 = vcombine.high %v473_v8, %v477_v9 }
  0x7d   : > { %1162 = vmatpush2.bf16.msra.mxu0 %v1559_v15  ;;  %v464_v15 = vld [vmem:[%s1944_s10 + $0xd0] sm:$0xff] }
  0x7e   : > { %1203 = vmatpush2.bf16.msra.mxu1 %v1561_v16  ;;  %1163 = vmatprep.subr.bf16.mxu0 %v1552_v17  ;;  %v468_v16 = vld [vmem:[%s1944_s10 + $0xf0] sm:$0xff]  ;;  %v465_v17 = vld [vmem:[%s1944_s10 + $0xd8] sm:$0xff] }
  0x7f   : > { %1204 = vmatprep.subr.bf16.mxu1 %v1554_v18  ;;  %v469_v18 = vld [vmem:[%s1944_s10 + $0xf8] sm:$0xff]  ;;  %v1492_v21 = vcombine.high %v464_v15, %v468_v16 }
  0x80   : > { %v1494_v22 = vcombine.high %v465_v17, %v469_v18  ;;  %v1493_v28 = vcombine.low %v465_v17, %v469_v18  ;;  %v512_v18 = vld [vmem:[%s1944_s10 + $0x250] sm:$0xff] }
  0x81   : > { %1164 = vmatpush2.bf16.msra.mxu0 %v1551_v24  ;;  %v460_v24 = vld [vmem:[%s1944_s10 + $0xb0] sm:$0xff] }
  0x82   : > { %1205 = vmatpush2.bf16.msra.mxu1 %v1553_v25  ;;  %1165 = vmatprep.subr.bf16.mxu0 %v1544_v26  ;;  %v457_v25 = vld [vmem:[%s1944_s10 + $0x98] sm:$0xff]  ;;  %v1484_v29 = vcombine.high %v456_v23, %v460_v24 }
  0x83   : > { %1206 = vmatprep.subr.bf16.mxu1 %v1546_v27  ;;  %v461_v26 = vld [vmem:[%s1944_s10 + $0xb8] sm:$0xff]  ;;  %v1491_v27 = vcombine.low %v464_v15, %v468_v16 }
  0x84   : > { %v1486_v30 = vcombine.high %v457_v25, %v461_v26  ;;  %v1485_v36 = vcombine.low %v457_v25, %v461_v26  ;;  %v504_v26 = vld [vmem:[%s1944_s10 + $0x210] sm:$0xff] }
  0x85   : > { %1166 = vmatpush2.bf16.msra.mxu0 %v1543_v32  ;;  %v452_v32 = vld [vmem:[%s1944_s10 + $0x70] sm:$0xff] }
  0x86   : > { %1207 = vmatpush2.bf16.msra.mxu1 %v1545_v33  ;;  %1167 = vmatprep.subr.bf16.mxu0 %v1536_v34  ;;  %v449_v33 = vld [vmem:[%s1944_s10 + $0x58] sm:$0xff]  ;;  %v1476_v37 = vcombine.high %v448_v31, %v452_v32 }
  0x87   : > { %1208 = vmatprep.subr.bf16.mxu1 %v1538_v35  ;;  %v453_v34 = vld [vmem:[%s1944_s10 + $0x78] sm:$0xff]  ;;  %v1483_v35 = vcombine.low %v456_v23, %v460_v24 }
  0x88   : > { %v1478_v38 = vcombine.high %v449_v33, %v453_v34  ;;  %v1477_v44 = vcombine.low %v449_v33, %v453_v34 }
  0x89   : > { %1168 = vmatpush2.bf16.msra.mxu0 %v1535_v40  ;;  %v444_v40 = vld [vmem:[%s1944_s10 + $0x30] sm:$0xff] }
  0x8a   : > { %1209 = vmatpush2.bf16.msra.mxu1 %v1537_v41  ;;  %1169 = vmatprep.subr.bf16.mxu0 %v1528_v42  ;;  %v441_v41 = vld [vmem:[%s1944_s10 + $0x18] sm:$0xff]  ;;  %v1468_v45 = vcombine.high %v440_v39, %v444_v40 }
  0x8b   : > { %1210 = vmatprep.subr.bf16.mxu1 %v1530_v43  ;;  %v445_v42 = vld [vmem:[%s1944_s10 + $0x38] sm:$0xff]  ;;  %v1475_v43 = vcombine.low %v448_v31, %v452_v32 }
  0x8c   : > { %v1470_v46 = vcombine.high %v441_v41, %v445_v42 }
  0x8d   : > { %1170 = vmatpush2.bf16.msra.mxu0 %v1527_v49  ;;  %v545_v49 = vld [vmem:[%s1944_s10 + $0x358] sm:$0xff] }
  0x8e   : > { %1211 = vmatpush2.bf16.msra.mxu1 %v1529_v50  ;;  %1221 = vmatprep.subr.bf16.mxu0 %v1524_v51  ;;  %v1467_v50 = vcombine.low %v440_v39, %v444_v40  ;;  %v1469_v51 = vcombine.low %v441_v41, %v445_v42  ;;  %v1574_v55 = vcombine.high %v545_v49, %v545_v49 }
  0x8f   : > { %1262 = vmatprep.subr.bf16.mxu1 %v1526_v53  ;;  %v1572_v53 = vcombine.high %v544_v48, %v544_v48  ;;  %v1573_v57 = vcombine.low %v545_v49, %v545_v49 }
  0x90   : > { %1172 = vmatmul.mubr.bf16.vlgmr.msra.gmra.mxu0 %v2024_v56 }
  0x91   : > { %1213 = vmatmul.mubr.bf16.vlgmr.msra.gmra.mxu1 %v2024_v56  ;;  %1222 = vmatpush1.bf16.msra.mxu0 %v1523_v59  ;;  %v540_v59 = vld [vmem:[%s1944_s10 + $0x330] sm:$0xff]  ;;  %v1134_v0 = vsel %vm1114_vm1, %v1573_v57, 0 }
  0x92   : > { %1263 = vmatpush1.bf16.msra.mxu1 %v1525_v60  ;;  %1223 = vmatprep.subr.bf16.mxu0 %v1516_v61  ;;  %v537_v60 = vld [vmem:[%s1944_s10 + $0x318] sm:$0xff]  ;;  %v1564_v63 = vcombine.high %v536_v58, %v540_v59 }
  0x93   : > { %1264 = vmatprep.subr.bf16.mxu1 %v1518_v62  ;;  %1580 = vmatprep.mubr.msk.bf16.mxu0 %vm1110_vm0, %v1968_v19  ;;  %v541_v61 = vld [vmem:[%s1944_s10 + $0x338] sm:$0xff]  ;;  %v1128_v62 = vsel %vm1114_vm1, %v1571_v54, 0 }
  0x94   : > { %1582 = vmatprep.mubr.msk.bf16.mxu1 %vm1110_vm0, %v1968_v19  ;;  %v1501_v19 = vcombine.low %v473_v8, %v477_v9  ;;  %v1566_v47 = vcombine.high %v537_v60, %v541_v61  ;;  %v1565_v6 = vcombine.low %v537_v60, %v541_v61  ;;  %v520_v9 = vld [vmem:[%s1944_s10 + $0x290] sm:$0xff] }
  0x95   : > { %1224 = vmatpush1.bf16.msra.mxu0 %v1515_v2  ;;  %v532_v2 = vld [vmem:[%s1944_s10 + $0x2f0] sm:$0xff] }
  0x96   : > { %1265 = vmatpush1.bf16.msra.mxu1 %v1517_v3  ;;  %1225 = vmatprep.subr.bf16.mxu0 %v1508_v4  ;;  %v529_v3 = vld [vmem:[%s1944_s10 + $0x2d8] sm:$0xff]  ;;  %v1556_v7 = vcombine.high %v528_v1, %v532_v2 }
  0x97   : > { %1266 = vmatprep.subr.bf16.mxu1 %v1510_v5  ;;  %v533_v4 = vld [vmem:[%s1944_s10 + $0x2f8] sm:$0xff]  ;;  %v1563_v5 = vcombine.low %v536_v58, %v540_v59 }
  0x98   : > { %v1558_v8 = vcombine.high %v529_v3, %v533_v4  ;;  %v1557_v15 = vcombine.low %v529_v3, %v533_v4 }
  0x99   : > { %1226 = vmatpush1.bf16.msra.mxu0 %v1507_v11  ;;  %v524_v11 = vld [vmem:[%s1944_s10 + $0x2b0] sm:$0xff] }
  0x9a   : > { %1267 = vmatpush1.bf16.msra.mxu1 %v1509_v12  ;;  %1227 = vmatprep.subr.bf16.mxu0 %v1500_v13  ;;  %v521_v12 = vld [vmem:[%s1944_s10 + $0x298] sm:$0xff]  ;;  %v1548_v16 = vcombine.high %v520_v9, %v524_v11 }
  0x9b   : > { %1268 = vmatprep.subr.bf16.mxu1 %v1502_v14  ;;  %v525_v13 = vld [vmem:[%s1944_s10 + $0x2b8] sm:$0xff]  ;;  %v1555_v14 = vcombine.low %v528_v1, %v532_v2 }
  0x9c   : > { %v1550_v17 = vcombine.high %v521_v12, %v525_v13  ;;  %v1549_v23 = vcombine.low %v521_v12, %v525_v13 }
  0x9d   : > { %1228 = vmatpush1.bf16.msra.mxu0 %v1499_v20  ;;  %v516_v20 = vld [vmem:[%s1944_s10 + $0x270] sm:$0xff] }
  0x9e   : > { %1269 = vmatpush1.bf16.msra.mxu1 %v1501_v19  ;;  %1229 = vmatprep.subr.bf16.mxu0 %v1492_v21  ;;  %v513_v19 = vld [vmem:[%s1944_s10 + $0x258] sm:$0xff]  ;;  %v1540_v24 = vcombine.high %v512_v18, %v516_v20 }
  0x9f   : > { %1270 = vmatprep.subr.bf16.mxu1 %v1494_v22  ;;  %v517_v21 = vld [vmem:[%s1944_s10 + $0x278] sm:$0xff]  ;;  %v1547_v22 = vcombine.low %v520_v9, %v524_v11 }
  0xa0   : > { %v1542_v25 = vcombine.high %v513_v19, %v517_v21  ;;  %v1541_v31 = vcombine.low %v513_v19, %v517_v21 }
  0xa1   : > { %1230 = vmatpush1.bf16.msra.mxu0 %v1491_v27  ;;  %v508_v27 = vld [vmem:[%s1944_s10 + $0x230] sm:$0xff] }
  0xa2   : > { %1271 = vmatpush1.bf16.msra.mxu1 %v1493_v28  ;;  %1231 = vmatprep.subr.bf16.mxu0 %v1484_v29  ;;  %v505_v28 = vld [vmem:[%s1944_s10 + $0x218] sm:$0xff]  ;;  %v1532_v32 = vcombine.high %v504_v26, %v508_v27  ;;  %v1531_v34 = vcombine.low %v504_v26, %v508_v27 }
  0xa3   : > { %1272 = vmatprep.subr.bf16.mxu1 %v1486_v30  ;;  %v509_v29 = vld [vmem:[%s1944_s10 + $0x238] sm:$0xff]  ;;  %v1539_v30 = vcombine.low %v512_v18, %v516_v20 }
  0xa4   : > { %v1534_v33 = vcombine.high %v505_v28, %v509_v29 }
  0xa5   : > { %1232 = vmatpush1.bf16.msra.mxu0 %v1483_v35  ;;  %v1533_v35 = vcombine.low %v505_v28, %v509_v29 }
  0xa6   : > { %1273 = vmatpush1.bf16.msra.mxu1 %v1485_v36  ;;  %1233 = vmatprep.subr.bf16.mxu0 %v1476_v37 }
  0xa7   : > { %1274 = vmatprep.subr.bf16.mxu1 %v1478_v38 }
  0xa9   : > { %1234 = vmatpush1.bf16.msra.mxu0 %v1475_v43 }
  0xaa   : > { %1275 = vmatpush1.bf16.msra.mxu1 %v1477_v44  ;;  %1235 = vmatprep.subr.bf16.mxu0 %v1468_v45  ;;  %v1311_v45 = vsub.s32 0, %v1942_v52 }
  0xab   : > { %1276 = vmatprep.subr.bf16.mxu1 %v1470_v46 }
  0xad   : > { %1236 = vmatpush1.bf16.msra.mxu0 %v1467_v50 }
  0xae   : > { %1277 = vmatpush1.bf16.msra.mxu1 %v1469_v51  ;;  %1579 = vmatprep.subr.msk.bf16.mxu0 %vm1114_vm1, %v1572_v53 }
  0xaf   : > { %1581 = vmatprep.subr.msk.bf16.mxu1 %vm1114_vm1, %v1574_v55 }
  0xb1   : > { %1242 = vmatpush2.bf16.msra.mxu0 %v1128_v62 }
  0xb2   : > { %1283 = vmatpush2.bf16.msra.mxu1 %v1134_v0  ;;  %1243 = vmatprep.subr.bf16.mxu0 %v1564_v63 }
  0xb3   : > { %1284 = vmatprep.subr.bf16.mxu1 %v1566_v47 }
  0xb5   : > { %1244 = vmatpush2.bf16.msra.mxu0 %v1563_v5 }
  0xb6   : > { %1285 = vmatpush2.bf16.msra.mxu1 %v1565_v6  ;;  %1245 = vmatprep.subr.bf16.mxu0 %v1556_v7 }
  0xb7   : > { %1286 = vmatprep.subr.bf16.mxu1 %v1558_v8 }
  0xb9   : > { %1246 = vmatpush2.bf16.msra.mxu0 %v1555_v14 }
  0xba   : > { %1287 = vmatpush2.bf16.msra.mxu1 %v1557_v15  ;;  %1247 = vmatprep.subr.bf16.mxu0 %v1548_v16 }
  0xbb   : > { %1288 = vmatprep.subr.bf16.mxu1 %v1550_v17 }
  0xbd   : > { %1248 = vmatpush2.bf16.msra.mxu0 %v1547_v22 }
  0xbe   : > { %1289 = vmatpush2.bf16.msra.mxu1 %v1549_v23  ;;  %1249 = vmatprep.subr.bf16.mxu0 %v1540_v24 }
  0xbf   : > { %1290 = vmatprep.subr.bf16.mxu1 %v1542_v25 }
  0xc1   : > { %1250 = vmatpush2.bf16.msra.mxu0 %v1539_v30 }
  0xc2   : > { %1291 = vmatpush2.bf16.msra.mxu1 %v1541_v31  ;;  %1251 = vmatprep.subr.bf16.mxu0 %v1532_v32 }
  0xc3   : > { %1292 = vmatprep.subr.bf16.mxu1 %v1534_v33 }
  0xc5   : > { %1252 = vmatpush2.bf16.msra.mxu0 %v1531_v34 }
  0xc6   : > { %1293 = vmatpush2.bf16.msra.mxu1 %v1533_v35 }
  0xc8   : > { %1254 = vmatmul.mubr.bf16.vlgmr.msra.gmra.mxu0 %v2024_v56 }
  0xc9   : > { %1295 = vmatmul.mubr.bf16.vlgmr.msra.gmra.mxu1 %v2024_v56 }
  0xd1   : > { %v1307_v44 = vpop.permute.xlu0 %1306 }
  0xd2   : > { %v1312_v46 = vrot.slane %v1307_v44, %v1311_v45 }
  0xd5   : > { %v1325_v48 = vpop.permute.xlu0 %1324 }
  0xd6   : > { %v1330_v49 = vrot.slane %v1325_v48, %v1311_v45 }
 0x150   : > { %v1173_v36 = vpop.f32.mrf.mxu0 }
 0x151   : > { %v1214_v37 = vpop.f32.mrf.mxu1  ;;  %v1313_v50 = vmul.f32 %v1312_v46, %v1173_v36 }
 0x152   : > { %v1175_v38 = vpop.f32.mrf.mxu0  ;;  %v1315_v51 = vmul.f32 %v1312_v46, %v1214_v37 }
 0x153   : > { %v1216_v39 = vpop.f32.mrf.mxu1  ;;  %v1314_v53 = vmul.f32 %v1312_v46, %v1175_v38  ;;  %v1331_v56 = vadd.f32 %v1330_v49, %v1313_v50 }
 0x154   : > { %v1177_v40 = vpop.f32.mrf.mxu0  ;;  %v1316_v54 = vmul.f32 %v1312_v46, %v1216_v39  ;;  %v1333_v57 = vadd.f32 %v1330_v49, %v1315_v51 }
 0x155   : > { %v1218_v41 = vpop.f32.mrf.mxu1  ;;  %v1332_v55 = vadd.f32 %v1330_v49, %v1314_v53 }
 0x156   : > { %v1178_v42 = vpop.f32.mrf.mxu0  ;;  %v1334_v58 = vadd.f32 %v1330_v49, %v1316_v54 }
 0x157   : > { %v1219_v43 = vpop.f32.mrf.mxu1  ;;  %v1347_v62 = vcombine.low %v1331_v56, %v1332_v55 }
 0x158   : > { %v1348_v63 = vcombine.low %v1333_v57, %v1334_v58 }
 0x159   : > { %v1357_v7 = vrot.slane %v1347_v62, %v1961_v10 }
 0x15a   : > { %v1364_v8 = vrot.slane %v1348_v63, %v1961_v10 }
 0x15c   : > { %v1379_v17 = vcombine.low %v1357_v7, %v1364_v8 }
 0x15e   : > { %v1387_v19 = vrot.slane %v1379_v17, %v1961_v10 }
 0x188   : > { %v1255_v59 = vpop.f32.mrf.mxu0 }
 0x189   : > { %v1317_v60 = vmul.f32 %v1312_v46, %v1255_v59  ;;  %v1296_v61 = vpop.f32.mrf.mxu1 }
 0x18a   : > { %v1319_v0 = vmul.f32 %v1312_v46, %v1296_v61  ;;  %v1257_v47 = vpop.f32.mrf.mxu0 }
 0x18b   : > { %v1318_v52 = vmul.f32 %v1312_v46, %v1257_v47  ;;  %v1298_v1 = vpop.f32.mrf.mxu1  ;;  %v1335_v4 = vadd.f32 %v1330_v49, %v1317_v60 }
 0x18c   : > { %v1320_v2 = vmul.f32 %v1312_v46, %v1298_v1  ;;  %v1259_v3 = vpop.f32.mrf.mxu0  ;;  %v1337_v9 = vadd.f32 %v1330_v49, %v1319_v0 }
 0x18d   : > { %v1336_v5 = vadd.f32 %v1330_v49, %v1318_v52  ;;  %v1300_v6 = vpop.f32.mrf.mxu1 }
 0x18e   : > { %v1338_v11 = vadd.f32 %v1330_v49, %v1320_v2  ;;  %v1260_v12 = vpop.f32.mrf.mxu0 }
 0x18f   : > { %v1349_v13 = vcombine.low %v1335_v4, %v1336_v5  ;;  %v1301_v14 = vpop.f32.mrf.mxu1 }
 0x190   : > { %v1350_v15 = vcombine.low %v1337_v9, %v1338_v11 }
 0x191   : > { %v1371_v16 = vrot.slane %v1349_v13, %v1961_v10 }
 0x192   : > { %v1378_v18 = vrot.slane %v1350_v15, %v1961_v10 }
 0x194   : > { %v1380_v20 = vcombine.low %v1371_v16, %v1378_v18 }
 0x196   : > { %v1394_v21 = vrot.slane %v1380_v20, %v1961_v10 }
 0x198   : > { %v1395_v22 = vcombine.low %v1387_v19, %v1394_v21 }
 0x19a   : > { %1397 = vst [vmem:[%s434_s14] sm:$0xff] %v1395_v22 }
 0x19b PF: > { %p15_p9 = scmp.ge.s32.totalorder %s1697_s3, 6   ;;  %s2113_s19 = smov %s1641_s20 }
 0x19c   : > { %s2114_s20 = smov %s1706_s24  ;;  %s2115_s21 = smov %s1697_s3 }
 0x19d   :  { %17 = sbr.rel (!%p15_p9) target bundleno = 5 (0x5), region = 94 }

// kernel: depth_net.67
= control target key start
LH: loop header
LB: loop body
LE: loop exit
PB: predicated region body
PF: predicated region fallthrough
CT: control target
= control target key end

     0   :  { %v91_v44 = vlaneseq  ;;  %s338_s0 = inlined_call_operand.vmem [shape: f32[1,16,256], index: 0, kind: input, shape index: {}]   ;;  %s339_s1 = inlined_call_operand.vmem [shape: f32[1,16,256], index: 1, kind: input, shape index: {}]   ;;  %s340_s2 = inlined_call_operand.vmem [shape: f32[1,1,256], index: 2, kind: output, shape index: {0}]   ;;  %s341_s3 = inlined_call_operand.vmem [shape: f32[1,1,256], index: 3, kind: output, shape index: {1}]  }
   0x1   :  { %v13_v0 = vld [vmem:[%s338_s0] sm:$0xff]  ;;  %v14_v1 = vld [vmem:[%s338_s0 + $0x8] sm:$0xff]  ;;  %v15_v2 = vld [vmem:[%s338_s0 + $0x10] sm:$0xff] }
   0x2   :  { %v16_v3 = vld [vmem:[%s338_s0 + $0x18] sm:$0xff]  ;;  %v21_v4 = vmax.f32 %v13_v0, %v15_v2  ;;  %v269_v45 = vshrl.u32 %v91_v44, 7  ;;  %v17_v50 = vld [vmem:[%s339_s1] sm:$0xff]  ;;  %v19_v51 = vld [vmem:[%s339_s1 + $0x10] sm:$0xff]  ;;  %vm309_vm0 = vcmp.lt.s32.totalorder %v91_v44, 256 }
   0x3   :  { %v28_v5 = vmax.f32 %v14_v1, %v16_v3  ;;  %v18_v53 = vld [vmem:[%s339_s1 + $0x8] sm:$0xff]  ;;  %v20_v54 = vld [vmem:[%s339_s1 + $0x18] sm:$0xff] }
   0x4   :  { %v22_v6 = vrot.slane %v21_v4, 4  ;;  %v272_v46 = vadd.s32 8, %v269_v45  ;;  %v111_v47 = vcvt.s32.f32 %v269_v45 }
   0x5   :  { %v29_v7 = vrot.slane %v28_v5, 4 }
   0x6   :  { %v23_v8 = vmax.f32 %v21_v4, %v22_v6  ;;  %v112_v48 = vcvt.s32.f32 %v272_v46 }
   0x7   :  { %v30_v9 = vmax.f32 %v28_v5, %v29_v7 }
   0x8   :  { %v24_v10 = vrot.slane %v23_v8, 2 }
   0x9   :  { %v31_v11 = vrot.slane %v30_v9, 2 }
   0xa   :  { %v25_v12 = vmax.f32 %v23_v8, %v24_v10 }
   0xb   :  { %v32_v13 = vmax.f32 %v30_v9, %v31_v11 }
   0xc   :  { %v26_v14 = vrot.slane %v25_v12, 1 }
   0xd   :  { %v33_v15 = vrot.slane %v32_v13, 1 }
   0xe   :  { %v27_v16 = vmax.f32 %v25_v12, %v26_v14  ;;  %v234_v14 = vmov 1966171168  }
   0xf   :  { %v34_v17 = vmax.f32 %v32_v13, %v33_v15  ;;  %v89_v15 = vunpack.c.l.s4 %v234_v14 }
  0x10   :  { %v35_v18 = vsub.f32 %v13_v0, %v27_v16  ;;  %v37_v19 = vsub.f32 %v15_v2, %v27_v16 }
  0x11   :  { %v36_v20 = vsub.f32 %v14_v1, %v34_v17  ;;  %v38_v21 = vsub.f32 %v16_v3, %v34_v17 }
  0x12   :  { %v39_v22 = vmul.f32 1.442695, %v35_v18  ;;  %v43_v23 = vmul.f32 1.442695, %v37_v19 }
  0x13   :  { %v41_v24 = vmul.f32 1.442695, %v36_v20  ;;  %v45_v25 = vmul.f32 1.442695, %v38_v21 }
  0x14   :  { %222 = vpow2.f32 %v39_v22 }
  0x15   :  { %224 = vpow2.f32 %v41_v24  ;;  %v90_v24 = vunpack.c.0.s8 %v89_v15 }
  0x16   :  { %226 = vpow2.f32 %v43_v23 }
  0x17   :  { %228 = vpow2.f32 %v45_v25 }
  0x21   :  { %v223_v26 = vpop.eup %222 }
  0x22   :  { %v225_v27 = vpop.eup %224 }
  0x23   :  { %v227_v28 = vpop.eup %226 }
  0x24   :  { %v229_v29 = vpop.eup %228  ;;  %v47_v30 = vadd.f32 %v227_v28, %v223_v26 }
  0x25   :  { %v54_v31 = vadd.f32 %v229_v29, %v225_v27 }
  0x26   :  { %v48_v32 = vrot.slane %v47_v30, 4 }
  0x27   :  { %v55_v33 = vrot.slane %v54_v31, 4 }
  0x28   :  { %v49_v34 = vadd.f32 %v48_v32, %v47_v30 }
  0x29   :  { %v56_v35 = vadd.f32 %v55_v33, %v54_v31  ;;  %v305_v33 = vsub.s32 %v90_v24, %v269_v45 }
  0x2a   :  { %v50_v36 = vrot.slane %v49_v34, 2 }
  0x2b   :  { %v57_v37 = vrot.slane %v56_v35, 2 }
  0x2c   :  { %v51_v38 = vadd.f32 %v50_v36, %v49_v34 }
  0x2d   :  { %v58_v39 = vadd.f32 %v57_v37, %v56_v35 }
  0x2e   :  { %v52_v40 = vrot.slane %v51_v38, 1 }
  0x2f   :  { %v59_v41 = vrot.slane %v58_v39, 1 }
  0x30   :  { %v53_v42 = vadd.f32 %v52_v40, %v51_v38 }
  0x31   :  { %v60_v43 = vadd.f32 %v59_v41, %v58_v39 }
  0x32   :  { %230 = vrcp.f32 %v53_v42 }
  0x33   :  { %232 = vrcp.f32 %v60_v43 }
  0x3f   :  { %v231_v49 = vpop.eup %230 }
  0x40   :  { %v233_v52 = vpop.eup %232  ;;  %v288_v55 = vmul.f32 %v231_v49, %v223_v26  ;;  %v290_v56 = vmul.f32 %v231_v49, %v227_v28 }
  0x41   :  { %v292_v57 = vmul.f32 %v233_v52, %v225_v27  ;;  %v294_v58 = vmul.f32 %v233_v52, %v229_v29 }
  0x42   :  { %v67_v59 = vmul.f32 %v288_v55, %v17_v50  ;;  %v69_v60 = vmul.f32 %v290_v56, %v19_v51  ;;  %v113_v61 = vmul.f32 %v111_v47, %v288_v55  ;;  %v115_v62 = vmul.f32 %v112_v48, %v290_v56 }
  0x43   :  { %v68_v63 = vmul.f32 %v292_v57, %v18_v53  ;;  %v70_v0 = vmul.f32 %v294_v58, %v20_v54  ;;  %v114_v1 = vmul.f32 %v111_v47, %v292_v57  ;;  %v116_v2 = vmul.f32 %v112_v48, %v294_v58 }
  0x44   :  { %v71_v3 = vadd.f32 %v69_v60, %v67_v59  ;;  %v117_v4 = vadd.f32 %v115_v62, %v113_v61  ;;  %v235_v53 = vmov 0.0  }
  0x45   :  { %v78_v5 = vadd.f32 %v70_v0, %v68_v63  ;;  %v124_v6 = vadd.f32 %v116_v2, %v114_v1 }
  0x46   :  { %v72_v7 = vrot.slane %v71_v3, 4  ;;  %v118_v8 = vrot.slane %v117_v4, 4 }
  0x47   :  { %v79_v9 = vrot.slane %v78_v5, 4  ;;  %v125_v10 = vrot.slane %v124_v6, 4 }
  0x48   :  { %v73_v11 = vadd.f32 %v72_v7, %v71_v3  ;;  %v119_v12 = vadd.f32 %v118_v8, %v117_v4 }
  0x49   :  { %v80_v13 = vadd.f32 %v79_v9, %v78_v5  ;;  %v126_v16 = vadd.f32 %v125_v10, %v124_v6 }
  0x4a   :  { %v74_v17 = vrot.slane %v73_v11, 2  ;;  %v120_v18 = vrot.slane %v119_v12, 2 }
  0x4b   :  { %v81_v19 = vrot.slane %v80_v13, 2  ;;  %v127_v20 = vrot.slane %v126_v16, 2 }
  0x4c   :  { %v75_v21 = vadd.f32 %v74_v17, %v73_v11  ;;  %v121_v22 = vadd.f32 %v120_v18, %v119_v12 }
  0x4d   :  { %v82_v23 = vadd.f32 %v81_v19, %v80_v13  ;;  %v128_v25 = vadd.f32 %v127_v20, %v126_v16 }
  0x4e   :  { %v76_v26 = vrot.slane %v75_v21, 1  ;;  %v122_v27 = vrot.slane %v121_v22, 1 }
  0x4f   :  { %v83_v28 = vrot.slane %v82_v23, 1  ;;  %v129_v29 = vrot.slane %v128_v25, 1 }
  0x50   :  { %v77_v30 = vadd.f32 %v76_v26, %v75_v21  ;;  %v123_v31 = vadd.f32 %v122_v27, %v121_v22 }
  0x51   :  { %v84_v32 = vadd.f32 %v83_v28, %v82_v23  ;;  %v130_v34 = vadd.f32 %v129_v29, %v128_v25 }
  0x52   :  { %v216_v35 = vtrunc.f32 %v123_v31 }
  0x53   :  { %v87_v36 = vcombine.low %v77_v30, %v84_v32  ;;  %v218_v37 = vtrunc.f32 %v130_v34 }
  0x54   :  { %v217_v38 = vcvt.f32.s32 %v216_v35 }
  0x55   :  { %v94_v39 = vrot.slane %v87_v36, %v305_v33  ;;  %v219_v40 = vcvt.f32.s32 %v218_v37 }
  0x56   :  { %vm133_vm1 = vcmp.gt.s32.totalorder %v217_v38, 0 }
  0x57   :  { %v101_v42 = vrot.slane %v94_v39, %v305_v33  ;;  %v134_v43 = vsel %vm133_vm1, %v217_v38, 0  ;;  %vm135_vm2 = vcmp.gt.s32.totalorder %v219_v40, 0 }
  0x58   :  { %v136_v47 = vsel %vm135_vm2, %v219_v40, 0  ;;  %vm137_vm3 = vcmp.lt.s32.totalorder %v134_v43, 15 }
  0x59   :  { %107 = vst.msk [vmem:[%s340_s2] sm:$0x3] %vm309_vm0, %v101_v42  ;;  %v138_v48 = vsel %vm137_vm3, %v134_v43, 15  ;;  %vm139_vm4 = vcmp.lt.s32.totalorder %v136_v47, 15 }
  0x5a   :  { %v140_v49 = vsel %vm139_vm4, %v136_v47, 15  ;;  %v210_v44 = vadd.s32 4294967295, %v138_v48  ;;  %v147_v50 = vadd.s32 2, %v138_v48 }
  0x5b   :  { %v211_v51 = vadd.s32 4294967295, %v140_v49  ;;  %v148_v52 = vadd.s32 2, %v140_v49 }
  0x5c   :  { %vm143_vm5 = vcmp.ge.s32.totalorder %v269_v45, %v210_v44  ;;  %vm145_vm6 = vcmp.ge.s32.totalorder %v272_v46, %v210_v44  ;;  %vm149_vm7 = vcmp.le.s32.totalorder %v269_v45, %v147_v50  ;;  %vm151_vm8 = vcmp.le.s32.totalorder %v272_v46, %v147_v50 }
  0x5d   :  { %vm144_vm9 = vcmp.ge.s32.totalorder %v269_v45, %v211_v51  ;;  %vm146_vm10 = vcmp.ge.s32.totalorder %v272_v46, %v211_v51  ;;  %vm150_vm11 = vcmp.le.s32.totalorder %v269_v45, %v148_v52  ;;  %vm152_vm12 = vcmp.le.s32.totalorder %v272_v46, %v148_v52  ;;  %vm153_vm13 = vmand %vm143_vm5, %vm149_vm7 }
  0x5e   :  { %vm154_vm14 = vmand %vm144_vm9, %vm150_vm11  ;;  %v212_v54 = vsel %vm153_vm13, 1.0, %v235_v53 }
  0x5f   :  { %vm155_vm15 = vmand %vm145_vm6, %vm151_vm8  ;;  %v213_v59 = vsel %vm154_vm14, 1.0, %v235_v53  ;;  %v165_v60 = vmul.f32 %v212_v54, %v288_v55 }
  0x60   :  { %vm156_vm1 = vmand %vm146_vm10, %vm152_vm12  ;;  %v214_v61 = vsel %vm155_vm15, 1.0, %v235_v53  ;;  %v166_v62 = vmul.f32 %v213_v59, %v292_v57 }
  0x61   :  { %v215_v63 = vsel %vm156_vm1, 1.0, %v235_v53  ;;  %v167_v0 = vmul.f32 %v214_v61, %v290_v56 }
  0x62   :  { %v168_v1 = vmul.f32 %v215_v63, %v294_v58 }
  0x63   :  { %v169_v45 = vadd.f32 %v167_v0, %v165_v60 }
  0x64   :  { %v176_v2 = vadd.f32 %v168_v1, %v166_v62 }
  0x65   :  { %v170_v46 = vrot.slane %v169_v45, 4 }
  0x66   :  { %v177_v3 = vrot.slane %v176_v2, 4 }
  0x67   :  { %v171_v4 = vadd.f32 %v170_v46, %v169_v45 }
  0x68   :  { %v178_v5 = vadd.f32 %v177_v3, %v176_v2 }
  0x69   :  { %v172_v6 = vrot.slane %v171_v4, 2 }
  0x6a   :  { %v179_v7 = vrot.slane %v178_v5, 2 }
  0x6b   :  { %v173_v8 = vadd.f32 %v172_v6, %v171_v4 }
  0x6c   :  { %v180_v9 = vadd.f32 %v179_v7, %v178_v5 }
  0x6d   :  { %v174_v55 = vrot.slane %v173_v8, 1 }
  0x6e   :  { %v181_v10 = vrot.slane %v180_v9, 1 }
  0x6f   :  { %v175_v11 = vadd.f32 %v174_v55, %v173_v8 }
  0x70   :  { %v182_v12 = vadd.f32 %v181_v10, %v180_v9 }
  0x72   :  { %v185_v57 = vcombine.low %v175_v11, %v182_v12 }
  0x74   :  { %v192_v13 = vrot.slane %v185_v57, %v305_v33 }
  0x76   :  { %v199_v56 = vrot.slane %v192_v13, %v305_v33 }
  0x78   :  { %201 = vst.msk [vmem:[%s341_s3] sm:$0x3] %vm309_vm0, %v199_v56 }

</bundles_post_ra>
